<compile_context>
chip_gen: v7x
topology: tpu7x:2x2x1
jax: 0.10.0
libtpu: 0.0.40
codegen_flags: <defaults>
</compile_context>

<pallas_src>
import functools

import numpy as np
import jax
import jax.numpy as jnp
from jax.experimental import pallas as pl
from jax.experimental.pallas import tpu as pltpu


TOWERS = 8
AGGREGATORS = ("mean", "min", "max", "std")
SCALERS = ("identity", "amplification", "attenuation")


def _vmem_spec():
    # whole-array block resident in VMEM
    return pl.BlockSpec(memory_space=pltpu.MemorySpace.VMEM)


# -----------------------------------------------------------------------------
# Fused PNA conv layer kernel
# -----------------------------------------------------------------------------

def _pna_conv_kernel(x_ref, e_ref, src_col_ref, dst_col_ref, dst_row_ref,
                     w_ee_ref, b_ee_ref,
                     w_pre_i_ref, w_pre_j_ref, w_pre_e_ref, b_pre_ref,
                     w_post_x_ref, w_post_agg_ref, b_post_ref,
                     w_lin_ref, b_lin_ref, bn_g_ref, bn_b_ref,
                     o_ref, *, avg_log):
    f32 = jnp.float32
    N = x_ref.shape[0]
    E = e_ref.shape[0]
    D = w_pre_i_ref.shape[1]           # TOWERS * F_in

    x = x_ref[...]                                                   # [N, F_in]

    # ---- edge_encoder ------------------------------------------------------
    e_enc = (jnp.dot(e_ref[...], w_ee_ref[...],
                     preferred_element_type=f32) + b_ee_ref[...])    # [E, F_in]

    # ---- one-hot gather / scatter masks (built on-chip) ---------------------
    node_row = jax.lax.broadcasted_iota(jnp.int32, (E, N), 1)        # [E, N]
    src_oh = (src_col_ref[...] == node_row).astype(f32)              # x_j gather
    dst_oh = (dst_col_ref[...] == node_row).astype(f32)              # x_i gather
    node_col = jax.lax.broadcasted_iota(jnp.int32, (N, E), 0)        # [N, E]
    agg_mask = (dst_row_ref[...] == node_col).astype(f32)            # scatter

    # ---- pre-NNs (all towers fused; project at node granularity, then
    #      gather to edges with the one-hot matmuls) ---------------------------
    xi_p = jnp.dot(x, w_pre_i_ref[...], preferred_element_type=f32)  # [N, D]
    xj_p = jnp.dot(x, w_pre_j_ref[...], preferred_element_type=f32)  # [N, D]
    msgs = (jnp.dot(dst_oh, xi_p, preferred_element_type=f32)
            + jnp.dot(src_oh, xj_p, preferred_element_type=f32)
            + jnp.dot(e_enc, w_pre_e_ref[...], preferred_element_type=f32)
            + b_pre_ref[...])                                        # [E, D]

    # ---- aggregation: mean / min / max / std + in-degree ---------------------
    s = jnp.dot(agg_mask, msgs, preferred_element_type=f32)          # [N, D]
    ssq = jnp.dot(agg_mask, msgs * msgs, preferred_element_type=f32)
    cnt = jnp.sum(agg_mask, axis=1, keepdims=True)                   # [N, 1]
    cnt_c = jnp.maximum(cnt, 1.0)
    inv_cnt = pl.reciprocal(cnt_c, approx=True)
    mean = s * inv_cnt
    var = ssq * inv_cnt - mean * mean
    std = jnp.sqrt(jnp.maximum(var, 0.0) + 1e-5)

    # masked min/max as a single vectorized 3-D reduction over the edge axis
    big = jnp.float32(3.0e38)
    mask3 = jnp.broadcast_to(agg_mask[:, :, None], (N, E, D))        # [N, E, D]
    msgs3 = jnp.broadcast_to(msgs[None, :, :], (N, E, D))
    mn = jnp.min(msgs3 * mask3 + (1.0 - mask3) * big, axis=1)        # [N, D]
    mx = jnp.max(msgs3 * mask3 - (1.0 - mask3) * big, axis=1)        # [N, D]
    has = cnt > 0.0
    mn = jnp.where(has, mn, 0.0)
    mx = jnp.where(has, mx, 0.0)

    # ---- degree scalers ------------------------------------------------------
    log_d = jnp.log(cnt_c + 1.0)                                     # [N, 1]
    amp = log_d * (1.0 / avg_log)
    att = avg_log * pl.reciprocal(log_d, approx=True)

    aggs = (mean, mn, mx, std)
    pieces = ([a for a in aggs]
              + [a * amp for a in aggs]
              + [a * att for a in aggs])
    h_agg = jnp.concatenate(pieces, axis=1)                          # [N, 12*D]

    # ---- post-NNs (single lane-dense block-diagonal matmul) + conv.lin -------
    post = (jnp.dot(x, w_post_x_ref[...], preferred_element_type=f32)
            + jnp.dot(h_agg, w_post_agg_ref[...], preferred_element_type=f32)
            + b_post_ref[...])                                       # [N, T*F_out]
    y = (jnp.dot(post, w_lin_ref[...], preferred_element_type=f32)
         + b_lin_ref[...])                                           # [N, out]

    # ---- BatchNorm (training-mode batch stats) + ReLU ------------------------
    mu = jnp.mean(y, axis=0, keepdims=True)
    var_b = jnp.mean((y - mu) ** 2, axis=0, keepdims=True)
    yn = (y - mu) * jax.lax.rsqrt(var_b + 1e-5) * bn_g_ref[...] + bn_b_ref[...]
    o_ref[...] = jnp.maximum(yn, 0.0)                                # args.af=='relu'


def pna_conv_layer(x, e, src_col, dst_col, dst_row, p, avg_log):
    N, F_in = x.shape
    kernel = functools.partial(_pna_conv_kernel, avg_log=float(avg_log))
    return pl.pallas_call(
        kernel,
        out_shape=jax.ShapeDtypeStruct((N, F_in), jnp.float32),
        in_specs=[_vmem_spec()] * 18,
        out_specs=_vmem_spec(),
    )(x, e, src_col, dst_col, dst_row,
      p["w_ee"], p["b_ee"],
      p["w_pre_i"], p["w_pre_j"], p["w_pre_e"], p["b_pre"],
      p["w_post_x"], p["w_post_agg"], p["b_post"],
      p["w_lin"], p["b_lin"], p["bn_g"], p["bn_b"])


# -----------------------------------------------------------------------------
# Fused head kernels
# -----------------------------------------------------------------------------

def _pool_linear_bn_relu_kernel(batch_ref, x_ref, w_ref, b_ref, g_ref, beta_ref,
                                o_ref):
    f32 = jnp.float32
    G = o_ref.shape[0]
    N = x_ref.shape[0]
    gids = jax.lax.broadcasted_iota(jnp.int32, (G, N), 0)
    onehot = (batch_ref[...] == gids).astype(f32)                    # [G, N]
    pooled = jnp.dot(onehot, x_ref[...], preferred_element_type=f32)  # global_add_pool
    y = jnp.dot(pooled, w_ref[...], preferred_element_type=f32) + b_ref[...]
    mu = jnp.mean(y, axis=0, keepdims=True)
    var = jnp.mean((y - mu) ** 2, axis=0, keepdims=True)
    yn = (y - mu) * jax.lax.rsqrt(var + 1e-5) * g_ref[...] + beta_ref[...]
    o_ref[...] = jnp.maximum(yn, 0.0)


def pool_linear_bn_relu(x, batch, num_graphs, p):
    N, _ = x.shape
    F = p["w"].shape[1]
    return pl.pallas_call(
        _pool_linear_bn_relu_kernel,
        out_shape=jax.ShapeDtypeStruct((num_graphs, F), jnp.float32),
        in_specs=[_vmem_spec()] * 6,
        out_specs=_vmem_spec(),
    )(batch.reshape(1, N).astype(jnp.int32), x, p["w"], p["b"],
      p["bn_g"], p["bn_b"])


def _linear_bn_relu_kernel(x_ref, w_ref, b_ref, g_ref, beta_ref, o_ref):
    y = (jnp.dot(x_ref[...], w_ref[...],
                 preferred_element_type=jnp.float32) + b_ref[...])
    mu = jnp.mean(y, axis=0, keepdims=True)
    var = jnp.mean((y - mu) ** 2, axis=0, keepdims=True)
    yn = (y - mu) * jax.lax.rsqrt(var + 1e-5) * g_ref[...] + beta_ref[...]
    o_ref[...] = jnp.maximum(yn, 0.0)


def linear_bn_relu(x, p):
    M, _ = x.shape
    F = p["w"].shape[1]
    return pl.pallas_call(
        _linear_bn_relu_kernel,
        out_shape=jax.ShapeDtypeStruct((M, F), jnp.float32),
        in_specs=[_vmem_spec()] * 5,
        out_specs=_vmem_spec(),
    )(x, p["w"], p["b"], p["bn_g"], p["bn_b"])


def _final_kernel(x_ref, w_ref, b_ref, sig_ref, logit_ref):
    z = (jnp.dot(x_ref[...], w_ref[...],
                 preferred_element_type=jnp.float32) + b_ref[...])
    logit_ref[...] = z
    sig_ref[...] = jax.nn.sigmoid(z)


def final_linear_sigmoid(x, w, b):
    M, _ = x.shape
    F = w.shape[1]
    return pl.pallas_call(
        _final_kernel,
        out_shape=(jax.ShapeDtypeStruct((M, F), jnp.float32),
                   jax.ShapeDtypeStruct((M, F), jnp.float32)),
        in_specs=[_vmem_spec()] * 3,
        out_specs=(_vmem_spec(), _vmem_spec()),
    )(x, w, b)


# -----------------------------------------------------------------------------
# PNA_Net forward (glue around the kernels)
# -----------------------------------------------------------------------------

def pna_net_forward(params, x_ids, src, dst, edge_attr_ids, batch,
                    num_graphs, avg_log):
    # embedding-table gathers kept as JAX glue
    x = jnp.take(params["node_emb"], x_ids, axis=0)
    e = jnp.take(params["edge_emb"], edge_attr_ids, axis=0)

    E = src.shape[0]
    src_col = src.reshape(E, 1).astype(jnp.int32)
    dst_col = dst.reshape(E, 1).astype(jnp.int32)
    dst_row = dst.reshape(1, E).astype(jnp.int32)

    for conv_p in params["convs"]:
        x = pna_conv_layer(x, e, src_col, dst_col, dst_row, conv_p, avg_log)

    # global_add_pool fused with first MLP Linear + BN + ReLU
    x = pool_linear_bn_relu(x, batch, num_graphs, params["mlp"][0])
    for mlp_p in params["mlp"][1:]:
        x = linear_bn_relu(x, mlp_p)

    sig, logit = final_linear_sigmoid(x, params["w_final"], params["b_final"])
    return sig, logit


# -----------------------------------------------------------------------------
# Deterministic parameter init (shapes as implied by PNA_Net.__init__)
# -----------------------------------------------------------------------------

def init_params(key, n_embed=32, e_embed=16, hidden=32, n_pna=2, n_mlp_layer=1):
    F_in = n_embed
    F_out = n_embed // TOWERS
    D = TOWERS * F_in
    n_agg, n_sca = len(AGGREGATORS), len(SCALERS)
    k_post = (1 + n_agg * n_sca) * F_in                  # per-tower post-NN fan-in

    def uniform(k, shape, fan_in):
        lim = 1.0 / np.sqrt(fan_in)
        return jax.random.uniform(k, shape, jnp.float32, -lim, lim)

    keys = iter(jax.random.split(key, 128))
    params = {
        "node_emb": jax.random.normal(next(keys), (n_embed, n_embed), jnp.float32),
        "edge_emb": jax.random.normal(next(keys), (e_embed, e_embed), jnp.float32),
        "convs": [],
        "mlp": [],
    }
    for _ in range(n_pna):
        # tower pre-NN weights concatenated along the output dim, split by input
        w_pre = uniform(next(keys), (3 * F_in, D), 3 * F_in)
        b_pre = uniform(next(keys), (D,), 3 * F_in)
        # per-tower post-NN weights [T, 13*F_in, F_out] rearranged into a dense
        # x-block [F_in, T*F_out] and a block-diagonal agg-block [12*D, T*F_out]
        # so the post-NN is a single lane-dense matmul producing [N, T*F_out].
        w_post_t = np.asarray(uniform(next(keys), (TOWERS, k_post, F_out), k_post))
        b_post_t = np.asarray(uniform(next(keys), (TOWERS, F_out), k_post))
        w_post_x = np.zeros((F_in, TOWERS * F_out), np.float32)
        w_post_agg = np.zeros((n_agg * n_sca * D, TOWERS * F_out), np.float32)
        for t in range(TOWERS):
            cols = slice(t * F_out, (t + 1) * F_out)
            w_post_x[:, cols] = w_post_t[t, 0:F_in, :]
            for p in range(n_agg * n_sca):
                rows = slice(p * D + t * F_in, p * D + (t + 1) * F_in)
                w_post_agg[rows, cols] = w_post_t[t, (1 + p) * F_in:(2 + p) * F_in, :]
        params["convs"].append({
            "w_ee": uniform(next(keys), (e_embed, F_in), e_embed),
            "b_ee": uniform(next(keys), (F_in,), e_embed).reshape(1, F_in),
            "w_pre_i": w_pre[0:F_in],
            "w_pre_j": w_pre[F_in:2 * F_in],
            "w_pre_e": w_pre[2 * F_in:3 * F_in],
            "b_pre": b_pre.reshape(1, D),
            "w_post_x": jnp.asarray(w_post_x),
            "w_post_agg": jnp.asarray(w_post_agg),
            "b_post": jnp.asarray(b_post_t.reshape(1, TOWERS * F_out)),
            "w_lin": uniform(next(keys), (n_embed, n_embed), n_embed),
            "b_lin": uniform(next(keys), (n_embed,), n_embed).reshape(1, n_embed),
            "bn_g": jnp.ones((1, n_embed), jnp.float32),
            "bn_b": jnp.zeros((1, n_embed), jnp.float32),
        })
    dims = [(n_embed, hidden)] + [(hidden, hidden)] * n_mlp_layer
    for din, dout in dims:
        params["mlp"].append({
            "w": uniform(next(keys), (din, dout), din),
            "b": uniform(next(keys), (dout,), din).reshape(1, dout),
            "bn_g": jnp.ones((1, dout), jnp.float32),
            "bn_b": jnp.zeros((1, dout), jnp.float32),
        })
    params["w_final"] = uniform(next(keys), (hidden, 1), hidden)
    params["b_final"] = uniform(next(keys), (1,), hidden).reshape(1, 1)
    return params


# -----------------------------------------------------------------------------
# Example run
# -----------------------------------------------------------------------------

if __name__ == "__main__":
    N_NODES, N_EDGES, N_GRAPHS = 16, 48, 2       # small multiples of 8
    N_EMBED, E_EMBED, HIDDEN = 32, 16, 32        # args.n_embed / e_embed / hidden

    key = jax.random.PRNGKey(0)
    k_data, k_param = jax.random.split(key)
    kd = jax.random.split(k_data, 4)
    x_ids = jax.random.randint(kd[0], (N_NODES,), 0, N_EMBED, dtype=jnp.int32)
    edge_attr_ids = jax.random.randint(kd[1], (N_EDGES,), 0, E_EMBED, dtype=jnp.int32)
    src = jax.random.randint(kd[2], (N_EDGES,), 0, N_NODES, dtype=jnp.int32)
    dst = jax.random.randint(kd[3], (N_EDGES,), 0, N_NODES, dtype=jnp.int32)
    edge_index = jnp.stack([src, dst])           # [2, E]
    batch = jnp.concatenate([jnp.zeros(8, jnp.int32), jnp.ones(8, jnp.int32)])

    # comp_deg equivalent: in-degree histogram of the train set, consumed only
    # through avg_deg['log'] (amplification / attenuation scalers).
    dst_np = np.asarray(dst)
    in_deg = np.bincount(dst_np, minlength=N_NODES)
    deg_hist = np.bincount(in_deg)
    bins = np.arange(deg_hist.shape[0], dtype=np.float64)
    avg_log = float((np.log(bins + 1.0) * deg_hist).sum() / deg_hist.sum())

    params = init_params(k_param, n_embed=N_EMBED, e_embed=E_EMBED, hidden=HIDDEN,
                         n_pna=2, n_mlp_layer=1)

    fwd = jax.jit(functools.partial(pna_net_forward,
                                    num_graphs=N_GRAPHS, avg_log=avg_log))
    sig, logit = fwd(params, x_ids, edge_index[0], edge_index[1],
                     edge_attr_ids, batch)
    jax.block_until_ready((sig, logit))

    assert sig.shape == (N_GRAPHS, 1) and logit.shape == (N_GRAPHS, 1)
    assert bool(jnp.all(jnp.isfinite(sig))) and bool(jnp.all(jnp.isfinite(logit)))
    print("KERNEL_OK")
</pallas_src>

<mosaic_0001>
module attributes {stable_mosaic.version = 11 : i64} {
  func.func @_pool_linear_bn_relu_kernel(%arg0: memref<1x16xi32, #tpu.memory_space<vmem>>, %arg1: memref<16x32xf32, #tpu.memory_space<vmem>>, %arg2: memref<32x32xf32, #tpu.memory_space<vmem>>, %arg3: memref<1x32xf32, #tpu.memory_space<vmem>>, %arg4: memref<1x32xf32, #tpu.memory_space<vmem>>, %arg5: memref<1x32xf32, #tpu.memory_space<vmem>>, %arg6: memref<2x32xf32, #tpu.memory_space<vmem>>) attributes {dimension_semantics = [], scalar_prefetch = 0 : i64, scratch_operands = 0 : i64, tpu.core_type = #tpu.core_type<tc>} {
    %0 = tpu.iota {dimensions = array<i32: 0>} : vector<2x16xi32>
    %c0 = arith.constant 0 : index
    %c0_0 = arith.constant 0 : index
    %1 = vector.load %arg0[%c0, %c0_0] : memref<1x16xi32, #tpu.memory_space<vmem>>, vector<1x16xi32>
    %2 = vector.broadcast %1 : vector<1x16xi32> to vector<2x16xi32>
    %3 = arith.cmpi eq, %2, %0 : vector<2x16xi32>
    %4 = arith.extui %3 : vector<2x16xi1> to vector<2x16xi32>
    %5 = arith.sitofp %4 : vector<2x16xi32> to vector<2x16xf32>
    %c0_1 = arith.constant 0 : index
    %c0_2 = arith.constant 0 : index
    %6 = vector.load %arg1[%c0_1, %c0_2] : memref<16x32xf32, #tpu.memory_space<vmem>>, vector<16x32xf32>
    %cst = arith.constant dense<0.000000e+00> : vector<2x32xf32>
    %7 = tpu.matmul %5, %6, %cst {dimension_numbers = #tpu.dot_dimension_numbers<[1], [0], [0], [1], [0, 0, 1, 1], [], []>} : vector<2x16xf32>, vector<16x32xf32>, vector<2x32xf32> -> vector<2x32xf32>
    %c0_3 = arith.constant 0 : index
    %c0_4 = arith.constant 0 : index
    %8 = vector.load %arg2[%c0_3, %c0_4] : memref<32x32xf32, #tpu.memory_space<vmem>>, vector<32x32xf32>
    %cst_5 = arith.constant dense<0.000000e+00> : vector<2x32xf32>
    %9 = tpu.matmul %7, %8, %cst_5 {dimension_numbers = #tpu.dot_dimension_numbers<[1], [0], [0], [1], [0, 0, 1, 1], [], []>} : vector<2x32xf32>, vector<32x32xf32>, vector<2x32xf32> -> vector<2x32xf32>
    %c0_6 = arith.constant 0 : index
    %c0_7 = arith.constant 0 : index
    %10 = vector.load %arg3[%c0_6, %c0_7] : memref<1x32xf32, #tpu.memory_space<vmem>>, vector<1x32xf32>
    %11 = vector.broadcast %10 : vector<1x32xf32> to vector<2x32xf32>
    %12 = arith.addf %9, %11 : vector<2x32xf32>
    %cst_8 = arith.constant dense<0.000000e+00> : vector<32xf32>
    %13 = vector.multi_reduction <add>, %12, %cst_8 [0] : vector<2x32xf32> to vector<32xf32>
    %14 = vector.shape_cast %13 : vector<32xf32> to vector<1x32xf32>
    %cst_9 = arith.constant 2.000000e+00 : f32
    %15 = vector.broadcast %cst_9 : f32 to vector<1x32xf32>
    %16 = arith.divf %14, %15 : vector<1x32xf32>
    %17 = vector.broadcast %16 : vector<1x32xf32> to vector<2x32xf32>
    %18 = arith.subf %12, %17 : vector<2x32xf32>
    %19 = arith.mulf %18, %18 : vector<2x32xf32>
    %cst_10 = arith.constant dense<0.000000e+00> : vector<32xf32>
    %20 = vector.multi_reduction <add>, %19, %cst_10 [0] : vector<2x32xf32> to vector<32xf32>
    %21 = vector.shape_cast %20 : vector<32xf32> to vector<1x32xf32>
    %cst_11 = arith.constant 2.000000e+00 : f32
    %22 = vector.broadcast %cst_11 : f32 to vector<1x32xf32>
    %23 = arith.divf %21, %22 : vector<1x32xf32>
    %24 = vector.broadcast %16 : vector<1x32xf32> to vector<2x32xf32>
    %25 = arith.subf %12, %24 : vector<2x32xf32>
    %cst_12 = arith.constant 9.99999974E-6 : f32
    %26 = vector.broadcast %cst_12 : f32 to vector<1x32xf32>
    %27 = arith.addf %23, %26 : vector<1x32xf32>
    %28 = math.rsqrt %27 : vector<1x32xf32>
    %29 = vector.broadcast %28 : vector<1x32xf32> to vector<2x32xf32>
    %30 = arith.mulf %25, %29 : vector<2x32xf32>
    %c0_13 = arith.constant 0 : index
    %c0_14 = arith.constant 0 : index
    %31 = vector.load %arg4[%c0_13, %c0_14] : memref<1x32xf32, #tpu.memory_space<vmem>>, vector<1x32xf32>
    %32 = vector.broadcast %31 : vector<1x32xf32> to vector<2x32xf32>
    %33 = arith.mulf %30, %32 : vector<2x32xf32>
    %c0_15 = arith.constant 0 : index
    %c0_16 = arith.constant 0 : index
    %34 = vector.load %arg5[%c0_15, %c0_16] : memref<1x32xf32, #tpu.memory_space<vmem>>, vector<1x32xf32>
    %35 = vector.broadcast %34 : vector<1x32xf32> to vector<2x32xf32>
    %36 = arith.addf %33, %35 : vector<2x32xf32>
    %cst_17 = arith.constant 0.000000e+00 : f32
    %37 = vector.broadcast %cst_17 : f32 to vector<2x32xf32>
    %38 = arith.maximumf %36, %37 : vector<2x32xf32>
    %c0_18 = arith.constant 0 : index
    %c0_19 = arith.constant 0 : index
    %39 = vector.load %arg6[%c0_18, %c0_19] : memref<2x32xf32, #tpu.memory_space<vmem>>, vector<2x32xf32>
    tpu.vector_store %arg6[%c0_18, %c0_19], %38 {strides = array<i32>} : memref<2x32xf32, #tpu.memory_space<vmem>>, vector<2x32xf32>,
    return
  }
}

module attributes {stable_mosaic.version = 11 : i64} {
  func.func @_pna_conv_kernel(%arg0: memref<16x32xf32, #tpu.memory_space<vmem>>, %arg1: memref<48x16xf32, #tpu.memory_space<vmem>>, %arg2: memref<48x1xi32, #tpu.memory_space<vmem>>, %arg3: memref<48x1xi32, #tpu.memory_space<vmem>>, %arg4: memref<1x48xi32, #tpu.memory_space<vmem>>, %arg5: memref<16x32xf32, #tpu.memory_space<vmem>>, %arg6: memref<1x32xf32, #tpu.memory_space<vmem>>, %arg7: memref<32x256xf32, #tpu.memory_space<vmem>>, %arg8: memref<32x256xf32, #tpu.memory_space<vmem>>, %arg9: memref<32x256xf32, #tpu.memory_space<vmem>>, %arg10: memref<1x256xf32, #tpu.memory_space<vmem>>, %arg11: memref<32x32xf32, #tpu.memory_space<vmem>>, %arg12: memref<3072x32xf32, #tpu.memory_space<vmem>>, %arg13: memref<1x32xf32, #tpu.memory_space<vmem>>, %arg14: memref<32x32xf32, #tpu.memory_space<vmem>>, %arg15: memref<1x32xf32, #tpu.memory_space<vmem>>, %arg16: memref<1x32xf32, #tpu.memory_space<vmem>>, %arg17: memref<1x32xf32, #tpu.memory_space<vmem>>, %arg18: memref<16x32xf32, #tpu.memory_space<vmem>>) attributes {dimension_semantics = [], scalar_prefetch = 0 : i64, scratch_operands = 0 : i64, tpu.core_type = #tpu.core_type<tc>} {
    %c0 = arith.constant 0 : index
    %c0_0 = arith.constant 0 : index
    %0 = vector.load %arg0[%c0, %c0_0] : memref<16x32xf32, #tpu.memory_space<vmem>>, vector<16x32xf32>
    %c0_1 = arith.constant 0 : index
    %c0_2 = arith.constant 0 : index
    %1 = vector.load %arg1[%c0_1, %c0_2] : memref<48x16xf32, #tpu.memory_space<vmem>>, vector<48x16xf32>
    %c0_3 = arith.constant 0 : index
    %c0_4 = arith.constant 0 : index
    %2 = vector.load %arg5[%c0_3, %c0_4] : memref<16x32xf32, #tpu.memory_space<vmem>>, vector<16x32xf32>
    %cst = arith.constant dense<0.000000e+00> : vector<48x32xf32>
    %3 = tpu.matmul %1, %2, %cst {dimension_numbers = #tpu.dot_dimension_numbers<[1], [0], [0], [1], [0, 0, 1, 1], [], []>} : vector<48x16xf32>, vector<16x32xf32>, vector<48x32xf32> -> vector<48x32xf32>
    %c0_5 = arith.constant 0 : index
    %c0_6 = arith.constant 0 : index
    %4 = vector.load %arg6[%c0_5, %c0_6] : memref<1x32xf32, #tpu.memory_space<vmem>>, vector<1x32xf32>
    %5 = vector.broadcast %4 : vector<1x32xf32> to vector<48x32xf32>
    %6 = arith.addf %3, %5 : vector<48x32xf32>
    %7 = tpu.iota {dimensions = array<i32: 1>} : vector<48x16xi32>
    %c0_7 = arith.constant 0 : index
    %c0_8 = arith.constant 0 : index
    %8 = vector.load %arg2[%c0_7, %c0_8] : memref<48x1xi32, #tpu.memory_space<vmem>>, vector<48x1xi32>
    %9 = vector.broadcast %8 : vector<48x1xi32> to vector<48x16xi32>
    %10 = arith.cmpi eq, %9, %7 : vector<48x16xi32>
    %11 = arith.extui %10 : vector<48x16xi1> to vector<48x16xi32>
    %12 = arith.sitofp %11 : vector<48x16xi32> to vector<48x16xf32>
    %c0_9 = arith.constant 0 : index
    %c0_10 = arith.constant 0 : index
    %13 = vector.load %arg3[%c0_9, %c0_10] : memref<48x1xi32, #tpu.memory_space<vmem>>, vector<48x1xi32>
    %14 = vector.broadcast %13 : vector<48x1xi32> to vector<48x16xi32>
    %15 = arith.cmpi eq, %14, %7 : vector<48x16xi32>
    %16 = arith.extui %15 : vector<48x16xi1> to vector<48x16xi32>
    %17 = arith.sitofp %16 : vector<48x16xi32> to vector<48x16xf32>
    %18 = tpu.iota {dimensions = array<i32: 0>} : vector<16x48xi32>
    %c0_11 = arith.constant 0 : index
    %c0_12 = arith.constant 0 : index
    %19 = vector.load %arg4[%c0_11, %c0_12] : memref<1x48xi32, #tpu.memory_space<vmem>>, vector<1x48xi32>
    %20 = vector.broadcast %19 : vector<1x48xi32> to vector<16x48xi32>
    %21 = arith.cmpi eq, %20, %18 : vector<16x48xi32>
    %22 = arith.extui %21 : vector<16x48xi1> to vector<16x48xi32>
    %23 = arith.sitofp %22 : vector<16x48xi32> to vector<16x48xf32>
    %c0_13 = arith.constant 0 : index
    %c0_14 = arith.constant 0 : index
    %24 = vector.load %arg7[%c0_13, %c0_14] : memref<32x256xf32, #tpu.memory_space<vmem>>, vector<32x256xf32>
    %cst_15 = arith.constant dense<0.000000e+00> : vector<16x256xf32>
    %25 = tpu.matmul %0, %24, %cst_15 {dimension_numbers = #tpu.dot_dimension_numbers<[1], [0], [0], [1], [0, 0, 1, 1], [], []>} : vector<16x32xf32>, vector<32x256xf32>, vector<16x256xf32> -> vector<16x256xf32>
    %c0_16 = arith.constant 0 : index
    %c0_17 = arith.constant 0 : index
    %26 = vector.load %arg8[%c0_16, %c0_17] : memref<32x256xf32, #tpu.memory_space<vmem>>, vector<32x256xf32>
    %cst_18 = arith.constant dense<0.000000e+00> : vector<16x256xf32>
    %27 = tpu.matmul %0, %26, %cst_18 {dimension_numbers = #tpu.dot_dimension_numbers<[1], [0], [0], [1], [0, 0, 1, 1], [], []>} : vector<16x32xf32>, vector<32x256xf32>, vector<16x256xf32> -> vector<16x256xf32>
    %cst_19 = arith.constant dense<0.000000e+00> : vector<48x256xf32>
    %28 = tpu.matmul %17, %25, %cst_19 {dimension_numbers = #tpu.dot_dimension_numbers<[1], [0], [0], [1], [0, 0, 1, 1], [], []>} : vector<48x16xf32>, vector<16x256xf32>, vector<48x256xf32> -> vector<48x256xf32>
    %cst_20 = arith.constant dense<0.000000e+00> : vector<48x256xf32>
    %29 = tpu.matmul %12, %27, %cst_20 {dimension_numbers = #tpu.dot_dimension_numbers<[1], [0], [0], [1], [0, 0, 1, 1], [], []>} : vector<48x16xf32>, vector<16x256xf32>, vector<48x256xf32> -> vector<48x256xf32>
    %30 = arith.addf %28, %29 : vector<48x256xf32>
    %c0_21 = arith.constant 0 : index
    %c0_22 = arith.constant 0 : index
    %31 = vector.load %arg9[%c0_21, %c0_22] : memref<32x256xf32, #tpu.memory_space<vmem>>, vector<32x256xf32>
    %cst_23 = arith.constant dense<0.000000e+00> : vector<48x256xf32>
    %32 = tpu.matmul %6, %31, %cst_23 {dimension_numbers = #tpu.dot_dimension_numbers<[1], [0], [0], [1], [0, 0, 1, 1], [], []>} : vector<48x32xf32>, vector<32x256xf32>, vector<48x256xf32> -> vector<48x256xf32>
    %33 = arith.addf %30, %32 : vector<48x256xf32>
    %c0_24 = arith.constant 0 : index
    %c0_25 = arith.constant 0 : index
    %34 = vector.load %arg10[%c0_24, %c0_25] : memref<1x256xf32, #tpu.memory_space<vmem>>, vector<1x256xf32>
    %35 = vector.broadcast %34 : vector<1x256xf32> to vector<48x256xf32>
    %36 = arith.addf %33, %35 : vector<48x256xf32>
    %cst_26 = arith.constant dense<0.000000e+00> : vector<16x256xf32>
    %37 = tpu.matmul %23, %36, %cst_26 {dimension_numbers = #tpu.dot_dimension_numbers<[1], [0], [0], [1], [0, 0, 1, 1], [], []>} : vector<16x48xf32>, vector<48x256xf32>, vector<16x256xf32> -> vector<16x256xf32>
    %38 = arith.mulf %36, %36 : vector<48x256xf32>
    %cst_27 = arith.constant dense<0.000000e+00> : vector<16x256xf32>
    %39 = tpu.matmul %23, %38, %cst_27 {dimension_numbers = #tpu.dot_dimension_numbers<[1], [0], [0], [1], [0, 0, 1, 1], [], []>} : vector<16x48xf32>, vector<48x256xf32>, vector<16x256xf32> -> vector<16x256xf32>
    %cst_28 = arith.constant dense<0.000000e+00> : vector<16xf32>
    %40 = vector.multi_reduction <add>, %23, %cst_28 [1] : vector<16x48xf32> to vector<16xf32>
    %41 = vector.shape_cast %40 : vector<16xf32> to vector<16x1xf32>
    %cst_29 = arith.constant 1.000000e+00 : f32
    %42 = vector.broadcast %cst_29 : f32 to vector<16x1xf32>
    %43 = arith.maximumf %41, %42 : vector<16x1xf32>
    %44 = tpu.reciprocal %43 {approx = true} : vector<16x1xf32> -> vector<16x1xf32>
    %45 = vector.broadcast %44 : vector<16x1xf32> to vector<16x256xf32>
    %46 = arith.mulf %37, %45 : vector<16x256xf32>
    %47 = vector.broadcast %44 : vector<16x1xf32> to vector<16x256xf32>
    %48 = arith.mulf %39, %47 : vector<16x256xf32>
    %49 = arith.mulf %46, %46 : vector<16x256xf32>
    %50 = arith.subf %48, %49 : vector<16x256xf32>
    %cst_30 = arith.constant 0.000000e+00 : f32
    %51 = vector.broadcast %cst_30 : f32 to vector<16x256xf32>
    %52 = arith.maximumf %50, %51 : vector<16x256xf32>
    %cst_31 = arith.constant 9.99999974E-6 : f32
    %53 = vector.broadcast %cst_31 : f32 to vector<16x256xf32>
    %54 = arith.addf %52, %53 : vector<16x256xf32>
    %55 = math.sqrt %54 : vector<16x256xf32>
    %56 = vector.shape_cast %23 : vector<16x48xf32> to vector<16x48x1xf32>
    %57 = vector.shape_cast %56 : vector<16x48x1xf32> to vector<16x48x1xf32>
    %58 = vector.broadcast %57 : vector<16x48x1xf32> to vector<16x48x256xf32>
    %59 = vector.shape_cast %36 : vector<48x256xf32> to vector<1x48x256xf32>
    %60 = vector.shape_cast %59 : vector<1x48x256xf32> to vector<1x48x256xf32>
    %61 = vector.broadcast %60 : vector<1x48x256xf32> to vector<16x48x256xf32>
    %62 = arith.mulf %61, %58 : vector<16x48x256xf32>
    %cst_32 = arith.constant 1.000000e+00 : f32
    %63 = vector.broadcast %cst_32 : f32 to vector<16x48x256xf32>
    %64 = arith.subf %63, %58 : vector<16x48x256xf32>
    %cst_33 = arith.constant 3.000000e+38 : f32
    %65 = vector.broadcast %cst_33 : f32 to vector<16x48x256xf32>
    %66 = arith.mulf %64, %65 : vector<16x48x256xf32>
    %67 = arith.addf %62, %66 : vector<16x48x256xf32>
    %cst_34 = arith.constant dense<0x7F800000> : vector<16x256xf32>
    %68 = vector.multi_reduction <minimumf>, %67, %cst_34 [1] : vector<16x48x256xf32> to vector<16x256xf32>
    %69 = arith.mulf %61, %58 : vector<16x48x256xf32>
    %cst_35 = arith.constant 1.000000e+00 : f32
    %70 = vector.broadcast %cst_35 : f32 to vector<16x48x256xf32>
    %71 = arith.subf %70, %58 : vector<16x48x256xf32>
    %cst_36 = arith.constant 3.000000e+38 : f32
    %72 = vector.broadcast %cst_36 : f32 to vector<16x48x256xf32>
    %73 = arith.mulf %71, %72 : vector<16x48x256xf32>
    %74 = arith.subf %69, %73 : vector<16x48x256xf32>
    %cst_37 = arith.constant dense<0xFF800000> : vector<16x256xf32>
    %75 = vector.multi_reduction <maximumf>, %74, %cst_37 [1] : vector<16x48x256xf32> to vector<16x256xf32>
    %cst_38 = arith.constant 0.000000e+00 : f32
    %76 = vector.broadcast %cst_38 : f32 to vector<16x1xf32>
    %77 = arith.cmpf ogt, %41, %76 : vector<16x1xf32>
    %cst_39 = arith.constant 0.000000e+00 : f32
    %78 = vector.shape_cast %77 : vector<16x1xi1> to vector<16x1xi1>
    %79 = vector.broadcast %78 : vector<16x1xi1> to vector<16x256xi1>
    %80 = vector.broadcast %cst_39 : f32 to vector<16x256xf32>
    %81 = arith.select %79, %68, %80 : vector<16x256xi1>, vector<16x256xf32>
    %cst_40 = arith.constant 0.000000e+00 : f32
    %82 = vector.shape_cast %77 : vector<16x1xi1> to vector<16x1xi1>
    %83 = vector.broadcast %82 : vector<16x1xi1> to vector<16x256xi1>
    %84 = vector.broadcast %cst_40 : f32 to vector<16x256xf32>
    %85 = arith.select %83, %75, %84 : vector<16x256xi1>, vector<16x256xf32>
    %cst_41 = arith.constant 1.000000e+00 : f32
    %86 = vector.broadcast %cst_41 : f32 to vector<16x1xf32>
    %87 = arith.addf %43, %86 : vector<16x1xf32>
    %88 = math.log %87 : vector<16x1xf32>
    %cst_42 = arith.constant 0.773305058 : f32
    %89 = vector.broadcast %cst_42 : f32 to vector<16x1xf32>
    %90 = arith.mulf %88, %89 : vector<16x1xf32>
    %91 = tpu.reciprocal %88 {approx = true} : vector<16x1xf32> -> vector<16x1xf32>
    %cst_43 = arith.constant 1.29315078 : f32
    %92 = vector.broadcast %cst_43 : f32 to vector<16x1xf32>
    %93 = arith.mulf %92, %91 : vector<16x1xf32>
    %94 = vector.broadcast %90 : vector<16x1xf32> to vector<16x256xf32>
    %95 = arith.mulf %46, %94 : vector<16x256xf32>
    %96 = vector.broadcast %90 : vector<16x1xf32> to vector<16x256xf32>
    %97 = arith.mulf %81, %96 : vector<16x256xf32>
    %98 = vector.broadcast %90 : vector<16x1xf32> to vector<16x256xf32>
    %99 = arith.mulf %85, %98 : vector<16x256xf32>
    %100 = vector.broadcast %90 : vector<16x1xf32> to vector<16x256xf32>
    %101 = arith.mulf %55, %100 : vector<16x256xf32>
    %102 = vector.broadcast %93 : vector<16x1xf32> to vector<16x256xf32>
    %103 = arith.mulf %46, %102 : vector<16x256xf32>
    %104 = vector.broadcast %93 : vector<16x1xf32> to vector<16x256xf32>
    %105 = arith.mulf %81, %104 : vector<16x256xf32>
    %106 = vector.broadcast %93 : vector<16x1xf32> to vector<16x256xf32>
    %107 = arith.mulf %85, %106 : vector<16x256xf32>
    %108 = vector.broadcast %93 : vector<16x1xf32> to vector<16x256xf32>
    %109 = arith.mulf %55, %108 : vector<16x256xf32>
    %110 = tpu.concatenate %46, %81, %85, %55, %95, %97, %99, %101, %103, %105, %107, %109 in 1 : vector<16x256xf32>, vector<16x256xf32>, vector<16x256xf32>, vector<16x256xf32>, vector<16x256xf32>, vector<16x256xf32>, vector<16x256xf32>, vector<16x256xf32>, vector<16x256xf32>, vector<16x256xf32>, vector<16x256xf32>, vector<16x256xf32> -> vector<16x3072xf32>
    %c0_44 = arith.constant 0 : index
    %c0_45 = arith.constant 0 : index
    %111 = vector.load %arg11[%c0_44, %c0_45] : memref<32x32xf32, #tpu.memory_space<vmem>>, vector<32x32xf32>
    %cst_46 = arith.constant dense<0.000000e+00> : vector<16x32xf32>
    %112 = tpu.matmul %0, %111, %cst_46 {dimension_numbers = #tpu.dot_dimension_numbers<[1], [0], [0], [1], [0, 0, 1, 1], [], []>} : vector<16x32xf32>, vector<32x32xf32>, vector<16x32xf32> -> vector<16x32xf32>
    %c0_47 = arith.constant 0 : index
    %c0_48 = arith.constant 0 : index
    %113 = vector.load %arg12[%c0_47, %c0_48] : memref<3072x32xf32, #tpu.memory_space<vmem>>, vector<3072x32xf32>
    %cst_49 = arith.constant dense<0.000000e+00> : vector<16x32xf32>
    %114 = tpu.matmul %110, %113, %cst_49 {dimension_numbers = #tpu.dot_dimension_numbers<[1], [0], [0], [1], [0, 0, 1, 1], [], []>} : vector<16x3072xf32>, vector<3072x32xf32>, vector<16x32xf32> -> vector<16x32xf32>
    %115 = arith.addf %112, %114 : vector<16x32xf32>
    %c0_50 = arith.constant 0 : index
    %c0_51 = arith.constant 0 : index
    %116 = vector.load %arg13[%c0_50, %c0_51] : memref<1x32xf32, #tpu.memory_space<vmem>>, vector<1x32xf32>
    %117 = vector.broadcast %116 : vector<1x32xf32> to vector<16x32xf32>
    %118 = arith.addf %115, %117 : vector<16x32xf32>
    %c0_52 = arith.constant 0 : index
    %c0_53 = arith.constant 0 : index
    %119 = vector.load %arg14[%c0_52, %c0_53] : memref<32x32xf32, #tpu.memory_space<vmem>>, vector<32x32xf32>
    %cst_54 = arith.constant dense<0.000000e+00> : vector<16x32xf32>
    %120 = tpu.matmul %118, %119, %cst_54 {dimension_numbers = #tpu.dot_dimension_numbers<[1], [0], [0], [1], [0, 0, 1, 1], [], []>} : vector<16x32xf32>, vector<32x32xf32>, vector<16x32xf32> -> vector<16x32xf32>
    %c0_55 = arith.constant 0 : index
    %c0_56 = arith.constant 0 : index
    %121 = vector.load %arg15[%c0_55, %c0_56] : memref<1x32xf32, #tpu.memory_space<vmem>>, vector<1x32xf32>
    %122 = vector.broadcast %121 : vector<1x32xf32> to vector<16x32xf32>
    %123 = arith.addf %120, %122 : vector<16x32xf32>
    %cst_57 = arith.constant dense<0.000000e+00> : vector<32xf32>
    %124 = vector.multi_reduction <add>, %123, %cst_57 [0] : vector<16x32xf32> to vector<32xf32>
    %125 = vector.shape_cast %124 : vector<32xf32> to vector<1x32xf32>
    %cst_58 = arith.constant 1.600000e+01 : f32
    %126 = vector.broadcast %cst_58 : f32 to vector<1x32xf32>
    %127 = arith.divf %125, %126 : vector<1x32xf32>
    %128 = vector.broadcast %127 : vector<1x32xf32> to vector<16x32xf32>
    %129 = arith.subf %123, %128 : vector<16x32xf32>
    %130 = arith.mulf %129, %129 : vector<16x32xf32>
    %cst_59 = arith.constant dense<0.000000e+00> : vector<32xf32>
    %131 = vector.multi_reduction <add>, %130, %cst_59 [0] : vector<16x32xf32> to vector<32xf32>
    %132 = vector.shape_cast %131 : vector<32xf32> to vector<1x32xf32>
    %cst_60 = arith.constant 1.600000e+01 : f32
    %133 = vector.broadcast %cst_60 : f32 to vector<1x32xf32>
    %134 = arith.divf %132, %133 : vector<1x32xf32>
    %135 = vector.broadcast %127 : vector<1x32xf32> to vector<16x32xf32>
    %136 = arith.subf %123, %135 : vector<16x32xf32>
    %cst_61 = arith.constant 9.99999974E-6 : f32
    %137 = vector.broadcast %cst_61 : f32 to vector<1x32xf32>
    %138 = arith.addf %134, %137 : vector<1x32xf32>
    %139 = math.rsqrt %138 : vector<1x32xf32>
    %140 = vector.broadcast %139 : vector<1x32xf32> to vector<16x32xf32>
    %141 = arith.mulf %136, %140 : vector<16x32xf32>
    %c0_62 = arith.constant 0 : index
    %c0_63 = arith.constant 0 : index
    %142 = vector.load %arg16[%c0_62, %c0_63] : memref<1x32xf32, #tpu.memory_space<vmem>>, vector<1x32xf32>
    %143 = vector.broadcast %142 : vector<1x32xf32> to vector<16x32xf32>
    %144 = arith.mulf %141, %143 : vector<16x32xf32>
    %c0_64 = arith.constant 0 : index
    %c0_65 = arith.constant 0 : index
    %145 = vector.load %arg17[%c0_64, %c0_65] : memref<1x32xf32, #tpu.memory_space<vmem>>, vector<1x32xf32>
    %146 = vector.broadcast %145 : vector<1x32xf32> to vector<16x32xf32>
    %147 = arith.addf %144, %146 : vector<16x32xf32>
    %cst_66 = arith.constant 0.000000e+00 : f32
    %148 = vector.broadcast %cst_66 : f32 to vector<16x32xf32>
    %149 = arith.maximumf %147, %148 : vector<16x32xf32>
    %c0_67 = arith.constant 0 : index
    %c0_68 = arith.constant 0 : index
    %150 = vector.load %arg18[%c0_67, %c0_68] : memref<16x32xf32, #tpu.memory_space<vmem>>, vector<16x32xf32>
    tpu.vector_store %arg18[%c0_67, %c0_68], %149 {strides = array<i32>} : memref<16x32xf32, #tpu.memory_space<vmem>>, vector<16x32xf32>,
    return
  }
}

module attributes {stable_mosaic.version = 11 : i64} {
  func.func @_linear_bn_relu_kernel(%arg0: memref<2x32xf32, #tpu.memory_space<vmem>>, %arg1: memref<32x32xf32, #tpu.memory_space<vmem>>, %arg2: memref<1x32xf32, #tpu.memory_space<vmem>>, %arg3: memref<1x32xf32, #tpu.memory_space<vmem>>, %arg4: memref<1x32xf32, #tpu.memory_space<vmem>>, %arg5: memref<2x32xf32, #tpu.memory_space<vmem>>) attributes {dimension_semantics = [], scalar_prefetch = 0 : i64, scratch_operands = 0 : i64, tpu.core_type = #tpu.core_type<tc>} {
    %c0 = arith.constant 0 : index
    %c0_0 = arith.constant 0 : index
    %0 = vector.load %arg0[%c0, %c0_0] : memref<2x32xf32, #tpu.memory_space<vmem>>, vector<2x32xf32>
    %c0_1 = arith.constant 0 : index
    %c0_2 = arith.constant 0 : index
    %1 = vector.load %arg1[%c0_1, %c0_2] : memref<32x32xf32, #tpu.memory_space<vmem>>, vector<32x32xf32>
    %cst = arith.constant dense<0.000000e+00> : vector<2x32xf32>
    %2 = tpu.matmul %0, %1, %cst {dimension_numbers = #tpu.dot_dimension_numbers<[1], [0], [0], [1], [0, 0, 1, 1], [], []>} : vector<2x32xf32>, vector<32x32xf32>, vector<2x32xf32> -> vector<2x32xf32>
    %c0_3 = arith.constant 0 : index
    %c0_4 = arith.constant 0 : index
    %3 = vector.load %arg2[%c0_3, %c0_4] : memref<1x32xf32, #tpu.memory_space<vmem>>, vector<1x32xf32>
    %4 = vector.broadcast %3 : vector<1x32xf32> to vector<2x32xf32>
    %5 = arith.addf %2, %4 : vector<2x32xf32>
    %cst_5 = arith.constant dense<0.000000e+00> : vector<32xf32>
    %6 = vector.multi_reduction <add>, %5, %cst_5 [0] : vector<2x32xf32> to vector<32xf32>
    %7 = vector.shape_cast %6 : vector<32xf32> to vector<1x32xf32>
    %cst_6 = arith.constant 2.000000e+00 : f32
    %8 = vector.broadcast %cst_6 : f32 to vector<1x32xf32>
    %9 = arith.divf %7, %8 : vector<1x32xf32>
    %10 = vector.broadcast %9 : vector<1x32xf32> to vector<2x32xf32>
    %11 = arith.subf %5, %10 : vector<2x32xf32>
    %12 = arith.mulf %11, %11 : vector<2x32xf32>
    %cst_7 = arith.constant dense<0.000000e+00> : vector<32xf32>
    %13 = vector.multi_reduction <add>, %12, %cst_7 [0] : vector<2x32xf32> to vector<32xf32>
    %14 = vector.shape_cast %13 : vector<32xf32> to vector<1x32xf32>
    %cst_8 = arith.constant 2.000000e+00 : f32
    %15 = vector.broadcast %cst_8 : f32 to vector<1x32xf32>
    %16 = arith.divf %14, %15 : vector<1x32xf32>
    %17 = vector.broadcast %9 : vector<1x32xf32> to vector<2x32xf32>
    %18 = arith.subf %5, %17 : vector<2x32xf32>
    %cst_9 = arith.constant 9.99999974E-6 : f32
    %19 = vector.broadcast %cst_9 : f32 to vector<1x32xf32>
    %20 = arith.addf %16, %19 : vector<1x32xf32>
    %21 = math.rsqrt %20 : vector<1x32xf32>
    %22 = vector.broadcast %21 : vector<1x32xf32> to vector<2x32xf32>
    %23 = arith.mulf %18, %22 : vector<2x32xf32>
    %c0_10 = arith.constant 0 : index
    %c0_11 = arith.constant 0 : index
    %24 = vector.load %arg3[%c0_10, %c0_11] : memref<1x32xf32, #tpu.memory_space<vmem>>, vector<1x32xf32>
    %25 = vector.broadcast %24 : vector<1x32xf32> to vector<2x32xf32>
    %26 = arith.mulf %23, %25 : vector<2x32xf32>
    %c0_12 = arith.constant 0 : index
    %c0_13 = arith.constant 0 : index
    %27 = vector.load %arg4[%c0_12, %c0_13] : memref<1x32xf32, #tpu.memory_space<vmem>>, vector<1x32xf32>
    %28 = vector.broadcast %27 : vector<1x32xf32> to vector<2x32xf32>
    %29 = arith.addf %26, %28 : vector<2x32xf32>
    %cst_14 = arith.constant 0.000000e+00 : f32
    %30 = vector.broadcast %cst_14 : f32 to vector<2x32xf32>
    %31 = arith.maximumf %29, %30 : vector<2x32xf32>
    %c0_15 = arith.constant 0 : index
    %c0_16 = arith.constant 0 : index
    %32 = vector.load %arg5[%c0_15, %c0_16] : memref<2x32xf32, #tpu.memory_space<vmem>>, vector<2x32xf32>
    tpu.vector_store %arg5[%c0_15, %c0_16], %31 {strides = array<i32>} : memref<2x32xf32, #tpu.memory_space<vmem>>, vector<2x32xf32>,
    return
  }
}

module attributes {stable_mosaic.version = 11 : i64} {
  func.func @_final_kernel(%arg0: memref<2x32xf32, #tpu.memory_space<vmem>>, %arg1: memref<32x1xf32, #tpu.memory_space<vmem>>, %arg2: memref<1x1xf32, #tpu.memory_space<vmem>>, %arg3: memref<2x1xf32, #tpu.memory_space<vmem>>, %arg4: memref<2x1xf32, #tpu.memory_space<vmem>>) attributes {dimension_semantics = [], scalar_prefetch = 0 : i64, scratch_operands = 0 : i64, tpu.core_type = #tpu.core_type<tc>} {
    %c0 = arith.constant 0 : index
    %c0_0 = arith.constant 0 : index
    %0 = vector.load %arg0[%c0, %c0_0] : memref<2x32xf32, #tpu.memory_space<vmem>>, vector<2x32xf32>
    %c0_1 = arith.constant 0 : index
    %c0_2 = arith.constant 0 : index
    %1 = vector.load %arg1[%c0_1, %c0_2] : memref<32x1xf32, #tpu.memory_space<vmem>>, vector<32x1xf32>
    %cst = arith.constant dense<0.000000e+00> : vector<2x1xf32>
    %2 = tpu.matmul %0, %1, %cst {dimension_numbers = #tpu.dot_dimension_numbers<[1], [0], [0], [1], [0, 0, 1, 1], [], []>} : vector<2x32xf32>, vector<32x1xf32>, vector<2x1xf32> -> vector<2x1xf32>
    %c0_3 = arith.constant 0 : index
    %c0_4 = arith.constant 0 : index
    %3 = vector.load %arg2[%c0_3, %c0_4] : memref<1x1xf32, #tpu.memory_space<vmem>>, vector<1x1xf32>
    %4 = vector.broadcast %3 : vector<1x1xf32> to vector<2x1xf32>
    %5 = arith.addf %2, %4 : vector<2x1xf32>
    %c0_5 = arith.constant 0 : index
    %c0_6 = arith.constant 0 : index
    %6 = vector.load %arg4[%c0_5, %c0_6] : memref<2x1xf32, #tpu.memory_space<vmem>>, vector<2x1xf32>
    tpu.vector_store %arg4[%c0_5, %c0_6], %5 {strides = array<i32>} : memref<2x1xf32, #tpu.memory_space<vmem>>, vector<2x1xf32>,
    %7 = arith.negf %5 : vector<2x1xf32>
    %8 = math.exp %7 : vector<2x1xf32>
    %cst_7 = arith.constant 1.000000e+00 : f32
    %9 = vector.broadcast %cst_7 : f32 to vector<2x1xf32>
    %10 = arith.addf %9, %8 : vector<2x1xf32>
    %11 = arith.divf %9, %10 : vector<2x1xf32>
    %c0_8 = arith.constant 0 : index
    %c0_9 = arith.constant 0 : index
    %12 = vector.load %arg3[%c0_8, %c0_9] : memref<2x1xf32, #tpu.memory_space<vmem>>, vector<2x1xf32>
    tpu.vector_store %arg3[%c0_8, %c0_9], %11 {strides = array<i32>} : memref<2x1xf32, #tpu.memory_space<vmem>>, vector<2x1xf32>,
    return
  }
}

</mosaic_0001>

<bundles_post_ra>
// kernel: pna_net_forward.7
= control target key start
LH: loop header
LB: loop body
LE: loop exit
PB: predicated region body
PF: predicated region fallthrough
CT: control target
= control target key end

     0   :  { %v23_v0 = vlaneseq  ;;  %v286_v1 = vmov 0.0|0.0   ;;  %vm287_vm0 = vmmov 0   ;;  %v288_v4 = vmov 0.0   ;;  %s360_s1 = inlined_call_operand.vmem [shape: f32[16,32], index: 1, kind: input, shape index: {}]   ;;  %s361_s0 = inlined_call_operand.vmem [shape: s32[1,16], index: 0, kind: input, shape index: {}]   ;;  %s362_s2 = inlined_call_operand.vmem [shape: f32[32,32], index: 2, kind: input, shape index: {}]   ;;  %s363_s3 = inlined_call_operand.vmem [shape: f32[1,32], index: 3, kind: input, shape index: {}]   ;;  %s364_s4 = inlined_call_operand.vmem [shape: f32[1,32], index: 4, kind: input, shape index: {}]   ;;  %s365_s5 = inlined_call_operand.vmem [shape: f32[1,32], index: 5, kind: input, shape index: {}]   ;;  %s366_s6 = inlined_call_operand.vmem [shape: f32[2,32], index: 6, kind: output, shape index: {}]  }
   0x1   :  { %272 = vmatprep.subr.bf16.mxu0 %v286_v1  ;;  %v33_v2 = vld [vmem:[%s360_s1] sm:$0xff]  ;;  %v34_v3 = vld [vmem:[%s360_s1 + $0x8] sm:$0xff]  ;;  %258 = vmatprep.mubr.msk.f32.mxu0 %vm287_vm0, %v288_v4  ;;  %v111_v10 = vld [vmem:[%s362_s2 + $0x10] sm:$0xff]  ;;  %vm35_vm2 = vcmask 130048   ;;  %vm120_vm3 = vcmask 261120   ;;  %vm194_vm4 = vcmask 254976  }
   0x2   :  { %v239_v5 = vld [vmem:[%s361_s0] ss:$0 sm:$0xff]  ;;  %v273_v6 = vpack.c.bf16 %v34_v3, %v33_v2  ;;  %v24_v7 = vshrl.u32 %v23_v0, 7  ;;  %275 = vmatprep.subr.bf16.mxu1 %v286_v1  ;;  %v110_v9 = vld [vmem:[%s362_s2 + $0x8] sm:$0xff]  ;;  %269 = vmatprep.mubr.msk.f32.mxu1 %vm287_vm0, %v288_v4  ;;  %v112_v12 = vld [vmem:[%s362_s2 + $0x18] sm:$0xff] }
   0x3   :  { %v109_v8 = vld [vmem:[%s362_s2] sm:$0xff]  ;;  %v279_v14 = vpack.c.bf16 %v112_v12, %v111_v10 }
   0x4   :  { %v276_v11 = vpack.c.bf16 %v110_v9, %v109_v8  ;;  %274 = vmatpush3.bf16.msra.mxu0 %v273_v6  ;;  %vm30_vm1 = vcmp.eq.s32.totalorder %v239_v5, %v24_v7  ;;  %v242_v17 = vld [vmem:[%s363_s3] ss:$0 sm:$0xff] }
   0x5   :  { %v240_v13 = vsel %vm30_vm1, 1.0, %v288_v4  ;;  %v244_v41 = vld [vmem:[%s364_s4] ss:$0 sm:$0xff] }
   0x6   :  { %277 = vmatpush3.bf16.msra.mxu1 %v276_v11  ;;  %v245_v43 = vld [vmem:[%s365_s5] ss:$0 sm:$0xff] }
   0x7   :  { %278 = vmatprep.subr.bf16.mxu1 %v286_v1  ;;  %259 = vmatmul.mubr.msk.f32.vlgmr.msra.gmra.mrb[0].mxu0 %vm35_vm2, %v240_v13 }
   0xa   :  { %280 = vmatpush3.bf16.msra.mxu1 %v279_v14 }
  0xda   :  { %v105_v15 = vpop.f32.mrb[0].mxu0 }
  0xdb   :  { %v260_v16 = vpop.f32.mrb[1].mxu0  ;;  %270 = vmatmul.mubr.msk.f32.vlgmr.msra.gmra.mrb[0].mxu1 %vm120_vm3, %v105_v15 }
 0x1ae   :  { %v190_v18 = vpop.f32.mrb[0].mxu1 }
 0x1af   :  { %v191_v19 = vadd.f32 %v242_v17, %v190_v18  ;;  %v271_v20 = vpop.f32.mrb[1].mxu1 }
 0x1b1   :  { %v195_v21 = vsel %vm194_vm4, %v191_v19, 0.0 }
 0x1b2   :  { %v196_v22 = vrot.slane %v195_v21, 4 }
 0x1b4   :  { %v197_v23 = vadd.f32 %v196_v22, %v195_v21 }
 0x1b6   :  { %v198_v24 = vrot.slane %v197_v23, 2 }
 0x1b8   :  { %v199_v25 = vadd.f32 %v198_v24, %v197_v23 }
 0x1ba   :  { %v200_v26 = vrot.slane %v199_v25, 1 }
 0x1bc   :  { %v201_v27 = vadd.f32 %v200_v26, %v199_v25 }
 0x1be   :  { %v203_v28 = vmul.f32 0.5, %v201_v27 }
 0x1c0   :  { %v204_v29 = vsub.f32 %v191_v19, %v203_v28 }
 0x1c2   :  { %v205_v30 = vmul.f32 %v204_v29, %v204_v29 }
 0x1c4   :  { %v206_v31 = vsel %vm194_vm4, %v205_v30, 0.0 }
 0x1c5   :  { %v207_v32 = vrot.slane %v206_v31, 4 }
 0x1c7   :  { %v208_v33 = vadd.f32 %v207_v32, %v206_v31 }
 0x1c9   :  { %v209_v34 = vrot.slane %v208_v33, 2 }
 0x1cb   :  { %v210_v35 = vadd.f32 %v209_v34, %v208_v33 }
 0x1cd   :  { %v211_v36 = vrot.slane %v210_v35, 1 }
 0x1cf   :  { %v212_v37 = vadd.f32 %v211_v36, %v210_v35 }
 0x1d1   :  { %v213_v38 = vmul.f32 0.5, %v212_v37 }
 0x1d3   :  { %v214_v39 = vadd.f32 1e-05, %v213_v38 }
 0x1d5   :  { %284 = vrsqrt.f32 %v214_v39 }
 0x1df   :  { %v285_v40 = vpop.eup %284 }
 0x1e0   :  { %v216_v42 = vmul.f32 %v285_v40, %v204_v29 }
 0x1e2   :  { %v224_v44 = vmul.f32 %v244_v41, %v216_v42 }
 0x1e4   :  { %v232_v45 = vadd.f32 %v245_v43, %v224_v44 }
 0x1e6   :  { %v233_v46 = vmax.f32 %v232_v45, 0.0 }
 0x1e8   :  { %234 = vst.msk [vmem:[%s366_s6] sm:$0x3] %vm194_vm4, %v233_v46 }

// kernel: pna_net_forward.8
= control target key start
LH: loop header
LB: loop body
LE: loop exit
PB: predicated region body
PF: predicated region fallthrough
CT: control target
= control target key end

     0   :  { %v182_v0 = vmov 0.0|0.0   ;;  %vm183_vm0 = vmmov 0   ;;  %v184_v4 = vmov 0.0   ;;  %vm32_vm1 = vcmask 261120   ;;  %s245_s1 = inlined_call_operand.vmem [shape: f32[32,32], index: 1, kind: input, shape index: {}]   ;;  %s246_s0 = inlined_call_operand.vmem [shape: f32[2,32], index: 0, kind: input, shape index: {}]   ;;  %s247_s2 = inlined_call_operand.vmem [shape: f32[1,32], index: 2, kind: input, shape index: {}]   ;;  %s248_s3 = inlined_call_operand.vmem [shape: f32[1,32], index: 3, kind: input, shape index: {}]   ;;  %s249_s4 = inlined_call_operand.vmem [shape: f32[1,32], index: 4, kind: input, shape index: {}]   ;;  %s250_s5 = inlined_call_operand.vmem [shape: f32[2,32], index: 5, kind: output, shape index: {}]  }
   0x1   :  { %171 = vmatprep.subr.bf16.mxu0 %v182_v0  ;;  %v21_v1 = vld [vmem:[%s245_s1] sm:$0xff]  ;;  %v22_v2 = vld [vmem:[%s245_s1 + $0x8] sm:$0xff]  ;;  %v23_v3 = vld [vmem:[%s245_s1 + $0x10] sm:$0xff]  ;;  %168 = vmatprep.mubr.msk.f32.mxu0 %vm183_vm0, %v184_v4  ;;  %vm106_vm2 = vcmask 254976  }
   0x2   :  { %v172_v5 = vpack.c.bf16 %v22_v2, %v21_v1  ;;  %v24_v6 = vld [vmem:[%s245_s1 + $0x18] sm:$0xff]  ;;  %v20_v8 = vld [vmem:[%s246_s0] sm:$0x3] }
   0x3   :  { %v175_v7 = vpack.c.bf16 %v24_v6, %v23_v3  ;;  %v151_v9 = vld [vmem:[%s247_s2] ss:$0 sm:$0xff] }
   0x4   :  { %173 = vmatpush3.bf16.msra.mxu0 %v172_v5  ;;  %v153_v33 = vld [vmem:[%s248_s3] ss:$0 sm:$0xff] }
   0x5   :  { %174 = vmatprep.subr.bf16.mxu0 %v182_v0  ;;  %v154_v35 = vld [vmem:[%s249_s4] ss:$0 sm:$0xff] }
   0x8   :  { %176 = vmatpush3.bf16.msra.mxu0 %v175_v7 }
   0xb   :  { %169 = vmatmul.mubr.msk.f32.vlgmr.msra.gmra.mrb[0].mxu0 %vm32_vm1, %v20_v8 }
  0xde   :  { %v102_v10 = vpop.f32.mrb[0].mxu0 }
  0xdf   :  { %v103_v11 = vadd.f32 %v151_v9, %v102_v10  ;;  %v170_v12 = vpop.f32.mrb[1].mxu0 }
  0xe1   :  { %v107_v13 = vsel %vm106_vm2, %v103_v11, 0.0 }
  0xe2   :  { %v108_v14 = vrot.slane %v107_v13, 4 }
  0xe4   :  { %v109_v15 = vadd.f32 %v108_v14, %v107_v13 }
  0xe6   :  { %v110_v16 = vrot.slane %v109_v15, 2 }
  0xe8   :  { %v111_v17 = vadd.f32 %v110_v16, %v109_v15 }
  0xea   :  { %v112_v18 = vrot.slane %v111_v17, 1 }
  0xec   :  { %v113_v19 = vadd.f32 %v112_v18, %v111_v17 }
  0xee   :  { %v115_v20 = vmul.f32 0.5, %v113_v19 }
  0xf0   :  { %v116_v21 = vsub.f32 %v103_v11, %v115_v20 }
  0xf2   :  { %v117_v22 = vmul.f32 %v116_v21, %v116_v21 }
  0xf4   :  { %v118_v23 = vsel %vm106_vm2, %v117_v22, 0.0 }
  0xf5   :  { %v119_v24 = vrot.slane %v118_v23, 4 }
  0xf7   :  { %v120_v25 = vadd.f32 %v119_v24, %v118_v23 }
  0xf9   :  { %v121_v26 = vrot.slane %v120_v25, 2 }
  0xfb   :  { %v122_v27 = vadd.f32 %v121_v26, %v120_v25 }
  0xfd   :  { %v123_v28 = vrot.slane %v122_v27, 1 }
  0xff   :  { %v124_v29 = vadd.f32 %v123_v28, %v122_v27 }
 0x101   :  { %v125_v30 = vmul.f32 0.5, %v124_v29 }
 0x103   :  { %v126_v31 = vadd.f32 1e-05, %v125_v30 }
 0x105   :  { %180 = vrsqrt.f32 %v126_v31 }
 0x10f   :  { %v181_v32 = vpop.eup %180 }
 0x110   :  { %v128_v34 = vmul.f32 %v181_v32, %v116_v21 }
 0x112   :  { %v136_v36 = vmul.f32 %v153_v33, %v128_v34 }
 0x114   :  { %v144_v37 = vadd.f32 %v154_v35, %v136_v36 }
 0x116   :  { %v145_v38 = vmax.f32 %v144_v37, 0.0 }
 0x118   :  { %146 = vst.msk [vmem:[%s250_s5] sm:$0x3] %vm106_vm2, %v145_v38 }

// kernel: pna_net_forward.9
= control target key start
LH: loop header
LB: loop body
LE: loop exit
PB: predicated region body
PF: predicated region fallthrough
CT: control target
= control target key end

     0   :  { %v153_v0 = vmov 0.0|0.0   ;;  %vm154_vm0 = vmmov 0   ;;  %v155_v4 = vmov 0.0   ;;  %vm30_vm1 = vcmask 261120   ;;  %s205_s1 = inlined_call_operand.vmem [shape: f32[32,1], index: 1, kind: input, shape index: {}]   ;;  %s206_s2 = inlined_call_operand.<no memory space> [shape: f32[1,1], index: 2, kind: input, shape index: {}]   ;;  %s207_s0 = inlined_call_operand.vmem [shape: f32[2,32], index: 0, kind: input, shape index: {}]   ;;  %s208_s4 = inlined_call_operand.vmem [shape: f32[2,1], index: 4, kind: output, shape index: {1}]   ;;  %s209_s3 = inlined_call_operand.vmem [shape: f32[2,1], index: 3, kind: output, shape index: {0}]  }
   0x1   :  { %140 = vmatprep.subr.bf16.mxu0 %v153_v0  ;;  %v19_v1 = vld [vmem:[%s205_s1] sm:$0xff]  ;;  %v20_v2 = vld [vmem:[%s205_s1 + $0x8] sm:$0xff]  ;;  %v21_v3 = vld [vmem:[%s205_s1 + $0x10] sm:$0xff]  ;;  %137 = vmatprep.mubr.msk.f32.mxu0 %vm154_vm0, %v155_v4  ;;  %v10_v5 = vstv %s206_s2  ;;  %vm104_vm2 = vcmask 1024  }
   0x2   :  { %v141_v6 = vpack.c.bf16 %v20_v2, %v19_v1  ;;  %v22_v7 = vld [vmem:[%s205_s1 + $0x18] sm:$0xff]  ;;  %11 = vst [vmem:[#allocation2] sm:$0x1] %v10_v5  ;;  %v18_v9 = vld [vmem:[%s207_s0] sm:$0x3] }
   0x3   :  { %v144_v8 = vpack.c.bf16 %v22_v7, %v21_v3 }
   0x4   :  { %142 = vmatpush3.bf16.msra.mxu0 %v141_v6 }
   0x5   :  { %143 = vmatprep.subr.bf16.mxu0 %v153_v0 }
   0x8   :  { %145 = vmatpush3.bf16.msra.mxu0 %v144_v8 }
   0x9   :  { %v121_v10 = vld [vmem:[#allocation2] ss:$0 sm:$0xff] }
   0xb   :  { %138 = vmatmul.mubr.msk.f32.vlgmr.msra.gmra.mrb[0].mxu0 %vm30_vm1, %v18_v9 }
  0xde   :  { %v100_v11 = vpop.f32.mrb[0].mxu0 }
  0xdf   :  { %v101_v12 = vadd.f32 %v121_v10, %v100_v11  ;;  %v139_v13 = vpop.f32.mrb[1].mxu0 }
  0xe1   :  { %105 = vst.msk [vmem:[%s208_s4] sm:$0x3] %vm104_vm2, %v101_v12  ;;  %v123_v14 = vmul.f32 -1.442695, %v101_v12 }
  0xe3   :  { %149 = vpow2.f32 %v123_v14 }
  0xed   :  { %v150_v15 = vpop.eup %149 }
  0xee   :  { %v109_v16 = vadd.f32 1.0, %v150_v15 }
  0xf0   :  { %151 = vrcp.f32 %v109_v16 }
  0xfa   :  { %v152_v17 = vpop.eup %151 }
  0xfb   :  { %112 = vst.msk [vmem:[%s209_s3] sm:$0x3] %vm104_vm2, %v152_v17 }

// kernel: pna_net_forward.5
= control target key start
LH: loop header
LB: loop body
LE: loop exit
PB: predicated region body
PF: predicated region fallthrough
CT: control target
= control target key end

     0   :  { %vm76_vm0 = vcmask 130048   ;;  %v5808_v3 = vmov 0   ;;  %v10502_v32 = vmov 0.0   ;;  %vm298_vm1 = vcmask 261120   ;;  %s10480_s5 = inlined_call_operand.vmem [shape: f32[16,32], index: 5, kind: input, shape index: {}]   ;;  %s10481_s1 = inlined_call_operand.vmem [shape: f32[48,16], index: 1, kind: input, shape index: {}]   ;;  %s10482_s7 = inlined_call_operand.vmem [shape: f32[32,256], index: 7, kind: input, shape index: {}]   ;;  %s10483_s8 = inlined_call_operand.vmem [shape: f32[32,256], index: 8, kind: input, shape index: {}]   ;;  %s10484_s2 = inlined_call_operand.vmem [shape: s32[48,1], index: 2, kind: input, shape index: {}]   ;;  %s10485_s0 = inlined_call_operand.vmem [shape: f32[16,32], index: 0, kind: input, shape index: {}]   ;;  %s10486_s3 = inlined_call_operand.vmem [shape: s32[48,1], index: 3, kind: input, shape index: {}]   ;;  %s10487_s4 = inlined_call_operand.vmem [shape: s32[1,48], index: 4, kind: input, shape index: {}]   ;;  %s10488_s9 = inlined_call_operand.vmem [shape: f32[32,256], index: 9, kind: input, shape index: {}]   ;;  %s10489_s6 = inlined_call_operand.vmem [shape: f32[1,32], index: 6, kind: input, shape index: {}]   ;;  %s10490_s12 = inlined_call_operand.vmem [shape: f32[3072,32], index: 12, kind: input, shape index: {}]   ;;  %s10491_s10 = inlined_call_operand.vmem [shape: f32[1,256], index: 10, kind: input, shape index: {}]   ;;  %s10492_s11 = inlined_call_operand.vmem [shape: f32[32,32], index: 11, kind: input, shape index: {}]   ;;  %s10493_s14 = inlined_call_operand.vmem [shape: f32[32,32], index: 14, kind: input, shape index: {}]   ;;  %s10494_s13 = inlined_call_operand.vmem [shape: f32[1,32], index: 13, kind: input, shape index: {}]   ;;  %s10495_s15 = inlined_call_operand.vmem [shape: f32[1,32], index: 15, kind: input, shape index: {}]   ;;  %s10496_s16 = inlined_call_operand.vmem [shape: f32[1,32], index: 16, kind: input, shape index: {}]   ;;  %s10497_s17 = inlined_call_operand.vmem [shape: f32[1,32], index: 17, kind: input, shape index: {}]   ;;  %s10498_s18 = inlined_call_operand.vmem [shape: f32[16,32], index: 18, kind: output, shape index: {}]  }
   0x1   :  { %11079 = sst [smem:[#allocation307_spill]] %s10480_s5  ;;  %5782 = vset.pattern.permute.xlu0 %v5808_v3  ;;  %5783 = vset.pattern.permute.xlu1 %v5808_v3  ;;  %v383_v18 = vld [vmem:[%s10483_s8 + $0x8] sm:$0xff]  ;;  %v385_v19 = vld [vmem:[%s10483_s8 + $0x18] sm:$0xff]  ;;  %v192_v24 = vld [vmem:[%s10484_s2] sm:$0xff]  ;;  %v190_v43 = vlaneseq  ;;  %vm868_vm3 = vcmask 392192  }
   0x2   :  { %11080 = sst [smem:[#allocation308_spill]] %s10481_s1  ;;  %s11082_s29 = sld [smem:[#allocation307_spill]]  ;;  %v5306_v25 = vpack.c.bf16 %v385_v19, %v383_v18  ;;  %v382_v26 = vld [vmem:[%s10483_s8] sm:$0xff]  ;;  %v384_v27 = vld [vmem:[%s10483_s8 + $0x10] sm:$0xff]  ;;  %v387_v29 = vld [vmem:[%s10483_s8 + $0x28] sm:$0xff]  ;;  %199 = vperm.xlu0 %5782, %v192_v24  }
   0x3   :  { %11081 = sst [smem:[#allocation309_spill]] %s10482_s7  ;;  %s11083_s20 = sld [smem:[#allocation308_spill]]  ;;  %v194_v28 = vld [vmem:[%s10484_s2 + $0x10] sm:$0xff]  ;;  %v389_v30 = vld [vmem:[%s10483_s8 + $0x38] sm:$0xff]  ;;  %v193_v31 = vld [vmem:[%s10484_s2 + $0x8] sm:$0xff]  ;;  %v5308_v34 = vpack.c.bf16 %v384_v27, %v382_v26  ;;  %v6020_v46 = vshrl.u32 %v190_v43, 7 }
   0x4   :  { %s11084_s7 = sld [smem:[#allocation309_spill]]  ;;  %205 = vperm.xlu1 %5783, %v194_v28   ;;  %v59_v33 = vld [vmem:[%s10485_s0] sm:$0xff]  ;;  %v195_v35 = vld [vmem:[%s10484_s2 + $0x18] sm:$0xff]  ;;  %v5310_v36 = vpack.c.bf16 %v389_v30, %v387_v29  ;;  %v388_v38 = vld [vmem:[%s10483_s8 + $0x30] sm:$0xff] }
   0x5   :  { %v386_v37 = vld [vmem:[%s10483_s8 + $0x20] sm:$0xff]  ;;  %v60_v40 = vld [vmem:[%s10485_s0 + $0x8] sm:$0xff]  ;;  %v236_v48 = vld [vmem:[%s10486_s3 + $0x10] sm:$0xff]  ;;  %v6042_v51 = vsub.s32 0, %v6020_v46  ;;  %v6054_v55 = vsub.s32 1, %v6020_v46  ;;  %v1159_v57 = vsub.s32 2, %v6020_v46 }
   0x6   :  { %202 = vperm.xlu0 %5782, %v193_v31   ;;  %v196_v39 = vld [vmem:[%s10484_s2 + $0x20] sm:$0xff]  ;;  %v5312_v41 = vpack.c.bf16 %v388_v38, %v386_v37  ;;  %v197_v42 = vld [vmem:[%s10484_s2 + $0x28] sm:$0xff]  ;;  %v237_v49 = vld [vmem:[%s10486_s3 + $0x18] sm:$0xff]  ;;  %v1186_v59 = vsub.s32 3, %v6020_v46  ;;  %v1213_v61 = vsub.s32 4, %v6020_v46  ;;  %v1240_v63 = vsub.s32 5, %v6020_v46 }
   0x7   :  { %v234_v44 = vld [vmem:[%s10486_s3] sm:$0xff]  ;;  %v235_v45 = vld [vmem:[%s10486_s3 + $0x8] sm:$0xff]  ;;  %11085 = vst [vmem:[#allocation2_spill] sm:$0xff] %v6042_v51  ;;  %11087 = vst [vmem:[#allocation4_spill] sm:$0xff] %v6054_v55 }
   0x8   :  { %v67_v0 = vld [vmem:[%s11082_s29] sm:$0xff]  ;;  %v68_v1 = vld [vmem:[%s11082_s29 + $0x8] sm:$0xff]  ;;  %208 = vperm.xlu1 %5783, %v195_v35  }
   0x9   :  { %v61_v2 = vld [vmem:[%s11083_s20] sm:$0xff]  ;;  %v5294_v4 = vpack.c.bf16 %v68_v1, %v67_v0  ;;  %v62_v12 = vld [vmem:[%s11083_s20 + $0x8] sm:$0xff]  ;;  %v63_v14 = vld [vmem:[%s11083_s20 + $0x10] sm:$0xff] }
   0xa   :  { %5263 = vmatprep.mubr.msk.f32.mxu0 %vm76_vm0, %v61_v2  ;;  %v291_v5 = vld [vmem:[%s11084_s7 + $0x8] sm:$0xff]  ;;  %v293_v6 = vld [vmem:[%s11084_s7 + $0x18] sm:$0xff]  ;;  %v290_v8 = vld [vmem:[%s11084_s7] sm:$0xff]  ;;  %211 = vperm.xlu0 %5782, %v196_v39   ;;  %v1267_v2 = vsub.s32 6, %v6020_v46 }
   0xb   :  { %v5298_v7 = vpack.c.bf16 %v293_v6, %v291_v5  ;;  %v292_v9 = vld [vmem:[%s11084_s7 + $0x10] sm:$0xff]  ;;  %5295 = vmatprep.subr.bf16.mxu0 %v5294_v4  ;;  %v295_v10 = vld [vmem:[%s11084_s7 + $0x28] sm:$0xff]  ;;  %v297_v11 = vld [vmem:[%s11084_s7 + $0x38] sm:$0xff]  ;;  %5754 = vmatprep.subr.bf16.mxu1 %v5294_v4 }
   0xc   :  { %5297 = vmatpush3.bf16.msra.mxu0 %v5294_v4  ;;  %v5300_v13 = vpack.c.bf16 %v292_v9, %v290_v8  ;;  %5755 = vmatpush3.bf16.msra.mxu1 %v5294_v4  ;;  %v5302_v15 = vpack.c.bf16 %v297_v11, %v295_v10  ;;  %v294_v16 = vld [vmem:[%s11084_s7 + $0x20] sm:$0xff]  ;;  %v296_v17 = vld [vmem:[%s11084_s7 + $0x30] sm:$0xff]  ;;  %v64_v20 = vld [vmem:[%s11083_s20 + $0x18] sm:$0xff]  ;;  %v1294_v4 = vsub.s32 7, %v6020_v46  ;;  %v278_v9 = vadd.s32 8, %v6020_v46 }
   0xd   :  { %5299 = vmatprep.subr.bf16.mxu0 %v5298_v7  ;;  %v5304_v21 = vpack.c.bf16 %v296_v17, %v294_v16  ;;  %v65_v22 = vld [vmem:[%s11083_s20 + $0x20] sm:$0xff]  ;;  %v66_v23 = vld [vmem:[%s11083_s20 + $0x28] sm:$0xff]  ;;  %214 = vperm.xlu1 %5783, %v197_v42  }
   0xe   :  { %5269 = vmatprep.mubr.msk.f32.mxu1 %vm76_vm0, %v65_v22  ;;  %241 = vperm.xlu0 %5782, %v234_v44   ;;  %v6025_v47 = vld [vmem:[%s10487_s4] ss:$0 sm:$0xff]  ;;  %v239_v52 = vld [vmem:[%s10486_s3 + $0x28] sm:$0xff] }
   0xf   :  { %5264 = vmatmul.mubr.msk.f32.vlgmr.msra.gmra.mrb[0].mxu0 %vm76_vm0, %v62_v12  ;;  %5270 = vmatmul.mubr.msk.f32.vlgmr.msra.gmra.mrb[0].mxu1 %vm76_vm0, %v66_v23  ;;  %vm284_vm2 = vcmp.eq.s32.totalorder %v6025_v47, %v6020_v46  ;;  %v238_v50 = vld [vmem:[%s10486_s3 + $0x20] sm:$0xff]  ;;  %vm285_vm4 = vcmp.eq.s32.totalorder %v6025_v47, %v278_v9 }
  0x10   :  { %5301 = vmatpush1.bf16.msra.mxu0 %v5300_v13  ;;  %5266 = vmatprep.mubr.msk.f32.mxu0 %vm76_vm0, %v63_v14  ;;  %v6048_v53 = vsel %vm284_vm2, 1.0, %v10502_v32  ;;  %v6095_v11 = vsel %vm285_vm4, 1.0, %v10502_v32  ;;  %vm3047_vm4 = vcmask 1042434  }
  0x11   :  { %5303 = vmatprep.subr.bf16.mxu0 %v5302_v15  ;;  %549 = vmatprep.mubr.f32.mxu1 %v10502_v32  ;;  %11086 = vst [vmem:[#allocation3_spill] sm:$0xff] %v6048_v53  ;;  %v1106_v54 = vrot.slane %v6048_v53, %v6042_v51  ;;  %v1133_v56 = vrot.slane %v6048_v53, %v6054_v55  ;;  %v1041_v1 = vsel %vm868_vm3, %v6048_v53, 0.0  ;;  %11088 = vst [vmem:[#allocation5_spill] sm:$0xff] %v6095_v11 }
  0x12   :  { %244 = vperm.xlu1 %5783, %v235_v45   ;;  %247 = vperm.xlu0 %5782, %v236_v48   ;;  %v1160_v58 = vrot.slane %v6048_v53, %v1159_v57  ;;  %v1187_v60 = vrot.slane %v6048_v53, %v1186_v59  ;;  %v1214_v62 = vrot.slane %v6048_v53, %v1213_v61  ;;  %v1044_v31 = vsel %vm868_vm3, %v6095_v11, 0.0 }
  0x13   :  { %5267 = vmatmul.mubr.msk.f32.gmra.mrb[2].mxu0 %vm76_vm0, %v64_v20  ;;  %v1241_v0 = vrot.slane %v6048_v53, %v1240_v63  ;;  %v1268_v3 = vrot.slane %v6048_v53, %v1267_v2  ;;  %v1295_v5 = vrot.slane %v6048_v53, %v1294_v4  ;;  %v6099_v12 = vrot.slane %v6095_v11, %v6042_v51  ;;  %v3253_v53 = vld [vmem:[%s10490_s12 + $0x188] sm:$0xff] }
  0x14   :  { %5305 = vmatpush1.bf16.msra.mxu0 %v5304_v21  ;;  %369 = vmatprep.mubr.f32.mxu0 %v10502_v32  ;;  %v6106_v14 = vrot.slane %v6095_v11, %v6054_v55  ;;  %v6114_v16 = vrot.slane %v6095_v11, %v1159_v57  ;;  %v6126_v19 = vrot.slane %v6095_v11, %v1186_v59 }
  0x15   :  { %5307 = vmatprep.subr.bf16.mxu0 %v5306_v25  ;;  %v6135_v21 = vrot.slane %v6095_v11, %v1213_v61  ;;  %v6163_v29 = vrot.slane %v6095_v11, %v1240_v63  ;;  %v6184_v37 = vrot.slane %v6095_v11, %v1267_v2  ;;  %v6202_v47 = vrot.slane %v6095_v11, %v1294_v4  ;;  %v706_v63 = vld [vmem:[%s10488_s9 + $0x8] sm:$0xff]  ;;  %v3252_v11 = vld [vmem:[%s10490_s12 + $0x180] sm:$0xff] }
  0x16   :  { %250 = vperm.xlu1 %5783, %v237_v49   ;;  %253 = vperm.xlu0 %5782, %v238_v50   ;;  %v5386_v51 = vpack.c.bf16 %v3253_v53, %v3252_v11  ;;  %v3238_v11 = vld [vmem:[%s10490_s12 + $0x110] sm:$0xff] }
  0x17   :  { %4741 = vmatmul.mubr.msk.f32.vlgmr.msra.gmra.mrb[4].mxu0 %vm298_vm1, %v59_v33 }
  0x18   :  { %5309 = vmatpush1.bf16.msra.mxu0 %v5308_v34  ;;  %375 = vmatprep.mubr.f32.mxu0 %v10502_v32 }
  0x19   :  { %5311 = vmatprep.subr.bf16.mxu0 %v5310_v36 }
  0x1a   :  { %256 = vperm.xlu1 %5783, %v239_v52   ;;  %1108 = vbcast.lane.b32.xlu0 %v1106_v54, 256 }
  0x1b   :  { %4742 = vmatmul.mubr.msk.f32.gmra.mrb[6].mxu0 %vm298_vm1, %v60_v40 }
  0x1c   :  { %5313 = vmatpush1.bf16.msra.mxu0 %v5312_v41  ;;  %454 = vmatprep.mubr.f32.mxu0 %v10502_v32 }
  0x1e   :  { %1112 = vbcast.lane.b32.xlu1 %v1106_v54, 264  ;;  %1135 = vbcast.lane.b32.xlu0 %v1133_v56, 256 }
  0x1f   :  { %4743 = vmatmul.mubr.msk.f32.vlgmr.msra.gmra.mrb[8].mxu0 %vm298_vm1, %v59_v33 }
  0x20   :  { %460 = vmatprep.mubr.f32.mxu0 %v10502_v32 }
  0x22   :  { %1139 = vbcast.lane.b32.xlu1 %v1133_v56, 264  ;;  %1162 = vbcast.lane.b32.xlu0 %v1160_v58, 256 }
  0x23   :  { %4744 = vmatmul.mubr.msk.f32.gmra.mrb[10].mxu0 %vm298_vm1, %v60_v40 }
  0x24   :  { %939 = vmatprep.mubr.f32.mxu0 %v10502_v32 }
  0x26   :  { %1166 = vbcast.lane.b32.xlu1 %v1160_v58, 264  ;;  %1116 = vbcast.lane.b32.xlu0 %v1106_v54, 272 }
  0x2a   :  { %1143 = vbcast.lane.b32.xlu1 %v1133_v56, 272  ;;  %1189 = vbcast.lane.b32.xlu0 %v1187_v60, 256 }
  0x2e   :  { %1193 = vbcast.lane.b32.xlu1 %v1187_v60, 264  ;;  %1170 = vbcast.lane.b32.xlu0 %v1160_v58, 272 }
  0x32   :  { %1216 = vbcast.lane.b32.xlu1 %v1214_v62, 256  ;;  %1220 = vbcast.lane.b32.xlu0 %v1214_v62, 264 }
  0x36   :  { %1120 = vbcast.lane.b32.xlu0 %v1106_v54, 280 }
  0x3a   :  { %1147 = vbcast.lane.b32.xlu0 %v1133_v56, 280 }
  0x3e   :  { %1197 = vbcast.lane.b32.xlu0 %v1187_v60, 272 }
  0x42   :  { %1243 = vbcast.lane.b32.xlu0 %v1241_v0, 256 }
  0x46   :  { %1247 = vbcast.lane.b32.xlu0 %v1241_v0, 264 }
  0x4a   :  { %1174 = vbcast.lane.b32.xlu0 %v1160_v58, 280 }
  0x4e   :  { %1224 = vbcast.lane.b32.xlu0 %v1214_v62, 272 }
  0x52   :  { %1270 = vbcast.lane.b32.xlu0 %v1268_v3, 256 }
  0x56   :  { %1042 = vadd.xlane.f32.xlu1 %v1041_v1  ;;  %1274 = vbcast.lane.b32.xlu0 %v1268_v3, 264 }
  0x5a   :  { %1151 = vbcast.lane.b32.xlu0 %v1133_v56, 288 }
  0x5e   :  { %1201 = vbcast.lane.b32.xlu0 %v1187_v60, 280 }
  0x62   :  { %1251 = vbcast.lane.b32.xlu0 %v1241_v0, 272 }
  0x66   :  { %1297 = vbcast.lane.b32.xlu0 %v1295_v5, 256 }
  0x67   :  { %1124 = vbcast.lane.b32.xlu1 %v1106_v54, 288 }
  0x6a   :  { %1178 = vbcast.lane.b32.xlu0 %v1160_v58, 288 }
  0x6b   :  { %1301 = vbcast.lane.b32.xlu1 %v1295_v5, 264 }
  0x6e   :  { %1278 = vbcast.lane.b32.xlu0 %v1268_v3, 272 }
  0x6f   :  { %1228 = vbcast.lane.b32.xlu1 %v1214_v62, 280 }
  0x72   :  { %1155 = vbcast.lane.b32.xlu0 %v1133_v56, 296 }
  0x73   :  { %1128 = vbcast.lane.b32.xlu1 %v1106_v54, 296 }
  0x76   :  { %1255 = vbcast.lane.b32.xlu0 %v1241_v0, 280 }
  0x77   :  { %1205 = vbcast.lane.b32.xlu1 %v1187_v60, 288 }
  0x7a   :  { %1182 = vbcast.lane.b32.xlu0 %v1160_v58, 296  ;;  %v6210_v58 = vand.u32 127, %v190_v43  ;;  %v708_v43 = vld [vmem:[%s10488_s9 + $0x18] sm:$0xff] }
  0x7b   :  { %1305 = vbcast.lane.b32.xlu1 %v1295_v5, 272  ;;  %v5322_v2 = vpack.c.bf16 %v708_v43, %v706_v63 }
  0x7e   :  { %1282 = vbcast.lane.b32.xlu0 %v1268_v3, 280 }
  0x7f   :  { %1232 = vbcast.lane.b32.xlu1 %v1214_v62, 288 }
  0x81   :  { %v6084_v6 = vpop.permute.xlu0 %199 }
  0x82   :  { %1259 = vbcast.lane.b32.xlu0 %v1241_v0, 288  ;;  %vm216_vm5 = vcmp.eq.s32.totalorder %v6084_v6, %v6210_v58 }
  0x83   :  { %1209 = vbcast.lane.b32.xlu1 %v1187_v60, 296 }
  0x85   :  { %v6086_v7 = vpop.permute.xlu0 %202 }
  0x86   :  { %1236 = vbcast.lane.b32.xlu0 %v1214_v62, 296  ;;  %vm217_vm6 = vcmp.eq.s32.totalorder %v6086_v7, %v6210_v58 }
  0x87   :  { %1309 = vbcast.lane.b32.xlu1 %v1295_v5, 280  ;;  %v4727_v4 = vsel %vm217_vm6, 1.0, %v10502_v32  ;;  %vm3053_vm6 = vcmask 1045509  }
  0x89   :  { %v6088_v8 = vpop.permute.xlu0 %211 }
  0x8a   :  { %1263 = vbcast.lane.b32.xlu0 %v1241_v0, 296  ;;  %v4726_v0 = vsel %vm216_vm5, 1.0, %v10502_v32  ;;  %vm220_vm9 = vcmp.eq.s32.totalorder %v6088_v8, %v6210_v58  ;;  %v705_v8 = vld [vmem:[%s10488_s9] sm:$0xff]  ;;  %vm3051_vm5 = vcmask 1044484  }
  0x8b   :  { %1286 = vbcast.lane.b32.xlu1 %v1268_v3, 288 }
  0x8d   :  { %v6092_v10 = vpop.permute.xlu0 %241 }
  0x8e   :  { %1290 = vbcast.lane.b32.xlu0 %v1268_v3, 296  ;;  %v206_v3 = vpop.permute.xlu1 %205  ;;  %vm258_vm11 = vcmp.eq.s32.totalorder %v6092_v10, %v6210_v58 }
  0x8f   :  { %1313 = vbcast.lane.b32.xlu1 %v1295_v5, 288  ;;  %vm218_vm7 = vcmp.eq.s32.totalorder %v206_v3, %v6210_v58  ;;  %v4732_v10 = vsel %vm258_vm11, 1.0, %v10502_v32 }
  0x90   :  { %v4728_v6 = vsel %vm218_vm7, 1.0, %v10502_v32  ;;  %vm3055_vm7 = vcmask 1046534  }
  0x91   :  { %v6101_v13 = vpop.permute.xlu0 %247 }
  0x92   :  { %1324 = vbcast.lane.b32.xlu0 %v6099_v12, 256  ;;  %v209_v7 = vpop.permute.xlu1 %208  ;;  %vm260_vm13 = vcmp.eq.s32.totalorder %v6101_v13, %v6210_v58 }
  0x93   :  { %1317 = vbcast.lane.b32.xlu1 %v1295_v5, 296  ;;  %vm219_vm8 = vcmp.eq.s32.totalorder %v209_v7, %v6210_v58  ;;  %v4734_v43 = vsel %vm260_vm13, 1.0, %v10502_v32 }
  0x95   :  { %v6108_v15 = vpop.permute.xlu0 %253 }
  0x96   :  { %1351 = vbcast.lane.b32.xlu0 %v6106_v14, 256  ;;  %vm262_vm15 = vcmp.eq.s32.totalorder %v6108_v15, %v6210_v58  ;;  %v4719_v15 = vld [vmem:[%s10489_s6] ss:$0 sm:$0xff] }
  0x97   :  { %1328 = vbcast.lane.b32.xlu1 %v6099_v12, 264 }
  0x99   :  { %v6116_v17 = vpop.permute.xlu0 %1108 }
  0x9a   :  { %11089 = vst [vmem:[#allocation6_spill] sm:$0xff] %v6116_v17  ;;  %1378 = vbcast.lane.b32.xlu0 %v6114_v16, 256 }
  0x9b   :  { %1355 = vbcast.lane.b32.xlu1 %v6106_v14, 264 }
  0x9d   :  { %v6119_v18 = vpop.permute.xlu0 %1135 }
  0x9e   :  { %11090 = vst [vmem:[#allocation7_spill] sm:$0xff] %v6119_v18  ;;  %1332 = vbcast.lane.b32.xlu0 %v6099_v12, 272 }
  0x9f   :  { %1382 = vbcast.lane.b32.xlu1 %v6114_v16, 264 }
  0xa1   :  { %v6128_v20 = vpop.permute.xlu0 %1162 }
  0xa2   :  { %11091 = vst [vmem:[#allocation8_spill] sm:$0xff] %v6128_v20  ;;  %1405 = vbcast.lane.b32.xlu0 %v6126_v19, 256 }
  0xa3   :  { %1359 = vbcast.lane.b32.xlu1 %v6106_v14, 272 }
  0xa5   :  { %v6137_v22 = vpop.permute.xlu0 %1116 }
  0xa6   :  { %11092 = vst [vmem:[#allocation9_spill] sm:$0xff] %v6137_v22  ;;  %1386 = vbcast.lane.b32.xlu0 %v6114_v16, 272 }
  0xa7   :  { %1409 = vbcast.lane.b32.xlu1 %v6126_v19, 264 }
  0xa9   :  { %v6141_v23 = vpop.permute.xlu0 %1189 }
  0xaa   :  { %11093 = vst [vmem:[#allocation10_spill] sm:$0xff] %v6141_v23  ;;  %1436 = vbcast.lane.b32.xlu0 %v6135_v21, 264 }
  0xab   :  { %1432 = vbcast.lane.b32.xlu1 %v6135_v21, 256 }
  0xad   :  { %v6144_v24 = vpop.permute.xlu0 %1170 }
  0xae   :  { %11094 = vst [vmem:[#allocation11_spill] sm:$0xff] %v6144_v24  ;;  %1336 = vbcast.lane.b32.xlu0 %v6099_v12, 280 }
  0xb1   :  { %v6147_v25 = vpop.permute.xlu0 %1220 }
  0xb2   :  { %11095 = vst [vmem:[#allocation12_spill] sm:$0xff] %v6147_v25  ;;  %1363 = vbcast.lane.b32.xlu0 %v6106_v14, 280 }
  0xb5   :  { %v6150_v26 = vpop.permute.xlu0 %1120 }
  0xb6   :  { %11096 = vst [vmem:[#allocation13_spill] sm:$0xff] %v6150_v26  ;;  %1413 = vbcast.lane.b32.xlu0 %v6126_v19, 272 }
  0xb9   :  { %v6153_v27 = vpop.permute.xlu0 %1147 }
  0xba   :  { %11097 = vst [vmem:[#allocation14_spill] sm:$0xff] %v6153_v27  ;;  %1459 = vbcast.lane.b32.xlu0 %v6163_v29, 256 }
  0xbd   :  { %v6157_v28 = vpop.permute.xlu0 %1197 }
  0xbe   :  { %11098 = vst [vmem:[#allocation15_spill] sm:$0xff] %v6157_v28  ;;  %1463 = vbcast.lane.b32.xlu0 %v6163_v29, 264 }
  0xc1   :  { %v6165_v30 = vpop.permute.xlu0 %1243 }
  0xc2   :  { %11099 = vst [vmem:[#allocation16_spill] sm:$0xff] %v6165_v30  ;;  %1390 = vbcast.lane.b32.xlu0 %v6114_v16, 280 }
  0xc5   :  { %v6171_v33 = vpop.permute.xlu0 %1247 }
  0xc6   :  { %11100 = vst [vmem:[#allocation17_spill] sm:$0xff] %v6171_v33  ;;  %1440 = vbcast.lane.b32.xlu0 %v6135_v21, 272 }
  0xc9   :  { %v6178_v36 = vpop.permute.xlu0 %1174 }
  0xca   :  { %11101 = vst [vmem:[#allocation18_spill] sm:$0xff] %v6178_v36  ;;  %1486 = vbcast.lane.b32.xlu0 %v6184_v37, 256 }
  0xcd   :  { %v6195_v42 = vpop.permute.xlu0 %1224 }
  0xce   :  { %11102 = vst [vmem:[#allocation19_spill] sm:$0xff] %v6195_v42  ;;  %1490 = vbcast.lane.b32.xlu0 %v6184_v37, 264 }
  0xcf   :  { %1045 = vadd.xlane.f32.xlu1 %v1044_v31  ;;  %v4730_v31 = vsel %vm220_vm9, 1.0, %v10502_v32 }
  0xd1   :  { %v6204_v52 = vpop.permute.xlu0 %1270 }
  0xd2   :  { %11103 = vst [vmem:[#allocation20_spill] sm:$0xff] %v6204_v52  ;;  %1367 = vbcast.lane.b32.xlu0 %v6106_v14, 288 }
  0xd5   :  { %v6212_v46 = vpop.permute.xlu0 %1274 }
  0xd6   :  { %1417 = vbcast.lane.b32.xlu0 %v6126_v19, 280  ;;  %11104 = vst [vmem:[#allocation21_spill] sm:$0xff] %v6212_v46 }
  0xd9   :  { %v6226_v1 = vpop.permute.xlu0 %1151 }
  0xda   :  { %1467 = vbcast.lane.b32.xlu0 %v6163_v29, 272  ;;  %11105 = vst [vmem:[#allocation22_spill] sm:$0xff] %v6226_v1 }
  0xdd   :  { %v6237_v5 = vpop.permute.xlu0 %1201 }
  0xde   :  { %1513 = vbcast.lane.b32.xlu0 %v6202_v47, 256  ;;  %11106 = vst [vmem:[#allocation23_spill] sm:$0xff] %v6237_v5 }
  0xe0   :  { %1340 = vbcast.lane.b32.xlu1 %v6099_v12, 288 }
  0xe1   :  { %v6248_v9 = vpop.permute.xlu0 %1251 }
  0xe2   :  { %v6174_v34 = vpop.f32.mrb[0].mxu0  ;;  %v6186_v38 = vpop.f32.mrb[0].mxu1  ;;  %1394 = vbcast.lane.b32.xlu0 %v6114_v16, 288  ;;  %11107 = vst [vmem:[#allocation24_spill] sm:$0xff] %v6248_v9 }
  0xe3   :  { %v6176_v35 = vpop.f32.mrb[1].mxu0  ;;  %v6190_v40 = vpop.f32.mrb[1].mxu1 }
  0xe4   :  { %1517 = vbcast.lane.b32.xlu1 %v6202_v47, 264 }
  0xe6   :  { %v6188_v39 = vpop.f32.mrb[2].mxu0  ;;  %1494 = vbcast.lane.b32.xlu0 %v6184_v37, 272 }
  0xe7   :  { %v6192_v41 = vpop.f32.mrb[3].mxu0 }
  0xe8   :  { %1444 = vbcast.lane.b32.xlu1 %v6135_v21, 280 }
  0xea   :  { %v371_v44 = vpop.f32.mrb[4].mxu0  ;;  %1371 = vbcast.lane.b32.xlu0 %v6106_v14, 296  ;;  %v707_v14 = vld [vmem:[%s10488_s9 + $0x10] sm:$0xff] }
  0xeb   :  { %v373_v45 = vpop.f32.mrb[5].mxu0 }
  0xec   :  { %1344 = vbcast.lane.b32.xlu1 %v6099_v12, 296  ;;  %v4729_v12 = vsel %vm219_vm8, 1.0, %v10502_v32  ;;  %vm3057_vm8 = vcmask 1047559  }
  0xee   :  { %v377_v48 = vpop.f32.mrb[6].mxu0  ;;  %1471 = vbcast.lane.b32.xlu0 %v6163_v29, 280 }
  0xef   :  { %v5320_v49 = vpack.c.bf16 %v377_v48, %v371_v44  ;;  %v379_v50 = vpop.f32.mrb[7].mxu0  ;;  %v215_v44 = vpop.permute.xlu1 %214  ;;  %v710_v48 = vld [vmem:[%s10488_s9 + $0x28] sm:$0xff] }
  0xf0   :  { %v5318_v54 = vpack.c.bf16 %v379_v50, %v373_v45  ;;  %1421 = vbcast.lane.b32.xlu1 %v6126_v19, 288  ;;  %v6259_v45 = vpop.permute.xlu0 %1297  ;;  %vm221_vm10 = vcmp.eq.s32.totalorder %v215_v44, %v6210_v58 }
  0xf1   :  { %11108 = vst [vmem:[#allocation25_spill] sm:$0xff] %v6259_v45 }
  0xf2   :  { %v456_v56 = vpop.f32.mrb[8].mxu0  ;;  %1398 = vbcast.lane.b32.xlu0 %v6114_v16, 296  ;;  %v5324_v16 = vpack.c.bf16 %v707_v14, %v705_v8  ;;  %v182_v8 = vadd.f32 %v4719_v15, %v6190_v40 }
  0xf3   :  { %v458_v57 = vpop.f32.mrb[9].mxu0 }
  0xf4   :  { %1521 = vbcast.lane.b32.xlu1 %v6202_v47, 272  ;;  %v6284_v50 = vpop.permute.xlu0 %1178 }
  0xf5   :  { %11109 = vst [vmem:[#allocation26_spill] sm:$0xff] %v6284_v50 }
  0xf6   :  { %v462_v59 = vpop.f32.mrb[10].mxu0  ;;  %1498 = vbcast.lane.b32.xlu0 %v6184_v37, 280 }
  0xf7   :  { %v5316_v60 = vpack.c.bf16 %v462_v59, %v456_v56  ;;  %v464_v61 = vpop.f32.mrb[11].mxu0  ;;  %v711_v59 = vld [vmem:[%s10488_s9 + $0x30] sm:$0xff] }
  0xf8   :  { %v5314_v62 = vpack.c.bf16 %v464_v61, %v458_v57  ;;  %1448 = vbcast.lane.b32.xlu1 %v6135_v21, 288  ;;  %v709_v57 = vld [vmem:[%s10488_s9 + $0x20] sm:$0xff] }
  0xfa   :  { %5315 = vmatprep.subr.bf16.mxu1 %v5314_v62  ;;  %1475 = vbcast.lane.b32.xlu0 %v6163_v29, 288  ;;  %v6300_v62 = vpop.permute.xlu0 %1278 }
  0xfb   :  { %5317 = vmatpush1.bf16.msra.mxu1 %v5316_v60  ;;  %v5328_v60 = vpack.c.bf16 %v711_v59, %v709_v57  ;;  %11110 = vst [vmem:[#allocation27_spill] sm:$0xff] %v6300_v62 }
  0xfc   :  { %5319 = vmatprep.subr.bf16.mxu1 %v5318_v54  ;;  %1425 = vbcast.lane.b32.xlu1 %v6126_v19, 296  ;;  %v4731_v19 = vsel %vm221_vm10, 1.0, %v10502_v32  ;;  %v245_v54 = vpop.permute.xlu1 %244 }
  0xfd   :  { %vm259_vm12 = vcmp.eq.s32.totalorder %v245_v54, %v6210_v58 }
  0xfe   :  { %4745 = vmatmul.mubr.msk.f32.vlgmr.msra.gmra.mrb[2].mxu1 %vm76_vm0, %v4726_v0  ;;  %v4733_v61 = vsel %vm259_vm12, 1.0, %v10502_v32  ;;  %1452 = vbcast.lane.b32.xlu0 %v6135_v21, 296 }
  0xff   :  { %5321 = vmatpush1.bf16.msra.mxu1 %v5320_v49  ;;  %555 = vmatprep.mubr.f32.mxu1 %v10502_v32  ;;  %v712_v49 = vld [vmem:[%s10488_s9 + $0x38] sm:$0xff] }
 0x100   :  { %5323 = vmatprep.subr.bf16.mxu1 %v5322_v2  ;;  %1525 = vbcast.lane.b32.xlu1 %v6202_v47, 280  ;;  %v5326_v56 = vpack.c.bf16 %v712_v49, %v710_v48  ;;  %v251_v63 = vpop.permute.xlu1 %250  ;;  %v4736_v2 = vsel %vm262_vm15, 1.0, %v10502_v32 }
 0x101   :  { %vm261_vm14 = vcmp.eq.s32.totalorder %v251_v63, %v6210_v58 }
 0x102   :  { %4746 = vmatmul.mubr.msk.f32.gmra.mrb[4].mxu1 %vm76_vm0, %v4727_v4  ;;  %1479 = vbcast.lane.b32.xlu0 %v6163_v29, 296  ;;  %v4735_v13 = vsel %vm261_vm14, 1.0, %v10502_v32 }
 0x103   :  { %561 = vmatprep.mubr.f32.mxu1 %v10502_v32 }
 0x104   :  { %1502 = vbcast.lane.b32.xlu1 %v6184_v37, 288  ;;  %v257_v0 = vpop.permute.xlu1 %256 }
 0x105   :  { %vm263_vm2 = vcmp.eq.s32.totalorder %v257_v0, %v6210_v58  ;;  %v162_v58 = vadd.f32 %v4719_v15, %v6176_v35 }
 0x106   :  { %4747 = vmatmul.mubr.msk.f32.gmra.mrb[6].mxu1 %vm76_vm0, %v4728_v6  ;;  %1506 = vbcast.lane.b32.xlu0 %v6184_v37, 296  ;;  %v4737_v29 = vsel %vm263_vm2, 1.0, %v10502_v32  ;;  %v167_v6 = vadd.f32 %v6174_v34, %v4719_v15  ;;  %v177_v34 = vadd.f32 %v6188_v39, %v4719_v15 }
 0x107   :  { %567 = vmatprep.mubr.f32.mxu1 %v10502_v32 }
 0x108   :  { %1529 = vbcast.lane.b32.xlu1 %v6202_v47, 288  ;;  %v6320_v21 = vpop.permute.xlu1 %1112 }
 0x109   :  { %11112 = vst [vmem:[#allocation29_spill] sm:$0xff] %v6320_v21 }
 0x10a   :  { %4748 = vmatmul.mubr.msk.f32.gmra.mrb[8].mxu1 %vm76_vm0, %v4729_v12 }
 0x10b   :  { %573 = vmatprep.mubr.f32.mxu1 %v10502_v32 }
 0x10c   :  { %1533 = vbcast.lane.b32.xlu1 %v6202_v47, 296  ;;  %v6312_v47 = vpop.permute.xlu0 %1155  ;;  %v6334_v4 = vpop.permute.xlu1 %1139 }
 0x10d   :  { %11111 = vst [vmem:[#allocation28_spill] sm:$0xff] %v6312_v47  ;;  %11114 = vst [vmem:[#allocation31_spill] sm:$0xff] %v6334_v4 }
 0x10e   :  { %4749 = vmatmul.mubr.msk.f32.gmra.mrb[10].mxu1 %vm76_vm0, %v4730_v31  ;;  %v172_v31 = vadd.f32 %v4719_v15, %v6192_v41  ;;  %v187_v41 = vadd.f32 %v6186_v38, %v4719_v15 }
 0x10f   :  { %579 = vmatprep.mubr.f32.mxu1 %v10502_v32 }
 0x110   :  { %v6324_v3 = vpop.permute.xlu0 %1255  ;;  %v6343_v7 = vpop.permute.xlu1 %1166 }
 0x111   :  { %11113 = vst [vmem:[#allocation30_spill] sm:$0xff] %v6324_v3  ;;  %11116 = vst [vmem:[#allocation33_spill] sm:$0xff] %v6343_v7 }
 0x112   :  { %4750 = vmatmul.mubr.msk.f32.gmra.mrb[12].mxu1 %vm76_vm0, %v4731_v19 }
 0x113   :  { %668 = vmatprep.mubr.f32.mxu1 %v10502_v32 }
 0x114   :  { %v6337_v37 = vpop.permute.xlu0 %1182  ;;  %v6351_v44 = vpop.permute.xlu1 %1143 }
 0x115   :  { %11115 = vst [vmem:[#allocation32_spill] sm:$0xff] %v6337_v37  ;;  %11118 = vst [vmem:[#allocation35_spill] sm:$0xff] %v6351_v44 }
 0x116   :  { %4751 = vmatmul.mubr.msk.f32.vlgmr.msra.gmra.mrb[2].mxu1 %vm76_vm0, %v4732_v10 }
 0x117   :  { %5325 = vmatpush1.bf16.msra.mxu1 %v5324_v16  ;;  %674 = vmatprep.mubr.f32.mxu1 %v10502_v32 }
 0x118   :  { %5327 = vmatprep.subr.bf16.mxu1 %v5326_v56  ;;  %v6345_v12 = vpop.permute.xlu0 %1282  ;;  %v6360_v14 = vpop.permute.xlu1 %1193 }
 0x119   :  { %11117 = vst [vmem:[#allocation34_spill] sm:$0xff] %v6345_v12  ;;  %11120 = vst [vmem:[#allocation37_spill] sm:$0xff] %v6360_v14 }
 0x11a   :  { %4752 = vmatmul.mubr.msk.f32.gmra.mrb[4].mxu1 %vm76_vm0, %v4733_v61 }
 0x11b   :  { %680 = vmatprep.mubr.f32.mxu1 %v10502_v32  ;;  %5329 = vmatpush1.bf16.msra.mxu1 %v5328_v60 }
 0x11c   :  { %v6354_v35 = vpop.permute.xlu0 %1259  ;;  %v6368_v48 = vpop.permute.xlu1 %1216  ;;  %5387 = vmatprep.subr.bf16.mxu1 %v5386_v51 }
 0x11d   :  { %11119 = vst [vmem:[#allocation36_spill] sm:$0xff] %v6354_v35  ;;  %11122 = vst [vmem:[#allocation39_spill] sm:$0xff] %v6368_v48 }
 0x11e   :  { %4753 = vmatmul.mubr.msk.f32.gmra.mrb[6].mxu1 %vm76_vm0, %v4734_v43 }
 0x11f   :  { %686 = vmatprep.mubr.f32.mxu1 %v10502_v32 }
 0x120   :  { %v6362_v19 = vpop.permute.xlu0 %1236  ;;  %v6372_v49 = vpop.xlane.xlu1 %1042 }
 0x121   :  { %11121 = vst [vmem:[#allocation38_spill] sm:$0xff] %v6362_v19  ;;  %11124 = vst [vmem:[#allocation41_spill] sm:$0xff] %v6372_v49 }
 0x122   :  { %4754 = vmatmul.mubr.msk.f32.gmra.mrb[8].mxu1 %vm76_vm0, %v4735_v13 }
 0x123   :  { %692 = vmatprep.mubr.f32.mxu1 %v10502_v32 }
 0x124   :  { %v6370_v39 = vpop.permute.xlu0 %1263  ;;  %v6376_v16 = vpop.permute.xlu1 %1124 }
 0x125   :  { %11123 = vst [vmem:[#allocation40_spill] sm:$0xff] %v6370_v39  ;;  %11126 = vst [vmem:[#allocation43_spill] sm:$0xff] %v6376_v16 }
 0x126   :  { %4755 = vmatmul.mubr.msk.f32.gmra.mrb[10].mxu1 %vm76_vm0, %v4736_v2 }
 0x127   :  { %698 = vmatprep.mubr.f32.mxu1 %v10502_v32 }
 0x128   :  { %v6374_v40 = vpop.permute.xlu0 %1290  ;;  %v6380_v56 = vpop.permute.xlu1 %1301 }
 0x129   :  { %11125 = vst [vmem:[#allocation42_spill] sm:$0xff] %v6374_v40  ;;  %11128 = vst [vmem:[#allocation45_spill] sm:$0xff] %v6380_v56 }
 0x12a   :  { %4756 = vmatmul.mubr.msk.f32.gmra.mrb[12].mxu1 %vm76_vm0, %v4737_v29  ;;  %vm3045_vm0 = vcmask 1041409  }
 0x12b   :  { %795 = vmatprep.mubr.f32.mxu1 %v10502_v32 }
 0x12c   :  { %v6378_v54 = vpop.permute.xlu0 %1324  ;;  %v6384_v59 = vpop.permute.xlu1 %1228 }
 0x12d   :  { %11127 = vst [vmem:[#allocation44_spill] sm:$0xff] %v6378_v54  ;;  %11130 = vst [vmem:[#allocation47_spill] sm:$0xff] %v6384_v59 }
 0x12e   :  { %4757 = vmatmul.mubr.msk.f32.vlgmr.msra.gmra.mrb[2].mxu1 %vm298_vm1, %v162_v58 }
 0x12f   :  { %801 = vmatprep.mubr.f32.mxu1 %v10502_v32 }
 0x130   :  { %v6382_v57 = vpop.permute.xlu0 %1351  ;;  %v6388_v10 = vpop.permute.xlu1 %1128 }
 0x131   :  { %11129 = vst [vmem:[#allocation46_spill] sm:$0xff] %v6382_v57  ;;  %11132 = vst [vmem:[#allocation49_spill] sm:$0xff] %v6388_v10 }
 0x132   :  { %4758 = vmatmul.mubr.msk.f32.gmra.mrb[4].mxu1 %vm298_vm1, %v167_v6 }
 0x133   :  { %807 = vmatprep.mubr.f32.mxu1 %v10502_v32 }
 0x134   :  { %v6386_v38 = vpop.permute.xlu0 %1378  ;;  %v6392_v61 = vpop.permute.xlu1 %1205 }
 0x135   :  { %11131 = vst [vmem:[#allocation48_spill] sm:$0xff] %v6386_v38  ;;  %11134 = vst [vmem:[#allocation51_spill] sm:$0xff] %v6392_v61 }
 0x136   :  { %4759 = vmatmul.mubr.msk.f32.gmra.mrb[6].mxu1 %vm298_vm1, %v172_v31 }
 0x137   :  { %813 = vmatprep.mubr.f32.mxu1 %v10502_v32 }
 0x138   :  { %v6390_v60 = vpop.permute.xlu0 %1332  ;;  %v6396_v43 = vpop.permute.xlu1 %1305 }
 0x139   :  { %11133 = vst [vmem:[#allocation50_spill] sm:$0xff] %v6390_v60  ;;  %11136 = vst [vmem:[#allocation53_spill] sm:$0xff] %v6396_v43  ;;  %v3246_v60 = vld [vmem:[%s10490_s12 + $0x150] sm:$0xff] }
 0x13a   :  { %4760 = vmatmul.mubr.msk.f32.gmra.mrb[8].mxu1 %vm298_vm1, %v177_v34 }
 0x13b   :  { %819 = vmatprep.mubr.f32.mxu1 %v10502_v32 }
 0x13c   :  { %v6394_v63 = vpop.permute.xlu0 %1405  ;;  %v6400_v13 = vpop.permute.xlu1 %1232 }
 0x13d   :  { %11135 = vst [vmem:[#allocation52_spill] sm:$0xff] %v6394_v63  ;;  %11138 = vst [vmem:[#allocation55_spill] sm:$0xff] %v6400_v13  ;;  %v3242_v63 = vld [vmem:[%s10490_s12 + $0x130] sm:$0xff] }
 0x13e   :  { %4761 = vmatmul.mubr.msk.f32.gmra.mrb[10].mxu1 %vm298_vm1, %v182_v8 }
 0x13f   :  { %825 = vmatprep.mubr.f32.mxu1 %v10502_v32 }
 0x140   :  { %v6398_v0 = vpop.permute.xlu0 %1386  ;;  %v6404_v15 = vpop.permute.xlu1 %1209 }
 0x141   :  { %11137 = vst [vmem:[#allocation54_spill] sm:$0xff] %v6398_v0  ;;  %11140 = vst [vmem:[#allocation57_spill] sm:$0xff] %v6404_v15  ;;  %v3240_v0 = vld [vmem:[%s10490_s12 + $0x120] sm:$0xff] }
 0x142   :  { %4762 = vmatmul.mubr.msk.f32.gmra.mrb[12].mxu1 %vm298_vm1, %v187_v41 }
 0x144   :  { %v6402_v2 = vpop.permute.xlu0 %1436  ;;  %v6408_v58 = vpop.permute.xlu1 %1309 }
 0x145   :  { %11139 = vst [vmem:[#allocation56_spill] sm:$0xff] %v6402_v2  ;;  %11142 = vst [vmem:[#allocation59_spill] sm:$0xff] %v6408_v58  ;;  %v3239_v2 = vld [vmem:[%s10490_s12 + $0x118] sm:$0xff] }
 0x146   :  { %v5392_v51 = vpack.c.bf16 %v3239_v2, %v3238_v11  ;;  %v3241_v2 = vld [vmem:[%s10490_s12 + $0x128] sm:$0xff] }
 0x147   :  { %v5396_v11 = vpack.c.bf16 %v3241_v2, %v3240_v0  ;;  %v3243_v0 = vld [vmem:[%s10490_s12 + $0x138] sm:$0xff]  ;;  %v3260_v2 = vld [vmem:[%s10490_s12 + $0x1c0] sm:$0xff] }
 0x148   :  { %v6406_v29 = vpop.permute.xlu0 %1336  ;;  %v6412_v31 = vpop.permute.xlu1 %1286 }
 0x149   :  { %11141 = vst [vmem:[#allocation58_spill] sm:$0xff] %v6406_v29  ;;  %11144 = vst [vmem:[#allocation61_spill] sm:$0xff] %v6412_v31  ;;  %v3254_v29 = vld [vmem:[%s10490_s12 + $0x190] sm:$0xff] }
 0x14c   :  { %v6410_v6 = vpop.permute.xlu0 %1363  ;;  %v6416_v8 = vpop.permute.xlu1 %1313 }
 0x14d   :  { %11143 = vst [vmem:[#allocation60_spill] sm:$0xff] %v6410_v6  ;;  %11146 = vst [vmem:[#allocation63_spill] sm:$0xff] %v6416_v8 }
 0x150   :  { %v6414_v34 = vpop.permute.xlu0 %1413  ;;  %v6420_v32 = vpop.permute.xlu1 %1317 }
 0x151   :  { %11145 = vst [vmem:[#allocation62_spill] sm:$0xff] %v6414_v34  ;;  %11148 = vst [vmem:[#allocation65_spill] sm:$0xff] %v6420_v32  ;;  %v3236_v34 = vld [vmem:[%s10490_s12 + $0x100] sm:$0xff] }
 0x154   :  { %v6418_v41 = vpop.permute.xlu0 %1459 }
 0x155   :  { %11147 = vst [vmem:[#allocation64_spill] sm:$0xff] %v6418_v41  ;;  %v3237_v41 = vld [vmem:[%s10490_s12 + $0x108] sm:$0xff] }
 0x156   :  { %v5388_v6 = vpack.c.bf16 %v3237_v41, %v3236_v34  ;;  %v6448_v34 = vpop.permute.xlu1 %1328  ;;  %v3256_v41 = vld [vmem:[%s10490_s12 + $0x1a0] sm:$0xff] }
 0x157   :  { %11150 = vst [vmem:[#allocation67_spill] sm:$0xff] %v6448_v34 }
 0x158   :  { %v6428_v55 = vpop.permute.xlu0 %1463  ;;  %5389 = vmatpush3.bf16.msra.mxu1 %v5388_v6 }
 0x159   :  { %11149 = vst [vmem:[#allocation66_spill] sm:$0xff] %v6428_v55  ;;  %v3255_v55 = vld [vmem:[%s10490_s12 + $0x198] sm:$0xff] }
 0x15a   :  { %v5390_v53 = vpack.c.bf16 %v3255_v55, %v3254_v29  ;;  %v3257_v55 = vld [vmem:[%s10490_s12 + $0x1a8] sm:$0xff] }
 0x15b   :  { %v5394_v29 = vpack.c.bf16 %v3257_v55, %v3256_v41  ;;  %v3259_v41 = vld [vmem:[%s10490_s12 + $0x1b8] sm:$0xff] }
 0x15c   :  { %v6450_v6 = vpop.permute.xlu0 %1390  ;;  %5391 = vmatprep.subr.bf16.mxu1 %v5390_v53  ;;  %v6464_v53 = vpop.permute.xlu1 %1355 }
 0x15d   :  { %11151 = vst [vmem:[#allocation68_spill] sm:$0xff] %v6450_v6  ;;  %5393 = vmatpush3.bf16.msra.mxu1 %v5392_v51  ;;  %11152 = vst [vmem:[#allocation69_spill] sm:$0xff] %v6464_v53  ;;  %v3258_v51 = vld [vmem:[%s10490_s12 + $0x1b0] sm:$0xff]  ;;  %v10535_v53 = vmax.f32 %v6372_v49, 1.0  ;;  %v1745_v49 = vsub.f32 1.0, %v6141_v23 }
 0x15e   :  { %5395 = vmatprep.subr.bf16.mxu1 %v5394_v29  ;;  %v5398_v6 = vpack.c.bf16 %v3259_v41, %v3258_v51  ;;  %v5400_v29 = vpack.c.bf16 %v3243_v0, %v3242_v63  ;;  %v3244_v41 = vld [vmem:[%s10490_s12 + $0x140] sm:$0xff] }
 0x160   :  { %v6472_v55 = vpop.permute.xlu0 %1440  ;;  %v6492_v63 = vpop.permute.xlu1 %1382 }
 0x161   :  { %5397 = vmatpush3.bf16.msra.mxu1 %v5396_v11  ;;  %11153 = vst [vmem:[#allocation70_spill] sm:$0xff] %v6472_v55  ;;  %v3261_v11 = vld [vmem:[%s10490_s12 + $0x1c8] sm:$0xff]  ;;  %11154 = vst [vmem:[#allocation71_spill] sm:$0xff] %v6492_v63  ;;  %v3248_v63 = vld [vmem:[%s10490_s12 + $0x160] sm:$0xff] }
 0x162   :  { %5399 = vmatprep.subr.bf16.mxu1 %v5398_v6  ;;  %v5402_v51 = vpack.c.bf16 %v3261_v11, %v3260_v2  ;;  %v3245_v55 = vld [vmem:[%s10490_s12 + $0x148] sm:$0xff]  ;;  %v3263_v2 = vld [vmem:[%s10490_s12 + $0x1d8] sm:$0xff] }
 0x163   :  { %v5404_v6 = vpack.c.bf16 %v3245_v55, %v3244_v41  ;;  %v3247_v55 = vld [vmem:[%s10490_s12 + $0x158] sm:$0xff] }
 0x164   :  { %v6494_v0 = vpop.permute.xlu0 %1486  ;;  %v5408_v41 = vpack.c.bf16 %v3247_v55, %v3246_v60  ;;  %v3249_v60 = vld [vmem:[%s10490_s12 + $0x168] sm:$0xff]  ;;  %v3266_v55 = vld [vmem:[%s10490_s12 + $0x1f0] sm:$0xff] }
 0x165   :  { %5401 = vmatpush3.bf16.msra.mxu1 %v5400_v29  ;;  %11155 = vst [vmem:[#allocation72_spill] sm:$0xff] %v6494_v0  ;;  %v3262_v29 = vld [vmem:[%s10490_s12 + $0x1d0] sm:$0xff] }
 0x166   :  { %5403 = vmatprep.subr.bf16.mxu1 %v5402_v51  ;;  %v5406_v11 = vpack.c.bf16 %v3263_v2, %v3262_v29  ;;  %v6508_v51 = vpop.permute.xlu1 %1359  ;;  %v3265_v29 = vld [vmem:[%s10490_s12 + $0x1e8] sm:$0xff] }
 0x167   :  { %11156 = vst [vmem:[#allocation73_spill] sm:$0xff] %v6508_v51 }
 0x168   :  { %v6516_v2 = vpop.permute.xlu0 %1490 }
 0x169   :  { %5405 = vmatpush3.bf16.msra.mxu1 %v5404_v6  ;;  %v3264_v6 = vld [vmem:[%s10490_s12 + $0x1e0] sm:$0xff]  ;;  %11157 = vst [vmem:[#allocation74_spill] sm:$0xff] %v6516_v2  ;;  %v3251_v2 = vld [vmem:[%s10490_s12 + $0x178] sm:$0xff] }
 0x16a   :  { %5407 = vmatprep.subr.bf16.mxu1 %v5406_v11  ;;  %v5410_v0 = vpack.c.bf16 %v3265_v29, %v3264_v6  ;;  %v5412_v11 = vpack.c.bf16 %v3249_v60, %v3248_v63  ;;  %v3250_v29 = vld [vmem:[%s10490_s12 + $0x170] sm:$0xff]  ;;  %v6536_v63 = vpop.permute.xlu1 %1409 }
 0x16b   :  { %11158 = vst [vmem:[#allocation75_spill] sm:$0xff] %v6536_v63 }
 0x16c   :  { %v6538_v60 = vpop.permute.xlu0 %1367 }
 0x16d   :  { %5409 = vmatpush3.bf16.msra.mxu1 %v5408_v41  ;;  %v3267_v41 = vld [vmem:[%s10490_s12 + $0x1f8] sm:$0xff]  ;;  %11159 = vst [vmem:[#allocation76_spill] sm:$0xff] %v6538_v60 }
 0x16e   :  { %5411 = vmatprep.subr.bf16.mxu1 %v5410_v0  ;;  %v5414_v6 = vpack.c.bf16 %v3267_v41, %v3266_v55  ;;  %v5416_v0 = vpack.c.bf16 %v3251_v2, %v3250_v29  ;;  %v3156_v2 = vadd.f32 1.0, %v10535_v53  ;;  %v1741_v53 = vsub.f32 1.0, %v6144_v24 }
 0x16f   :  { %v6583_v24 = vmul.f32 3e+38, %v1745_v49  ;;  %v1735_v49 = vsub.f32 1.0, %v6351_v44 }
 0x170   :  { %v6542_v51 = vpop.permute.xlu0 %1417  ;;  %5784 = vlog2.f32 %v3156_v2 }
 0x171   :  { %5413 = vmatpush3.bf16.msra.mxu1 %v5412_v11  ;;  %v6540_v11 = vpop.permute.xlu1 %1432  ;;  %11161 = vst [vmem:[#allocation78_spill] sm:$0xff] %v6542_v51  ;;  %11175 = vst [vmem:[#allocation92_spill] sm:$0xff] %v6583_v24  ;;  %v1758_v24 = vsub.f32 1.0, %v6171_v33 }
 0x172   :  { %5415 = vmatprep.subr.bf16.mxu1 %v5414_v6  ;;  %11160 = vst [vmem:[#allocation77_spill] sm:$0xff] %v6540_v11 }
 0x174   :  { %v6546_v41 = vpop.permute.xlu0 %1467 }
 0x175   :  { %5417 = vmatpush3.bf16.msra.mxu1 %v5416_v0  ;;  %v6544_v55 = vpop.xlane.xlu1 %1045  ;;  %11163 = vst [vmem:[#allocation80_spill] sm:$0xff] %v6546_v41  ;;  %v1733_v41 = vsub.f32 1.0, %v6119_v18  ;;  %v1730_v18 = vsub.f32 1.0, %v6150_v26 }
 0x176   :  { %11162 = vst [vmem:[#allocation79_spill] sm:$0xff] %v6544_v55  ;;  %v1727_v55 = vsub.f32 1.0, %v6116_v17 }
 0x177   :  { %v6573_v17 = vmul.f32 3e+38, %v1733_v41  ;;  %v6589_v41 = vmul.f32 3e+38, %v1741_v53  ;;  %v1746_v53 = vsub.f32 1.0, %v6360_v14 }
 0x178   :  { %v6551_v34 = vpop.permute.xlu0 %1513  ;;  %v6569_v2 = vmul.f32 3e+38, %v1727_v55  ;;  %v1736_v55 = vsub.f32 1.0, %v6153_v27 }
 0x179   :  { %v6549_v38 = vpop.permute.xlu1 %1340  ;;  %11165 = vst [vmem:[#allocation82_spill] sm:$0xff] %v6551_v34  ;;  %v1729_v34 = vsub.f32 1.0, %v6137_v22  ;;  %11171 = vst [vmem:[#allocation88_spill] sm:$0xff] %v6573_v17 }
 0x17a   :  { %11164 = vst [vmem:[#allocation81_spill] sm:$0xff] %v6549_v38  ;;  %v1739_v38 = vsub.f32 1.0, %v6128_v20  ;;  %11170 = vst [vmem:[#allocation87_spill] sm:$0xff] %v6569_v2  ;;  %v1734_v20 = vsub.f32 1.0, %v6334_v4  ;;  %v1757_v4 = vsub.f32 1.0, %v6165_v30 }
 0x17b   :  { %v6581_v23 = vmul.f32 3e+38, %v1729_v34  ;;  %11177 = vst [vmem:[#allocation94_spill] sm:$0xff] %v6589_v41  ;;  %v6598_v34 = vmul.f32 3e+38, %v1730_v18  ;;  %v1763_v18 = vsub.f32 1.0, %v6204_v52 }
 0x17c   :  { %v6557_v6 = vpop.permute.xlu0 %1394  ;;  %v6601_v27 = vmul.f32 3e+38, %v1734_v20  ;;  %v6604_v41 = vmul.f32 3e+38, %v1736_v55  ;;  %v6616_v20 = vmul.f32 3e+38, %v1757_v4 }
 0x17d   :  { %v6555_v29 = vpop.permute.xlu1 %1517  ;;  %11167 = vst [vmem:[#allocation84_spill] sm:$0xff] %v6557_v6  ;;  %v1752_v6 = vsub.f32 1.0, %v6147_v25  ;;  %11174 = vst [vmem:[#allocation91_spill] sm:$0xff] %v6581_v23  ;;  %v1740_v25 = vsub.f32 1.0, %v6343_v7  ;;  %v1753_v23 = vsub.f32 1.0, %v6195_v42  ;;  %v1764_v55 = vsub.f32 1.0, %v6212_v46 }
 0x17e   :  { %11166 = vst [vmem:[#allocation83_spill] sm:$0xff] %v6555_v29  ;;  %v5785_v29 = vpop.eup %5784  ;;  %11180 = vst [vmem:[#allocation97_spill] sm:$0xff] %v6598_v34  ;;  %v1769_v4 = vsub.f32 1.0, %v6259_v45 }
 0x17f   :  { %v6592_v26 = vmul.f32 3e+38, %v1752_v6  ;;  %11181 = vst [vmem:[#allocation98_spill] sm:$0xff] %v6601_v27  ;;  %11182 = vst [vmem:[#allocation99_spill] sm:$0xff] %v6604_v41  ;;  %v6607_v6 = vmul.f32 3e+38, %v1740_v25 }
 0x180   :  { %v6562_v51 = vpop.permute.xlu0 %1494  ;;  %11186 = vst [vmem:[#allocation103_spill] sm:$0xff] %v6616_v20  ;;  %v1737_v41 = vsub.f32 1.0, %v6226_v1  ;;  %v6628_v27 = vmul.f32 3e+38, %v1746_v53  ;;  %v1731_v1 = vsub.f32 1.0, %v6376_v16 }
 0x181   :  { %v6559_v0 = vpop.permute.xlu1 %1444  ;;  %11169 = vst [vmem:[#allocation86_spill] sm:$0xff] %v6562_v51  ;;  %v6575_v51 = vmul.f32 3e+38, %v1739_v38  ;;  %v1747_v38 = vsub.f32 1.0, %v6157_v28  ;;  %11178 = vst [vmem:[#allocation95_spill] sm:$0xff] %v6592_v26  ;;  %v1751_v26 = vsub.f32 1.0, %v6368_v48 }
 0x182   :  { %11168 = vst [vmem:[#allocation85_spill] sm:$0xff] %v6559_v0  ;;  %v1728_v0 = vsub.f32 1.0, %v6320_v21  ;;  %v3159_v21 = vmul.f32 0.6931472, %v5785_v29  ;;  %v1742_v29 = vsub.f32 1.0, %v6178_v36  ;;  %11183 = vst [vmem:[#allocation100_spill] sm:$0xff] %v6607_v6 }
 0x183   :  { %11172 = vst [vmem:[#allocation89_spill] sm:$0xff] %v6575_v51  ;;  %v6620_v36 = vmul.f32 3e+38, %v1735_v49  ;;  %v6624_v6 = vmul.f32 3e+38, %v1758_v24  ;;  %11190 = vst [vmem:[#allocation107_spill] sm:$0xff] %v6628_v27 }
 0x184   :  { %v6587_v2 = vpop.permute.xlu0 %1371  ;;  %v6595_v51 = vmul.f32 3e+38, %v1728_v0  ;;  %v6610_v0 = vmul.f32 3e+38, %v1747_v38  ;;  %5786 = vrcp.f32 %v3159_v21  ;;  %v1748_v38 = vsub.f32 1.0, %v6237_v5 }
 0x185   :  { %v6579_v22 = vpop.permute.xlu1 %1344  ;;  %11176 = vst [vmem:[#allocation93_spill] sm:$0xff] %v6587_v2  ;;  %11187 = vst [vmem:[#allocation104_spill] sm:$0xff] %v6620_v36  ;;  %v6630_v42 = vmul.f32 3e+38, %v1742_v29  ;;  %v6633_v20 = vmul.f32 3e+38, %v1751_v26 }
 0x186   :  { %11173 = vst [vmem:[#allocation90_spill] sm:$0xff] %v6579_v22  ;;  %11179 = vst [vmem:[#allocation96_spill] sm:$0xff] %v6595_v51  ;;  %v6636_v49 = vmul.f32 3e+38, %v1753_v23  ;;  %v6638_v36 = vmul.f32 3e+38, %v1763_v18 }
 0x187   :  { %11184 = vst [vmem:[#allocation101_spill] sm:$0xff] %v6610_v0  ;;  %11189 = vst [vmem:[#allocation106_spill] sm:$0xff] %v6624_v6  ;;  %v1759_v0 = vsub.f32 1.0, %v6248_v9  ;;  %v1743_v24 = vsub.f32 1.0, %v6284_v50  ;;  %v1770_v6 = vsub.f32 1.0, %v6380_v56  ;;  %v1765_v29 = vsub.f32 1.0, %v6300_v62 }
 0x188   :  { %v6622_v25 = vpop.permute.xlu0 %1471  ;;  %11191 = vst [vmem:[#allocation108_spill] sm:$0xff] %v6630_v42  ;;  %11192 = vst [vmem:[#allocation109_spill] sm:$0xff] %v6633_v20  ;;  %v6642_v5 = vmul.f32 3e+38, %v1764_v55  ;;  %v6644_v53 = vmul.f32 3e+38, %v1737_v41 }
 0x189   :  { %v6614_v34 = vpop.permute.xlu1 %1421  ;;  %11188 = vst [vmem:[#allocation105_spill] sm:$0xff] %v6622_v25  ;;  %11193 = vst [vmem:[#allocation110_spill] sm:$0xff] %v6636_v49  ;;  %v1754_v27 = vsub.f32 1.0, %v6384_v59  ;;  %v6648_v26 = vmul.f32 3e+38, %v1748_v38  ;;  %v1732_v23 = vsub.f32 1.0, %v6388_v10 }
 0x18a   :  { %11185 = vst [vmem:[#allocation102_spill] sm:$0xff] %v6614_v34  ;;  %11194 = vst [vmem:[#allocation111_spill] sm:$0xff] %v6638_v36  ;;  %v6650_v20 = vmul.f32 3e+38, %v1759_v0  ;;  %v6655_v36 = vmul.f32 3e+38, %v1769_v4 }
 0x18b   :  { %11195 = vst [vmem:[#allocation112_spill] sm:$0xff] %v6642_v5  ;;  %11196 = vst [vmem:[#allocation113_spill] sm:$0xff] %v6644_v53  ;;  %v1738_v49 = vsub.f32 1.0, %v6312_v47  ;;  %v6658_v55 = vmul.f32 3e+38, %v1731_v1  ;;  %v1749_v41 = vsub.f32 1.0, %v6392_v61 }
 0x18c   :  { %11197 = vst [vmem:[#allocation114_spill] sm:$0xff] %v6648_v26  ;;  %11198 = vst [vmem:[#allocation115_spill] sm:$0xff] %v6650_v20  ;;  %v6661_v5 = vpop.permute.xlu0 %1398  ;;  %v6663_v42 = vmul.f32 3e+38, %v1743_v24  ;;  %v1760_v38 = vsub.f32 1.0, %v6324_v3  ;;  %v1771_v20 = vsub.f32 1.0, %v6396_v43 }
 0x18d   :  { %v6653_v18 = vpop.permute.xlu1 %1521  ;;  %11200 = vst [vmem:[#allocation117_spill] sm:$0xff] %v6655_v36  ;;  %11201 = vst [vmem:[#allocation118_spill] sm:$0xff] %v6658_v55  ;;  %v6666_v0 = vmul.f32 3e+38, %v1770_v6  ;;  %v6669_v26 = vmul.f32 3e+38, %v1765_v29 }
 0x18e   :  { %11199 = vst [vmem:[#allocation116_spill] sm:$0xff] %v6653_v18  ;;  %11202 = vst [vmem:[#allocation119_spill] sm:$0xff] %v6661_v5  ;;  %v1744_v4 = vsub.f32 1.0, %v6337_v37  ;;  %v6672_v36 = vmul.f32 3e+38, %v1754_v27  ;;  %v5787_v1 = vpop.eup %5786  ;;  %v1766_v47 = vsub.f32 1.0, %v6345_v12 }
 0x18f   :  { %11203 = vst [vmem:[#allocation120_spill] sm:$0xff] %v6663_v42  ;;  %11204 = vst [vmem:[#allocation121_spill] sm:$0xff] %v6666_v0  ;;  %v6675_v10 = vmul.f32 0.77330506, %v3159_v21  ;;  %v6677_v53 = vmul.f32 3e+38, %v1732_v23 }
 0x190   :  { %11205 = vst [vmem:[#allocation122_spill] sm:$0xff] %v6669_v26  ;;  %11206 = vst [vmem:[#allocation123_spill] sm:$0xff] %v6672_v36  ;;  %v1755_v24 = vsub.f32 1.0, %v6400_v13  ;;  %v6680_v42 = vmul.f32 3e+38, %v1738_v49  ;;  %v1761_v6 = vsub.f32 1.0, %v6354_v35 }
 0x191   :  { %11207 = vst [vmem:[#allocation124_spill] sm:$0xff] %v6675_v10  ;;  %11208 = vst [vmem:[#allocation125_spill] sm:$0xff] %v6677_v53  ;;  %v6683_v0 = vmul.f32 3e+38, %v1749_v41  ;;  %v1750_v29 = vsub.f32 1.0, %v6404_v15  ;;  %v1756_v27 = vsub.f32 1.0, %v6362_v19  ;;  %v6692_v23 = vpop.permute.xlu1 %1448 }
 0x192   :  { %11209 = vst [vmem:[#allocation126_spill] sm:$0xff] %v6680_v42  ;;  %v6686_v26 = vmul.f32 3e+38, %v1760_v38  ;;  %v6689_v36 = vmul.f32 3e+38, %v1771_v20  ;;  %v1772_v21 = vsub.f32 1.0, %v6408_v58 }
 0x193   :  { %11210 = vst [vmem:[#allocation127_spill] sm:$0xff] %v6683_v0  ;;  %11213 = vst [vmem:[#allocation130_spill] sm:$0xff] %v6692_v23  ;;  %v6694_v10 = vmul.f32 3e+38, %v1744_v4  ;;  %v6696_v49 = vmul.f32 1.2931508, %v5787_v1  ;;  %v6700_v0 = vpop.permute.xlu0 %1498 }
 0x194   :  { %11211 = vst [vmem:[#allocation128_spill] sm:$0xff] %v6686_v26  ;;  %11212 = vst [vmem:[#allocation129_spill] sm:$0xff] %v6689_v36  ;;  %v1762_v42 = vsub.f32 1.0, %v6370_v39  ;;  %v1767_v41 = vsub.f32 1.0, %v6412_v31  ;;  %v6702_v38 = vmul.f32 3e+38, %v1766_v47 }
 0x195   :  { %11214 = vst [vmem:[#allocation131_spill] sm:$0xff] %v6694_v10  ;;  %11215 = vst [vmem:[#allocation132_spill] sm:$0xff] %v6696_v49  ;;  %v1768_v26 = vsub.f32 1.0, %v6374_v40  ;;  %v6705_v20 = vmul.f32 3e+38, %v1755_v24  ;;  %v1773_v36 = vsub.f32 1.0, %v6416_v8 }
 0x196   :  { %11216 = vst [vmem:[#allocation133_spill] sm:$0xff] %v6700_v0  ;;  %11217 = vst [vmem:[#allocation134_spill] sm:$0xff] %v6702_v38  ;;  %v6708_v53 = vmul.f32 3e+38, %v1761_v6  ;;  %v1775_v4 = vsub.f32 1.0, %v6378_v54  ;;  %v1774_v49 = vsub.f32 1.0, %v6420_v32 }
 0x197   :  { %11218 = vst [vmem:[#allocation135_spill] sm:$0xff] %v6705_v20  ;;  %v6711_v1 = vmul.f32 3e+38, %v1750_v29  ;;  %v6714_v10 = vmul.f32 3e+38, %v1756_v27  ;;  %v1781_v39 = vsub.f32 1.0, %v6382_v57 }
 0x198   :  { %11219 = vst [vmem:[#allocation136_spill] sm:$0xff] %v6708_v53  ;;  %v6717_v47 = vmul.f32 3e+38, %v1772_v21  ;;  %v11223_v38 = vld [vmem:[#allocation67_spill] sm:$0xff]  ;;  %v6720_v24 = vmul.f32 3e+38, %v1762_v42  ;;  %v6732_v21 = vpop.permute.xlu1 %1425 }
 0x199   :  { %11220 = vst [vmem:[#allocation137_spill] sm:$0xff] %v6711_v1  ;;  %11221 = vst [vmem:[#allocation138_spill] sm:$0xff] %v6714_v10  ;;  %v1776_v40 = vsub.f32 1.0, %v11223_v38  ;;  %v11225_v20 = vld [vmem:[#allocation48_spill] sm:$0xff]  ;;  %v6723_v6 = vmul.f32 3e+38, %v1767_v41 }
 0x19a   :  { %11222 = vst [vmem:[#allocation139_spill] sm:$0xff] %v6717_v47  ;;  %11224 = vst [vmem:[#allocation140_spill] sm:$0xff] %v6720_v24  ;;  %v1787_v19 = vsub.f32 1.0, %v11225_v20  ;;  %v11227_v53 = vld [vmem:[#allocation69_spill] sm:$0xff]  ;;  %v6726_v29 = vmul.f32 3e+38, %v1768_v26 }
 0x19b   :  { %11226 = vst [vmem:[#allocation141_spill] sm:$0xff] %v6723_v6  ;;  %v1782_v54 = vsub.f32 1.0, %v11227_v53  ;;  %v11229_v1 = vld [vmem:[#allocation50_spill] sm:$0xff]  ;;  %v6729_v27 = vmul.f32 3e+38, %v1773_v36  ;;  %v11231_v10 = vld [vmem:[#allocation71_spill] sm:$0xff]  ;;  %v6740_v6 = vpop.permute.xlu0 %1475 }
 0x19c   :  { %11228 = vst [vmem:[#allocation142_spill] sm:$0xff] %v6726_v29  ;;  %v1777_v32 = vsub.f32 1.0, %v11229_v1  ;;  %v1788_v57 = vsub.f32 1.0, %v11231_v10  ;;  %11232 = vst [vmem:[#allocation144_spill] sm:$0xff] %v6732_v21  ;;  %v6734_v47 = vmul.f32 3e+38, %v1775_v4 }
 0x19d   :  { %11230 = vst [vmem:[#allocation143_spill] sm:$0xff] %v6729_v27  ;;  %v11234_v42 = vld [vmem:[#allocation52_spill] sm:$0xff]  ;;  %v6737_v24 = vmul.f32 3e+38, %v1774_v49  ;;  %v11236_v41 = vld [vmem:[#allocation73_spill] sm:$0xff]  ;;  %11237 = vst [vmem:[#allocation147_spill] sm:$0xff] %v6740_v6 }
 0x19e   :  { %11233 = vst [vmem:[#allocation145_spill] sm:$0xff] %v6734_v47  ;;  %v1793_v38 = vsub.f32 1.0, %v11234_v42  ;;  %v1783_v20 = vsub.f32 1.0, %v11236_v41  ;;  %v6742_v26 = vmul.f32 3e+38, %v1781_v39  ;;  %v11239_v53 = vld [vmem:[#allocation54_spill] sm:$0xff] }
 0x19f   :  { %11235 = vst [vmem:[#allocation146_spill] sm:$0xff] %v6737_v24  ;;  %v1789_v1 = vsub.f32 1.0, %v11239_v53  ;;  %v6745_v36 = vmul.f32 3e+38, %v1776_v40  ;;  %v1794_v10 = vsub.f32 1.0, %v6536_v63  ;;  %v11242_v4 = vld [vmem:[#allocation56_spill] sm:$0xff] }
 0x1a0   :  { %11238 = vst [vmem:[#allocation148_spill] sm:$0xff] %v6742_v26  ;;  %v6748_v27 = vmul.f32 3e+38, %v1787_v19  ;;  %v1800_v47 = vsub.f32 1.0, %v11242_v4  ;;  %v6751_v29 = vmul.f32 3e+38, %v1782_v54 }
 0x1a1   :  { %11240 = vst [vmem:[#allocation149_spill] sm:$0xff] %v6745_v36  ;;  %v1799_v49 = vsub.f32 1.0, %v6540_v11  ;;  %v6754_v42 = vmul.f32 3e+38, %v1777_v32  ;;  %v11245_v41 = vld [vmem:[#allocation58_spill] sm:$0xff]  ;;  %v11246_v39 = vld [vmem:[#allocation60_spill] sm:$0xff] }
 0x1a2   :  { %11241 = vst [vmem:[#allocation150_spill] sm:$0xff] %v6748_v27  ;;  %11243 = vst [vmem:[#allocation151_spill] sm:$0xff] %v6751_v29  ;;  %v1778_v24 = vsub.f32 1.0, %v11245_v41  ;;  %v1784_v26 = vsub.f32 1.0, %v11246_v39  ;;  %v6758_v15 = vmul.f32 3e+38, %v1788_v57  ;;  %v6772_v41 = vpop.permute.xlu1 %1525 }
 0x1a3   :  { %11244 = vst [vmem:[#allocation152_spill] sm:$0xff] %v6754_v42  ;;  %v6760_v40 = vmul.f32 3e+38, %v1793_v38  ;;  %v11249_v36 = vld [vmem:[#allocation62_spill] sm:$0xff]  ;;  %v11250_v19 = vld [vmem:[#allocation64_spill] sm:$0xff]  ;;  %11256 = vst [vmem:[#allocation158_spill] sm:$0xff] %v6772_v41 }
 0x1a4   :  { %11247 = vst [vmem:[#allocation153_spill] sm:$0xff] %v6758_v15  ;;  %v1795_v63 = vsub.f32 1.0, %v11249_v36  ;;  %v1805_v27 = vsub.f32 1.0, %v11250_v19  ;;  %v6764_v53 = vmul.f32 3e+38, %v1783_v20  ;;  %v11253_v29 = vld [vmem:[#allocation66_spill] sm:$0xff]  ;;  %v6780_v20 = vpop.permute.xlu0 %1452 }
 0x1a5   :  { %11248 = vst [vmem:[#allocation154_spill] sm:$0xff] %v6760_v40  ;;  %v6766_v54 = vmul.f32 3e+38, %v1789_v1  ;;  %v1806_v4 = vsub.f32 1.0, %v11253_v29  ;;  %v11254_v32 = vld [vmem:[#allocation68_spill] sm:$0xff]  ;;  %v11258_v38 = vld [vmem:[#allocation70_spill] sm:$0xff] }
 0x1a6   :  { %11251 = vst [vmem:[#allocation155_spill] sm:$0xff] %v6764_v53  ;;  %v1790_v42 = vsub.f32 1.0, %v11254_v32  ;;  %v6770_v11 = vmul.f32 3e+38, %v1794_v10  ;;  %v6774_v57 = vmul.f32 3e+38, %v1800_v47 }
 0x1a7   :  { %11252 = vst [vmem:[#allocation156_spill] sm:$0xff] %v6766_v54  ;;  %v1801_v40 = vsub.f32 1.0, %v11258_v38  ;;  %v11259_v15 = vld [vmem:[#allocation72_spill] sm:$0xff]  ;;  %v6778_v39 = vmul.f32 3e+38, %v1799_v49  ;;  %11261 = vst [vmem:[#allocation161_spill] sm:$0xff] %v6780_v20 }
 0x1a8   :  { %11255 = vst [vmem:[#allocation157_spill] sm:$0xff] %v6770_v11  ;;  %11257 = vst [vmem:[#allocation159_spill] sm:$0xff] %v6774_v57  ;;  %v1811_v36 = vsub.f32 1.0, %v11259_v15  ;;  %v6782_v1 = vmul.f32 3e+38, %v1778_v24  ;;  %v11264_v53 = vld [vmem:[#allocation74_spill] sm:$0xff] }
 0x1a9   :  { %11260 = vst [vmem:[#allocation160_spill] sm:$0xff] %v6778_v39  ;;  %v6784_v54 = vmul.f32 3e+38, %v1784_v26  ;;  %v1812_v29 = vsub.f32 1.0, %v11264_v53  ;;  %v1785_v10 = vsub.f32 1.0, %v6538_v60  ;;  %v11267_v57 = vld [vmem:[#allocation78_spill] sm:$0xff] }
 0x1aa   :  { %11262 = vst [vmem:[#allocation162_spill] sm:$0xff] %v6782_v1  ;;  %v6788_v11 = vmul.f32 3e+38, %v1795_v63  ;;  %v6790_v47 = vmul.f32 3e+38, %v1805_v27  ;;  %v1796_v19 = vsub.f32 1.0, %v11267_v57 }
 0x1ab   :  { %11263 = vst [vmem:[#allocation163_spill] sm:$0xff] %v6784_v54  ;;  %v11268_v38 = vld [vmem:[#allocation80_spill] sm:$0xff]  ;;  %v6794_v49 = vmul.f32 3e+38, %v1806_v4  ;;  %v6796_v39 = vmul.f32 3e+38, %v1790_v42  ;;  %v6811_v42 = vpop.permute.xlu1 %1502 }
 0x1ac   :  { %11265 = vst [vmem:[#allocation164_spill] sm:$0xff] %v6788_v11  ;;  %11266 = vst [vmem:[#allocation165_spill] sm:$0xff] %v6790_v47  ;;  %v1807_v15 = vsub.f32 1.0, %v11268_v38  ;;  %v11271_v24 = vld [vmem:[#allocation81_spill] sm:$0xff]  ;;  %v11272_v26 = vld [vmem:[#allocation82_spill] sm:$0xff] }
 0x1ad   :  { %11269 = vst [vmem:[#allocation166_spill] sm:$0xff] %v6794_v49  ;;  %11270 = vst [vmem:[#allocation167_spill] sm:$0xff] %v6796_v39  ;;  %v1779_v1 = vsub.f32 1.0, %v11271_v24  ;;  %v1817_v54 = vsub.f32 1.0, %v11272_v26  ;;  %v6800_v32 = vmul.f32 3e+38, %v1801_v40 }
 0x1ae   :  { %v6802_v53 = vmul.f32 3e+38, %v1811_v36  ;;  %v11275_v63 = vld [vmem:[#allocation83_spill] sm:$0xff]  ;;  %v11276_v27 = vld [vmem:[#allocation84_spill] sm:$0xff]  ;;  %v6806_v60 = vmul.f32 3e+38, %v1812_v29 }
 0x1af   :  { %11273 = vst [vmem:[#allocation168_spill] sm:$0xff] %v6800_v32  ;;  %v1818_v11 = vsub.f32 1.0, %v11275_v63  ;;  %v1791_v47 = vsub.f32 1.0, %v11276_v27  ;;  %v6808_v57 = vmul.f32 3e+38, %v1785_v10  ;;  %v11279_v4 = vld [vmem:[#allocation85_spill] sm:$0xff]  ;;  %v6819_v32 = vpop.permute.xlu0 %1479 }
 0x1b0   :  { %11274 = vst [vmem:[#allocation169_spill] sm:$0xff] %v6802_v53  ;;  %11277 = vst [vmem:[#allocation170_spill] sm:$0xff] %v6806_v60  ;;  %v1802_v49 = vsub.f32 1.0, %v11279_v4  ;;  %v6813_v39 = vmul.f32 3e+38, %v1796_v19  ;;  %v1780_v40 = vsub.f32 1.0, %v6579_v22 }
 0x1b1   :  { %11278 = vst [vmem:[#allocation171_spill] sm:$0xff] %v6808_v57  ;;  %11280 = vst [vmem:[#allocation172_spill] sm:$0xff] %v6811_v42  ;;  %v6815_v38 = vmul.f32 3e+38, %v1807_v15  ;;  %v11283_v36 = vld [vmem:[#allocation86_spill] sm:$0xff]  ;;  %v1797_v10 = vsub.f32 1.0, %v6614_v34 }
 0x1b2   :  { %11281 = vst [vmem:[#allocation173_spill] sm:$0xff] %v6813_v39  ;;  %v1813_v53 = vsub.f32 1.0, %v11283_v36  ;;  %11284 = vst [vmem:[#allocation175_spill] sm:$0xff] %v6819_v32  ;;  %v6821_v63 = vmul.f32 3e+38, %v1779_v1  ;;  %v1786_v60 = vsub.f32 1.0, %v6587_v2 }
 0x1b3   :  { %11282 = vst [vmem:[#allocation174_spill] sm:$0xff] %v6815_v38  ;;  %v6823_v29 = vmul.f32 3e+38, %v1817_v54  ;;  %v6827_v57 = vmul.f32 3e+38, %v1818_v11  ;;  %v1808_v15 = vsub.f32 1.0, %v6622_v25 }
 0x1b4   :  { %11285 = vst [vmem:[#allocation176_spill] sm:$0xff] %v6821_v63  ;;  %v6829_v19 = vmul.f32 3e+38, %v1791_v47  ;;  %v6832_v38 = vmul.f32 3e+38, %v1802_v49  ;;  %v1819_v39 = vsub.f32 1.0, %v6653_v18 }
 0x1b5   :  { %11286 = vst [vmem:[#allocation177_spill] sm:$0xff] %v6823_v29  ;;  %11287 = vst [vmem:[#allocation178_spill] sm:$0xff] %v6827_v57  ;;  %v844_v1 = vld [vmem:[%s10491_s10] sm:$0x3]  ;;  %v6838_v54 = vmul.f32 3e+38, %v1780_v40 }
 0x1b6   :  { %11288 = vst [vmem:[#allocation179_spill] sm:$0xff] %v6829_v19  ;;  %11289 = vst [vmem:[#allocation180_spill] sm:$0xff] %v6832_v38  ;;  %v6840_v29 = vmul.f32 3e+38, %v1813_v53  ;;  %v1792_v63 = vsub.f32 1.0, %v6661_v5  ;;  %v1803_v57 = vsub.f32 1.0, %v6692_v23  ;;  %v6849_v38 = vpop.permute.xlu1 %1529 }
 0x1b7   :  { %11290 = vst [vmem:[#allocation181_spill] sm:$0xff] %v6838_v54  ;;  %v6843_v11 = vmul.f32 3e+38, %v1797_v10  ;;  %v6845_v47 = vmul.f32 3e+38, %v1786_v60  ;;  %v1814_v49 = vsub.f32 1.0, %v6700_v0 }
 0x1b8   :  { %11291 = vst [vmem:[#allocation182_spill] sm:$0xff] %v6840_v29  ;;  %11294 = vst [vmem:[#allocation185_spill] sm:$0xff] %v6849_v38  ;;  %v6851_v19 = vmul.f32 3e+38, %v1808_v15  ;;  %v11296_v18 = vld [vmem:[#allocation2_spill] sm:$0xff]  ;;  %v1798_v53 = vsub.f32 1.0, %v6732_v21  ;;  %v6858_v29 = vpop.permute.xlu0 %1506 }
 0x1b9   :  { %11292 = vst [vmem:[#allocation183_spill] sm:$0xff] %v6843_v11  ;;  %11293 = vst [vmem:[#allocation184_spill] sm:$0xff] %v6845_v47  ;;  %v6854_v26 = vrot.slane %v844_v1, %v11296_v18  ;;  %v1809_v40 = vsub.f32 1.0, %v6740_v6  ;;  %v6860_v10 = vmul.f32 3e+38, %v1819_v39  ;;  %v11299_v60 = vld [vmem:[#allocation4_spill] sm:$0xff] }
 0x1ba   :  { %11295 = vst [vmem:[#allocation186_spill] sm:$0xff] %v6851_v19  ;;  %11297 = vst [vmem:[#allocation2_spill] sm:$0xff] %v6858_v29  ;;  %v6863_v11 = vrot.slane %v844_v1, %v11299_v60  ;;  %v1820_v47 = vsub.f32 1.0, %v6772_v41  ;;  %v1804_v54 = vsub.f32 1.0, %v6780_v20  ;;  %v6867_v15 = vmul.f32 3e+38, %v1792_v63 }
 0x1bb   :  { %11298 = vst [vmem:[#allocation187_spill] sm:$0xff] %v6860_v10  ;;  %v1815_v18 = vsub.f32 1.0, %v6811_v42  ;;  %v1821_v19 = vsub.f32 1.0, %v6849_v38  ;;  %v1810_v0 = vsub.f32 1.0, %v6819_v32  ;;  %v6872_v36 = vmul.f32 3e+38, %v1803_v57 }
 0x1bc   :  { %11300 = vst [vmem:[#allocation4_spill] sm:$0xff] %v6867_v15  ;;  %v6874_v6 = vmul.f32 3e+38, %v1814_v49  ;;  %v1816_v39 = vsub.f32 1.0, %v6858_v29  ;;  %v6877_v60 = vmul.f32 3e+38, %v1798_v53 }
 0x1bd   :  { %11301 = vst [vmem:[#allocation188_spill] sm:$0xff] %v6872_v36  ;;  %v6879_v10 = vmul.f32 3e+38, %v1809_v40  ;;  %v6884_v41 = vmul.f32 3e+38, %v1820_v47  ;;  %v11313_v47 = vld [vmem:[#allocation6_spill] sm:$0xff] }
 0x1be   :  { %11302 = vst [vmem:[#allocation189_spill] sm:$0xff] %v6874_v6  ;;  %11303 = vst [vmem:[#allocation190_spill] sm:$0xff] %v6877_v60  ;;  %v6886_v38 = vmul.f32 3e+38, %v1804_v54  ;;  %v6891_v49 = vmul.f32 3e+38, %v1815_v18 }
 0x1bf   :  { %11304 = vst [vmem:[#allocation191_spill] sm:$0xff] %v6879_v10  ;;  %11306 = vst [vmem:[#allocation193_spill] sm:$0xff] %v6884_v41  ;;  %v6893_v6 = vmul.f32 3e+38, %v1821_v19  ;;  %v6895_v36 = vmul.f32 3e+38, %v1810_v0 }
 0x1c0   :  { %11307 = vst [vmem:[#allocation194_spill] sm:$0xff] %v6886_v38  ;;  %11309 = vst [vmem:[#allocation196_spill] sm:$0xff] %v6891_v49  ;;  %v6897_v53 = vmul.f32 3e+38, %v1816_v39  ;;  %v11315_v54 = vld [vmem:[#allocation7_spill] sm:$0xff]  ;;  %v11330_v20 = vld [vmem:[#allocation89_spill] sm:$0xff] }
 0x1c1   :  { %11310 = vst [vmem:[#allocation197_spill] sm:$0xff] %v6893_v6  ;;  %11311 = vst [vmem:[#allocation198_spill] sm:$0xff] %v6895_v36  ;;  %v11319_v6 = vld [vmem:[#allocation8_spill] sm:$0xff]  ;;  %v11322_v36 = vld [vmem:[#allocation10_spill] sm:$0xff] }
 0x1c2   :  { %11312 = vst [vmem:[#allocation199_spill] sm:$0xff] %v6897_v53  ;;  %v11329_v29 = vld [vmem:[#allocation87_spill] sm:$0xff]  ;;  %v11331_v34 = vld [vmem:[#allocation29_spill] sm:$0xff] }
 0x1c3   :  { %v11333_v27 = vld [vmem:[#allocation31_spill] sm:$0xff] }
 0x201   :  { %v797_v1 = vpop.f32.mrb[2].mxu1 }
 0x202   :  { %v6882_v63 = vadd.f32 %v6854_v26, %v797_v1  ;;  %v799_v15 = vpop.f32.mrb[3].mxu1 }
 0x203   :  { %v6889_v57 = vadd.f32 %v6863_v11, %v799_v15 }
 0x204   :  { %11305 = vst [vmem:[#allocation192_spill] sm:$0xff] %v6882_v63  ;;  %v6901_v40 = vmul.f32 %v6882_v63, %v6882_v63  ;;  %v6905_v1 = vmul.f32 %v11313_v47, %v6882_v63  ;;  %v6909_v15 = vmul.f32 %v11315_v54, %v6882_v63 }
 0x205   :  { %11308 = vst [vmem:[#allocation195_spill] sm:$0xff] %v6889_v57  ;;  %v803_v18 = vpop.f32.mrb[4].mxu1  ;;  %v6913_v19 = vmul.f32 %v6889_v57, %v6889_v57  ;;  %v6917_v0 = vmul.f32 %v11313_v47, %v6889_v57  ;;  %v6921_v39 = vmul.f32 %v11315_v54, %v6889_v57  ;;  %v6925_v41 = vmul.f32 %v11319_v6, %v6889_v57 }
 0x206   :  { %11314 = vst [vmem:[#allocation6_spill] sm:$0xff] %v6905_v1  ;;  %11316 = vst [vmem:[#allocation7_spill] sm:$0xff] %v6909_v15  ;;  %v6928_v53 = vadd.f32 %v6854_v26, %v803_v18  ;;  %v805_v49 = vpop.f32.mrb[5].mxu1  ;;  %v6932_v10 = vmul.f32 %v11322_v36, %v6889_v57  ;;  %v6936_v47 = vmul.f32 %v6368_v48, %v6889_v57 }
 0x207   :  { %11317 = vst [vmem:[#allocation200_spill] sm:$0xff] %v6917_v0  ;;  %11318 = vst [vmem:[#allocation201_spill] sm:$0xff] %v6921_v39  ;;  %v6940_v54 = vmul.f32 %v6165_v30, %v6889_v57  ;;  %v6943_v38 = vadd.f32 %v6863_v11, %v805_v49  ;;  %v6947_v18 = vmul.f32 %v6204_v52, %v6889_v57  ;;  %v11351_v30 = vld [vmem:[#allocation19_spill] sm:$0xff] }
 0x208   :  { %11320 = vst [vmem:[#allocation202_spill] sm:$0xff] %v6925_v41  ;;  %11321 = vst [vmem:[#allocation203_spill] sm:$0xff] %v6928_v53  ;;  %v6951_v60 = vmul.f32 %v6259_v45, %v6889_v57  ;;  %v6955_v42 = vadd.f32 %v11329_v29, %v6917_v0  ;;  %v5332_v32 = vpack.c.bf16 %v6928_v53, %v6882_v63  ;;  %v11344_v45 = vld [vmem:[#allocation9_spill] sm:$0xff] }
 0x209   :  { %11323 = vst [vmem:[#allocation204_spill] sm:$0xff] %v6932_v10  ;;  %11324 = vst [vmem:[#allocation205_spill] sm:$0xff] %v6936_v47  ;;  %v6961_v25 = vmul.f32 %v6928_v53, %v6928_v53  ;;  %v6965_v49 = vadd.f32 %v6573_v17, %v6921_v39  ;;  %v6969_v23 = vadd.f32 %v11330_v20, %v6925_v41  ;;  %v809_v4 = vpop.f32.mrb[6].mxu1  ;;  %v11339_v17 = vld [vmem:[#allocation12_spill] sm:$0xff] }
 0x20a   :  { %11325 = vst [vmem:[#allocation206_spill] sm:$0xff] %v6940_v54  ;;  %11326 = vst [vmem:[#allocation207_spill] sm:$0xff] %v6943_v38  ;;  %v5330_v0 = vpack.c.bf16 %v6943_v38, %v6889_v57  ;;  %v6975_v21 = vmul.f32 %v6943_v38, %v6943_v38  ;;  %v6979_v5 = vmul.f32 %v11331_v34, %v6943_v38  ;;  %v811_v41 = vpop.f32.mrb[7].mxu1  ;;  %v11368_v34 = vld [vmem:[#allocation23_spill] sm:$0xff] }
 0x20b   :  { %11327 = vst [vmem:[#allocation208_spill] sm:$0xff] %v6947_v18  ;;  %11328 = vst [vmem:[#allocation209_spill] sm:$0xff] %v6951_v60  ;;  %v6983_v39 = vmul.f32 %v11333_v27, %v6943_v38  ;;  %v6986_v2 = vadd.f32 %v6854_v26, %v809_v4  ;;  %v6992_v24 = vmul.f32 %v6343_v7, %v6943_v38  ;;  %v11361_v27 = vld [vmem:[#allocation13_spill] sm:$0xff] }
 0x20c   :  { %11332 = vst [vmem:[#allocation210_spill] sm:$0xff] %v6979_v5  ;;  %v6996_v57 = vmul.f32 %v6360_v14, %v6943_v38  ;;  %v6999_v20 = vadd.f32 %v6863_v11, %v811_v41  ;;  %5331 = vmatprep.subr.bf16.mxu0 %v5330_v0  ;;  %v7005_v15 = vmul.f32 %v11339_v17, %v6943_v38 }
 0x20d   :  { %11334 = vst [vmem:[#allocation211_spill] sm:$0xff] %v6983_v39  ;;  %11335 = vst [vmem:[#allocation212_spill] sm:$0xff] %v6986_v2  ;;  %v7009_v22 = vmul.f32 %v6171_v33, %v6943_v38  ;;  %5333 = vmatpush1.bf16.msra.mxu0 %v5332_v32  ;;  %v7013_v29 = vmul.f32 %v6986_v2, %v6986_v2  ;;  %v7017_v41 = vmul.f32 %v6212_v46, %v6943_v38  ;;  %v815_v1 = vpop.f32.mrb[8].mxu1 }
 0x20e   :  { %11336 = vst [vmem:[#allocation213_spill] sm:$0xff] %v6992_v24  ;;  %11337 = vst [vmem:[#allocation214_spill] sm:$0xff] %v6996_v57  ;;  %v7021_v0 = vmul.f32 %v6380_v56, %v6943_v38  ;;  %v7025_v4 = vadd.f32 %v6595_v51, %v6979_v5  ;;  %v7029_v32 = vmul.f32 %v6999_v20, %v6999_v20  ;;  %v11347_v38 = vld [vmem:[#allocation11_spill] sm:$0xff]  ;;  %v817_v51 = vpop.f32.mrb[9].mxu1 }
 0x20f   :  { %11338 = vst [vmem:[#allocation215_spill] sm:$0xff] %v6999_v20  ;;  %11340 = vst [vmem:[#allocation216_spill] sm:$0xff] %v7005_v15  ;;  %v7033_v52 = vmul.f32 %v11344_v45, %v6999_v20  ;;  %v7037_v46 = vmul.f32 %v6351_v44, %v6999_v20  ;;  %v7041_v56 = vmul.f32 %v11347_v38, %v6999_v20  ;;  %v11363_v45 = vld [vmem:[#allocation14_spill] sm:$0xff] }
 0x210   :  { %11341 = vst [vmem:[#allocation217_spill] sm:$0xff] %v7009_v22  ;;  %11342 = vst [vmem:[#allocation218_spill] sm:$0xff] %v7017_v41  ;;  %v7044_v5 = vadd.f32 %v6854_v26, %v815_v1  ;;  %v7048_v33 = vmul.f32 %v6157_v28, %v6999_v20  ;;  %v7052_v17 = vmul.f32 %v11351_v30, %v6999_v20  ;;  %v11357_v28 = vld [vmem:[#allocation91_spill] sm:$0xff] }
 0x211   :  { %11343 = vst [vmem:[#allocation219_spill] sm:$0xff] %v7021_v0  ;;  %11345 = vst [vmem:[#allocation220_spill] sm:$0xff] %v7033_v52  ;;  %v7056_v48 = vmul.f32 %v6248_v9, %v6999_v20  ;;  %v7059_v14 = vadd.f32 %v6863_v11, %v817_v51  ;;  %v7063_v1 = vmul.f32 %v6300_v62, %v6999_v20  ;;  %v11358_v51 = vld [vmem:[#allocation98_spill] sm:$0xff]  ;;  %v11359_v62 = vld [vmem:[#allocation104_spill] sm:$0xff] }
 0x212   :  { %11346 = vst [vmem:[#allocation221_spill] sm:$0xff] %v7037_v46  ;;  %11348 = vst [vmem:[#allocation222_spill] sm:$0xff] %v7041_v56  ;;  %v7067_v36 = vmul.f32 %v6396_v43, %v6999_v20  ;;  %v7071_v38 = vadd.f32 %v11357_v28, %v7033_v52  ;;  %v5336_v30 = vpack.c.bf16 %v7044_v5, %v6986_v2  ;;  %v821_v43 = vpop.f32.mrb[10].mxu1 }
 0x213   :  { %11349 = vst [vmem:[#allocation223_spill] sm:$0xff] %v7044_v5  ;;  %11350 = vst [vmem:[#allocation224_spill] sm:$0xff] %v7048_v33  ;;  %v7077_v9 = vmul.f32 %v7044_v5, %v7044_v5  ;;  %v7081_v7 = vadd.f32 %v11358_v51, %v6983_v39  ;;  %v7085_v44 = vadd.f32 %v11359_v62, %v7037_v46  ;;  %v823_v46 = vpop.f32.mrb[11].mxu1 }
 0x214   :  { %11352 = vst [vmem:[#allocation225_spill] sm:$0xff] %v7052_v17  ;;  %11353 = vst [vmem:[#allocation226_spill] sm:$0xff] %v7056_v48  ;;  %v5334_v52 = vpack.c.bf16 %v7059_v14, %v6999_v20  ;;  %v7091_v28 = vmul.f32 %v7059_v14, %v7059_v14  ;;  %v7095_v5 = vmul.f32 %v11361_v27, %v7059_v14  ;;  %v11366_v20 = vld [vmem:[#allocation18_spill] sm:$0xff] }
 0x215   :  { %11354 = vst [vmem:[#allocation227_spill] sm:$0xff] %v7059_v14  ;;  %11355 = vst [vmem:[#allocation228_spill] sm:$0xff] %v7063_v1  ;;  %v7099_v39 = vmul.f32 %v11363_v45, %v7059_v14  ;;  %v7102_v51 = vadd.f32 %v6854_v26, %v821_v43  ;;  %v7108_v2 = vmul.f32 %v11366_v20, %v7059_v14  ;;  %v11376_v43 = vld [vmem:[#allocation97_spill] sm:$0xff]  ;;  %v827_v20 = vpop.f32.mrb[12].mxu1 }
 0x216   :  { %11356 = vst [vmem:[#allocation229_spill] sm:$0xff] %v7067_v36  ;;  %11360 = vst [vmem:[#allocation230_spill] sm:$0xff] %v7085_v44  ;;  %v7112_v53 = vmul.f32 %v11368_v34, %v7059_v14  ;;  %v7115_v27 = vadd.f32 %v6863_v11, %v823_v46  ;;  %5335 = vmatprep.subr.bf16.mxu0 %v5334_v52  ;;  %v7121_v45 = vmul.f32 %v6384_v59, %v7059_v14 }
 0x217   :  { %11362 = vst [vmem:[#allocation231_spill] sm:$0xff] %v7095_v5  ;;  %11364 = vst [vmem:[#allocation232_spill] sm:$0xff] %v7099_v39  ;;  %v7125_v62 = vmul.f32 %v6324_v3, %v7059_v14  ;;  %5337 = vmatpush1.bf16.msra.mxu0 %v5336_v30  ;;  %v7129_v34 = vmul.f32 %v7102_v51, %v7102_v51  ;;  %v7133_v46 = vmul.f32 %v6345_v12, %v7059_v14  ;;  %v11379_v12 = vld [vmem:[#allocation22_spill] sm:$0xff] }
 0x218   :  { %11365 = vst [vmem:[#allocation233_spill] sm:$0xff] %v7102_v51  ;;  %11367 = vst [vmem:[#allocation234_spill] sm:$0xff] %v7108_v2  ;;  %v7137_v52 = vmul.f32 %v6408_v58, %v7059_v14  ;;  %v7141_v59 = vadd.f32 %v11376_v43, %v7095_v5  ;;  %v7145_v30 = vmul.f32 %v7115_v27, %v7115_v27  ;;  %v829_v43 = vpop.f32.mrb[13].mxu1 }
 0x219   :  { %11369 = vst [vmem:[#allocation235_spill] sm:$0xff] %v7112_v53  ;;  %11370 = vst [vmem:[#allocation236_spill] sm:$0xff] %v7115_v27  ;;  %v7149_v3 = vmul.f32 %v6376_v16, %v7115_v27  ;;  %v7153_v6 = vmul.f32 %v11379_v12, %v7115_v27  ;;  %v7157_v14 = vmul.f32 %v6284_v50, %v7115_v27 }
 0x21a   :  { %11371 = vst [vmem:[#allocation237_spill] sm:$0xff] %v7121_v45  ;;  %11372 = vst [vmem:[#allocation238_spill] sm:$0xff] %v7125_v62  ;;  %v7160_v5 = vadd.f32 %v6854_v26, %v827_v20  ;;  %v7164_v58 = vmul.f32 %v6392_v61, %v7115_v27  ;;  %v7168_v16 = vmul.f32 %v6400_v13, %v7115_v27 }
 0x21b   :  { %11373 = vst [vmem:[#allocation239_spill] sm:$0xff] %v7129_v34  ;;  %11374 = vst [vmem:[#allocation240_spill] sm:$0xff] %v7133_v46  ;;  %v7172_v12 = vmul.f32 %v6354_v35, %v7115_v27  ;;  %v7175_v63 = vadd.f32 %v6863_v11, %v829_v43  ;;  %v7179_v20 = vmul.f32 %v6412_v31, %v7115_v27  ;;  %v11391_v11 = vld [vmem:[#allocation99_spill] sm:$0xff]  ;;  %v11393_v31 = vld [vmem:[#allocation113_spill] sm:$0xff] }
 0x21c   :  { %11375 = vst [vmem:[#allocation241_spill] sm:$0xff] %v7137_v52  ;;  %11377 = vst [vmem:[#allocation242_spill] sm:$0xff] %v7141_v59  ;;  %v7183_v26 = vmul.f32 %v6416_v8, %v7115_v27  ;;  %v7187_v61 = vadd.f32 %v6658_v55, %v7149_v3  ;;  %v5340_v13 = vpack.c.bf16 %v7160_v5, %v7102_v51  ;;  %v11395_v55 = vld [vmem:[#allocation49_spill] sm:$0xff]  ;;  %v11413_v34 = vld [vmem:[#allocation94_spill] sm:$0xff] }
 0x21d   :  { %11378 = vst [vmem:[#allocation243_spill] sm:$0xff] %v7149_v3  ;;  %11380 = vst [vmem:[#allocation244_spill] sm:$0xff] %v7153_v6  ;;  %v7193_v35 = vmul.f32 %v7160_v5, %v7160_v5  ;;  %v7197_v43 = vadd.f32 %v11391_v11, %v7099_v39  ;;  %v7201_v50 = vadd.f32 %v11393_v31, %v7153_v6  ;;  %v11402_v11 = vld [vmem:[#allocation38_spill] sm:$0xff] }
 0x21e   :  { %11381 = vst [vmem:[#allocation245_spill] sm:$0xff] %v7157_v14  ;;  %11382 = vst [vmem:[#allocation246_spill] sm:$0xff] %v7160_v5  ;;  %v5338_v8 = vpack.c.bf16 %v7175_v63, %v7115_v27  ;;  %v963_v3 = vmul.f32 %v7175_v63, %v7175_v63  ;;  %v7209_v51 = vmul.f32 %v11395_v55, %v7175_v63  ;;  %v11397_v5 = vld [vmem:[#allocation28_spill] sm:$0xff]  ;;  %v11400_v27 = vld [vmem:[#allocation57_spill] sm:$0xff] }
 0x21f   :  { %11383 = vst [vmem:[#allocation247_spill] sm:$0xff] %v7164_v58  ;;  %11384 = vst [vmem:[#allocation248_spill] sm:$0xff] %v7168_v16  ;;  %v7219_v6 = vmul.f32 %v6337_v37, %v7175_v63  ;;  %v7223_v31 = vmul.f32 %v11400_v27, %v7175_v63  ;;  %v11406_v39 = vld [vmem:[#allocation42_spill] sm:$0xff]  ;;  %v11408_v37 = vld [vmem:[#allocation65_spill] sm:$0xff] }
 0x220   :  { %11385 = vst [vmem:[#allocation249_spill] sm:$0xff] %v7172_v12  ;;  %11386 = vst [vmem:[#allocation250_spill] sm:$0xff] %v7175_v63  ;;  %5339 = vmatprep.subr.bf16.mxu0 %v5338_v8  ;;  %v5350_v55 = vpack.c.bf16 %v963_v3, %v7145_v30  ;;  %v7236_v59 = vmul.f32 %v11406_v39, %v7175_v63  ;;  %v7240_v44 = vmul.f32 %v11408_v37, %v7175_v63  ;;  %v11410_v27 = vld [vmem:[#allocation125_spill] sm:$0xff]  ;;  %v11411_v8 = vld [vmem:[#allocation126_spill] sm:$0xff] }
 0x221   :  { %11387 = vst [vmem:[#allocation251_spill] sm:$0xff] %v7179_v20  ;;  %11388 = vst [vmem:[#allocation252_spill] sm:$0xff] %v7183_v26  ;;  %5341 = vmatpush1.bf16.msra.mxu0 %v5340_v13  ;;  %v11412_v30 = vld [vmem:[#allocation100_spill] sm:$0xff]  ;;  %v1948_v39 = vadd.f32 %v11413_v34, %v7041_v56 }
 0x222   :  { %11389 = vst [vmem:[#allocation253_spill] sm:$0xff] %v7187_v61  ;;  %11390 = vst [vmem:[#allocation254_spill] sm:$0xff] %v7193_v35  ;;  %v7213_v61 = vmul.f32 %v11397_v5, %v7175_v63  ;;  %v11404_v5 = vld [vmem:[#allocation40_spill] sm:$0xff]  ;;  %v7254_v35 = vpop.permute.xlu1 %1533 }
 0x223   :  { %11392 = vst [vmem:[#allocation255_spill] sm:$0xff] %v7197_v43  ;;  %11394 = vst [vmem:[#allocation256_spill] sm:$0xff] %v7201_v50  ;;  %v7227_v50 = vmul.f32 %v11402_v11, %v7175_v63  ;;  %v7232_v43 = vmul.f32 %v11404_v5, %v7175_v63  ;;  %v7244_v11 = vadd.f32 %v11410_v27, %v7209_v51  ;;  %v11416_v13 = vld [vmem:[#allocation108_spill] sm:$0xff] }
 0x224   :  { %11396 = vst [vmem:[#allocation257_spill] sm:$0xff] %v7209_v51  ;;  %11398 = vst [vmem:[#allocation258_spill] sm:$0xff] %v7213_v61  ;;  %v7248_v3 = vadd.f32 %v11411_v8, %v7213_v61  ;;  %v1946_v5 = vadd.f32 %v11412_v30, %v6992_v24  ;;  %v11415_v63 = vpack.c.bf16 %v6975_v21, %v6913_v19  ;;  %v11417_v27 = vld [vmem:[#allocation120_spill] sm:$0xff]  ;;  %v11418_v8 = vld [vmem:[#allocation131_spill] sm:$0xff] }
 0x225   :  { %11399 = vst [vmem:[#allocation259_spill] sm:$0xff] %v7219_v6  ;;  %11401 = vst [vmem:[#allocation260_spill] sm:$0xff] %v7223_v31  ;;  %v7261_v51 = vadd.f32 %v11416_v13, %v7108_v2  ;;  %v7265_v61 = vadd.f32 %v11417_v27, %v7157_v14  ;;  %v7269_v24 = vadd.f32 %v11418_v8, %v7219_v6  ;;  %v11419_v56 = vld [vmem:[#allocation92_spill] sm:$0xff]  ;;  %v11420_v30 = vld [vmem:[#allocation107_spill] sm:$0xff] }
 0x226   :  { %11403 = vst [vmem:[#allocation261_spill] sm:$0xff] %v7227_v50  ;;  %11405 = vst [vmem:[#allocation262_spill] sm:$0xff] %v7232_v43  ;;  %5343 = vmatprep.subr.bf16.mxu0 %v11415_v63  ;;  %v1956_v34 = vadd.f32 %v11419_v56, %v6932_v10  ;;  %v1958_v37 = vadd.f32 %v11420_v30, %v6996_v57  ;;  %v11421_v21 = vld [vmem:[#allocation101_spill] sm:$0xff]  ;;  %v11422_v19 = vld [vmem:[#allocation114_spill] sm:$0xff]  ;;  %v1822_v56 = vsub.f32 1.0, %v7254_v35 }
 0x227   :  { %11407 = vst [vmem:[#allocation263_spill] sm:$0xff] %v7236_v59  ;;  %11409 = vst [vmem:[#allocation264_spill] sm:$0xff] %v7240_v44  ;;  %v1960_v63 = vadd.f32 %v11421_v21, %v7048_v33  ;;  %v7279_v2 = vadd.f32 %v11422_v19, %v7112_v53  ;;  %v11423_v14 = vld [vmem:[#allocation127_spill] sm:$0xff]  ;;  %v11425_v6 = vld [vmem:[#allocation137_spill] sm:$0xff] }
 0x228   :  { %11414 = vst [vmem:[#allocation265_spill] sm:$0xff] %v7254_v35  ;;  %v7283_v27 = vadd.f32 %v11423_v14, %v7164_v58  ;;  %v11424_v13 = vld [vmem:[#allocation3_spill] sm:$0xff]  ;;  %v7289_v10 = vadd.f32 %v11425_v6, %v7223_v31  ;;  %v11426_v57 = vld [vmem:[#allocation109_spill] sm:$0xff]  ;;  %v11428_v53 = vld [vmem:[#allocation110_spill] sm:$0xff]  ;;  %v11429_v58 = vpack.c.bf16 %v6961_v25, %v6901_v40  ;;  %v11430_v14 = vmov 0.0  }
 0x229   :  { %4763 = vmatmul.mubr.msk.f32.vlgmr.msra.gmra.mrb[12].mxu0 %vm868_vm3, %v11424_v13  ;;  %v1968_v30 = vadd.f32 %v11426_v57, %v6936_v47  ;;  %v11427_v33 = vld [vmem:[#allocation95_spill] sm:$0xff]  ;;  %v1972_v19 = vadd.f32 %v11428_v53, %v7052_v17  ;;  %v11433_v57 = vld [vmem:[#allocation138_spill] sm:$0xff]  ;;  %v11434_v17 = vpack.c.bf16 %v7091_v28, %v7029_v32  ;;  %v11442_v32 = vld [vmem:[#allocation112_spill] sm:$0xff] }
 0x22a   :  { %v1970_v21 = vadd.f32 %v11427_v33, %v7005_v15  ;;  %5345 = vmatpush1.bf16.msra.mxu0 %v11429_v58  ;;  %945 = vmatprep.mubr.f32.mxu0 %v11430_v14  ;;  %v11431_v31 = vld [vmem:[#allocation123_spill] sm:$0xff]  ;;  %v7308_v15 = vadd.f32 %v11433_v57, %v7227_v50  ;;  %v11436_v58 = vld [vmem:[#allocation106_spill] sm:$0xff]  ;;  %v11440_v57 = vld [vmem:[#allocation140_spill] sm:$0xff] }
 0x22b   :  { %v1974_v6 = vadd.f32 %v11431_v31, %v7121_v45  ;;  %v11432_v8 = vld [vmem:[#allocation135_spill] sm:$0xff]  ;;  %5347 = vmatprep.subr.bf16.mxu0 %v11434_v17  ;;  %v1982_v40 = vadd.f32 %v11436_v58, %v7009_v22  ;;  %v11438_v31 = vld [vmem:[#allocation128_spill] sm:$0xff]  ;;  %v1990_v33 = vadd.f32 %v11440_v57, %v7232_v43  ;;  %v11447_v43 = vld [vmem:[#allocation142_spill] sm:$0xff] }
 0x22c   :  { %v1976_v47 = vadd.f32 %v11432_v8, %v7168_v16  ;;  %v11435_v35 = vld [vmem:[#allocation103_spill] sm:$0xff]  ;;  %v1986_v16 = vadd.f32 %v11438_v31, %v7125_v62  ;;  %v11439_v8 = vld [vmem:[#allocation136_spill] sm:$0xff]  ;;  %v11445_v62 = vld [vmem:[#allocation134_spill] sm:$0xff]  ;;  %v2002_v57 = vadd.f32 %v11447_v43, %v7236_v59 }
 0x22d   :  { %v1980_v25 = vadd.f32 %v11435_v35, %v6940_v54  ;;  %v11437_v53 = vld [vmem:[#allocation115_spill] sm:$0xff]  ;;  %v1988_v50 = vadd.f32 %v11439_v8, %v7172_v12  ;;  %v1994_v54 = vadd.f32 %v11442_v32, %v7017_v41  ;;  %v11443_v35 = vld [vmem:[#allocation5_spill] sm:$0xff]  ;;  %v1998_v31 = vadd.f32 %v11445_v62, %v7133_v46  ;;  %v11460_v32 = vld [vmem:[#allocation242_spill] sm:$0xff] }
 0x22e   :  { %v1984_v45 = vadd.f32 %v11437_v53, %v7056_v48  ;;  %v11441_v17 = vld [vmem:[#allocation111_spill] sm:$0xff]  ;;  %4764 = vmatmul.mubr.msk.f32.gmra.mrb[14].mxu0 %vm868_vm3, %v11443_v35  ;;  %v11444_v48 = vld [vmem:[#allocation122_spill] sm:$0xff]  ;;  %v11446_v12 = vld [vmem:[#allocation141_spill] sm:$0xff]  ;;  %v7339_v53 = vmul.f32 3e+38, %v1822_v56  ;;  %v11449_v41 = vpack.c.bf16 %v7077_v9, %v7013_v29 }
 0x22f   :  { %v1992_v28 = vadd.f32 %v11441_v17, %v6947_v18  ;;  %v1996_v22 = vadd.f32 %v11444_v48, %v7063_v1  ;;  %v2000_v8 = vadd.f32 %v11446_v12, %v7179_v20  ;;  %1028 = vmatprep.mubr.f32.mxu0 %v11430_v14  ;;  %v11450_v18 = vld [vmem:[#allocation117_spill] sm:$0xff]  ;;  %v11453_v59 = vld [vmem:[#allocation139_spill] sm:$0xff]  ;;  %v11455_v9 = vld [vmem:[#allocation146_spill] sm:$0xff] }
 0x230   :  { %11448 = vst [vmem:[#allocation3_spill] sm:$0xff] %v7339_v53  ;;  %5349 = vmatpush1.bf16.msra.mxu0 %v11449_v41  ;;  %v2004_v1 = vadd.f32 %v11450_v18, %v6951_v60  ;;  %v11451_v48 = vld [vmem:[#allocation121_spill] sm:$0xff]  ;;  %v2010_v56 = vadd.f32 %v11453_v59, %v7137_v52  ;;  %v11454_v53 = vld [vmem:[#allocation143_spill] sm:$0xff]  ;;  %v2014_v29 = vadd.f32 %v11455_v9, %v7240_v44  ;;  %v11456_v18 = vld [vmem:[#allocation254_spill] sm:$0xff] }
 0x231   :  { %v2006_v46 = vadd.f32 %v11451_v48, %v7021_v0  ;;  %v11452_v62 = vld [vmem:[#allocation129_spill] sm:$0xff]  ;;  %5351 = vmatprep.subr.bf16.mxu0 %v5350_v55  ;;  %v2012_v43 = vadd.f32 %v11454_v53, %v7183_v26  ;;  %v2122_v41 = vmin.f32 %v6955_v42, %v7025_v4  ;;  %v2144_v60 = vmin.f32 %v6965_v49, %v7081_v7  ;;  %v11457_v26 = vld [vmem:[#allocation239_spill] sm:$0xff]  ;;  %v11459_v44 = vld [vmem:[#allocation230_spill] sm:$0xff] }
 0x232   :  { %v2008_v20 = vadd.f32 %v11452_v62, %v7067_v36  ;;  %v2166_v0 = vmin.f32 %v6969_v23, %v1946_v5  ;;  %v2188_v48 = vmin.f32 %v1956_v34, %v1958_v37  ;;  %v2210_v36 = vmin.f32 %v1968_v30, %v1970_v21  ;;  %v11461_v34 = vld [vmem:[#allocation255_spill] sm:$0xff] }
 0x233   :  { %v2123_v55 = vmin.f32 %v2122_v41, %v7071_v38  ;;  %v2232_v62 = vmin.f32 %v1980_v25, %v1982_v40  ;;  %v2254_v52 = vmin.f32 %v1992_v28, %v1994_v54  ;;  %v2276_v59 = vmin.f32 %v2004_v1, %v2006_v46 }
 0x234   :  { %v11458_v53 = vpack.c.bf16 %v11456_v18, %v11457_v26  ;;  %v2145_v9 = vmin.f32 %v2144_v60, %v11459_v44  ;;  %v2167_v12 = vmin.f32 %v2166_v0, %v1948_v39  ;;  %v2189_v42 = vmin.f32 %v2188_v48, %v1960_v63 }
 0x235   :  { %v2211_v4 = vmin.f32 %v2210_v36, %v1972_v19  ;;  %v2124_v7 = vmin.f32 %v2123_v55, %v11460_v32  ;;  %v2233_v49 = vmin.f32 %v2232_v62, %v1984_v45  ;;  %v2255_v5 = vmin.f32 %v2254_v52, %v1996_v22  ;;  %v11463_v45 = vld [vmem:[#allocation256_spill] sm:$0xff] }
 0x236   :  { %5353 = vmatpush1.bf16.msra.mxu0 %v11458_v53  ;;  %v2277_v37 = vmin.f32 %v2276_v59, %v2008_v20  ;;  %v2146_v23 = vmin.f32 %v2145_v9, %v11461_v34  ;;  %v2168_v38 = vmin.f32 %v2167_v12, %v7261_v51  ;;  %v2190_v54 = vmin.f32 %v2189_v42, %v7279_v2  ;;  %v11462_v53 = vld [vmem:[#allocation253_spill] sm:$0xff] }
 0x237   :  { %v2212_v1 = vmin.f32 %v2211_v4, %v1974_v6  ;;  %v2125_v44 = vmin.f32 %v2124_v7, %v11462_v53  ;;  %v2234_v60 = vmin.f32 %v2233_v49, %v1986_v16  ;;  %v2256_v48 = vmin.f32 %v2255_v5, %v1998_v31  ;;  %v11464_v49 = vld [vmem:[#allocation41_spill] sm:$0xff] }
 0x238   :  { %v2278_v36 = vmin.f32 %v2277_v37, %v2010_v56  ;;  %v2147_v22 = vmin.f32 %v2146_v23, %v11463_v45  ;;  %v2169_v62 = vmin.f32 %v2168_v38, %v7265_v61  ;;  %v2191_v59 = vmin.f32 %v2190_v54, %v7283_v27  ;;  %v11466_v45 = vld [vmem:[#allocation8_spill] sm:$0xff] }
 0x239   :  { %4765 = vmatmul.mubr.msk.f32.vlgmr.msra.gmra.mrb[16].mxu0 %vm868_vm3, %v11424_v13  ;;  %v2213_v12 = vmin.f32 %v2212_v1, %v1976_v47  ;;  %v2126_v2 = vmin.f32 %v2125_v44, %v7244_v11  ;;  %v2235_v6 = vmin.f32 %v2234_v60, %v1988_v50  ;;  %v2257_v39 = vmin.f32 %v2256_v48, %v2000_v8 }
 0x23a   :  { %1034 = vmatprep.mubr.f32.mxu0 %v11430_v14  ;;  %v2279_v18 = vmin.f32 %v2278_v36, %v2012_v43  ;;  %v2148_v0 = vmin.f32 %v2147_v22, %v7248_v3  ;;  %v2170_v16 = vmin.f32 %v2169_v62, %v7269_v24  ;;  %v2192_v31 = vmin.f32 %v2191_v59, %v7289_v10  ;;  %v11465_v36 = vld [vmem:[#allocation192_spill] sm:$0xff] }
 0x23b   :  { %v2214_v14 = vmin.f32 %v2213_v12, %v7308_v15  ;;  %v2127_v61 = vrot.slane %v2126_v2, 4  ;;  %v2236_v51 = vmin.f32 %v2235_v6, %v1990_v33  ;;  %v2258_v27 = vmin.f32 %v2257_v39, %v2002_v57  ;;  %v11468_v39 = vld [vmem:[#allocation203_spill] sm:$0xff] }
 0x23c   :  { %v2280_v47 = vmin.f32 %v2279_v18, %v2014_v29  ;;  %v2149_v46 = vrot.slane %v2148_v0, 4  ;;  %v2171_v52 = vrot.slane %v2170_v16, 4  ;;  %v2193_v50 = vrot.slane %v2192_v31, 4  ;;  %v11469_v18 = vld [vmem:[#allocation29_spill] sm:$0xff] }
 0x23d   :  { %4766 = vmatmul.mubr.msk.f32.gmra.mrb[18].mxu0 %vm868_vm3, %v11443_v35  ;;  %v2215_v20 = vrot.slane %v2214_v14, 4  ;;  %v2128_v26 = vmin.f32 %v2126_v2, %v2127_v61  ;;  %v2237_v11 = vrot.slane %v2236_v51, 4  ;;  %v2259_v43 = vrot.slane %v2258_v27, 4  ;;  %v11474_v61 = vld [vmem:[#allocation223_spill] sm:$0xff] }
 0x23e   :  { %v2281_v8 = vrot.slane %v2280_v47, 4  ;;  %v2150_v24 = vmin.f32 %v2148_v0, %v2149_v46  ;;  %v2172_v10 = vmin.f32 %v2170_v16, %v2171_v52  ;;  %v2194_v3 = vmin.f32 %v2192_v31, %v2193_v50  ;;  %v11471_v16 = vld [vmem:[#allocation212_spill] sm:$0xff]  ;;  %v11472_v31 = vld [vmem:[#allocation9_spill] sm:$0xff]  ;;  %v11478_v52 = vld [vmem:[#allocation43_spill] sm:$0xff] }
 0x23f   :  { %v2216_v15 = vmin.f32 %v2214_v14, %v2215_v20  ;;  %v2129_v30 = vrot.slane %v2128_v26, 2  ;;  %v2238_v35 = vmin.f32 %v2236_v51, %v2237_v11  ;;  %v2260_v13 = vmin.f32 %v2258_v27, %v2259_v43  ;;  %v11475_v51 = vld [vmem:[#allocation13_spill] sm:$0xff]  ;;  %v11480_v20 = vld [vmem:[#allocation246_spill] sm:$0xff]  ;;  %v11483_v43 = vld [vmem:[#allocation31_spill] sm:$0xff] }
 0x240   :  { %v2282_v33 = vmin.f32 %v2280_v47, %v2281_v8  ;;  %vm3049_vm3 = vcmask 1043459   ;;  %v2151_v57 = vrot.slane %v2150_v24, 2  ;;  %v2173_v21 = vrot.slane %v2172_v10, 2  ;;  %v11477_v46 = vld [vmem:[#allocation233_spill] sm:$0xff] }
 0x241   :  { %v2195_v63 = vrot.slane %v2194_v3, 2  ;;  %v2217_v19 = vrot.slane %v2216_v15, 2  ;;  %v2130_v25 = vmin.f32 %v2128_v26, %v2129_v30  ;;  %v2239_v40 = vrot.slane %v2238_v35, 2  ;;  %v11481_v26 = vld [vmem:[#allocation49_spill] sm:$0xff] }
 0x242   :  { %v2261_v28 = vrot.slane %v2260_v13, 2  ;;  %v2283_v32 = vrot.slane %v2282_v33, 2  ;;  %v2152_v56 = vmin.f32 %v2150_v24, %v2151_v57  ;;  %v2174_v9 = vmin.f32 %v2172_v10, %v2173_v21  ;;  %v11485_v10 = vld [vmem:[#allocation35_spill] sm:$0xff]  ;;  %v11491_v57 = vld [vmem:[#allocation28_spill] sm:$0xff] }
 0x243   :  { %v2196_v29 = vmin.f32 %v2194_v3, %v2195_v63  ;;  %v2218_v41 = vmin.f32 %v2216_v15, %v2217_v19  ;;  %v2131_v55 = vrot.slane %v2130_v25, 1  ;;  %v2240_v42 = vmin.f32 %v2238_v35, %v2239_v40  ;;  %v11487_v15 = vld [vmem:[#allocation14_spill] sm:$0xff]  ;;  %v11493_v63 = vld [vmem:[#allocation33_spill] sm:$0xff] }
 0x244   :  { %v2262_v4 = vmin.f32 %v2260_v13, %v2261_v28  ;;  %v2284_v7 = vmin.f32 %v2282_v33, %v2283_v32  ;;  %vm3007_vm9 = vcmp.gt.f32.partialorder %v11464_v49, 0.0  ;;  %v2153_v5 = vrot.slane %v2152_v56, 1  ;;  %v11489_v35 = vld [vmem:[#allocation22_spill] sm:$0xff] }
 0x245   :  { %v2175_v37 = vrot.slane %v2174_v9, 1  ;;  %v2197_v34 = vrot.slane %v2196_v29, 1  ;;  %v2219_v23 = vrot.slane %v2218_v41, 1  ;;  %v2132_v38 = vmin.f32 %v2130_v25, %v2131_v55  ;;  %v11495_v25 = vld [vmem:[#allocation11_spill] sm:$0xff]  ;;  %v11497_v32 = vld [vmem:[#allocation18_spill] sm:$0xff] }
 0x246   :  { %v2241_v54 = vrot.slane %v2240_v42, 1  ;;  %v2263_v1 = vrot.slane %v2262_v4, 1  ;;  %v2285_v53 = vrot.slane %v2284_v7, 1  ;;  %v2154_v44 = vmin.f32 %v2152_v56, %v2153_v5  ;;  %v11505_v5 = vld [vmem:[#allocation37_spill] sm:$0xff] }
 0x247   :  { %v2176_v60 = vmin.f32 %v2174_v9, %v2175_v37  ;;  %v2198_v48 = vmin.f32 %v2196_v29, %v2197_v34  ;;  %v7388_v22 = vmul.f32 %v11466_v45, %v11465_v36  ;;  %v2220_v62 = vmin.f32 %v2218_v41, %v2219_v23  ;;  %v11499_v9 = vld [vmem:[#allocation26_spill] sm:$0xff]  ;;  %v11501_v41 = vld [vmem:[#allocation32_spill] sm:$0xff]  ;;  %v11507_v34 = vld [vmem:[#allocation15_spill] sm:$0xff] }
 0x248   :  { %v2242_v59 = vmin.f32 %v2240_v42, %v2241_v54  ;;  %v2264_v12 = vmin.f32 %v2262_v4, %v2263_v1  ;;  %v2286_v2 = vmin.f32 %v2284_v7, %v2285_v53  ;;  %v3059_v6 = vsel %vm3045_vm0, %v2154_v44, %v2132_v38  ;;  %v11503_v4 = vld [vmem:[#allocation10_spill] sm:$0xff]  ;;  %v11510_v54 = vld [vmem:[#allocation23_spill] sm:$0xff] }
 0x249   :  { %11467 = vst [vmem:[#allocation5_spill] sm:$0xff] %v7388_v22  ;;  %v7393_v0 = vmul.f32 %v11469_v18, %v11468_v39  ;;  %v7397_v14 = vmul.f32 %v11472_v31, %v11471_v16  ;;  %v7401_v27 = vmul.f32 %v11475_v51, %v11474_v61  ;;  %v3060_v47 = vsel %vm3047_vm4, %v2176_v60, %v3059_v6  ;;  %v11512_v53 = vld [vmem:[#allocation51_spill] sm:$0xff]  ;;  %v11514_v60 = vld [vmem:[#allocation57_spill] sm:$0xff] }
 0x24a   :  { %v7406_v50 = vmul.f32 %v11478_v52, %v11477_v46  ;;  %v7410_v11 = vmul.f32 %v11481_v26, %v11480_v20  ;;  %v7414_v8 = vmul.f32 %v11483_v43, %v11468_v39  ;;  %v3061_v24 = vsel %vm3049_vm3, %v2198_v48, %v3060_v47  ;;  %v11516_v45 = vld [vmem:[#allocation39_spill] sm:$0xff]  ;;  %v11526_v52 = vld [vmem:[#allocation38_spill] sm:$0xff]  ;;  %v11528_v43 = vld [vmem:[#allocation16_spill] sm:$0xff] }
 0x24b   :  { %11470 = vst [vmem:[#allocation254_spill] sm:$0xff] %v7393_v0  ;;  %11473 = vst [vmem:[#allocation239_spill] sm:$0xff] %v7397_v14  ;;  %v7419_v3 = vmul.f32 %v11485_v10, %v11471_v16  ;;  %v7423_v30 = vmul.f32 %v11487_v15, %v11474_v61  ;;  %v7427_v13 = vmul.f32 %v11489_v35, %v11477_v46  ;;  %v11522_v18 = vld [vmem:[#allocation47_spill] sm:$0xff]  ;;  %v11530_v10 = vld [vmem:[#allocation17_spill] sm:$0xff] }
 0x24c   :  { %11476 = vst [vmem:[#allocation230_spill] sm:$0xff] %v7401_v27  ;;  %11479 = vst [vmem:[#allocation242_spill] sm:$0xff] %v7406_v50  ;;  %v3062_v33 = vsel %vm3051_vm5, %v2220_v62, %v3061_v24  ;;  %v7432_v21 = vmul.f32 %v11491_v57, %v11480_v20  ;;  %v7436_v19 = vmul.f32 %v11493_v63, %v11468_v39  ;;  %v11524_v51 = vld [vmem:[#allocation55_spill] sm:$0xff]  ;;  %v11532_v35 = vld [vmem:[#allocation24_spill] sm:$0xff] }
 0x24d   :  { %11482 = vst [vmem:[#allocation255_spill] sm:$0xff] %v7410_v11  ;;  %11484 = vst [vmem:[#allocation253_spill] sm:$0xff] %v7414_v8  ;;  %v7440_v40 = vmul.f32 %v11495_v25, %v11471_v16  ;;  %v3063_v28 = vsel %vm3053_vm6, %v2242_v59, %v3062_v33  ;;  %v7445_v56 = vmul.f32 %v11497_v32, %v11474_v61  ;;  %v11518_v59 = vld [vmem:[#allocation12_spill] sm:$0xff]  ;;  %v11534_v57 = vld [vmem:[#allocation30_spill] sm:$0xff] }
 0x24e   :  { %11486 = vst [vmem:[#allocation256_spill] sm:$0xff] %v7419_v3  ;;  %11488 = vst [vmem:[#allocation8_spill] sm:$0xff] %v7423_v30  ;;  %v7449_v29 = vmul.f32 %v11499_v9, %v11477_v46  ;;  %v7453_v55 = vmul.f32 %v11501_v41, %v11480_v20  ;;  %v3064_v42 = vsel %vm3055_vm7, %v2264_v12, %v3063_v28  ;;  %v11536_v25 = vld [vmem:[#allocation36_spill] sm:$0xff] }
 0x24f   :  { %11490 = vst [vmem:[#allocation29_spill] sm:$0xff] %v7427_v13  ;;  %11492 = vst [vmem:[#allocation9_spill] sm:$0xff] %v7432_v21  ;;  %v7458_v7 = vmul.f32 %v11503_v4, %v11465_v36  ;;  %v7462_v37 = vmul.f32 %v11505_v5, %v11468_v39  ;;  %v7466_v23 = vmul.f32 %v11507_v34, %v11471_v16  ;;  %v11538_v32 = vld [vmem:[#allocation40_spill] sm:$0xff]  ;;  %v11542_v4 = vld [vmem:[#allocation21_spill] sm:$0xff] }
 0x250   :  { %11494 = vst [vmem:[#allocation13_spill] sm:$0xff] %v7436_v19  ;;  %11496 = vst [vmem:[#allocation43_spill] sm:$0xff] %v7440_v40  ;;  %v7469_v38 = vsel %vm3057_vm8, %v2286_v2, %v3064_v42  ;;  %v7473_v1 = vmul.f32 %v11510_v54, %v11474_v61  ;;  %v7477_v44 = vmul.f32 %v11512_v53, %v11477_v46  ;;  %v11520_v2 = vld [vmem:[#allocation19_spill] sm:$0xff]  ;;  %v11540_v41 = vld [vmem:[#allocation20_spill] sm:$0xff] }
 0x251   :  { %11498 = vst [vmem:[#allocation49_spill] sm:$0xff] %v7445_v56  ;;  %11500 = vst [vmem:[#allocation31_spill] sm:$0xff] %v7449_v29  ;;  %v7481_v48 = vmul.f32 %v11514_v60, %v11480_v20  ;;  %4767 = vmatprep.mubr.msk.f32.mxu1 %vm3007_vm9, %v7469_v38  ;;  %v7488_v62 = vmul.f32 %v11516_v45, %v11465_v36  ;;  %v7492_v12 = vmul.f32 %v11518_v59, %v11468_v39  ;;  %v11544_v34 = vld [vmem:[#allocation27_spill] sm:$0xff]  ;;  %v11546_v53 = vld [vmem:[#allocation34_spill] sm:$0xff] }
 0x252   :  { %11502 = vst [vmem:[#allocation35_spill] sm:$0xff] %v7453_v55  ;;  %11504 = vst [vmem:[#allocation14_spill] sm:$0xff] %v7458_v7  ;;  %v7496_v6 = vmul.f32 %v11520_v2, %v11471_v16  ;;  %v7500_v31 = vmul.f32 %v11522_v18, %v11474_v61  ;;  %v7504_v47 = vmul.f32 %v11524_v51, %v11477_v46  ;;  %v11548_v45 = vld [vmem:[#allocation61_spill] sm:$0xff]  ;;  %v11550_v2 = vld [vmem:[#allocation42_spill] sm:$0xff] }
 0x253   :  { %11506 = vst [vmem:[#allocation22_spill] sm:$0xff] %v7462_v37  ;;  %11508 = vst [vmem:[#allocation28_spill] sm:$0xff] %v7466_v23  ;;  %v7508_v26 = vmul.f32 %v11526_v52, %v11480_v20  ;;  %v7512_v24 = vmul.f32 %v11528_v43, %v11465_v36  ;;  %v7516_v15 = vmul.f32 %v11530_v10, %v11468_v39  ;;  %v11552_v51 = vld [vmem:[#allocation25_spill] sm:$0xff] }
 0x254   :  { %11509 = vst [vmem:[#allocation33_spill] sm:$0xff] %v7469_v38  ;;  %11511 = vst [vmem:[#allocation11_spill] sm:$0xff] %v7473_v1  ;;  %v7520_v33 = vmul.f32 %v11532_v35, %v11471_v16  ;;  %v7524_v63 = vmul.f32 %v11534_v57, %v11474_v61  ;;  %v7528_v28 = vmul.f32 %v11536_v25, %v11477_v46  ;;  %v11554_v43 = vld [vmem:[#allocation45_spill] sm:$0xff]  ;;  %v11558_v25 = vld [vmem:[#allocation59_spill] sm:$0xff] }
 0x255   :  { %11513 = vst [vmem:[#allocation18_spill] sm:$0xff] %v7477_v44  ;;  %11515 = vst [vmem:[#allocation26_spill] sm:$0xff] %v7481_v48  ;;  %v7532_v9 = vmul.f32 %v11538_v32, %v11480_v20  ;;  %v7536_v42 = vmul.f32 %v11540_v41, %v11465_v36  ;;  %v7540_v5 = vmul.f32 %v11542_v4, %v11468_v39  ;;  %v11556_v35 = vld [vmem:[#allocation53_spill] sm:$0xff]  ;;  %v11560_v41 = vld [vmem:[#allocation63_spill] sm:$0xff] }
 0x256   :  { %11517 = vst [vmem:[#allocation32_spill] sm:$0xff] %v7488_v62  ;;  %11519 = vst [vmem:[#allocation10_spill] sm:$0xff] %v7492_v12  ;;  %v7544_v54 = vmul.f32 %v11544_v34, %v11471_v16  ;;  %v7548_v60 = vmul.f32 %v11546_v53, %v11474_v61  ;;  %v7552_v59 = vmul.f32 %v11548_v45, %v11477_v46  ;;  %v11562_v34 = vld [vmem:[#allocation65_spill] sm:$0xff]  ;;  %v11564_v45 = vld [vmem:[#allocation6_spill] sm:$0xff] }
 0x257   :  { %11521 = vst [vmem:[#allocation37_spill] sm:$0xff] %v7496_v6  ;;  %11523 = vst [vmem:[#allocation15_spill] sm:$0xff] %v7500_v31  ;;  %v7556_v18 = vmul.f32 %v11550_v2, %v11480_v20  ;;  %v7560_v52 = vmul.f32 %v11552_v51, %v11465_v36  ;;  %v7564_v10 = vmul.f32 %v11554_v43, %v11468_v39  ;;  %v11565_v2 = vld [vmem:[#allocation87_spill] sm:$0xff]  ;;  %v11566_v43 = vld [vmem:[#allocation96_spill] sm:$0xff] }
 0x258   :  { %11525 = vst [vmem:[#allocation23_spill] sm:$0xff] %v7504_v47  ;;  %11527 = vst [vmem:[#allocation51_spill] sm:$0xff] %v7508_v26  ;;  %v7568_v57 = vmul.f32 %v11556_v35, %v11471_v16  ;;  %v7572_v32 = vmul.f32 %v11558_v25, %v11474_v61  ;;  %v7576_v4 = vmul.f32 %v11560_v41, %v11477_v46  ;;  %v11567_v35 = vld [vmem:[#allocation91_spill] sm:$0xff]  ;;  %v11568_v25 = vld [vmem:[#allocation97_spill] sm:$0xff] }
 0x259   :  { %11529 = vst [vmem:[#allocation57_spill] sm:$0xff] %v7512_v24  ;;  %11531 = vst [vmem:[#allocation39_spill] sm:$0xff] %v7516_v15  ;;  %v7580_v53 = vmul.f32 %v11562_v34, %v11480_v20  ;;  %v1919_v51 = vadd.f32 %v11565_v2, %v11564_v45  ;;  %v1921_v38 = vadd.f32 %v11566_v43, %v7393_v0  ;;  %v11569_v41 = vld [vmem:[#allocation118_spill] sm:$0xff]  ;;  %v11570_v34 = vld [vmem:[#allocation125_spill] sm:$0xff] }
 0x25a   :  { %11533 = vst [vmem:[#allocation12_spill] sm:$0xff] %v7520_v33  ;;  %11535 = vst [vmem:[#allocation19_spill] sm:$0xff] %v7524_v63  ;;  %v1923_v16 = vadd.f32 %v11567_v35, %v7397_v14  ;;  %v7590_v61 = vadd.f32 %v11568_v25, %v7401_v27  ;;  %v7594_v46 = vadd.f32 %v11569_v41, %v7406_v50  ;;  %v11572_v39 = vld [vmem:[#allocation7_spill] sm:$0xff]  ;;  %v11573_v45 = vld [vmem:[#allocation88_spill] sm:$0xff] }
 0x25b   :  { %11537 = vst [vmem:[#allocation47_spill] sm:$0xff] %v7528_v28  ;;  %11539 = vst [vmem:[#allocation55_spill] sm:$0xff] %v7532_v9  ;;  %v7598_v20 = vadd.f32 %v11570_v34, %v7410_v11  ;;  %v1931_v2 = vadd.f32 %v11573_v45, %v11572_v39  ;;  %v11574_v0 = vld [vmem:[#allocation98_spill] sm:$0xff]  ;;  %v11575_v14 = vld [vmem:[#allocation104_spill] sm:$0xff] }
 0x25c   :  { %11541 = vst [vmem:[#allocation38_spill] sm:$0xff] %v7536_v42  ;;  %11543 = vst [vmem:[#allocation16_spill] sm:$0xff] %v7540_v5  ;;  %v1933_v43 = vadd.f32 %v11574_v0, %v7414_v8  ;;  %v1935_v35 = vadd.f32 %v11575_v14, %v7419_v3  ;;  %v11576_v27 = vld [vmem:[#allocation99_spill] sm:$0xff]  ;;  %v11577_v50 = vld [vmem:[#allocation113_spill] sm:$0xff] }
 0x25d   :  { %11545 = vst [vmem:[#allocation17_spill] sm:$0xff] %v7544_v54  ;;  %11547 = vst [vmem:[#allocation24_spill] sm:$0xff] %v7548_v60  ;;  %v7608_v25 = vadd.f32 %v11576_v27, %v7423_v30  ;;  %v7612_v41 = vadd.f32 %v11577_v50, %v7427_v13  ;;  %v11579_v11 = vld [vmem:[#allocation126_spill] sm:$0xff]  ;;  %v11581_v39 = vld [vmem:[#allocation89_spill] sm:$0xff] }
 0x25e   :  { %11549 = vst [vmem:[#allocation30_spill] sm:$0xff] %v7552_v59  ;;  %11551 = vst [vmem:[#allocation36_spill] sm:$0xff] %v7556_v18  ;;  %v7616_v34 = vadd.f32 %v11579_v11, %v7432_v21  ;;  %v1943_v45 = vadd.f32 %v11581_v39, %v7388_v22  ;;  %v11582_v8 = vld [vmem:[#allocation100_spill] sm:$0xff]  ;;  %v11583_v3 = vld [vmem:[#allocation94_spill] sm:$0xff] }
 0x25f   :  { %11553 = vst [vmem:[#allocation40_spill] sm:$0xff] %v7560_v52  ;;  %11555 = vst [vmem:[#allocation20_spill] sm:$0xff] %v7564_v10  ;;  %v1945_v0 = vadd.f32 %v11582_v8, %v7436_v19  ;;  %v1947_v14 = vadd.f32 %v11583_v3, %v7440_v40  ;;  %v11584_v30 = vld [vmem:[#allocation108_spill] sm:$0xff]  ;;  %v11586_v50 = vld [vmem:[#allocation131_spill] sm:$0xff] }
 0x260   :  { %11557 = vst [vmem:[#allocation21_spill] sm:$0xff] %v7568_v57  ;;  %11559 = vst [vmem:[#allocation27_spill] sm:$0xff] %v7572_v32  ;;  %v1949_v27 = vadd.f32 %v11584_v30, %v7445_v56  ;;  %v11585_v36 = vld [vmem:[#allocation120_spill] sm:$0xff]  ;;  %v7630_v49 = vadd.f32 %v11586_v50, %v7453_v55  ;;  %v11589_v22 = vld [vmem:[#allocation107_spill] sm:$0xff] }
 0x261   :  { %11561 = vst [vmem:[#allocation34_spill] sm:$0xff] %v7576_v4  ;;  %11563 = vst [vmem:[#allocation61_spill] sm:$0xff] %v7580_v53  ;;  %v1951_v13 = vadd.f32 %v11585_v36, %v7449_v29  ;;  %v11588_v21 = vld [vmem:[#allocation92_spill] sm:$0xff]  ;;  %v1957_v39 = vadd.f32 %v11589_v22, %v7462_v37  ;;  %v11590_v19 = vld [vmem:[#allocation101_spill] sm:$0xff] }
 0x262   :  { %11571 = vst [vmem:[#allocation42_spill] sm:$0xff] %v7598_v20  ;;  %11578 = vst [vmem:[#allocation25_spill] sm:$0xff] %v7612_v41  ;;  %v1955_v11 = vadd.f32 %v11588_v21, %v7458_v7  ;;  %v1959_v8 = vadd.f32 %v11590_v19, %v7466_v23  ;;  %v11591_v40 = vld [vmem:[#allocation114_spill] sm:$0xff]  ;;  %v11592_v56 = vld [vmem:[#allocation127_spill] sm:$0xff] }
 0x263   :  { %11580 = vst [vmem:[#allocation45_spill] sm:$0xff] %v7616_v34  ;;  %11587 = vst [vmem:[#allocation53_spill] sm:$0xff] %v7630_v49  ;;  %v1961_v3 = vadd.f32 %v11591_v40, %v7473_v1  ;;  %v1963_v30 = vadd.f32 %v11592_v56, %v7477_v44  ;;  %v11593_v29 = vld [vmem:[#allocation137_spill] sm:$0xff]  ;;  %v11595_v7 = vld [vmem:[#allocation95_spill] sm:$0xff] }
 0x264   :  { %v1965_v36 = vadd.f32 %v11593_v29, %v7481_v48  ;;  %v11594_v55 = vld [vmem:[#allocation109_spill] sm:$0xff]  ;;  %v1969_v21 = vadd.f32 %v11595_v7, %v7492_v12  ;;  %v11596_v37 = vld [vmem:[#allocation110_spill] sm:$0xff]  ;;  %v11597_v23 = vld [vmem:[#allocation123_spill] sm:$0xff] }
 0x265   :  { %v1967_v50 = vadd.f32 %v11594_v55, %v7488_v62  ;;  %v1971_v22 = vadd.f32 %v11596_v37, %v7496_v6  ;;  %v1973_v19 = vadd.f32 %v11597_v23, %v7500_v31  ;;  %v11598_v1 = vld [vmem:[#allocation135_spill] sm:$0xff]  ;;  %v11599_v44 = vld [vmem:[#allocation138_spill] sm:$0xff]  ;;  %v1981_v62 = vadd.f32 %v11436_v58, %v7516_v15  ;;  %v11602_v6 = vld [vmem:[#allocation128_spill] sm:$0xff] }
 0x266   :  { %v1975_v40 = vadd.f32 %v11598_v1, %v7504_v47  ;;  %v1977_v56 = vadd.f32 %v11599_v44, %v7508_v26  ;;  %v11600_v48 = vld [vmem:[#allocation103_spill] sm:$0xff]  ;;  %v1985_v37 = vadd.f32 %v11602_v6, %v7524_v63  ;;  %v11603_v31 = vld [vmem:[#allocation136_spill] sm:$0xff]  ;;  %v1991_v26 = vadd.f32 %v11441_v17, %v7536_v42  ;;  %v11606_v15 = vld [vmem:[#allocation122_spill] sm:$0xff] }
 0x267   :  { %v1979_v29 = vadd.f32 %v11600_v48, %v7512_v24  ;;  %v11601_v12 = vld [vmem:[#allocation115_spill] sm:$0xff]  ;;  %v1987_v23 = vadd.f32 %v11603_v31, %v7528_v28  ;;  %v11604_v47 = vld [vmem:[#allocation140_spill] sm:$0xff]  ;;  %v1995_v58 = vadd.f32 %v11606_v15, %v7544_v54  ;;  %v11608_v63 = vld [vmem:[#allocation141_spill] sm:$0xff]  ;;  %v2111_v44 = vmin.f32 %v1919_v51, %v1921_v38 }
 0x268   :  { %v1983_v7 = vadd.f32 %v11601_v12, %v7520_v33  ;;  %v1989_v1 = vadd.f32 %v11604_v47, %v7532_v9  ;;  %v11605_v24 = vld [vmem:[#allocation112_spill] sm:$0xff]  ;;  %v11607_v33 = vld [vmem:[#allocation134_spill] sm:$0xff]  ;;  %v1999_v6 = vadd.f32 %v11608_v63, %v7552_v59  ;;  %v11610_v9 = vld [vmem:[#allocation117_spill] sm:$0xff]  ;;  %v2177_v55 = vmin.f32 %v1955_v11, %v1957_v39 }
 0x269   :  { %v1993_v48 = vadd.f32 %v11605_v24, %v7540_v5  ;;  %v1997_v12 = vadd.f32 %v11607_v33, %v7548_v60  ;;  %v11609_v28 = vld [vmem:[#allocation142_spill] sm:$0xff]  ;;  %v2003_v47 = vadd.f32 %v11610_v9, %v7560_v52  ;;  %v11611_v42 = vld [vmem:[#allocation121_spill] sm:$0xff]  ;;  %v11613_v54 = vld [vmem:[#allocation139_spill] sm:$0xff]  ;;  %v2199_v52 = vmin.f32 %v1967_v50, %v1969_v21 }
 0x26a   :  { %v2001_v31 = vadd.f32 %v11609_v28, %v7556_v18  ;;  %v2005_v17 = vadd.f32 %v11611_v42, %v7564_v10  ;;  %v11612_v5 = vld [vmem:[#allocation129_spill] sm:$0xff]  ;;  %v2009_v15 = vadd.f32 %v11613_v54, %v7572_v32  ;;  %v11614_v60 = vld [vmem:[#allocation143_spill] sm:$0xff]  ;;  %v11615_v59 = vld [vmem:[#allocation146_spill] sm:$0xff]  ;;  %v2133_v18 = vmin.f32 %v1931_v2, %v1933_v43 }
 0x26b   :  { %v2007_v24 = vadd.f32 %v11612_v5, %v7568_v57  ;;  %v2011_v33 = vadd.f32 %v11614_v60, %v7576_v4  ;;  %v2013_v63 = vadd.f32 %v11615_v59, %v7580_v53  ;;  %v2155_v28 = vmin.f32 %v1943_v45, %v1945_v0  ;;  %v11681_v59 = vld [vmem:[#allocation56_spill] sm:$0xff] }
 0x26c   :  { %v2221_v9 = vmin.f32 %v1979_v29, %v1981_v62  ;;  %v2243_v49 = vmin.f32 %v1991_v26, %v1993_v48  ;;  %v2265_v10 = vmin.f32 %v2003_v47, %v2005_v17  ;;  %v2112_v42 = vmin.f32 %v2111_v44, %v1923_v16  ;;  %v11616_v16 = vld [vmem:[#allocation25_spill] sm:$0xff] }
 0x26d   :  { %v2134_v34 = vmin.f32 %v2133_v18, %v1935_v35  ;;  %v2156_v57 = vmin.f32 %v2155_v28, %v1947_v14  ;;  %v2178_v5 = vmin.f32 %v2177_v55, %v1959_v8  ;;  %v2200_v20 = vmin.f32 %v2199_v52, %v1971_v22  ;;  %v11617_v55 = vld [vmem:[#allocation42_spill] sm:$0xff] }
 0x26e   :  { %v2222_v32 = vmin.f32 %v2221_v9, %v1983_v7  ;;  %v2244_v54 = vmin.f32 %v2243_v49, %v1995_v58  ;;  %v2266_v41 = vmin.f32 %v2265_v10, %v2007_v24  ;;  %v2113_v4 = vmin.f32 %v2112_v42, %v7590_v61  ;;  %v11618_v7 = vld [vmem:[#allocation45_spill] sm:$0xff] }
 0x26f   :  { %v2135_v53 = vmin.f32 %v2134_v34, %v7608_v25  ;;  %v2157_v38 = vmin.f32 %v2156_v57, %v1949_v27  ;;  %v2179_v2 = vmin.f32 %v2178_v5, %v1961_v3  ;;  %v2201_v0 = vmin.f32 %v2200_v20, %v1973_v19  ;;  %v11619_v27 = vld [vmem:[#allocation53_spill] sm:$0xff] }
 0x270   :  { %v2223_v39 = vmin.f32 %v2222_v32, %v1985_v37  ;;  %v2245_v50 = vmin.f32 %v2244_v54, %v1997_v12  ;;  %v2267_v11 = vmin.f32 %v2266_v41, %v2009_v15  ;;  %v2114_v17 = vmin.f32 %v2113_v4, %v7594_v46 }
 0x271   :  { %v2136_v21 = vmin.f32 %v2135_v53, %v11616_v16  ;;  %v2158_v14 = vmin.f32 %v2157_v38, %v1951_v13  ;;  %v2180_v8 = vmin.f32 %v2179_v2, %v1963_v30  ;;  %v2202_v22 = vmin.f32 %v2201_v0, %v1975_v40 }
 0x272   :  { %v2224_v29 = vmin.f32 %v2223_v39, %v1987_v23  ;;  %v2246_v58 = vmin.f32 %v2245_v50, %v1999_v6  ;;  %v2268_v49 = vmin.f32 %v2267_v11, %v2011_v33  ;;  %v2115_v61 = vmin.f32 %v2114_v17, %v11617_v55 }
 0x273   :  { %v2137_v44 = vmin.f32 %v2136_v21, %v11618_v7  ;;  %v2159_v3 = vmin.f32 %v2158_v14, %v11619_v27  ;;  %v2181_v20 = vmin.f32 %v2180_v8, %v1965_v36  ;;  %v2203_v19 = vmin.f32 %v2202_v22, %v1977_v56  ;;  %v11624_v7 = vld [vmem:[#allocation67_spill] sm:$0xff] }
 0x274   :  { %v2225_v37 = vmin.f32 %v2224_v29, %v1989_v1  ;;  %v2247_v48 = vmin.f32 %v2246_v58, %v2001_v31  ;;  %v2269_v62 = vmin.f32 %v2268_v49, %v2013_v63  ;;  %v2116_v46 = vrot.slane %v2115_v61, 4  ;;  %v11620_v58 = vld [vmem:[#allocation195_spill] sm:$0xff]  ;;  %v11621_v49 = vld [vmem:[#allocation44_spill] sm:$0xff] }
 0x275   :  { %v2138_v12 = vrot.slane %v2137_v44, 4  ;;  %v2160_v47 = vrot.slane %v2159_v3, 4  ;;  %v2182_v13 = vrot.slane %v2181_v20, 4  ;;  %v2204_v30 = vrot.slane %v2203_v19, 4  ;;  %v11626_v27 = vld [vmem:[#allocation215_spill] sm:$0xff] }
 0x276   :  { %v2226_v40 = vrot.slane %v2225_v37, 4  ;;  %v2248_v23 = vrot.slane %v2247_v48, 4  ;;  %v2270_v6 = vrot.slane %v2269_v62, 4  ;;  %v2117_v26 = vmin.f32 %v2115_v61, %v2116_v46  ;;  %v11623_v61 = vld [vmem:[#allocation207_spill] sm:$0xff]  ;;  %v11632_v46 = vld [vmem:[#allocation236_spill] sm:$0xff] }
 0x277   :  { %v2139_v24 = vmin.f32 %v2137_v44, %v2138_v12  ;;  %v2161_v15 = vmin.f32 %v2159_v3, %v2160_v47  ;;  %v2183_v33 = vmin.f32 %v2181_v20, %v2182_v13  ;;  %v2205_v28 = vmin.f32 %v2203_v19, %v2204_v30  ;;  %v11627_v3 = vld [vmem:[#allocation50_spill] sm:$0xff]  ;;  %v11633_v12 = vld [vmem:[#allocation81_spill] sm:$0xff] }
 0x278   :  { %v2227_v9 = vmin.f32 %v2225_v37, %v2226_v40  ;;  %v2249_v42 = vmin.f32 %v2247_v48, %v2248_v23  ;;  %v2271_v36 = vmin.f32 %v2269_v62, %v2270_v6  ;;  %v2118_v56 = vrot.slane %v2117_v26, 2  ;;  %v11629_v37 = vld [vmem:[#allocation227_spill] sm:$0xff]  ;;  %v11630_v48 = vld [vmem:[#allocation58_spill] sm:$0xff] }
 0x279   :  { %v2140_v1 = vrot.slane %v2139_v24, 2  ;;  %v2162_v31 = vrot.slane %v2161_v15, 2  ;;  %v2184_v63 = vrot.slane %v2183_v33, 2  ;;  %v2206_v5 = vrot.slane %v2205_v28, 2  ;;  %v11635_v13 = vld [vmem:[#allocation250_spill] sm:$0xff] }
 0x27a   :  { %v2228_v54 = vrot.slane %v2227_v9, 2  ;;  %v2250_v18 = vrot.slane %v2249_v42, 2  ;;  %v2272_v52 = vrot.slane %v2271_v36, 2  ;;  %v2119_v10 = vmin.f32 %v2117_v26, %v2118_v56  ;;  %v11636_v30 = vld [vmem:[#allocation90_spill] sm:$0xff]  ;;  %v11646_v56 = vld [vmem:[#allocation76_spill] sm:$0xff] }
 0x27b   :  { %v2141_v57 = vmin.f32 %v2139_v24, %v2140_v1  ;;  %v2163_v32 = vmin.f32 %v2161_v15, %v2162_v31  ;;  %v2185_v4 = vmin.f32 %v2183_v33, %v2184_v63  ;;  %v2207_v53 = vmin.f32 %v2205_v28, %v2206_v5  ;;  %v11638_v6 = vld [vmem:[#allocation46_spill] sm:$0xff]  ;;  %v11640_v24 = vld [vmem:[#allocation69_spill] sm:$0xff] }
 0x27c   :  { %v2229_v45 = vmin.f32 %v2227_v9, %v2228_v54  ;;  %v2251_v51 = vmin.f32 %v2249_v42, %v2250_v18  ;;  %v2273_v43 = vmin.f32 %v2271_v36, %v2272_v52  ;;  %v2120_v35 = vrot.slane %v2119_v10, 1  ;;  %v11642_v33 = vld [vmem:[#allocation73_spill] sm:$0xff]  ;;  %v11644_v42 = vld [vmem:[#allocation60_spill] sm:$0xff]  ;;  %v11652_v52 = vld [vmem:[#allocation71_spill] sm:$0xff] }
 0x27d   :  { %v2142_v25 = vrot.slane %v2141_v57, 1  ;;  %v2164_v41 = vrot.slane %v2163_v32, 1  ;;  %v2186_v34 = vrot.slane %v2185_v4, 1  ;;  %v2208_v38 = vrot.slane %v2207_v53, 1  ;;  %v11648_v31 = vld [vmem:[#allocation93_spill] sm:$0xff]  ;;  %v11650_v54 = vld [vmem:[#allocation48_spill] sm:$0xff] }
 0x27e   :  { %v2230_v2 = vrot.slane %v2229_v45, 1  ;;  %v2252_v0 = vrot.slane %v2251_v51, 1  ;;  %v2274_v39 = vrot.slane %v2273_v43, 1  ;;  %v2121_v50 = vmin.f32 %v2119_v10, %v2120_v35  ;;  %v11660_v35 = vld [vmem:[#allocation119_spill] sm:$0xff] }
 0x27f   :  { %v2143_v11 = vmin.f32 %v2141_v57, %v2142_v25  ;;  %v2165_v17 = vmin.f32 %v2163_v32, %v2164_v41  ;;  %v2187_v16 = vmin.f32 %v2185_v4, %v2186_v34  ;;  %v2209_v21 = vmin.f32 %v2207_v53, %v2208_v38  ;;  %v11654_v57 = vld [vmem:[#allocation54_spill] sm:$0xff]  ;;  %v11656_v53 = vld [vmem:[#allocation68_spill] sm:$0xff] }
 0x280   :  { %v2231_v14 = vmin.f32 %v2229_v45, %v2230_v2  ;;  %v2253_v8 = vmin.f32 %v2251_v51, %v2252_v0  ;;  %v2275_v22 = vmin.f32 %v2273_v43, %v2274_v39  ;;  %v7702_v55 = vmul.f32 %v11621_v49, %v11620_v58  ;;  %v11658_v51 = vld [vmem:[#allocation84_spill] sm:$0xff]  ;;  %v11664_v2 = vld [vmem:[#allocation75_spill] sm:$0xff]  ;;  %v11666_v39 = vld [vmem:[#allocation62_spill] sm:$0xff] }
 0x281   :  { %v3046_v29 = vsel %vm3045_vm0, %v2143_v11, %v2121_v50  ;;  %v7706_v44 = vmul.f32 %v11624_v7, %v11623_v61  ;;  %v7710_v20 = vmul.f32 %v11627_v3, %v11626_v27  ;;  %v7715_v62 = vmul.f32 %v11630_v48, %v11629_v37  ;;  %v11662_v34 = vld [vmem:[#allocation52_spill] sm:$0xff]  ;;  %v11683_v11 = vld [vmem:[#allocation70_spill] sm:$0xff] }
 0x282   :  { %11622 = vst [vmem:[#allocation59_spill] sm:$0xff] %v7702_v55  ;;  %v3048_v19 = vsel %vm3047_vm4, %v2165_v17, %v3046_v29  ;;  %v7719_v47 = vmul.f32 %v11633_v12, %v11632_v46  ;;  %v7723_v40 = vmul.f32 %v11636_v30, %v11635_v13  ;;  %v7728_v26 = vmul.f32 %v11638_v6, %v11620_v58  ;;  %v11723_v6 = vld [vmem:[#allocation185_spill] sm:$0xff]  ;;  %v11739_v48 = vld [vmem:[#allocation184_spill] sm:$0xff] }
 0x283   :  { %11625 = vst [vmem:[#allocation63_spill] sm:$0xff] %v7706_v44  ;;  %11628 = vst [vmem:[#allocation65_spill] sm:$0xff] %v7710_v20  ;;  %v3050_v23 = vsel %vm3049_vm3, %v2187_v16, %v3048_v19  ;;  %v7732_v15 = vmul.f32 %v11640_v24, %v11623_v61  ;;  %v7736_v28 = vmul.f32 %v11642_v33, %v11626_v27  ;;  %v11669_v16 = vld [vmem:[#allocation78_spill] sm:$0xff]  ;;  %v11675_v19 = vld [vmem:[#allocation124_spill] sm:$0xff] }
 0x284   :  { %11631 = vst [vmem:[#allocation25_spill] sm:$0xff] %v7715_v62  ;;  %11634 = vst [vmem:[#allocation42_spill] sm:$0xff] %v7719_v47  ;;  %v3052_v9 = vsel %vm3051_vm5, %v2209_v21, %v3050_v23  ;;  %v7741_v36 = vmul.f32 %v11644_v42, %v11629_v37  ;;  %v7745_v1 = vmul.f32 %v11646_v56, %v11632_v46  ;;  %v11715_v56 = vld [vmem:[#allocation82_spill] sm:$0xff]  ;;  %v11717_v42 = vld [vmem:[#allocation83_spill] sm:$0xff] }
 0x285   :  { %11637 = vst [vmem:[#allocation45_spill] sm:$0xff] %v7723_v40  ;;  %11639 = vst [vmem:[#allocation53_spill] sm:$0xff] %v7728_v26  ;;  %v7749_v63 = vmul.f32 %v11648_v31, %v11635_v13  ;;  %v3054_v5 = vsel %vm3053_vm6, %v2231_v14, %v3052_v9  ;;  %v7754_v18 = vmul.f32 %v11650_v54, %v11620_v58  ;;  %v11671_v14 = vld [vmem:[#allocation102_spill] sm:$0xff]  ;;  %v11677_v9 = vld [vmem:[#allocation132_spill] sm:$0xff] }
 0x286   :  { %11641 = vst [vmem:[#allocation195_spill] sm:$0xff] %v7732_v15  ;;  %11643 = vst [vmem:[#allocation207_spill] sm:$0xff] %v7736_v28  ;;  %v7758_v10 = vmul.f32 %v11652_v52, %v11623_v61  ;;  %v7762_v32 = vmul.f32 %v11654_v57, %v11626_v27  ;;  %v3056_v4 = vsel %vm3055_vm7, %v2253_v8, %v3054_v5  ;;  %v11707_v57 = vld [vmem:[#allocation86_spill] sm:$0xff]  ;;  %v11709_v52 = vld [vmem:[#allocation133_spill] sm:$0xff] }
 0x287   :  { %11645 = vst [vmem:[#allocation215_spill] sm:$0xff] %v7741_v36  ;;  %11647 = vst [vmem:[#allocation227_spill] sm:$0xff] %v7745_v1  ;;  %v7767_v45 = vmul.f32 %v11656_v53, %v11629_v37  ;;  %v7771_v43 = vmul.f32 %v11658_v51, %v11632_v46  ;;  %v7775_v25 = vmul.f32 %v11660_v35, %v11635_v13  ;;  %v11701_v35 = vld [vmem:[#allocation175_spill] sm:$0xff]  ;;  %v11703_v51 = vld [vmem:[#allocation72_spill] sm:$0xff] }
 0x288   :  { %11649 = vst [vmem:[#allocation236_spill] sm:$0xff] %v7749_v63  ;;  %11651 = vst [vmem:[#allocation250_spill] sm:$0xff] %v7754_v18  ;;  %v3058_v41 = vsel %vm3057_vm8, %v2275_v22, %v3056_v4  ;;  %v7780_v38 = vmul.f32 %v11662_v34, %v11620_v58  ;;  %v7784_v0 = vmul.f32 %v11664_v2, %v11623_v61  ;;  %v11673_v22 = vld [vmem:[#allocation144_spill] sm:$0xff]  ;;  %v11679_v4 = vld [vmem:[#allocation77_spill] sm:$0xff] }
 0x289   :  { %11653 = vst [vmem:[#allocation266_spill] sm:$0xff] %v7758_v10  ;;  %11655 = vst [vmem:[#allocation267_spill] sm:$0xff] %v7762_v32  ;;  %v7788_v50 = vmul.f32 %v11666_v39, %v11626_v27  ;;  %v3084_v17 = vsel %vm3007_vm9, %v3058_v41, 0.0  ;;  %4768 = vmatmul.mubr.msk.f32.vlgmr.msra.gmra.mrb[14].mxu1 %vm3007_vm9, %v3058_v41  ;;  %v7796_v21 = vmul.f32 %v11669_v16, %v11629_v37  ;;  %v11695_v39 = vld [vmem:[#allocation80_spill] sm:$0xff]  ;;  %v11697_v2 = vld [vmem:[#allocation105_spill] sm:$0xff] }
 0x28a   :  { %11657 = vst [vmem:[#allocation268_spill] sm:$0xff] %v7767_v45  ;;  %11659 = vst [vmem:[#allocation269_spill] sm:$0xff] %v7771_v43  ;;  %v7800_v8 = vmul.f32 %v11671_v14, %v11632_v46  ;;  %v7804_v29 = vmul.f32 %v11673_v22, %v11635_v13  ;;  %v7807_v23 = vmul.f32 %v11675_v19, %v3084_v17  ;;  %v11685_v22 = vld [vmem:[#allocation85_spill] sm:$0xff]  ;;  %v11691_v19 = vld [vmem:[#allocation64_spill] sm:$0xff] }
 0x28b   :  { %11661 = vst [vmem:[#allocation270_spill] sm:$0xff] %v7775_v25  ;;  %11663 = vst [vmem:[#allocation271_spill] sm:$0xff] %v7780_v38  ;;  %v7810_v5 = vmul.f32 %v11677_v9, %v3084_v17  ;;  %v7814_v41 = vmul.f32 %v11679_v4, %v11620_v58  ;;  %v7818_v60 = vmul.f32 %v11681_v59, %v11623_v61  ;;  %v11693_v4 = vld [vmem:[#allocation66_spill] sm:$0xff]  ;;  %v11699_v34 = vld [vmem:[#allocation147_spill] sm:$0xff] }
 0x28c   :  { %11665 = vst [vmem:[#allocation272_spill] sm:$0xff] %v7784_v0  ;;  %11667 = vst [vmem:[#allocation273_spill] sm:$0xff] %v7788_v50  ;;  %v7822_v14 = vmul.f32 %v11683_v11, %v11626_v27  ;;  %v7826_v16 = vmul.f32 %v11685_v22, %v11629_v37  ;;  %v7838_v59 = vmul.f32 %v11691_v19, %v11620_v58  ;;  %v11705_v53 = vld [vmem:[#allocation74_spill] sm:$0xff]  ;;  %v11711_v54 = vld [vmem:[#allocation172_spill] sm:$0xff] }
 0x28d   :  { %11670 = vst [vmem:[#allocation274_spill] sm:$0xff] %v7796_v21  ;;  %11672 = vst [vmem:[#allocation275_spill] sm:$0xff] %v7800_v8  ;;  %v7842_v11 = vmul.f32 %v11693_v4, %v11623_v61  ;;  %v7846_v22 = vmul.f32 %v11695_v39, %v11626_v27  ;;  %v7858_v19 = vmul.f32 %v11701_v35, %v11635_v13  ;;  %v11713_v31 = vld [vmem:[#allocation2_spill] sm:$0xff]  ;;  %v11719_v33 = vld [vmem:[#allocation116_spill] sm:$0xff] }
 0x28e   :  { %11674 = vst [vmem:[#allocation276_spill] sm:$0xff] %v7804_v29  ;;  %11676 = vst [vmem:[#allocation277_spill] sm:$0xff] %v7807_v23  ;;  %v11687_v23 = vld [vmem:[#allocation130_spill] sm:$0xff]  ;;  %v7862_v4 = vmul.f32 %v11703_v51, %v11620_v58  ;;  %v7866_v39 = vmul.f32 %v11705_v53, %v11623_v61  ;;  %v7878_v35 = vmul.f32 %v11711_v54, %v11632_v46  ;;  %v11725_v30 = vld [vmem:[#allocation265_spill] sm:$0xff] }
 0x28f   :  { %11678 = vst [vmem:[#allocation278_spill] sm:$0xff] %v7810_v5  ;;  %11680 = vst [vmem:[#allocation279_spill] sm:$0xff] %v7814_v41  ;;  %v7830_v17 = vmul.f32 %v11687_v23, %v11632_v46  ;;  %v11689_v5 = vld [vmem:[#allocation161_spill] sm:$0xff]  ;;  %v7850_v23 = vmul.f32 %v11697_v2, %v11629_v37  ;;  %v7870_v2 = vmul.f32 %v11707_v57, %v11626_v27  ;;  %v11721_v24 = vld [vmem:[#allocation158_spill] sm:$0xff] }
 0x290   :  { %11682 = vst [vmem:[#allocation280_spill] sm:$0xff] %v7818_v60  ;;  %11684 = vst [vmem:[#allocation281_spill] sm:$0xff] %v7822_v14  ;;  %v7834_v9 = vmul.f32 %v11689_v5, %v11635_v13  ;;  %v7854_v5 = vmul.f32 %v11699_v34, %v11632_v46  ;;  %v7874_v34 = vmul.f32 %v11709_v52, %v11629_v37 }
 0x291   :  { %11686 = vst [vmem:[#allocation282_spill] sm:$0xff] %v7826_v16  ;;  %11688 = vst [vmem:[#allocation283_spill] sm:$0xff] %v7830_v17  ;;  %v7882_v51 = vmul.f32 %v11713_v31, %v11635_v13  ;;  %v7886_v53 = vmul.f32 %v11715_v56, %v11620_v58  ;;  %v7890_v57 = vmul.f32 %v11717_v42, %v11623_v61  ;;  %v11727_v56 = vld [vmem:[#allocation145_spill] sm:$0xff] }
 0x292   :  { %11690 = vst [vmem:[#allocation284_spill] sm:$0xff] %v7834_v9  ;;  %11692 = vst [vmem:[#allocation285_spill] sm:$0xff] %v7838_v59  ;;  %v7894_v52 = vmul.f32 %v11719_v33, %v11626_v27  ;;  %v7898_v54 = vmul.f32 %v11721_v24, %v11629_v37  ;;  %v7902_v31 = vmul.f32 %v11723_v6, %v11632_v46  ;;  %v11728_v42 = vld [vmem:[#allocation149_spill] sm:$0xff]  ;;  %v11729_v27 = vld [vmem:[#allocation152_spill] sm:$0xff] }
 0x293   :  { %11694 = vst [vmem:[#allocation286_spill] sm:$0xff] %v7842_v11  ;;  %11696 = vst [vmem:[#allocation287_spill] sm:$0xff] %v7846_v22  ;;  %v7906_v58 = vmul.f32 %v11725_v30, %v11635_v13  ;;  %v2016_v61 = vadd.f32 %v11727_v56, %v7702_v55  ;;  %v2018_v12 = vadd.f32 %v11728_v42, %v7706_v44  ;;  %v11730_v37 = vld [vmem:[#allocation162_spill] sm:$0xff]  ;;  %v11731_v46 = vld [vmem:[#allocation176_spill] sm:$0xff] }
 0x294   :  { %11698 = vst [vmem:[#allocation288_spill] sm:$0xff] %v7850_v23  ;;  %11700 = vst [vmem:[#allocation289_spill] sm:$0xff] %v7854_v5  ;;  %v2020_v33 = vadd.f32 %v11729_v27, %v7710_v20  ;;  %v7916_v24 = vadd.f32 %v11730_v37, %v7715_v62  ;;  %v7920_v6 = vadd.f32 %v11731_v46, %v7719_v47  ;;  %v11732_v13 = vld [vmem:[#allocation181_spill] sm:$0xff]  ;;  %v11734_v55 = vld [vmem:[#allocation148_spill] sm:$0xff] }
 0x295   :  { %11702 = vst [vmem:[#allocation290_spill] sm:$0xff] %v7858_v19  ;;  %11704 = vst [vmem:[#allocation291_spill] sm:$0xff] %v7862_v4  ;;  %v7924_v30 = vadd.f32 %v11732_v13, %v7723_v40  ;;  %v2028_v56 = vadd.f32 %v11734_v55, %v7728_v26  ;;  %v11735_v44 = vld [vmem:[#allocation151_spill] sm:$0xff]  ;;  %v7940_v40 = vadd.f32 %v11739_v48, %v7749_v63  ;;  %v11741_v13 = vld [vmem:[#allocation150_spill] sm:$0xff] }
 0x296   :  { %11706 = vst [vmem:[#allocation292_spill] sm:$0xff] %v7866_v39  ;;  %11708 = vst [vmem:[#allocation293_spill] sm:$0xff] %v7870_v2  ;;  %v2030_v42 = vadd.f32 %v11735_v44, %v7732_v15  ;;  %v11736_v20 = vld [vmem:[#allocation155_spill] sm:$0xff]  ;;  %v2040_v26 = vadd.f32 %v11741_v13, %v7754_v18  ;;  %v11742_v55 = vld [vmem:[#allocation153_spill] sm:$0xff]  ;;  %v2298_v7 = vmin.f32 %v2016_v61, %v2018_v12 }
 0x297   :  { %11710 = vst [vmem:[#allocation294_spill] sm:$0xff] %v7874_v34  ;;  %11712 = vst [vmem:[#allocation295_spill] sm:$0xff] %v7878_v35  ;;  %v2032_v27 = vadd.f32 %v11736_v20, %v7736_v28  ;;  %v11737_v62 = vld [vmem:[#allocation163_spill] sm:$0xff]  ;;  %v2042_v15 = vadd.f32 %v11742_v55, %v7758_v10  ;;  %v11743_v44 = vld [vmem:[#allocation156_spill] sm:$0xff] }
 0x298   :  { %11714 = vst [vmem:[#allocation296_spill] sm:$0xff] %v7882_v51  ;;  %11716 = vst [vmem:[#allocation297_spill] sm:$0xff] %v7886_v53  ;;  %v7934_v37 = vadd.f32 %v11737_v62, %v7741_v36  ;;  %v11738_v47 = vld [vmem:[#allocation171_spill] sm:$0xff]  ;;  %v2044_v28 = vadd.f32 %v11743_v44, %v7762_v32  ;;  %v11748_v63 = vld [vmem:[#allocation154_spill] sm:$0xff] }
 0x299   :  { %11718 = vst [vmem:[#allocation298_spill] sm:$0xff] %v7890_v57  ;;  %11720 = vst [vmem:[#allocation299_spill] sm:$0xff] %v7894_v52  ;;  %v2036_v46 = vadd.f32 %v11738_v47, %v7745_v1  ;;  %v11744_v20 = vld [vmem:[#allocation167_spill] sm:$0xff]  ;;  %v11746_v1 = vld [vmem:[#allocation4_spill] sm:$0xff]  ;;  %v2052_v48 = vadd.f32 %v11748_v63, %v7780_v38 }
 0x29a   :  { %11722 = vst [vmem:[#allocation300_spill] sm:$0xff] %v7898_v54  ;;  %11724 = vst [vmem:[#allocation301_spill] sm:$0xff] %v7902_v31  ;;  %v2046_v36 = vadd.f32 %v11744_v20, %v7767_v45  ;;  %v11745_v62 = vld [vmem:[#allocation179_spill] sm:$0xff]  ;;  %v7954_v47 = vadd.f32 %v11746_v1, %v7775_v25  ;;  %v11749_v18 = vld [vmem:[#allocation157_spill] sm:$0xff] }
 0x29b   :  { %11726 = vst [vmem:[#allocation302_spill] sm:$0xff] %v7906_v58  ;;  %11733 = vst [vmem:[#allocation303_spill] sm:$0xff] %v7924_v30  ;;  %v2048_v3 = vadd.f32 %v11745_v62, %v7771_v43  ;;  %v2054_v13 = vadd.f32 %v11749_v18, %v7784_v0  ;;  %v11750_v10 = vld [vmem:[#allocation164_spill] sm:$0xff]  ;;  %v11751_v32 = vld [vmem:[#allocation173_spill] sm:$0xff] }
 0x29c   :  { %11740 = vst [vmem:[#allocation304_spill] sm:$0xff] %v7940_v40  ;;  %11747 = vst [vmem:[#allocation305_spill] sm:$0xff] %v7954_v47  ;;  %v2056_v55 = vadd.f32 %v11750_v10, %v7788_v50  ;;  %v2058_v44 = vadd.f32 %v11751_v32, %v7796_v21  ;;  %v11752_v45 = vld [vmem:[#allocation183_spill] sm:$0xff]  ;;  %v11753_v43 = vld [vmem:[#allocation190_spill] sm:$0xff]  ;;  %v2299_v47 = vmin.f32 %v2298_v7, %v2020_v33 }
 0x29d   :  { %v2060_v20 = vadd.f32 %v11752_v45, %v7800_v8  ;;  %v2062_v62 = vadd.f32 %v11753_v43, %v7804_v29  ;;  %v11754_v25 = vld [vmem:[#allocation160_spill] sm:$0xff]  ;;  %v11755_v38 = vld [vmem:[#allocation159_spill] sm:$0xff]  ;;  %v11759_v8 = vld [vmem:[#allocation194_spill] sm:$0xff]  ;;  %v2364_v49 = vmin.f32 %v2052_v48, %v2054_v13 }
 0x29e   :  { %v2064_v1 = vadd.f32 %v11754_v25, %v7814_v41  ;;  %v2066_v63 = vadd.f32 %v11755_v38, %v7818_v60  ;;  %v11756_v0 = vld [vmem:[#allocation168_spill] sm:$0xff]  ;;  %v2074_v45 = vadd.f32 %v11759_v8, %v7834_v9  ;;  %v11760_v29 = vld [vmem:[#allocation165_spill] sm:$0xff]  ;;  %v11761_v41 = vld [vmem:[#allocation166_spill] sm:$0xff] }
 0x29f   :  { %v2068_v18 = vadd.f32 %v11756_v0, %v7822_v14  ;;  %v11757_v50 = vld [vmem:[#allocation180_spill] sm:$0xff]  ;;  %v2076_v43 = vadd.f32 %v11760_v29, %v7838_v59  ;;  %v2078_v25 = vadd.f32 %v11761_v41, %v7842_v11  ;;  %v11762_v60 = vld [vmem:[#allocation174_spill] sm:$0xff]  ;;  %v11766_v9 = vld [vmem:[#allocation169_spill] sm:$0xff] }
 0x2a0   :  { %v2070_v10 = vadd.f32 %v11757_v50, %v7826_v16  ;;  %v11758_v21 = vld [vmem:[#allocation188_spill] sm:$0xff]  ;;  %v2080_v38 = vadd.f32 %v11762_v60, %v7846_v22  ;;  %v11763_v14 = vld [vmem:[#allocation186_spill] sm:$0xff]  ;;  %v11764_v16 = vld [vmem:[#allocation191_spill] sm:$0xff]  ;;  %v2088_v8 = vadd.f32 %v11766_v9, %v7862_v4 }
 0x2a1   :  { %v2072_v32 = vadd.f32 %v11758_v21, %v7830_v17  ;;  %v2082_v0 = vadd.f32 %v11763_v14, %v7850_v23  ;;  %v2084_v50 = vadd.f32 %v11764_v16, %v7854_v5  ;;  %v11765_v17 = vld [vmem:[#allocation198_spill] sm:$0xff]  ;;  %v11769_v22 = vld [vmem:[#allocation189_spill] sm:$0xff]  ;;  %v11770_v23 = vld [vmem:[#allocation196_spill] sm:$0xff] }
 0x2a2   :  { %v2086_v21 = vadd.f32 %v11765_v17, %v7858_v19  ;;  %v11767_v59 = vld [vmem:[#allocation170_spill] sm:$0xff]  ;;  %v2094_v60 = vadd.f32 %v11769_v22, %v7874_v34  ;;  %v2096_v14 = vadd.f32 %v11770_v23, %v7878_v35  ;;  %v11771_v5 = vld [vmem:[#allocation199_spill] sm:$0xff]  ;;  %v11772_v19 = vld [vmem:[#allocation177_spill] sm:$0xff] }
 0x2a3   :  { %v2090_v29 = vadd.f32 %v11767_v59, %v7866_v39  ;;  %v11768_v11 = vld [vmem:[#allocation182_spill] sm:$0xff]  ;;  %v2098_v16 = vadd.f32 %v11771_v5, %v7882_v51  ;;  %v2100_v17 = vadd.f32 %v11772_v19, %v7886_v53  ;;  %v11774_v39 = vld [vmem:[#allocation187_spill] sm:$0xff]  ;;  %v11776_v34 = vld [vmem:[#allocation197_spill] sm:$0xff]  ;;  %v2320_v51 = vmin.f32 %v2028_v56, %v2030_v42 }
 0x2a4   :  { %v2092_v41 = vadd.f32 %v11768_v11, %v7870_v2  ;;  %v11773_v4 = vld [vmem:[#allocation178_spill] sm:$0xff]  ;;  %v2104_v59 = vadd.f32 %v11774_v39, %v7894_v52  ;;  %v11775_v2 = vld [vmem:[#allocation193_spill] sm:$0xff]  ;;  %v2108_v22 = vadd.f32 %v11776_v34, %v7902_v31  ;;  %v11777_v35 = vld [vmem:[#allocation3_spill] sm:$0xff]  ;;  %v2342_v5 = vmin.f32 %v2040_v26, %v2042_v15 }
 0x2a5   :  { %v2102_v9 = vadd.f32 %v11773_v4, %v7890_v57  ;;  %v2106_v11 = vadd.f32 %v11775_v2, %v7898_v54  ;;  %v2110_v23 = vadd.f32 %v11777_v35, %v7906_v58  ;;  %v2386_v53 = vmin.f32 %v2064_v1, %v2066_v63  ;;  %v11778_v63 = vld [vmem:[#allocation303_spill] sm:$0xff] }
 0x2a6   :  { %v2408_v19 = vmin.f32 %v2076_v43, %v2078_v25  ;;  %v2321_v57 = vmin.f32 %v2320_v51, %v2032_v27  ;;  %v2430_v4 = vmin.f32 %v2088_v8, %v2090_v29  ;;  %v2343_v52 = vmin.f32 %v2342_v5, %v2044_v28 }
 0x2a7   :  { %v2452_v40 = vmin.f32 %v2100_v17, %v2102_v9  ;;  %v2365_v39 = vmin.f32 %v2364_v49, %v2056_v55  ;;  %v2387_v30 = vmin.f32 %v2386_v53, %v2068_v18  ;;  %v2300_v2 = vmin.f32 %v2299_v47, %v7916_v24  ;;  %v11779_v47 = vld [vmem:[#allocation304_spill] sm:$0xff] }
 0x2a8   :  { %v2409_v54 = vmin.f32 %v2408_v19, %v2080_v38  ;;  %v2322_v31 = vmin.f32 %v2321_v57, %v7934_v37  ;;  %v2431_v34 = vmin.f32 %v2430_v4, %v2092_v41  ;;  %v2344_v12 = vmin.f32 %v2343_v52, %v2046_v36 }
 0x2a9   :  { %v2453_v58 = vmin.f32 %v2452_v40, %v2104_v59  ;;  %v2366_v42 = vmin.f32 %v2365_v39, %v2058_v44  ;;  %v2388_v26 = vmin.f32 %v2387_v30, %v2070_v10  ;;  %v2301_v15 = vmin.f32 %v2300_v2, %v7920_v6  ;;  %v11780_v59 = vld [vmem:[#allocation305_spill] sm:$0xff] }
 0x2aa   :  { %v2410_v48 = vmin.f32 %v2409_v54, %v2082_v0  ;;  %v2323_v7 = vmin.f32 %v2322_v31, %v2036_v46  ;;  %v2432_v33 = vmin.f32 %v2431_v34, %v2094_v60  ;;  %v2345_v1 = vmin.f32 %v2344_v12, %v2048_v3 }
 0x2ab   :  { %v2454_v56 = vmin.f32 %v2453_v58, %v2106_v11  ;;  %v2367_v28 = vmin.f32 %v2366_v42, %v2060_v20  ;;  %v2389_v49 = vmin.f32 %v2388_v26, %v2072_v32  ;;  %v2302_v18 = vmin.f32 %v2301_v15, %v11778_v63  ;;  %v11781_v15 = vld [vmem:[#allocation79_spill] sm:$0xff] }
 0x2ac   :  { %v2411_v55 = vmin.f32 %v2410_v48, %v2084_v50  ;;  %v2324_v24 = vmin.f32 %v2323_v7, %v11779_v47  ;;  %v2433_v57 = vmin.f32 %v2432_v33, %v2096_v14  ;;  %v2346_v40 = vmin.f32 %v2345_v1, %v11780_v59  ;;  %v11783_v47 = vld [vmem:[#allocation44_spill] sm:$0xff] }
 0x2ad   :  { %v2455_v53 = vmin.f32 %v2454_v56, %v2108_v22  ;;  %v2368_v44 = vmin.f32 %v2367_v28, %v2062_v62  ;;  %v2390_v30 = vmin.f32 %v2389_v49, %v2074_v45  ;;  %v2303_v54 = vrot.slane %v2302_v18, 4 }
 0x2ae   :  { %v2412_v36 = vmin.f32 %v2411_v55, %v2086_v21  ;;  %v2325_v6 = vrot.slane %v2324_v24, 4  ;;  %v2434_v31 = vmin.f32 %v2433_v57, %v2098_v16  ;;  %v2347_v52 = vrot.slane %v2346_v40, 4  ;;  %v11785_v57 = vld [vmem:[#allocation203_spill] sm:$0xff] }
 0x2af   :  { %v2456_v60 = vmin.f32 %v2455_v53, %v2110_v23  ;;  %v2369_v3 = vrot.slane %v2368_v44, 4  ;;  %v2391_v20 = vrot.slane %v2390_v30, 4  ;;  %v2304_v32 = vmin.f32 %v2302_v18, %v2303_v54  ;;  %v11782_v18 = vld [vmem:[#allocation192_spill] sm:$0xff]  ;;  %v11786_v53 = vld [vmem:[#allocation67_spill] sm:$0xff] }
 0x2b0   :  { %v2413_v10 = vrot.slane %v2412_v36, 4  ;;  %v2326_v51 = vmin.f32 %v2324_v24, %v2325_v6  ;;  %v2435_v43 = vrot.slane %v2434_v31, 4  ;;  %v2348_v34 = vmin.f32 %v2346_v40, %v2347_v52  ;;  %v11788_v40 = vld [vmem:[#allocation212_spill] sm:$0xff]  ;;  %v11791_v54 = vld [vmem:[#allocation223_spill] sm:$0xff]  ;;  %v11792_v6 = vld [vmem:[#allocation58_spill] sm:$0xff] }
 0x2b1   :  { %v2457_v25 = vrot.slane %v2456_v60, 4  ;;  %v2370_v38 = vmin.f32 %v2368_v44, %v2369_v3  ;;  %v2392_v2 = vmin.f32 %v2390_v30, %v2391_v20  ;;  %v2305_v39 = vrot.slane %v2304_v32, 2  ;;  %v11789_v44 = vld [vmem:[#allocation50_spill] sm:$0xff]  ;;  %v11795_v52 = vld [vmem:[#allocation81_spill] sm:$0xff] }
 0x2b2   :  { %v2414_v0 = vmin.f32 %v2412_v36, %v2413_v10  ;;  %v2327_v62 = vrot.slane %v2326_v51, 2  ;;  %v2436_v45 = vmin.f32 %v2434_v31, %v2435_v43  ;;  %v2349_v11 = vrot.slane %v2348_v34, 2  ;;  %v11797_v20 = vld [vmem:[#allocation246_spill] sm:$0xff] }
 0x2b3   :  { %v2458_v50 = vmin.f32 %v2456_v60, %v2457_v25  ;;  %v2371_v21 = vrot.slane %v2370_v38, 2  ;;  %v2393_v16 = vrot.slane %v2392_v2, 2  ;;  %v2306_v8 = vmin.f32 %v2304_v32, %v2305_v39  ;;  %v11794_v60 = vld [vmem:[#allocation233_spill] sm:$0xff]  ;;  %v11798_v10 = vld [vmem:[#allocation90_spill] sm:$0xff] }
 0x2b4   :  { %v2415_v14 = vrot.slane %v2414_v0, 2  ;;  %v2328_v22 = vmin.f32 %v2326_v51, %v2327_v62  ;;  %v2437_v29 = vrot.slane %v2436_v45, 2  ;;  %v2350_v23 = vmin.f32 %v2348_v34, %v2349_v11  ;;  %v11800_v43 = vld [vmem:[#allocation46_spill] sm:$0xff]  ;;  %v11802_v34 = vld [vmem:[#allocation69_spill] sm:$0xff]  ;;  %v11806_v62 = vld [vmem:[#allocation60_spill] sm:$0xff] }
 0x2b5   :  { %v2459_v19 = vrot.slane %v2458_v50, 2  ;;  %v2372_v9 = vmin.f32 %v2370_v38, %v2371_v21  ;;  %v2394_v5 = vmin.f32 %v2392_v2, %v2393_v16  ;;  %v2307_v41 = vrot.slane %v2306_v8, 1  ;;  %v11804_v2 = vld [vmem:[#allocation73_spill] sm:$0xff] }
 0x2b6   :  { %v2416_v4 = vmin.f32 %v2414_v0, %v2415_v14  ;;  %v2329_v17 = vrot.slane %v2328_v22, 1  ;;  %v2438_v58 = vmin.f32 %v2436_v45, %v2437_v29  ;;  %v2351_v27 = vrot.slane %v2350_v23, 1  ;;  %v11810_v21 = vld [vmem:[#allocation93_spill] sm:$0xff]  ;;  %v11814_v29 = vld [vmem:[#allocation71_spill] sm:$0xff] }
 0x2b7   :  { %v2460_v61 = vmin.f32 %v2458_v50, %v2459_v19  ;;  %v2373_v37 = vrot.slane %v2372_v9, 1  ;;  %v2395_v46 = vrot.slane %v2394_v5, 1  ;;  %v2308_v12 = vmin.f32 %v2306_v8, %v2307_v41  ;;  %v11808_v50 = vld [vmem:[#allocation76_spill] sm:$0xff] }
 0x2b8   :  { %v2417_v13 = vrot.slane %v2416_v4, 1  ;;  %v2330_v42 = vmin.f32 %v2328_v22, %v2329_v17  ;;  %v2439_v26 = vrot.slane %v2438_v58, 1  ;;  %vm3008_vm10 = vcmp.gt.f32.partialorder %v11781_v15, 0.0  ;;  %v11812_v8 = vld [vmem:[#allocation48_spill] sm:$0xff] }
 0x2b9   :  { %v2461_v48 = vrot.slane %v2460_v61, 1  ;;  %v2352_v7 = vmin.f32 %v2350_v23, %v2351_v27  ;;  %v2374_v33 = vmin.f32 %v2372_v9, %v2373_v37  ;;  %v2396_v56 = vmin.f32 %v2394_v5, %v2395_v46  ;;  %v11816_v23 = vld [vmem:[#allocation54_spill] sm:$0xff]  ;;  %v11821_v17 = vld [vmem:[#allocation84_spill] sm:$0xff] }
 0x2ba   :  { %v2418_v1 = vmin.f32 %v2416_v4, %v2417_v13  ;;  %v2440_v28 = vmin.f32 %v2438_v58, %v2439_v26  ;;  %v3073_v55 = vsel %vm3045_vm0, %v2330_v42, %v2308_v12  ;;  %v8027_v24 = vmul.f32 %v11783_v47, %v11782_v18  ;;  %v11819_v4 = vld [vmem:[#allocation68_spill] sm:$0xff]  ;;  %v11827_v13 = vld [vmem:[#allocation75_spill] sm:$0xff]  ;;  %v11829_v42 = vld [vmem:[#allocation62_spill] sm:$0xff] }
 0x2bb   :  { %v2462_v49 = vmin.f32 %v2460_v61, %v2461_v48  ;;  %v3074_v63 = vsel %vm3047_vm4, %v2352_v7, %v3073_v55  ;;  %v8031_v59 = vmul.f32 %v11786_v53, %v11785_v57  ;;  %v8035_v30 = vmul.f32 %v11789_v44, %v11788_v40  ;;  %v11823_v61 = vld [vmem:[#allocation119_spill] sm:$0xff]  ;;  %v11825_v37 = vld [vmem:[#allocation52_spill] sm:$0xff]  ;;  %v11831_v48 = vld [vmem:[#allocation78_spill] sm:$0xff] }
 0x2bc   :  { %11784 = vst [vmem:[#allocation303_spill] sm:$0xff] %v8027_v24  ;;  %v3075_v36 = vsel %vm3049_vm3, %v2374_v33, %v3074_v63  ;;  %v8040_v31 = vmul.f32 %v11792_v6, %v11791_v54  ;;  %v8044_v3 = vmul.f32 %v11795_v52, %v11794_v60  ;;  %v8048_v32 = vmul.f32 %v11798_v10, %v11797_v20  ;;  %v11833_v33 = vld [vmem:[#allocation102_spill] sm:$0xff]  ;;  %v11839_v63 = vld [vmem:[#allocation56_spill] sm:$0xff] }
 0x2bd   :  { %11787 = vst [vmem:[#allocation304_spill] sm:$0xff] %v8031_v59  ;;  %11790 = vst [vmem:[#allocation305_spill] sm:$0xff] %v8035_v30  ;;  %v3076_v51 = vsel %vm3051_vm5, %v2396_v56, %v3075_v36  ;;  %v8053_v25 = vmul.f32 %v11800_v43, %v11782_v18  ;;  %v8057_v38 = vmul.f32 %v11802_v34, %v11785_v57  ;;  %v11841_v53 = vld [vmem:[#allocation70_spill] sm:$0xff]  ;;  %v11843_v36 = vld [vmem:[#allocation85_spill] sm:$0xff] }
 0x2be   :  { %11793 = vst [vmem:[#allocation192_spill] sm:$0xff] %v8040_v31  ;;  %11796 = vst [vmem:[#allocation44_spill] sm:$0xff] %v8044_v3  ;;  %v8061_v0 = vmul.f32 %v11804_v2, %v11788_v40  ;;  %v3077_v39 = vsel %vm3053_vm6, %v2418_v1, %v3076_v51  ;;  %v8066_v45 = vmul.f32 %v11806_v62, %v11791_v54  ;;  %v11835_v1 = vld [vmem:[#allocation144_spill] sm:$0xff]  ;;  %v11845_v52 = vld [vmem:[#allocation130_spill] sm:$0xff] }
 0x2bf   :  { %11799 = vst [vmem:[#allocation203_spill] sm:$0xff] %v8048_v32  ;;  %11801 = vst [vmem:[#allocation67_spill] sm:$0xff] %v8053_v25  ;;  %v8070_v11 = vmul.f32 %v11808_v50, %v11794_v60  ;;  %v8074_v16 = vmul.f32 %v11810_v21, %v11797_v20  ;;  %v3078_v14 = vsel %vm3055_vm7, %v2440_v28, %v3077_v39  ;;  %v11847_v51 = vld [vmem:[#allocation161_spill] sm:$0xff]  ;;  %v11849_v34 = vld [vmem:[#allocation64_spill] sm:$0xff] }
 0x2c0   :  { %11803 = vst [vmem:[#allocation212_spill] sm:$0xff] %v8057_v38  ;;  %11805 = vst [vmem:[#allocation50_spill] sm:$0xff] %v8061_v0  ;;  %v8079_v22 = vmul.f32 %v11812_v8, %v11782_v18  ;;  %v8083_v19 = vmul.f32 %v11814_v29, %v11785_v57  ;;  %v8087_v9 = vmul.f32 %v11816_v23, %v11788_v40  ;;  %v11851_v39 = vld [vmem:[#allocation66_spill] sm:$0xff]  ;;  %v11853_v50 = vld [vmem:[#allocation80_spill] sm:$0xff] }
 0x2c1   :  { %11807 = vst [vmem:[#allocation223_spill] sm:$0xff] %v8066_v45  ;;  %11809 = vst [vmem:[#allocation58_spill] sm:$0xff] %v8070_v11  ;;  %v8090_v5 = vsel %vm3057_vm8, %v2462_v49, %v3078_v14  ;;  %v8094_v41 = vmul.f32 %v11819_v4, %v11791_v54  ;;  %v8098_v58 = vmul.f32 %v11821_v17, %v11794_v60  ;;  %v11837_v49 = vld [vmem:[#allocation77_spill] sm:$0xff]  ;;  %v11857_v29 = vld [vmem:[#allocation147_spill] sm:$0xff] }
 0x2c2   :  { %11811 = vst [vmem:[#allocation233_spill] sm:$0xff] %v8074_v16  ;;  %11813 = vst [vmem:[#allocation81_spill] sm:$0xff] %v8079_v22  ;;  %v8102_v27 = vmul.f32 %v11823_v61, %v11797_v20  ;;  %4769 = vmatprep.mubr.msk.f32.mxu1 %vm3008_vm10, %v8090_v5  ;;  %v8109_v46 = vmul.f32 %v11825_v37, %v11782_v18  ;;  %v8113_v12 = vmul.f32 %v11827_v13, %v11785_v57  ;;  %v11855_v14 = vld [vmem:[#allocation105_spill] sm:$0xff]  ;;  %v11859_v4 = vld [vmem:[#allocation175_spill] sm:$0xff] }
 0x2c3   :  { %11815 = vst [vmem:[#allocation246_spill] sm:$0xff] %v8083_v19  ;;  %11817 = vst [vmem:[#allocation90_spill] sm:$0xff] %v8087_v9  ;;  %v8117_v26 = vmul.f32 %v11829_v42, %v11788_v40  ;;  %v8121_v7 = vmul.f32 %v11831_v48, %v11791_v54  ;;  %v8125_v56 = vmul.f32 %v11833_v33, %v11794_v60  ;;  %v11861_v61 = vld [vmem:[#allocation72_spill] sm:$0xff]  ;;  %v11863_v13 = vld [vmem:[#allocation74_spill] sm:$0xff] }
 0x2c4   :  { %11818 = vst [vmem:[#allocation46_spill] sm:$0xff] %v8090_v5  ;;  %11820 = vst [vmem:[#allocation69_spill] sm:$0xff] %v8094_v41  ;;  %v8129_v28 = vmul.f32 %v11835_v1, %v11797_v20  ;;  %v8133_v55 = vmul.f32 %v11837_v49, %v11782_v18  ;;  %v8137_v47 = vmul.f32 %v11839_v63, %v11785_v57  ;;  %v11865_v48 = vld [vmem:[#allocation86_spill] sm:$0xff]  ;;  %v11867_v1 = vld [vmem:[#allocation133_spill] sm:$0xff] }
 0x2c5   :  { %11822 = vst [vmem:[#allocation73_spill] sm:$0xff] %v8098_v58  ;;  %11824 = vst [vmem:[#allocation60_spill] sm:$0xff] %v8102_v27  ;;  %v8141_v44 = vmul.f32 %v11841_v53, %v11788_v40  ;;  %v8145_v6 = vmul.f32 %v11843_v36, %v11791_v54  ;;  %v8149_v10 = vmul.f32 %v11845_v52, %v11794_v60  ;;  %v11869_v63 = vld [vmem:[#allocation172_spill] sm:$0xff]  ;;  %v11871_v36 = vld [vmem:[#allocation2_spill] sm:$0xff] }
 0x2c6   :  { %11826 = vst [vmem:[#allocation76_spill] sm:$0xff] %v8109_v46  ;;  %11828 = vst [vmem:[#allocation93_spill] sm:$0xff] %v8113_v12  ;;  %v8153_v43 = vmul.f32 %v11847_v51, %v11797_v20  ;;  %v8157_v2 = vmul.f32 %v11849_v34, %v11782_v18  ;;  %v8161_v62 = vmul.f32 %v11851_v39, %v11785_v57  ;;  %v11873_v51 = vld [vmem:[#allocation82_spill] sm:$0xff]  ;;  %v11875_v39 = vld [vmem:[#allocation83_spill] sm:$0xff] }
 0x2c7   :  { %11830 = vst [vmem:[#allocation48_spill] sm:$0xff] %v8117_v26  ;;  %11832 = vst [vmem:[#allocation71_spill] sm:$0xff] %v8121_v7  ;;  %v8165_v21 = vmul.f32 %v11853_v50, %v11788_v40  ;;  %v8169_v8 = vmul.f32 %v11855_v14, %v11791_v54  ;;  %v8173_v23 = vmul.f32 %v11857_v29, %v11794_v60  ;;  %v11877_v14 = vld [vmem:[#allocation116_spill] sm:$0xff] }
 0x2c8   :  { %11834 = vst [vmem:[#allocation54_spill] sm:$0xff] %v8125_v56  ;;  %11836 = vst [vmem:[#allocation68_spill] sm:$0xff] %v8129_v28  ;;  %v8177_v17 = vmul.f32 %v11859_v4, %v11797_v20  ;;  %v8181_v37 = vmul.f32 %v11861_v61, %v11782_v18  ;;  %v8185_v42 = vmul.f32 %v11863_v13, %v11785_v57  ;;  %v11879_v4 = vld [vmem:[#allocation158_spill] sm:$0xff]  ;;  %v11881_v13 = vld [vmem:[#allocation185_spill] sm:$0xff] }
 0x2c9   :  { %11838 = vst [vmem:[#allocation84_spill] sm:$0xff] %v8133_v55  ;;  %11840 = vst [vmem:[#allocation119_spill] sm:$0xff] %v8137_v47  ;;  %v8189_v33 = vmul.f32 %v11865_v48, %v11788_v40  ;;  %v8193_v49 = vmul.f32 %v11867_v1, %v11791_v54  ;;  %v8197_v53 = vmul.f32 %v11869_v63, %v11794_v60  ;;  %v11883_v1 = vld [vmem:[#allocation265_spill] sm:$0xff] }
 0x2ca   :  { %11842 = vst [vmem:[#allocation52_spill] sm:$0xff] %v8141_v44  ;;  %11844 = vst [vmem:[#allocation75_spill] sm:$0xff] %v8145_v6  ;;  %v8201_v52 = vmul.f32 %v11871_v36, %v11797_v20  ;;  %v8205_v34 = vmul.f32 %v11873_v51, %v11782_v18  ;;  %v8209_v50 = vmul.f32 %v11875_v39, %v11785_v57  ;;  %v11885_v63 = vld [vmem:[#allocation145_spill] sm:$0xff] }
 0x2cb   :  { %11846 = vst [vmem:[#allocation62_spill] sm:$0xff] %v8149_v10  ;;  %11848 = vst [vmem:[#allocation78_spill] sm:$0xff] %v8153_v43  ;;  %v8213_v29 = vmul.f32 %v11877_v14, %v11788_v40  ;;  %v8217_v61 = vmul.f32 %v11879_v4, %v11791_v54  ;;  %v8221_v48 = vmul.f32 %v11881_v13, %v11794_v60  ;;  %v11886_v36 = vld [vmem:[#allocation149_spill] sm:$0xff]  ;;  %v11887_v40 = vld [vmem:[#allocation152_spill] sm:$0xff] }
 0x2cc   :  { %11850 = vst [vmem:[#allocation102_spill] sm:$0xff] %v8157_v2  ;;  %11852 = vst [vmem:[#allocation144_spill] sm:$0xff] %v8161_v62  ;;  %v8225_v18 = vmul.f32 %v11883_v1, %v11797_v20  ;;  %v2015_v57 = vadd.f32 %v11885_v63, %v8027_v24  ;;  %v2017_v51 = vadd.f32 %v11886_v36, %v8031_v59  ;;  %v11888_v54 = vld [vmem:[#allocation162_spill] sm:$0xff]  ;;  %v11889_v60 = vld [vmem:[#allocation176_spill] sm:$0xff] }
 0x2cd   :  { %11854 = vst [vmem:[#allocation77_spill] sm:$0xff] %v8165_v21  ;;  %11856 = vst [vmem:[#allocation56_spill] sm:$0xff] %v8169_v8  ;;  %v2019_v39 = vadd.f32 %v11887_v40, %v8035_v30  ;;  %v8235_v14 = vadd.f32 %v11888_v54, %v8040_v31  ;;  %v8239_v4 = vadd.f32 %v11889_v60, %v8044_v3  ;;  %v11890_v20 = vld [vmem:[#allocation181_spill] sm:$0xff]  ;;  %v11892_v1 = vld [vmem:[#allocation148_spill] sm:$0xff] }
 0x2ce   :  { %11858 = vst [vmem:[#allocation70_spill] sm:$0xff] %v8173_v23  ;;  %11860 = vst [vmem:[#allocation85_spill] sm:$0xff] %v8177_v17  ;;  %v8243_v13 = vadd.f32 %v11890_v20, %v8048_v32  ;;  %v2027_v5 = vadd.f32 %v11892_v1, %v8053_v25  ;;  %v11893_v59 = vld [vmem:[#allocation151_spill] sm:$0xff]  ;;  %v11897_v36 = vld [vmem:[#allocation184_spill] sm:$0xff] }
 0x2cf   :  { %11862 = vst [vmem:[#allocation130_spill] sm:$0xff] %v8181_v37  ;;  %11864 = vst [vmem:[#allocation161_spill] sm:$0xff] %v8185_v42  ;;  %v2029_v24 = vadd.f32 %v11893_v59, %v8057_v38  ;;  %v11894_v30 = vld [vmem:[#allocation155_spill] sm:$0xff]  ;;  %v8259_v32 = vadd.f32 %v11897_v36, %v8074_v16  ;;  %v11899_v20 = vld [vmem:[#allocation150_spill] sm:$0xff] }
 0x2d0   :  { %11866 = vst [vmem:[#allocation64_spill] sm:$0xff] %v8189_v33  ;;  %11868 = vst [vmem:[#allocation66_spill] sm:$0xff] %v8193_v49  ;;  %v2031_v40 = vadd.f32 %v11894_v30, %v8061_v0  ;;  %v11895_v31 = vld [vmem:[#allocation163_spill] sm:$0xff]  ;;  %v2039_v25 = vadd.f32 %v11899_v20, %v8079_v22  ;;  %v11900_v1 = vld [vmem:[#allocation153_spill] sm:$0xff] }
 0x2d1   :  { %11870 = vst [vmem:[#allocation80_spill] sm:$0xff] %v8197_v53  ;;  %11872 = vst [vmem:[#allocation105_spill] sm:$0xff] %v8201_v52  ;;  %v8253_v54 = vadd.f32 %v11895_v31, %v8066_v45  ;;  %v11896_v3 = vld [vmem:[#allocation171_spill] sm:$0xff]  ;;  %v2041_v38 = vadd.f32 %v11900_v1, %v8083_v19  ;;  %v11901_v59 = vld [vmem:[#allocation156_spill] sm:$0xff] }
 0x2d2   :  { %11874 = vst [vmem:[#allocation147_spill] sm:$0xff] %v8205_v34  ;;  %11876 = vst [vmem:[#allocation175_spill] sm:$0xff] %v8209_v50  ;;  %v2035_v60 = vadd.f32 %v11896_v3, %v8070_v11  ;;  %v2043_v0 = vadd.f32 %v11901_v59, %v8087_v9  ;;  %v11902_v30 = vld [vmem:[#allocation167_spill] sm:$0xff]  ;;  %v11904_v11 = vld [vmem:[#allocation4_spill] sm:$0xff] }
 0x2d3   :  { %11878 = vst [vmem:[#allocation72_spill] sm:$0xff] %v8213_v29  ;;  %11880 = vst [vmem:[#allocation74_spill] sm:$0xff] %v8217_v61  ;;  %v2045_v45 = vadd.f32 %v11902_v30, %v8094_v41  ;;  %v11903_v31 = vld [vmem:[#allocation179_spill] sm:$0xff]  ;;  %v8273_v3 = vadd.f32 %v11904_v11, %v8102_v27  ;;  %v11906_v16 = vld [vmem:[#allocation154_spill] sm:$0xff] }
 0x2d4   :  { %11882 = vst [vmem:[#allocation86_spill] sm:$0xff] %v8221_v48  ;;  %11884 = vst [vmem:[#allocation133_spill] sm:$0xff] %v8225_v18  ;;  %v2047_v63 = vadd.f32 %v11903_v31, %v8098_v58  ;;  %v2051_v36 = vadd.f32 %v11906_v16, %v8109_v46  ;;  %v11907_v22 = vld [vmem:[#allocation157_spill] sm:$0xff]  ;;  %v11908_v19 = vld [vmem:[#allocation164_spill] sm:$0xff] }
 0x2d5   :  { %11891 = vst [vmem:[#allocation172_spill] sm:$0xff] %v8243_v13  ;;  %11898 = vst [vmem:[#allocation2_spill] sm:$0xff] %v8259_v32  ;;  %v2053_v20 = vadd.f32 %v11907_v22, %v8113_v12  ;;  %v2055_v1 = vadd.f32 %v11908_v19, %v8117_v26  ;;  %v11909_v9 = vld [vmem:[#allocation173_spill] sm:$0xff]  ;;  %v11910_v41 = vld [vmem:[#allocation183_spill] sm:$0xff] }
 0x2d6   :  { %11905 = vst [vmem:[#allocation82_spill] sm:$0xff] %v8273_v3  ;;  %v2057_v59 = vadd.f32 %v11909_v9, %v8121_v7  ;;  %v2059_v30 = vadd.f32 %v11910_v41, %v8125_v56  ;;  %v11911_v58 = vld [vmem:[#allocation190_spill] sm:$0xff]  ;;  %v11912_v27 = vld [vmem:[#allocation160_spill] sm:$0xff]  ;;  %v11913_v46 = vld [vmem:[#allocation159_spill] sm:$0xff] }
 0x2d7   :  { %v2061_v31 = vadd.f32 %v11911_v58, %v8129_v28  ;;  %v2063_v11 = vadd.f32 %v11912_v27, %v8133_v55  ;;  %v2065_v16 = vadd.f32 %v11913_v46, %v8137_v47  ;;  %v11914_v12 = vld [vmem:[#allocation168_spill] sm:$0xff]  ;;  %v11917_v56 = vld [vmem:[#allocation194_spill] sm:$0xff]  ;;  %v11918_v28 = vld [vmem:[#allocation165_spill] sm:$0xff]  ;;  %v2353_v15 = vmin.f32 %v2051_v36, %v2053_v20 }
 0x2d8   :  { %v2067_v22 = vadd.f32 %v11914_v12, %v8141_v44  ;;  %v11915_v26 = vld [vmem:[#allocation180_spill] sm:$0xff]  ;;  %v2073_v41 = vadd.f32 %v11917_v56, %v8153_v43  ;;  %v2075_v58 = vadd.f32 %v11918_v28, %v8157_v2  ;;  %v11919_v55 = vld [vmem:[#allocation166_spill] sm:$0xff]  ;;  %v11924_v43 = vld [vmem:[#allocation169_spill] sm:$0xff] }
 0x2d9   :  { %v2069_v19 = vadd.f32 %v11915_v26, %v8145_v6  ;;  %v11916_v7 = vld [vmem:[#allocation188_spill] sm:$0xff]  ;;  %v2077_v27 = vadd.f32 %v11919_v55, %v8161_v62  ;;  %v11920_v47 = vld [vmem:[#allocation174_spill] sm:$0xff]  ;;  %v11922_v6 = vld [vmem:[#allocation191_spill] sm:$0xff]  ;;  %v2087_v56 = vadd.f32 %v11924_v43, %v8181_v37 }
 0x2da   :  { %v2071_v9 = vadd.f32 %v11916_v7, %v8149_v10  ;;  %v2079_v46 = vadd.f32 %v11920_v47, %v8165_v21  ;;  %v11921_v44 = vld [vmem:[#allocation186_spill] sm:$0xff]  ;;  %v2083_v26 = vadd.f32 %v11922_v6, %v8173_v23  ;;  %v11927_v21 = vld [vmem:[#allocation189_spill] sm:$0xff]  ;;  %v11929_v23 = vld [vmem:[#allocation199_spill] sm:$0xff] }
 0x2db   :  { %v2081_v12 = vadd.f32 %v11921_v44, %v8169_v8  ;;  %v11923_v10 = vld [vmem:[#allocation198_spill] sm:$0xff]  ;;  %v2093_v47 = vadd.f32 %v11927_v21, %v8193_v49  ;;  %v11928_v8 = vld [vmem:[#allocation196_spill] sm:$0xff]  ;;  %v2097_v6 = vadd.f32 %v11929_v23, %v8201_v52  ;;  %v11934_v49 = vld [vmem:[#allocation197_spill] sm:$0xff]  ;;  %v2309_v52 = vmin.f32 %v2027_v5, %v2029_v24 }
 0x2dc   :  { %v2085_v7 = vadd.f32 %v11923_v10, %v8177_v17  ;;  %v11925_v2 = vld [vmem:[#allocation170_spill] sm:$0xff]  ;;  %v2095_v44 = vadd.f32 %v11928_v8, %v8197_v53  ;;  %v11930_v17 = vld [vmem:[#allocation177_spill] sm:$0xff]  ;;  %v2107_v21 = vadd.f32 %v11934_v49, %v8221_v48  ;;  %v2109_v53 = vadd.f32 %v11777_v35, %v8225_v18 }
 0x2dd   :  { %v2089_v28 = vadd.f32 %v11925_v2, %v8185_v42  ;;  %v11926_v62 = vld [vmem:[#allocation182_spill] sm:$0xff]  ;;  %v2099_v10 = vadd.f32 %v11930_v17, %v8205_v34  ;;  %v11932_v42 = vld [vmem:[#allocation187_spill] sm:$0xff]  ;;  %v2287_v8 = vmin.f32 %v2015_v57, %v2017_v51  ;;  %v2331_v23 = vmin.f32 %v2039_v25, %v2041_v38  ;;  %v11999_v35 = vld [vmem:[#allocation205_spill] sm:$0xff] }
 0x2de   :  { %v2091_v55 = vadd.f32 %v11926_v62, %v8189_v33  ;;  %v11931_v37 = vld [vmem:[#allocation178_spill] sm:$0xff]  ;;  %v2103_v2 = vadd.f32 %v11932_v42, %v8213_v29  ;;  %v11933_v33 = vld [vmem:[#allocation193_spill] sm:$0xff]  ;;  %v2375_v34 = vmin.f32 %v2063_v11, %v2065_v16  ;;  %v2397_v17 = vmin.f32 %v2075_v58, %v2077_v27 }
 0x2df   :  { %v2101_v43 = vadd.f32 %v11931_v37, %v8209_v50  ;;  %v2105_v62 = vadd.f32 %v11933_v33, %v8217_v61  ;;  %v2288_v3 = vmin.f32 %v2287_v8, %v2019_v39  ;;  %v2310_v50 = vmin.f32 %v2309_v52, %v2031_v40  ;;  %v3220_v39 = vld [vmem:[%s10490_s12 + $0x80] sm:$0xff] }
 0x2e0   :  { %v2419_v37 = vmin.f32 %v2087_v56, %v2089_v28  ;;  %v2332_v29 = vmin.f32 %v2331_v23, %v2043_v0  ;;  %v2354_v42 = vmin.f32 %v2353_v15, %v2055_v1  ;;  %v2376_v13 = vmin.f32 %v2375_v34, %v2067_v22  ;;  %v3205_v1 = vld [vmem:[%s10490_s12 + $0x8] sm:$0xff] }
 0x2e1   :  { %v2441_v32 = vmin.f32 %v2099_v10, %v2101_v43  ;;  %v2398_v61 = vmin.f32 %v2397_v17, %v2079_v46  ;;  %v2289_v33 = vmin.f32 %v2288_v3, %v8235_v14  ;;  %v2311_v48 = vmin.f32 %v2310_v50, %v8253_v54  ;;  %v11935_v46 = vld [vmem:[#allocation172_spill] sm:$0xff]  ;;  %v11936_v3 = vld [vmem:[#allocation2_spill] sm:$0xff]  ;;  %v3221_v54 = vld [vmem:[%s10490_s12 + $0x88] sm:$0xff] }
 0x2e2   :  { %v2420_v49 = vmin.f32 %v2419_v37, %v2091_v55  ;;  %v2333_v57 = vmin.f32 %v2332_v29, %v2045_v45  ;;  %v2355_v24 = vmin.f32 %v2354_v42, %v2057_v59  ;;  %v2377_v25 = vmin.f32 %v2376_v13, %v2069_v19  ;;  %v3204_v13 = vld [vmem:[%s10490_s12] sm:$0xff] }
 0x2e3   :  { %v2442_v18 = vmin.f32 %v2441_v32, %v2103_v2  ;;  %v2399_v38 = vmin.f32 %v2398_v61, %v2081_v12  ;;  %v2290_v11 = vmin.f32 %v2289_v33, %v8239_v4  ;;  %v2312_v16 = vmin.f32 %v2311_v48, %v2035_v60  ;;  %v11937_v32 = vld [vmem:[#allocation82_spill] sm:$0xff] }
 0x2e4   :  { %v2421_v5 = vmin.f32 %v2420_v49, %v2093_v47  ;;  %v2334_v27 = vmin.f32 %v2333_v57, %v2047_v63  ;;  %v2356_v0 = vmin.f32 %v2355_v24, %v2059_v30  ;;  %v2378_v15 = vmin.f32 %v2377_v25, %v2071_v9  ;;  %v3222_v57 = vld [vmem:[%s10490_s12 + $0x90] sm:$0xff]  ;;  %v3223_v24 = vld [vmem:[%s10490_s12 + $0x98] sm:$0xff] }
 0x2e5   :  { %v2443_v58 = vmin.f32 %v2442_v18, %v2105_v62  ;;  %v2400_v22 = vmin.f32 %v2399_v38, %v2083_v26  ;;  %v2291_v56 = vmin.f32 %v2290_v11, %v11935_v46  ;;  %v2313_v28 = vmin.f32 %v2312_v16, %v11936_v3  ;;  %v8372_v46 = vld [vmem:[%s10490_s12 + $0xa0] sm:$0xff] }
 0x2e6   :  { %v2422_v10 = vmin.f32 %v2421_v5, %v2095_v44  ;;  %v2335_v45 = vmin.f32 %v2334_v27, %v11937_v32  ;;  %v2357_v59 = vmin.f32 %v2356_v0, %v2061_v31  ;;  %v2379_v19 = vmin.f32 %v2378_v15, %v2073_v41  ;;  %v8362_v5 = vld [vmem:[%s10490_s12 + $0x10] sm:$0xff]  ;;  %v8382_v3 = vld [vmem:[%s10490_s12 + $0x20] sm:$0xff]  ;;  %v11938_v32 = vld [vmem:[#allocation79_spill] sm:$0xff] }
 0x2e7   :  { %v2444_v55 = vmin.f32 %v2443_v58, %v2107_v21  ;;  %v2401_v12 = vmin.f32 %v2400_v22, %v2085_v7  ;;  %v2292_v43 = vrot.slane %v2291_v56, 4  ;;  %v2314_v2 = vrot.slane %v2313_v28, 4  ;;  %v8367_v58 = vld [vmem:[%s10490_s12 + $0x18] sm:$0xff] }
 0x2e8   :  { %v2423_v8 = vmin.f32 %v2422_v10, %v2097_v6  ;;  %v2336_v62 = vrot.slane %v2335_v45, 4  ;;  %v2358_v23 = vrot.slane %v2357_v59, 4  ;;  %v2380_v30 = vrot.slane %v2379_v19, 4  ;;  %v8392_v10 = vld [vmem:[%s10490_s12 + $0xb0] sm:$0xff] }
 0x2e9   :  { %v2445_v47 = vmin.f32 %v2444_v55, %v2109_v53  ;;  %v2402_v9 = vrot.slane %v2401_v12, 4  ;;  %v2293_v26 = vmin.f32 %v2291_v56, %v2292_v43  ;;  %v2315_v17 = vmin.f32 %v2313_v28, %v2314_v2  ;;  %v8377_v56 = vld [vmem:[%s10490_s12 + $0xa8] sm:$0xff]  ;;  %v8397_v55 = vld [vmem:[%s10490_s12 + $0xb8] sm:$0xff]  ;;  %v8413_v43 = vld [vmem:[%s10490_s12 + $0xc0] sm:$0xff] }
 0x2ea   :  { %v2424_v37 = vrot.slane %v2423_v8, 4  ;;  %v2337_v33 = vmin.f32 %v2335_v45, %v2336_v62  ;;  %v2359_v44 = vmin.f32 %v2357_v59, %v2358_v23  ;;  %v2381_v21 = vmin.f32 %v2379_v19, %v2380_v30  ;;  %v8387_v28 = vld [vmem:[%s10490_s12 + $0x28] sm:$0xff]  ;;  %v8403_v19 = vld [vmem:[%s10490_s12 + $0x30] sm:$0xff] }
 0x2eb   :  { %v2446_v42 = vrot.slane %v2445_v47, 4  ;;  %v2403_v49 = vmin.f32 %v2401_v12, %v2402_v9  ;;  %v2294_v52 = vrot.slane %v2293_v26, 2  ;;  %v2316_v31 = vrot.slane %v2315_v17, 2  ;;  %v8408_v12 = vld [vmem:[%s10490_s12 + $0x38] sm:$0xff]  ;;  %v8418_v2 = vld [vmem:[%s10490_s12 + $0xc8] sm:$0xff] }
 0x2ec   :  { %v2425_v41 = vmin.f32 %v2423_v8, %v2424_v37  ;;  %v2338_v34 = vrot.slane %v2337_v33, 2  ;;  %v2360_v50 = vrot.slane %v2359_v44, 2  ;;  %v2382_v6 = vrot.slane %v2381_v21, 2  ;;  %v8423_v8 = vld [vmem:[%s10490_s12 + $0x40] sm:$0xff]  ;;  %v8444_v37 = vld [vmem:[%s10490_s12 + $0x50] sm:$0xff] }
 0x2ed   :  { %v2447_v7 = vmin.f32 %v2445_v47, %v2446_v42  ;;  %v2404_v53 = vrot.slane %v2403_v49, 2  ;;  %v2295_v29 = vmin.f32 %v2293_v26, %v2294_v52  ;;  %v2317_v61 = vmin.f32 %v2315_v17, %v2316_v31  ;;  %v8428_v47 = vld [vmem:[%s10490_s12 + $0x48] sm:$0xff]  ;;  %v8434_v26 = vld [vmem:[%s10490_s12 + $0xd0] sm:$0xff]  ;;  %v8439_v17 = vld [vmem:[%s10490_s12 + $0xd8] sm:$0xff] }
 0x2ee   :  { %v2426_v48 = vrot.slane %v2425_v41, 2  ;;  %v2339_v63 = vmin.f32 %v2337_v33, %v2338_v34  ;;  %v2361_v36 = vmin.f32 %v2359_v44, %v2360_v50  ;;  %v2383_v51 = vmin.f32 %v2381_v21, %v2382_v6  ;;  %v8449_v42 = vld [vmem:[%s10490_s12 + $0x58] sm:$0xff]  ;;  %v8454_v33 = vld [vmem:[%s10490_s12 + $0xe0] sm:$0xff]  ;;  %v8459_v44 = vld [vmem:[%s10490_s12 + $0xe8] sm:$0xff] }
 0x2ef   :  { %v2448_v18 = vrot.slane %v2447_v7, 2  ;;  %v2405_v40 = vmin.f32 %v2403_v49, %v2404_v53  ;;  %v2296_v14 = vrot.slane %v2295_v29, 1  ;;  %v2318_v60 = vrot.slane %v2317_v61, 1  ;;  %v8475_v34 = vld [vmem:[%s10490_s12 + $0xf0] sm:$0xff] }
 0x2f0   :  { %v2427_v4 = vmin.f32 %v2425_v41, %v2426_v48  ;;  %v2340_v25 = vrot.slane %v2339_v63, 1  ;;  %v2362_v38 = vrot.slane %v2361_v36, 1  ;;  %v2384_v11 = vrot.slane %v2383_v51, 1  ;;  %v8465_v41 = vld [vmem:[%s10490_s12 + $0x60] sm:$0xff]  ;;  %11941 = vst [vmem:[#allocation158_spill] sm:$0xff] %v8475_v34  ;;  %v8488_v48 = vld [vmem:[%s10490_s12 + $0x70] sm:$0xff] }
 0x2f1   :  { %v2449_v20 = vmin.f32 %v2447_v7, %v2448_v18  ;;  %v2406_v16 = vrot.slane %v2405_v40, 1  ;;  %v2297_v27 = vmin.f32 %v2295_v29, %v2296_v14  ;;  %v2319_v0 = vmin.f32 %v2317_v61, %v2318_v60  ;;  %11939 = vst [vmem:[#allocation83_spill] sm:$0xff] %v8465_v41  ;;  %v8470_v7 = vld [vmem:[%s10490_s12 + $0x68] sm:$0xff]  ;;  %v8483_v61 = vld [vmem:[%s10490_s12 + $0xf8] sm:$0xff]  ;;  %11943 = vst [vmem:[#allocation265_spill] sm:$0xff] %v8488_v48 }
 0x2f2   :  { %v2428_v15 = vrot.slane %v2427_v4, 1  ;;  %v11036_v45 = vmax.f32 %v11938_v32, 1.0  ;;  %v2341_v59 = vmin.f32 %v2339_v63, %v2340_v25  ;;  %v2363_v62 = vmin.f32 %v2361_v36, %v2362_v38  ;;  %11940 = vst [vmem:[#allocation116_spill] sm:$0xff] %v8470_v7  ;;  %11942 = vst [vmem:[#allocation185_spill] sm:$0xff] %v8483_v61  ;;  %v8493_v18 = vld [vmem:[%s10490_s12 + $0x78] sm:$0xff]  ;;  %v3317_v14 = vld [vmem:[%s10490_s12 + $0x388] sm:$0xff] }
 0x2f3   :  { %v2450_v22 = vrot.slane %v2449_v20, 1  ;;  %v2385_v23 = vmin.f32 %v2383_v51, %v2384_v11  ;;  %v3066_v30 = vsel %vm3045_vm0, %v2319_v0, %v2297_v27  ;;  %v5354_v9 = vpack.c.bf16 %v3221_v54, %v3220_v39  ;;  %11944 = vst [vmem:[#allocation172_spill] sm:$0xff] %v8493_v18  ;;  %v8505_v39 = vld [vmem:[%s10490_s12 + $0x280] sm:$0xff]  ;;  %v11977_v0 = vld [vmem:[#allocation213_spill] sm:$0xff]  ;;  %v12035_v38 = vld [vmem:[#allocation263_spill] sm:$0xff] }
 0x2f4   :  { %v2407_v21 = vmin.f32 %v2405_v40, %v2406_v16  ;;  %v3067_v49 = vsel %vm3047_vm4, %v2341_v59, %v3066_v30  ;;  %v5356_v52 = vpack.c.bf16 %v3205_v1, %v3204_v13  ;;  %v5358_v31 = vpack.c.bf16 %v3223_v24, %v3222_v57  ;;  %11945 = vst [vmem:[#allocation2_spill] sm:$0xff] %v8505_v39  ;;  %v3316_v54 = vld [vmem:[%s10490_s12 + $0x380] sm:$0xff]  ;;  %v8523_v1 = vld [vmem:[%s10490_s12 + $0x288] sm:$0xff]  ;;  %v11955_v30 = vld [vmem:[#allocation220_spill] sm:$0xff] }
 0x2f5   :  { %v2429_v50 = vmin.f32 %v2427_v4, %v2428_v15  ;;  %v2451_v6 = vmin.f32 %v2449_v20, %v2450_v22  ;;  %v3068_v53 = vsel %vm3049_vm3, %v2363_v62, %v3067_v49  ;;  %5355 = vmatprep.subr.bf16.mxu0 %v5354_v9  ;;  %v5360_v29 = vpack.c.bf16 %v8367_v58, %v8362_v5  ;;  %v3300_v57 = vld [vmem:[%s10490_s12 + $0x300] sm:$0xff]  ;;  %v3301_v24 = vld [vmem:[%s10490_s12 + $0x308] sm:$0xff]  ;;  %v3318_v5 = vld [vmem:[%s10490_s12 + $0x390] sm:$0xff] }
 0x2f6   :  { %v3069_v63 = vsel %vm3051_vm5, %v2385_v23, %v3068_v53  ;;  %5357 = vmatpush3.bf16.msra.mxu0 %v5356_v52  ;;  %v5362_v36 = vpack.c.bf16 %v8377_v56, %v8372_v46  ;;  %v5364_v51 = vpack.c.bf16 %v8387_v28, %v8382_v3  ;;  %v5366_v40 = vpack.c.bf16 %v8397_v55, %v8392_v10  ;;  %v3319_v58 = vld [vmem:[%s10490_s12 + $0x398] sm:$0xff]  ;;  %v11950_v59 = vld [vmem:[#allocation87_spill] sm:$0xff]  ;;  %v11979_v52 = vld [vmem:[#allocation222_spill] sm:$0xff] }
 0x2f7   :  { %v3070_v60 = vsel %vm3053_vm6, %v2407_v21, %v3069_v63  ;;  %5359 = vmatprep.subr.bf16.mxu0 %v5358_v31  ;;  %v5368_v4 = vpack.c.bf16 %v8408_v12, %v8403_v19  ;;  %v5370_v20 = vpack.c.bf16 %v8418_v2, %v8413_v43  ;;  %11946 = vst [vmem:[#allocation82_spill] sm:$0xff] %v8523_v1  ;;  %v11948_v46 = vld [vmem:[#allocation41_spill] sm:$0xff]  ;;  %v11951_v19 = vld [vmem:[#allocation200_spill] sm:$0xff]  ;;  %v11953_v2 = vld [vmem:[#allocation210_spill] sm:$0xff] }
 0x2f8   :  { %v3071_v25 = vsel %vm3055_vm7, %v2429_v50, %v3070_v60  ;;  %v5450_v22 = vpack.c.bf16 %v3317_v14, %v3316_v54  ;;  %v11949_v56 = vmax.f32 %v11948_v46, 1.0  ;;  %v5452_v10 = vpack.c.bf16 %v3301_v24, %v3300_v57  ;;  %v11952_v43 = vld [vmem:[#allocation96_spill] sm:$0xff]  ;;  %v11954_v23 = vld [vmem:[#allocation91_spill] sm:$0xff]  ;;  %v11956_v21 = vld [vmem:[#allocation97_spill] sm:$0xff] }
 0x2f9   :  { %v8545_v27 = vsel %vm3057_vm8, %v2451_v6, %v3071_v25  ;;  %v5454_v55 = vpack.c.bf16 %v3319_v58, %v3318_v5  ;;  %v2464_v12 = vsub.f32 %v11951_v19, %v11950_v59  ;;  %v2466_v62 = vsub.f32 %v11953_v2, %v11952_v43  ;;  %v11957_v49 = vld [vmem:[#allocation231_spill] sm:$0xff]  ;;  %v11963_v54 = vld [vmem:[#allocation201_spill] sm:$0xff]  ;;  %v11964_v60 = vld [vmem:[#allocation98_spill] sm:$0xff] }
 0x2fa   :  { %11947 = vst [vmem:[#allocation306_spill] sm:$0xff] %v8545_v27  ;;  %5788 = vrcp.f32 %v11949_v56  ;;  %4770 = vmatmul.mubr.msk.f32.gmra.mrb[16].mxu1 %vm3008_vm10, %v8545_v27  ;;  %5361 = vmatpush3.bf16.msra.mxu0 %v5360_v29  ;;  %v2468_v9 = vsub.f32 %v11955_v30, %v11954_v23  ;;  %v11965_v57 = vld [vmem:[#allocation211_spill] sm:$0xff]  ;;  %v11966_v25 = vld [vmem:[#allocation104_spill] sm:$0xff]  ;;  %v11967_v5 = vld [vmem:[#allocation221_spill] sm:$0xff] }
 0x2fb   :  { %5790 = vrcp.f32 %v11036_v45  ;;  %5363 = vmatprep.subr.bf16.mxu0 %v5362_v36  ;;  %5451 = vmatprep.subr.bf16.mxu1 %v5450_v22  ;;  %v11962_v36 = vld [vmem:[#allocation88_spill] sm:$0xff]  ;;  %v2478_v24 = vsub.f32 %v11965_v57, %v11964_v60  ;;  %v2480_v58 = vsub.f32 %v11967_v5, %v11966_v25  ;;  %v11968_v22 = vld [vmem:[#allocation99_spill] sm:$0xff]  ;;  %v11975_v63 = vld [vmem:[#allocation202_spill] sm:$0xff] }
 0x2fc   :  { %5453 = vmatpush3.bf16.msra.mxu1 %v5452_v10  ;;  %v2476_v14 = vsub.f32 %v11963_v54, %v11962_v36  ;;  %v11969_v56 = vld [vmem:[#allocation232_spill] sm:$0xff]  ;;  %v11978_v57 = vld [vmem:[#allocation94_spill] sm:$0xff]  ;;  %v11994_v23 = vld [vmem:[#allocation127_spill] sm:$0xff] }
 0x2fd   :  { %5455 = vmatprep.subr.bf16.mxu1 %v5454_v55  ;;  %v11974_v55 = vld [vmem:[#allocation89_spill] sm:$0xff]  ;;  %v11976_v54 = vld [vmem:[#allocation100_spill] sm:$0xff]  ;;  %v2492_v5 = vsub.f32 %v11979_v52, %v11978_v57  ;;  %v11981_v11 = vld [vmem:[#allocation234_spill] sm:$0xff] }
 0x2fe   :  { %5365 = vmatpush3.bf16.msra.mxu0 %v5364_v51  ;;  %v2488_v15 = vsub.f32 %v11975_v63, %v11974_v55  ;;  %v2490_v6 = vsub.f32 %v11977_v0, %v11976_v54  ;;  %v11980_v16 = vld [vmem:[#allocation108_spill] sm:$0xff]  ;;  %v11988_v63 = vld [vmem:[#allocation107_spill] sm:$0xff]  ;;  %v11989_v55 = vld [vmem:[#allocation214_spill] sm:$0xff] }
 0x2ff   :  { %5367 = vmatprep.subr.bf16.mxu0 %v5366_v40  ;;  %v2494_v10 = vsub.f32 %v11981_v11, %v11980_v16  ;;  %v11986_v3 = vld [vmem:[#allocation92_spill] sm:$0xff]  ;;  %v2502_v36 = vsub.f32 %v11989_v55, %v11988_v63  ;;  %v11990_v0 = vld [vmem:[#allocation101_spill] sm:$0xff]  ;;  %v11992_v32 = vld [vmem:[#allocation114_spill] sm:$0xff] }
 0x300   :  { %v11987_v25 = vld [vmem:[#allocation204_spill] sm:$0xff]  ;;  %v11993_v52 = vld [vmem:[#allocation235_spill] sm:$0xff]  ;;  %v11998_v46 = vld [vmem:[#allocation109_spill] sm:$0xff]  ;;  %v2710_v2 = vmax.f32 %v2488_v15, %v2490_v6 }
 0x301   :  { %v2500_v60 = vsub.f32 %v11987_v25, %v11986_v3  ;;  %v11991_v40 = vld [vmem:[#allocation224_spill] sm:$0xff]  ;;  %v2506_v57 = vsub.f32 %v11993_v52, %v11992_v32  ;;  %v11995_v11 = vld [vmem:[#allocation247_spill] sm:$0xff]  ;;  %v2512_v39 = vsub.f32 %v11999_v35, %v11998_v46  ;;  %v12002_v55 = vld [vmem:[#allocation110_spill] sm:$0xff] }
 0x302   :  { %v2504_v54 = vsub.f32 %v11991_v40, %v11990_v0  ;;  %v2508_v16 = vsub.f32 %v11995_v11, %v11994_v23  ;;  %v12000_v1 = vld [vmem:[#allocation95_spill] sm:$0xff]  ;;  %v12001_v25 = vld [vmem:[#allocation216_spill] sm:$0xff]  ;;  %5369 = vmatpush3.bf16.msra.mxu0 %v5368_v4  ;;  %v12003_v63 = vld [vmem:[#allocation225_spill] sm:$0xff] }
 0x303   :  { %v2514_v3 = vsub.f32 %v12001_v25, %v12000_v1  ;;  %v2516_v48 = vsub.f32 %v12003_v63, %v12002_v55  ;;  %v12004_v40 = vld [vmem:[#allocation123_spill] sm:$0xff]  ;;  %v12005_v0 = vld [vmem:[#allocation237_spill] sm:$0xff]  ;;  %v12007_v32 = vld [vmem:[#allocation248_spill] sm:$0xff]  ;;  %5371 = vmatprep.subr.bf16.mxu0 %v5370_v20 }
 0x304   :  { %v2518_v18 = vsub.f32 %v12005_v0, %v12004_v40  ;;  %v12006_v52 = vld [vmem:[#allocation135_spill] sm:$0xff]  ;;  %v12011_v43 = vld [vmem:[#allocation206_spill] sm:$0xff]  ;;  %v12013_v13 = vld [vmem:[#allocation217_spill] sm:$0xff]  ;;  %v8630_v0 = vpop.eup %5788 }
 0x305   :  { %v2520_v30 = vsub.f32 %v12007_v32, %v12006_v52  ;;  %v12010_v59 = vld [vmem:[#allocation103_spill] sm:$0xff]  ;;  %v12012_v46 = vld [vmem:[#allocation106_spill] sm:$0xff]  ;;  %v12016_v63 = vld [vmem:[#allocation128_spill] sm:$0xff]  ;;  %12018 = vst [vmem:[#allocation200_spill] sm:$0xff] %v8630_v0 }
 0x306   :  { %v2524_v35 = vsub.f32 %v12011_v43, %v12010_v59  ;;  %v2526_v25 = vsub.f32 %v12013_v13, %v12012_v46  ;;  %v12014_v4 = vld [vmem:[#allocation115_spill] sm:$0xff]  ;;  %v12015_v1 = vld [vmem:[#allocation226_spill] sm:$0xff]  ;;  %v12019_v40 = vld [vmem:[#allocation136_spill] sm:$0xff]  ;;  %v8640_v46 = vpop.eup %5790 }
 0x307   :  { %v2528_v45 = vsub.f32 %v12015_v1, %v12014_v4  ;;  %v12017_v55 = vld [vmem:[#allocation238_spill] sm:$0xff]  ;;  %v12020_v32 = vld [vmem:[#allocation249_spill] sm:$0xff]  ;;  %v12021_v53 = vld [vmem:[#allocation140_spill] sm:$0xff]  ;;  %12027 = vst [vmem:[#allocation210_spill] sm:$0xff] %v8640_v46 }
 0x308   :  { %v2530_v28 = vsub.f32 %v12017_v55, %v12016_v63  ;;  %v2532_v52 = vsub.f32 %v12020_v32, %v12019_v40  ;;  %v12022_v27 = vld [vmem:[#allocation262_spill] sm:$0xff]  ;;  %v12023_v11 = vld [vmem:[#allocation111_spill] sm:$0xff]  ;;  %v12024_v23 = vld [vmem:[#allocation208_spill] sm:$0xff]  ;;  %v2776_v31 = vmax.f32 %v2524_v35, %v2526_v25 }
 0x309   :  { %v2534_v20 = vsub.f32 %v12022_v27, %v12021_v53  ;;  %v2536_v43 = vsub.f32 %v12024_v23, %v12023_v11  ;;  %v12025_v59 = vld [vmem:[#allocation112_spill] sm:$0xff]  ;;  %v12026_v29 = vld [vmem:[#allocation218_spill] sm:$0xff]  ;;  %v12032_v61 = vld [vmem:[#allocation141_spill] sm:$0xff]  ;;  %v12036_v23 = vpack.c.bf16 %v8428_v47, %v8423_v8 }
 0x30a   :  { %v2538_v13 = vsub.f32 %v12026_v29, %v12025_v59  ;;  %v12028_v1 = vld [vmem:[#allocation122_spill] sm:$0xff]  ;;  %v12029_v4 = vld [vmem:[#allocation228_spill] sm:$0xff]  ;;  %v12033_v51 = vld [vmem:[#allocation251_spill] sm:$0xff] }
 0x30b   :  { %v2540_v34 = vsub.f32 %v12029_v4, %v12028_v1  ;;  %v12030_v55 = vld [vmem:[#allocation134_spill] sm:$0xff]  ;;  %v12031_v63 = vld [vmem:[#allocation240_spill] sm:$0xff]  ;;  %v2544_v32 = vsub.f32 %v12033_v51, %v12032_v61  ;;  %5373 = vmatpush3.bf16.msra.mxu0 %v12036_v23  ;;  %v12037_v11 = vld [vmem:[#allocation117_spill] sm:$0xff]  ;;  %v12045_v51 = vpack.c.bf16 %v8439_v17, %v8434_v26  ;;  %v12050_v26 = vpack.c.bf16 %v8449_v42, %v8444_v37 }
 0x30c   :  { %v2542_v0 = vsub.f32 %v12031_v63, %v12030_v55  ;;  %v12034_v40 = vld [vmem:[#allocation142_spill] sm:$0xff]  ;;  %v12038_v29 = vld [vmem:[#allocation209_spill] sm:$0xff]  ;;  %v12040_v46 = vld [vmem:[#allocation219_spill] sm:$0xff]  ;;  %v2798_v50 = vmax.f32 %v2536_v43, %v2538_v13  ;;  %v2711_v17 = vmax.f32 %v2710_v2, %v2492_v5 }
 0x30d   :  { %v2546_v27 = vsub.f32 %v12035_v38, %v12034_v40  ;;  %v2548_v59 = vsub.f32 %v12038_v29, %v12037_v11  ;;  %v12039_v53 = vld [vmem:[#allocation121_spill] sm:$0xff]  ;;  %v12043_v63 = vld [vmem:[#allocation139_spill] sm:$0xff]  ;;  %5375 = vmatprep.subr.bf16.mxu0 %v12045_v51  ;;  %v12047_v40 = vld [vmem:[#allocation252_spill] sm:$0xff]  ;;  %v2666_v29 = vmax.f32 %v2464_v12, %v2466_v62  ;;  %v2688_v11 = vmax.f32 %v2476_v14, %v2478_v24 }
 0x30e   :  { %v2550_v41 = vsub.f32 %v12040_v46, %v12039_v53  ;;  %v12041_v4 = vld [vmem:[#allocation129_spill] sm:$0xff]  ;;  %v12046_v38 = vld [vmem:[#allocation143_spill] sm:$0xff]  ;;  %v12048_v47 = vld [vmem:[#allocation146_spill] sm:$0xff]  ;;  %v2732_v46 = vmax.f32 %v2500_v60, %v2502_v36  ;;  %v2754_v53 = vmax.f32 %v2512_v39, %v2514_v3  ;;  %v12051_v12 = vpack.c.bf16 %v8459_v44, %v8454_v33 }
 0x30f   :  { %v12042_v1 = vld [vmem:[#allocation229_spill] sm:$0xff]  ;;  %v2556_v8 = vsub.f32 %v12047_v40, %v12046_v38  ;;  %v12049_v23 = vld [vmem:[#allocation264_spill] sm:$0xff]  ;;  %5377 = vmatpush3.bf16.msra.mxu0 %v12050_v26  ;;  %v2777_v38 = vmax.f32 %v2776_v31, %v2528_v45  ;;  %v12052_v39 = vsub.f32 %v11957_v49, %v11956_v21  ;;  %v12053_v3 = vsub.f32 %v11969_v56, %v11968_v22  ;;  %v12055_v45 = vld [vmem:[#allocation118_spill] sm:$0xff] }
 0x310   :  { %v2552_v7 = vsub.f32 %v12042_v1, %v12041_v4  ;;  %v12044_v55 = vld [vmem:[#allocation241_spill] sm:$0xff]  ;;  %v2558_v61 = vsub.f32 %v12049_v23, %v12048_v47  ;;  %v2667_v1 = vmax.f32 %v2666_v29, %v2468_v9  ;;  %v2689_v4 = vmax.f32 %v2688_v11, %v2480_v58  ;;  %5379 = vmatprep.subr.bf16.mxu0 %v12051_v12  ;;  %v12057_v33 = vld [vmem:[#allocation244_spill] sm:$0xff]  ;;  %v12061_v58 = vld [vmem:[#allocation83_spill] sm:$0xff] }
 0x311   :  { %v2554_v19 = vsub.f32 %v12044_v55, %v12043_v63  ;;  %v2820_v55 = vmax.f32 %v2548_v59, %v2550_v41  ;;  %v2733_v51 = vmax.f32 %v2732_v46, %v2504_v54  ;;  %v2755_v40 = vmax.f32 %v2754_v53, %v2516_v48  ;;  %v12054_v48 = vld [vmem:[#allocation243_spill] sm:$0xff]  ;;  %v12058_v44 = vld [vmem:[#allocation113_spill] sm:$0xff]  ;;  %v12060_v24 = vld [vmem:[#allocation116_spill] sm:$0xff] }
 0x312   :  { %v2668_v15 = vmax.f32 %v2667_v1, %v12052_v39  ;;  %v2690_v41 = vmax.f32 %v2689_v4, %v12053_v3  ;;  %v2799_v59 = vmax.f32 %v2798_v50, %v2540_v34  ;;  %v2712_v37 = vmax.f32 %v2711_v17, %v2494_v10  ;;  %v12063_v34 = vld [vmem:[#allocation245_spill] sm:$0xff]  ;;  %v12073_v43 = vld [vmem:[#allocation126_spill] sm:$0xff]  ;;  %v12075_v29 = vld [vmem:[#allocation259_spill] sm:$0xff] }
 0x313   :  { %v2821_v62 = vmax.f32 %v2820_v55, %v2552_v7  ;;  %v2734_v42 = vmax.f32 %v2733_v51, %v2506_v57  ;;  %v2756_v9 = vmax.f32 %v2755_v40, %v2518_v18  ;;  %v2778_v6 = vmax.f32 %v2777_v38, %v2530_v28  ;;  %v12064_v7 = vld [vmem:[#allocation120_spill] sm:$0xff]  ;;  %v12066_v54 = vld [vmem:[#allocation185_spill] sm:$0xff]  ;;  %v12067_v57 = vld [vmem:[#allocation158_spill] sm:$0xff] }
 0x314   :  { %v12056_v31 = vsub.f32 %v12054_v48, %v12055_v45  ;;  %v12059_v36 = vsub.f32 %v12057_v33, %v12058_v44  ;;  %v2800_v49 = vmax.f32 %v2799_v59, %v2542_v0  ;;  %v12062_v56 = vpack.c.bf16 %v12060_v24, %v12061_v58  ;;  %v12069_v11 = vld [vmem:[#allocation257_spill] sm:$0xff]  ;;  %v12076_v46 = vld [vmem:[#allocation131_spill] sm:$0xff]  ;;  %v12082_v51 = vld [vmem:[#allocation138_spill] sm:$0xff] }
 0x315   :  { %v2822_v60 = vmax.f32 %v2821_v62, %v2554_v19  ;;  %v12065_v50 = vsub.f32 %v12063_v34, %v12064_v7  ;;  %v2735_v18 = vmax.f32 %v2734_v42, %v2508_v16  ;;  %v2757_v28 = vmax.f32 %v2756_v9, %v2520_v30  ;;  %v12070_v35 = vld [vmem:[#allocation125_spill] sm:$0xff]  ;;  %v12072_v19 = vld [vmem:[#allocation258_spill] sm:$0xff]  ;;  %v12078_v30 = vld [vmem:[#allocation260_spill] sm:$0xff] }
 0x316   :  { %v2669_v53 = vmax.f32 %v2668_v15, %v12056_v31  ;;  %v2691_v14 = vmax.f32 %v2690_v41, %v12059_v36  ;;  %5381 = vmatpush3.bf16.msra.mxu0 %v12062_v56  ;;  %v2779_v2 = vmax.f32 %v2778_v6, %v2532_v52  ;;  %v12068_v5 = vpack.c.bf16 %v12066_v54, %v12067_v57  ;;  %v12079_v52 = vld [vmem:[#allocation137_spill] sm:$0xff]  ;;  %v12084_v62 = vld [vmem:[#allocation172_spill] sm:$0xff]  ;;  %v12087_v48 = vld [vmem:[#allocation82_spill] sm:$0xff] }
 0x317   :  { %v2713_v10 = vmax.f32 %v2712_v37, %v12065_v50  ;;  %v12071_v25 = vsub.f32 %v12069_v11, %v12070_v35  ;;  %v12074_v13 = vsub.f32 %v12072_v19, %v12073_v43  ;;  %v2801_v38 = vmax.f32 %v2800_v49, %v2544_v32  ;;  %v12081_v17 = vld [vmem:[#allocation261_spill] sm:$0xff]  ;;  %v12088_v31 = vld [vmem:[#allocation2_spill] sm:$0xff] }
 0x318   :  { %5383 = vmatprep.subr.bf16.mxu0 %v12068_v5  ;;  %v2823_v23 = vmax.f32 %v2822_v60, %v2556_v8  ;;  %v12077_v1 = vsub.f32 %v12075_v29, %v12076_v46  ;;  %v12080_v55 = vsub.f32 %v12078_v30, %v12079_v52  ;;  %v12083_v40 = vsub.f32 %v12081_v17, %v12082_v51  ;;  %v12085_v32 = vld [vmem:[#allocation265_spill] sm:$0xff]  ;;  %v3268_v11 = vld [vmem:[%s10490_s12 + $0x200] sm:$0xff]  ;;  %v8731_v29 = vld [vmem:[%s10490_s12 + $0x210] sm:$0xff] }
 0x319   :  { %v2670_v0 = vmax.f32 %v2669_v53, %v12071_v25  ;;  %v2692_v4 = vmax.f32 %v2691_v14, %v12074_v13  ;;  %v2780_v39 = vmax.f32 %v2779_v2, %v2534_v20  ;;  %v2802_v41 = vmax.f32 %v2801_v38, %v2546_v27  ;;  %v3269_v25 = vld [vmem:[%s10490_s12 + $0x208] sm:$0xff]  ;;  %v3286_v38 = vld [vmem:[%s10490_s12 + $0x290] sm:$0xff]  ;;  %v8738_v17 = vld [vmem:[%s10490_s12 + $0x218] sm:$0xff] }
 0x31a   :  { %v2714_v16 = vmax.f32 %v2713_v10, %v12077_v1  ;;  %v2736_v26 = vmax.f32 %v2735_v18, %v12080_v55  ;;  %v2758_v12 = vmax.f32 %v2757_v28, %v12083_v40  ;;  %v2824_v59 = vmax.f32 %v2823_v23, %v2558_v61  ;;  %v3287_v23 = vld [vmem:[%s10490_s12 + $0x298] sm:$0xff]  ;;  %v12171_v46 = vld [vmem:[#allocation111_spill] sm:$0xff]  ;;  %v12175_v43 = vld [vmem:[#allocation122_spill] sm:$0xff] }
 0x31b   :  { %v2671_v15 = vrot.slane %v2670_v0, 4  ;;  %v2693_v3 = vrot.slane %v2692_v4, 4  ;;  %v12086_v8 = vpack.c.bf16 %v12084_v62, %v12085_v32  ;;  %v2781_v6 = vrot.slane %v2780_v39, 4  ;;  %v12179_v35 = vld [vmem:[#allocation141_spill] sm:$0xff] }
 0x31c   :  { %v2715_v37 = vrot.slane %v2714_v16, 4  ;;  %v2737_v42 = vrot.slane %v2736_v26, 4  ;;  %v2759_v9 = vrot.slane %v2758_v12, 4  ;;  %v12089_v53 = vpack.c.bf16 %v12087_v48, %v12088_v31  ;;  %v12183_v7 = vld [vmem:[#allocation117_spill] sm:$0xff] }
 0x31d   :  { %5385 = vmatpush3.bf16.msra.mxu0 %v12086_v8  ;;  %v2672_v33 = vmax.f32 %v2670_v0, %v2671_v15  ;;  %v2694_v36 = vmax.f32 %v2692_v4, %v2693_v3  ;;  %v2803_v14 = vrot.slane %v2802_v41, 4  ;;  %v2825_v20 = vrot.slane %v2824_v59, 4  ;;  %v12090_v3 = vld [vmem:[#allocation200_spill] sm:$0xff]  ;;  %v12187_v44 = vld [vmem:[#allocation129_spill] sm:$0xff] }
 0x31e   :  { %5419 = vmatprep.subr.bf16.mxu0 %v12089_v53  ;;  %v2716_v49 = vmax.f32 %v2714_v16, %v2715_v37  ;;  %v2738_v60 = vmax.f32 %v2736_v26, %v2737_v42  ;;  %v2760_v27 = vmax.f32 %v2758_v12, %v2759_v9  ;;  %v2782_v61 = vmax.f32 %v2780_v39, %v2781_v6  ;;  %v941_v26 = vpop.f32.mrb[12].mxu0  ;;  %v3302_v37 = vld [vmem:[%s10490_s12 + $0x310] sm:$0xff]  ;;  %v3303_v42 = vld [vmem:[%s10490_s12 + $0x318] sm:$0xff]  ;;  %v8753_v53 = vld [vmem:[%s10490_s12 + $0x2a0] sm:$0xff] }
 0x31f   :  { %v2673_v24 = vrot.slane %v2672_v33, 2  ;;  %v2695_v58 = vrot.slane %v2694_v36, 2  ;;  %v2804_v56 = vmax.f32 %v2802_v41, %v2803_v14  ;;  %v2826_v34 = vmax.f32 %v2824_v59, %v2825_v20  ;;  %v943_v59 = vpop.f32.mrb[13].mxu0  ;;  %v12094_v14 = vld [vmem:[#allocation132_spill] sm:$0xff] }
 0x320   :  { %v2717_v50 = vrot.slane %v2716_v49, 2  ;;  %v2739_v10 = vrot.slane %v2738_v60, 2  ;;  %v2761_v18 = vrot.slane %v2760_v27, 2  ;;  %v2783_v28 = vrot.slane %v2782_v61, 2 }
 0x321   :  { %v2674_v2 = vmax.f32 %v2672_v33, %v2673_v24  ;;  %v2696_v54 = vmax.f32 %v2694_v36, %v2695_v58  ;;  %v2805_v57 = vrot.slane %v2804_v56, 2  ;;  %v2827_v5 = vrot.slane %v2826_v34, 2  ;;  %v12092_v33 = vld [vmem:[#allocation124_spill] sm:$0xff]  ;;  %v3320_v24 = vld [vmem:[%s10490_s12 + $0x3a0] sm:$0xff]  ;;  %v947_v58 = vpop.f32.mrb[14].mxu0 }
 0x322   :  { %v2718_v0 = vmax.f32 %v2716_v49, %v2717_v50  ;;  %v2740_v19 = vmax.f32 %v2738_v60, %v2739_v10  ;;  %v2762_v13 = vmax.f32 %v2760_v27, %v2761_v18  ;;  %v2784_v4 = vmax.f32 %v2782_v61, %v2783_v28  ;;  %v3289_v27 = vld [vmem:[%s10490_s12 + $0x2a8] sm:$0xff]  ;;  %v8769_v61 = vld [vmem:[%s10490_s12 + $0x220] sm:$0xff] }
 0x323   :  { %v2675_v1 = vrot.slane %v2674_v2, 1  ;;  %v2697_v16 = vrot.slane %v2696_v54, 1  ;;  %v2806_v30 = vmax.f32 %v2804_v56, %v2805_v57  ;;  %v8733_v55 = vmax.f32 %v2826_v34, %v2827_v5  ;;  %v3321_v18 = vld [vmem:[%s10490_s12 + $0x3a8] sm:$0xff]  ;;  %v3304_v28 = vld [vmem:[%s10490_s12 + $0x320] sm:$0xff]  ;;  %v949_v5 = vpop.f32.mrb[15].mxu0 }
 0x324   :  { %v2719_v40 = vrot.slane %v2718_v0, 1  ;;  %v2741_v12 = vrot.slane %v2740_v19, 1  ;;  %v2763_v39 = vrot.slane %v2762_v13, 1  ;;  %v2785_v15 = vrot.slane %v2784_v4, 1 }
 0x325   :  { %v1051_v41 = vmul.f32 %v12090_v3, %v941_v26  ;;  %v2676_v62 = vmax.f32 %v2674_v2, %v2675_v1  ;;  %v2698_v32 = vmax.f32 %v2696_v54, %v2697_v16  ;;  %v2807_v8 = vrot.slane %v2806_v30, 1  ;;  %v3305_v2 = vld [vmem:[%s10490_s12 + $0x328] sm:$0xff]  ;;  %v12096_v54 = vld [vmem:[#allocation210_spill] sm:$0xff]  ;;  %v8812_v1 = vld [vmem:[%s10490_s12 + $0x230] sm:$0xff] }
 0x326   :  { %v8748_v9 = vmul.f32 %v12090_v3, %v943_v59  ;;  %v5420_v6 = vpack.c.bf16 %v3269_v25, %v3268_v11  ;;  %v5422_v48 = vpack.c.bf16 %v3287_v23, %v3286_v38  ;;  %v2720_v31 = vmax.f32 %v2718_v0, %v2719_v40  ;;  %v8801_v38 = vld [vmem:[%s10490_s12 + $0x2b8] sm:$0xff]  ;;  %v8836_v59 = vld [vmem:[%s10490_s12 + $0x2c0] sm:$0xff] }
 0x327   :  { %v8756_v36 = vmul.f32 %v12092_v33, %v1051_v41  ;;  %v8759_v20 = vmul.f32 %v12094_v14, %v1051_v41  ;;  %v5424_v49 = vpack.c.bf16 %v8738_v17, %v8731_v29  ;;  %v2742_v60 = vmax.f32 %v2740_v19, %v2741_v12  ;;  %v3273_v19 = vld [vmem:[%s10490_s12 + $0x228] sm:$0xff]  ;;  %v8817_v16 = vld [vmem:[%s10490_s12 + $0x238] sm:$0xff]  ;;  %v3306_v17 = vld [vmem:[%s10490_s12 + $0x330] sm:$0xff] }
 0x328   :  { %12091 = vst [vmem:[#allocation220_spill] sm:$0xff] %v8748_v9  ;;  %3652 = vmatprep.mubr.f32.mxu0 %v8748_v9  ;;  %v2764_v56 = vmax.f32 %v2762_v13, %v2763_v39  ;;  %v2829_v34 = vrot.slane %v8733_v55, 1  ;;  %v3127_v50 = vsel %vm3045_vm0, %v2698_v32, %v2676_v62  ;;  %v5456_v10 = vpack.c.bf16 %v3303_v42, %v3302_v37  ;;  %v8796_v13 = vld [vmem:[%s10490_s12 + $0x2b0] sm:$0xff]  ;;  %v3323_v26 = vld [vmem:[%s10490_s12 + $0x3b8] sm:$0xff]  ;;  %v8841_v62 = vld [vmem:[%s10490_s12 + $0x2c8] sm:$0xff] }
 0x329   :  { %12093 = vst [vmem:[#allocation97_spill] sm:$0xff] %v8756_v36  ;;  %12095 = vst [vmem:[#allocation231_spill] sm:$0xff] %v8759_v20  ;;  %v8787_v57 = vmul.f32 %v12096_v54, %v947_v58  ;;  %3653 = vmatmul.mubr.f32.vlgmr.msra.gmra.mrb[20].mxu0 %v1051_v41  ;;  %v2786_v11 = vmax.f32 %v2784_v4, %v2785_v15  ;;  %v2808_v25 = vmax.f32 %v2806_v30, %v2807_v8  ;;  %v3322_v30 = vld [vmem:[%s10490_s12 + $0x3b0] sm:$0xff]  ;;  %v12132_v20 = vld [vmem:[#allocation49_spill] sm:$0xff] }
 0x32a   :  { %v3128_v0 = vsel %vm3047_vm4, %v2720_v31, %v3127_v50  ;;  %v8804_v23 = vmul.f32 %v12096_v54, %v949_v5  ;;  %5421 = vmatpush3.bf16.msra.mxu0 %v5420_v6  ;;  %5457 = vmatpush3.bf16.msra.mxu1 %v5456_v10  ;;  %v8807_v29 = vmul.f32 %v1051_v41, %v1051_v41  ;;  %v3307_v41 = vld [vmem:[%s10490_s12 + $0x338] sm:$0xff]  ;;  %v8852_v6 = vld [vmem:[%s10490_s12 + $0x240] sm:$0xff]  ;;  %v12143_v36 = vld [vmem:[#allocation11_spill] sm:$0xff] }
 0x32b   :  { %12097 = vst [vmem:[#allocation201_spill] sm:$0xff] %v8787_v57  ;;  %v3129_v4 = vsel %vm3049_vm3, %v2742_v60, %v3128_v0  ;;  %5423 = vmatprep.subr.bf16.mxu0 %v5422_v48  ;;  %v5426_v12 = vpack.c.bf16 %v3289_v27, %v8753_v53  ;;  %v5458_v39 = vpack.c.bf16 %v3321_v18, %v3320_v24  ;;  %v3324_v48 = vld [vmem:[%s10490_s12 + $0x3c0] sm:$0xff]  ;;  %v8869_v27 = vld [vmem:[%s10490_s12 + $0x248] sm:$0xff]  ;;  %v12165_v14 = vld [vmem:[#allocation128_spill] sm:$0xff] }
 0x32c   :  { %12098 = vst [vmem:[#allocation211_spill] sm:$0xff] %v8804_v23  ;;  %v3130_v40 = vsel %vm3051_vm5, %v2764_v56, %v3129_v4  ;;  %v5460_v15 = vpack.c.bf16 %v3305_v2, %v3304_v28  ;;  %3657 = vmatprep.mubr.f32.mxu0 %v8804_v23  ;;  %v2830_v32 = vmax.f32 %v8733_v55, %v2829_v34  ;;  %v3325_v55 = vld [vmem:[%s10490_s12 + $0x3c8] sm:$0xff]  ;;  %v1030_v28 = vpop.f32.mrb[16].mxu0  ;;  %v12103_v0 = vld [vmem:[#allocation6_spill] sm:$0xff]  ;;  %v12104_v4 = vld [vmem:[#allocation96_spill] sm:$0xff] }
 0x32d   :  { %v3131_v8 = vsel %vm3053_vm6, %v2786_v11, %v3130_v40  ;;  %v1060_v37 = vmul.f32 %v8748_v9, %v8748_v9  ;;  %v5428_v42 = vpack.c.bf16 %v3273_v19, %v8769_v61  ;;  %3658 = vmatmul.mubr.f32.gmra.mrb[22].mxu0 %v8787_v57  ;;  %5459 = vmatprep.subr.bf16.mxu1 %v5458_v39  ;;  %v3308_v61 = vld [vmem:[%s10490_s12 + $0x340] sm:$0xff]  ;;  %v3309_v24 = vld [vmem:[%s10490_s12 + $0x348] sm:$0xff]  ;;  %v12167_v33 = vld [vmem:[#allocation136_spill] sm:$0xff] }
 0x32e   :  { %v3132_v31 = vsel %vm3055_vm7, %v2808_v25, %v3131_v8  ;;  %v8864_v53 = vmul.f32 %v8787_v57, %v8787_v57  ;;  %v5462_v60 = vpack.c.bf16 %v3323_v26, %v3322_v30  ;;  %5425 = vmatpush3.bf16.msra.mxu0 %v5424_v49  ;;  %5461 = vmatpush3.bf16.msra.mxu1 %v5460_v15  ;;  %v12102_v25 = vld [vmem:[#allocation87_spill] sm:$0xff]  ;;  %v12105_v30 = vld [vmem:[#allocation254_spill] sm:$0xff]  ;;  %v12131_v26 = vld [vmem:[#allocation108_spill] sm:$0xff] }
 0x32f   :  { %v8878_v58 = vsel %vm3057_vm8, %v2830_v32, %v3132_v31  ;;  %v5430_v56 = vpack.c.bf16 %v8801_v38, %v8796_v13  ;;  %v5464_v34 = vpack.c.bf16 %v3307_v41, %v3306_v17  ;;  %5427 = vmatprep.subr.bf16.mxu0 %v5426_v12  ;;  %v1062_v10 = vmul.f32 %v8804_v23, %v8804_v23  ;;  %v1032_v38 = vpop.f32.mrb[17].mxu0  ;;  %v12108_v40 = vld [vmem:[#allocation230_spill] sm:$0xff]  ;;  %v12111_v32 = vld [vmem:[#allocation79_spill] sm:$0xff]  ;;  %v12126_v41 = vld [vmem:[#allocation100_spill] sm:$0xff] }
 0x330   :  { %12099 = vst [vmem:[#allocation221_spill] sm:$0xff] %v8864_v53  ;;  %12100 = vst [vmem:[#allocation99_spill] sm:$0xff] %v8878_v58  ;;  %4771 = vmatprep.mubr.msk.f32.mxu0 %vm3007_vm9, %v8878_v58  ;;  %v5432_v18 = vpack.c.bf16 %v8817_v16, %v8812_v1  ;;  %v5466_v49 = vpack.c.bf16 %v3325_v55, %v3324_v48  ;;  %5463 = vmatprep.subr.bf16.mxu1 %v5462_v60  ;;  %v12106_v1 = vld [vmem:[#allocation91_spill] sm:$0xff]  ;;  %v12109_v15 = vld [vmem:[#allocation242_spill] sm:$0xff]  ;;  %v12112_v8 = vmax.f32 %v12111_v32, 1.0 }
 0x331   :  { %v5434_v2 = vpack.c.bf16 %v8841_v62, %v8836_v59  ;;  %v5436_v5 = vpack.c.bf16 %v8869_v27, %v8852_v6  ;;  %v5468_v11 = vpack.c.bf16 %v3309_v24, %v3308_v61  ;;  %v1055_v13 = vmul.f32 %v12090_v3, %v1030_v28  ;;  %v12107_v16 = vld [vmem:[#allocation239_spill] sm:$0xff]  ;;  %v12114_v55 = vld [vmem:[#allocation88_spill] sm:$0xff]  ;;  %v1036_v24 = vpop.f32.mrb[18].mxu0  ;;  %v12128_v12 = vld [vmem:[#allocation94_spill] sm:$0xff] }
 0x332   :  { %v1056_v39 = vmul.f32 %v12090_v3, %v1032_v38  ;;  %5429 = vmatpush3.bf16.msra.mxu0 %v5428_v42  ;;  %5465 = vmatpush3.bf16.msra.mxu1 %v5464_v34  ;;  %v8909_v6 = vadd.f32 1.0, %v12112_v8  ;;  %v12115_v31 = vld [vmem:[#allocation7_spill] sm:$0xff]  ;;  %v12116_v3 = vld [vmem:[#allocation98_spill] sm:$0xff]  ;;  %v12117_v42 = vld [vmem:[#allocation253_spill] sm:$0xff] }
 0x333   :  { %v1063_v48 = vsub.f32 %v1055_v13, %v8807_v29  ;;  %5431 = vmatprep.subr.bf16.mxu0 %v5430_v56  ;;  %5467 = vmatprep.subr.bf16.mxu1 %v5466_v49  ;;  %v2475_v60 = vsub.f32 %v12115_v31, %v12114_v55  ;;  %v2477_v27 = vsub.f32 %v12117_v42, %v12116_v3  ;;  %v12118_v34 = vld [vmem:[#allocation104_spill] sm:$0xff]  ;;  %v1038_v49 = vpop.f32.mrb[19].mxu0  ;;  %v12124_v31 = vld [vmem:[#allocation89_spill] sm:$0xff]  ;;  %v12151_v9 = vld [vmem:[#allocation10_spill] sm:$0xff] }
 0x334   :  { %12113 = vst [vmem:[#allocation232_spill] sm:$0xff] %v8909_v6  ;;  %v1064_v61 = vsub.f32 %v1056_v39, %v1060_v37  ;;  %v12119_v28 = vld [vmem:[#allocation256_spill] sm:$0xff]  ;;  %v8923_v56 = vmul.f32 %v12096_v54, %v1036_v24  ;;  %v12125_v37 = vld [vmem:[#allocation5_spill] sm:$0xff]  ;;  %v1058_v42 = vmul.f32 %v12096_v54, %v1038_v49  ;;  %v2493_v55 = vsub.f32 %v12132_v20, %v12131_v26  ;;  %v12159_v53 = vld [vmem:[#allocation103_spill] sm:$0xff] }
 0x335   :  { %v12120_v62 = vld [vmem:[#allocation8_spill] sm:$0xff]  ;;  %v1067_v29 = vmax.f32 %v1063_v48, 0.0  ;;  %v2487_v39 = vsub.f32 %v12125_v37, %v12124_v31  ;;  %v12127_v38 = vld [vmem:[#allocation13_spill] sm:$0xff]  ;;  %v12129_v48 = vld [vmem:[#allocation43_spill] sm:$0xff] }
 0x336   :  { %12122 = vst [vmem:[#allocation202_spill] sm:$0xff] %v8923_v56  ;;  %v1068_v3 = vmax.f32 %v1064_v61, 0.0  ;;  %5433 = vmatpush3.bf16.msra.mxu0 %v5432_v18  ;;  %5469 = vmatpush3.bf16.msra.mxu1 %v5468_v11  ;;  %v2489_v17 = vsub.f32 %v12127_v38, %v12126_v41  ;;  %v2491_v19 = vsub.f32 %v12129_v48, %v12128_v12  ;;  %v12135_v41 = vld [vmem:[#allocation92_spill] sm:$0xff]  ;;  %v12136_v38 = vld [vmem:[#allocation14_spill] sm:$0xff]  ;;  %v12137_v12 = vld [vmem:[#allocation107_spill] sm:$0xff] }
 0x337   :  { %v8934_v24 = vadd.f32 1e-05, %v1067_v29  ;;  %5435 = vmatprep.subr.bf16.mxu0 %v5434_v2  ;;  %v1066_v11 = vsub.f32 %v1058_v42, %v1062_v10  ;;  %v2499_v49 = vsub.f32 %v12136_v38, %v12135_v41  ;;  %v12138_v29 = vld [vmem:[#allocation22_spill] sm:$0xff]  ;;  %v12140_v20 = vld [vmem:[#allocation101_spill] sm:$0xff]  ;;  %v12141_v26 = vld [vmem:[#allocation28_spill] sm:$0xff] }
 0x338   :  { %v2501_v37 = vsub.f32 %v12138_v29, %v12137_v12  ;;  %v8949_v2 = vadd.f32 1e-05, %v1068_v3  ;;  %v2503_v48 = vsub.f32 %v12141_v26, %v12140_v20  ;;  %v12142_v31 = vld [vmem:[#allocation114_spill] sm:$0xff]  ;;  %v12145_v10 = vld [vmem:[#allocation127_spill] sm:$0xff]  ;;  %v12148_v12 = vld [vmem:[#allocation109_spill] sm:$0xff] }
 0x339   :  { %12130 = vst [vmem:[#allocation213_spill] sm:$0xff] %v8934_v24  ;;  %5792 = vrsqrt.f32 %v8934_v24  ;;  %v2505_v54 = vsub.f32 %v12143_v36, %v12142_v31  ;;  %v8955_v23 = vmax.f32 %v1066_v11, 0.0  ;;  %v12146_v42 = vld [vmem:[#allocation18_spill] sm:$0xff]  ;;  %v12149_v29 = vld [vmem:[#allocation32_spill] sm:$0xff]  ;;  %v12150_v3 = vld [vmem:[#allocation95_spill] sm:$0xff] }
 0x33a   :  { %12139 = vst [vmem:[#allocation222_spill] sm:$0xff] %v8949_v2  ;;  %5437 = vmatpush3.bf16.msra.mxu0 %v5436_v5  ;;  %v2507_v18 = vsub.f32 %v12146_v42, %v12145_v10  ;;  %v12147_v41 = vld [vmem:[#allocation26_spill] sm:$0xff]  ;;  %v2511_v58 = vsub.f32 %v12149_v29, %v12148_v12  ;;  %v2513_v32 = vsub.f32 %v12151_v9, %v12150_v3  ;;  %v12153_v20 = vld [vmem:[#allocation37_spill] sm:$0xff]  ;;  %v12154_v2 = vld [vmem:[#allocation123_spill] sm:$0xff] }
 0x33b   :  { %12144 = vst [vmem:[#allocation234_spill] sm:$0xff] %v8955_v23  ;;  %v2509_v38 = vsub.f32 %v12147_v41, %v12079_v52  ;;  %v12152_v24 = vld [vmem:[#allocation110_spill] sm:$0xff]  ;;  %v12155_v36 = vld [vmem:[#allocation15_spill] sm:$0xff]  ;;  %v12160_v52 = vld [vmem:[#allocation57_spill] sm:$0xff] }
 0x33c   :  { %v2515_v26 = vsub.f32 %v12153_v20, %v12152_v24  ;;  %v2517_v31 = vsub.f32 %v12155_v36, %v12154_v2  ;;  %v12156_v11 = vld [vmem:[#allocation135_spill] sm:$0xff]  ;;  %v2523_v41 = vsub.f32 %v12160_v52, %v12159_v53  ;;  %v12161_v56 = vld [vmem:[#allocation106_spill] sm:$0xff]  ;;  %v12164_v9 = vld [vmem:[#allocation12_spill] sm:$0xff] }
 0x33d   :  { %v12157_v5 = vld [vmem:[#allocation23_spill] sm:$0xff]  ;;  %v12169_v50 = vld [vmem:[#allocation140_spill] sm:$0xff]  ;;  %v12177_v13 = vld [vmem:[#allocation134_spill] sm:$0xff] }
 0x33e   :  { %v2519_v23 = vsub.f32 %v12157_v5, %v12156_v11  ;;  %v12158_v10 = vld [vmem:[#allocation51_spill] sm:$0xff]  ;;  %v12173_v61 = vld [vmem:[#allocation112_spill] sm:$0xff]  ;;  %v12181_v59 = vld [vmem:[#allocation142_spill] sm:$0xff] }
 0x33f   :  { %v2521_v42 = vsub.f32 %v12158_v10, %v12082_v51  ;;  %v12162_v12 = vld [vmem:[#allocation39_spill] sm:$0xff]  ;;  %v12172_v51 = vld [vmem:[#allocation38_spill] sm:$0xff]  ;;  %v12174_v53 = vld [vmem:[#allocation16_spill] sm:$0xff] }
 0x340   :  { %v2525_v29 = vsub.f32 %v12162_v12, %v12161_v56  ;;  %v12163_v6 = vld [vmem:[#allocation115_spill] sm:$0xff]  ;;  %v2535_v10 = vsub.f32 %v12172_v51, %v12171_v46  ;;  %v2537_v52 = vsub.f32 %v12174_v53, %v12173_v61  ;;  %v12176_v56 = vld [vmem:[#allocation17_spill] sm:$0xff]  ;;  %v12186_v46 = vld [vmem:[#allocation20_spill] sm:$0xff] }
 0x341   :  { %v2527_v3 = vsub.f32 %v12164_v9, %v12163_v6  ;;  %v12166_v24 = vld [vmem:[#allocation19_spill] sm:$0xff]  ;;  %v2539_v12 = vsub.f32 %v12176_v56, %v12175_v43  ;;  %v12178_v6 = vld [vmem:[#allocation24_spill] sm:$0xff]  ;;  %v12185_v57 = vld [vmem:[#allocation121_spill] sm:$0xff] }
 0x342   :  { %v2529_v20 = vsub.f32 %v12166_v24, %v12165_v14  ;;  %v12168_v2 = vld [vmem:[#allocation47_spill] sm:$0xff]  ;;  %v2541_v9 = vsub.f32 %v12178_v6, %v12177_v13  ;;  %v12180_v14 = vld [vmem:[#allocation30_spill] sm:$0xff]  ;;  %v2549_v51 = vsub.f32 %v12186_v46, %v12185_v57  ;;  %v12188_v61 = vld [vmem:[#allocation21_spill] sm:$0xff]  ;;  %v2677_v57 = vmax.f32 %v2475_v60, %v2477_v27 }
 0x343   :  { %v2531_v36 = vsub.f32 %v12168_v2, %v12167_v33  ;;  %v12170_v11 = vld [vmem:[#allocation55_spill] sm:$0xff]  ;;  %v2543_v24 = vsub.f32 %v12180_v14, %v12179_v35  ;;  %v12182_v33 = vld [vmem:[#allocation36_spill] sm:$0xff]  ;;  %v2551_v53 = vsub.f32 %v12188_v61, %v12187_v44  ;;  %v12191_v13 = vld [vmem:[#allocation34_spill] sm:$0xff]  ;;  %v2721_v46 = vmax.f32 %v2499_v49, %v2501_v37  ;;  %v9018_v45 = vpop.eup %5792 }
 0x344   :  { %v2533_v5 = vsub.f32 %v12170_v11, %v12169_v50  ;;  %v2545_v2 = vsub.f32 %v12182_v33, %v12181_v59  ;;  %v12184_v50 = vld [vmem:[#allocation40_spill] sm:$0xff]  ;;  %v12189_v43 = vld [vmem:[#allocation27_spill] sm:$0xff]  ;;  %v12192_v35 = vld [vmem:[#allocation61_spill] sm:$0xff]  ;;  %v12193_v59 = vsub.f32 %v12105_v30, %v12104_v4  ;;  %v2743_v44 = vmax.f32 %v2511_v58, %v2513_v32  ;;  %12196 = vst [vmem:[#allocation204_spill] sm:$0xff] %v9018_v45 }
 0x345   :  { %v2547_v11 = vsub.f32 %v12184_v50, %v12183_v7  ;;  %v2553_v56 = vsub.f32 %v12189_v43, %v12043_v63  ;;  %v12190_v8 = vld [vmem:[#allocation143_spill] sm:$0xff]  ;;  %v2557_v14 = vsub.f32 %v12192_v35, %v12048_v47  ;;  %v12194_v7 = vsub.f32 %v12103_v0, %v12102_v25 }
 0x346   :  { %v2555_v6 = vsub.f32 %v12191_v13, %v12190_v8  ;;  %v2699_v50 = vmax.f32 %v2487_v39, %v2489_v17  ;;  %v12195_v63 = vsub.f32 %v12107_v16, %v12106_v1  ;;  %v2765_v43 = vmax.f32 %v2523_v41, %v2525_v29  ;;  %v12202_v29 = vld [vmem:[#allocation29_spill] sm:$0xff] }
 0x347   :  { %v2655_v33 = vmax.f32 %v12194_v7, %v12193_v59  ;;  %v2787_v8 = vmax.f32 %v2535_v10, %v2537_v52  ;;  %v2809_v13 = vmax.f32 %v2547_v11, %v2549_v51  ;;  %v12197_v47 = vsub.f32 %v12119_v28, %v12118_v34  ;;  %v12200_v34 = vld [vmem:[#allocation118_spill] sm:$0xff]  ;;  %v12205_v10 = vld [vmem:[#allocation31_spill] sm:$0xff]  ;;  %v12206_v52 = vld [vmem:[#allocation120_spill] sm:$0xff] }
 0x348   :  { %v2700_v30 = vmax.f32 %v2699_v50, %v2491_v19  ;;  %v2722_v25 = vmax.f32 %v2721_v46, %v2503_v48  ;;  %v2744_v0 = vmax.f32 %v2743_v44, %v2515_v26  ;;  %v12198_v17 = vsub.f32 %v12108_v40, %v11956_v21  ;;  %v12203_v21 = vld [vmem:[#allocation113_spill] sm:$0xff]  ;;  %v12214_v7 = vld [vmem:[#allocation35_spill] sm:$0xff] }
 0x349   :  { %v2656_v61 = vmax.f32 %v2655_v33, %v12195_v63  ;;  %v2678_v4 = vmax.f32 %v2677_v57, %v12197_v47  ;;  %v2766_v32 = vmax.f32 %v2765_v43, %v2527_v3  ;;  %v2788_v60 = vmax.f32 %v2787_v8, %v2539_v12  ;;  %v12215_v33 = vld [vmem:[#allocation131_spill] sm:$0xff] }
 0x34a   :  { %v2810_v1 = vmax.f32 %v2809_v13, %v2551_v53  ;;  %v12199_v16 = vsub.f32 %v12120_v62, %v11968_v22  ;;  %v2701_v39 = vmax.f32 %v2700_v30, %v2493_v55  ;;  %v2723_v49 = vmax.f32 %v2722_v25, %v2505_v54  ;;  %v12208_v55 = vld [vmem:[#allocation255_spill] sm:$0xff]  ;;  %v12209_v54 = vld [vmem:[#allocation125_spill] sm:$0xff] }
 0x34b   :  { %v2657_v58 = vmax.f32 %v2656_v61, %v12198_v17  ;;  %v2745_v37 = vmax.f32 %v2744_v0, %v2517_v31  ;;  %v12201_v28 = vsub.f32 %v12109_v15, %v12200_v34  ;;  %v2767_v48 = vmax.f32 %v2766_v32, %v2529_v20  ;;  %v12211_v20 = vld [vmem:[#allocation9_spill] sm:$0xff] }
 0x34c   :  { %v2679_v27 = vmax.f32 %v2678_v4, %v12199_v16  ;;  %v2789_v26 = vmax.f32 %v2788_v60, %v2541_v9  ;;  %v2811_v41 = vmax.f32 %v2810_v1, %v2553_v56  ;;  %v12204_v40 = vsub.f32 %v12202_v29, %v12203_v21  ;;  %v12212_v9 = vld [vmem:[#allocation126_spill] sm:$0xff] }
 0x34d   :  { %v2658_v19 = vmax.f32 %v2657_v58, %v12201_v28  ;;  %v12207_v12 = vsub.f32 %v12205_v10, %v12206_v52  ;;  %v2724_v22 = vmax.f32 %v2723_v49, %v2507_v18  ;;  %v2746_v62 = vmax.f32 %v2745_v37, %v2519_v23 }
 0x34e   :  { %v2680_v3 = vmax.f32 %v2679_v27, %v12204_v40  ;;  %v12210_v31 = vsub.f32 %v12208_v55, %v12209_v54  ;;  %v2768_v53 = vmax.f32 %v2767_v48, %v2531_v36  ;;  %v2790_v15 = vmax.f32 %v2789_v26, %v2543_v24 }
 0x34f   :  { %v2702_v11 = vmax.f32 %v2701_v39, %v12207_v12  ;;  %v2812_v35 = vmax.f32 %v2811_v41, %v2555_v6  ;;  %v12213_v56 = vsub.f32 %v12211_v20, %v12212_v9  ;;  %v12216_v57 = vsub.f32 %v12214_v7, %v12215_v33  ;;  %v3294_v9 = vld [vmem:[%s10490_s12 + $0x2d0] sm:$0xff]  ;;  %v12219_v7 = vld [vmem:[#allocation149_spill] sm:$0xff]  ;;  %v12220_v33 = vld [vmem:[#allocation63_spill] sm:$0xff] }
 0x350   :  { %v2659_v51 = vmax.f32 %v2658_v19, %v12210_v31  ;;  %v2725_v46 = vmax.f32 %v2724_v22, %v2509_v38  ;;  %v2747_v44 = vmax.f32 %v2746_v62, %v2521_v42  ;;  %v2769_v18 = vmax.f32 %v2768_v53, %v2533_v5 }
 0x351   :  { %v2681_v59 = vmax.f32 %v2680_v3, %v12213_v56  ;;  %v2703_v50 = vmax.f32 %v2702_v11, %v12216_v57  ;;  %v2791_v23 = vmax.f32 %v2790_v15, %v2545_v2  ;;  %v2813_v61 = vmax.f32 %v2812_v35, %v2557_v14  ;;  %v12217_v15 = vld [vmem:[#allocation145_spill] sm:$0xff]  ;;  %v12218_v35 = vld [vmem:[#allocation59_spill] sm:$0xff] }
 0x352   :  { %v2660_v63 = vrot.slane %v2659_v51, 4  ;;  %v2726_v13 = vrot.slane %v2725_v46, 4  ;;  %v2748_v36 = vrot.slane %v2747_v44, 4  ;;  %v2770_v6 = vrot.slane %v2769_v18, 4  ;;  %v3295_v56 = vld [vmem:[%s10490_s12 + $0x2d8] sm:$0xff] }
 0x353   :  { %v2682_v43 = vrot.slane %v2681_v59, 4  ;;  %v2704_v8 = vrot.slane %v2703_v50, 4  ;;  %v2792_v47 = vrot.slane %v2791_v23, 4  ;;  %v2814_v4 = vrot.slane %v2813_v61, 4  ;;  %v12264_v57 = vld [vmem:[#allocation173_spill] sm:$0xff] }
 0x354   :  { %v2661_v24 = vmax.f32 %v2659_v51, %v2660_v63  ;;  %v2727_v0 = vmax.f32 %v2725_v46, %v2726_v13  ;;  %v2749_v17 = vmax.f32 %v2747_v44, %v2748_v36  ;;  %v2771_v32 = vmax.f32 %v2769_v18, %v2770_v6  ;;  %v12222_v46 = vld [vmem:[#allocation65_spill] sm:$0xff]  ;;  %v12223_v63 = vld [vmem:[#allocation162_spill] sm:$0xff]  ;;  %v12252_v36 = vld [vmem:[#allocation124_spill] sm:$0xff] }
 0x355   :  { %v2683_v30 = vmax.f32 %v2681_v59, %v2682_v43  ;;  %v2705_v25 = vmax.f32 %v2703_v50, %v2704_v8  ;;  %v2793_v38 = vmax.f32 %v2791_v23, %v2792_v47  ;;  %v2815_v42 = vmax.f32 %v2813_v61, %v2814_v4  ;;  %v12221_v50 = vld [vmem:[#allocation152_spill] sm:$0xff]  ;;  %v12224_v18 = vld [vmem:[#allocation25_spill] sm:$0xff] }
 0x356   :  { %v2662_v58 = vrot.slane %v2661_v24, 2  ;;  %v2728_v2 = vrot.slane %v2727_v0, 2  ;;  %v2750_v14 = vrot.slane %v2749_v17, 2  ;;  %v2772_v16 = vrot.slane %v2771_v32, 2  ;;  %v3278_v4 = vld [vmem:[%s10490_s12 + $0x250] sm:$0xff]  ;;  %v3331_v47 = vld [vmem:[%s10490_s12 + $0x3f8] sm:$0xff] }
 0x357   :  { %v2684_v60 = vrot.slane %v2683_v30, 2  ;;  %v2706_v5 = vrot.slane %v2705_v25, 2  ;;  %v2794_v27 = vrot.slane %v2793_v38, 2  ;;  %v2816_v39 = vrot.slane %v2815_v42, 2  ;;  %v12282_v23 = vld [vmem:[#allocation165_spill] sm:$0xff] }
 0x358   :  { %v2663_v1 = vmax.f32 %v2661_v24, %v2662_v58  ;;  %v2729_v34 = vmax.f32 %v2727_v0, %v2728_v2  ;;  %v2751_v28 = vmax.f32 %v2749_v17, %v2750_v14  ;;  %v2773_v48 = vmax.f32 %v2771_v32, %v2772_v16  ;;  %v12229_v17 = vld [vmem:[#allocation148_spill] sm:$0xff]  ;;  %v12230_v58 = vld [vmem:[#allocation53_spill] sm:$0xff]  ;;  %v12234_v2 = vld [vmem:[#allocation207_spill] sm:$0xff] }
 0x359   :  { %v2685_v49 = vmax.f32 %v2683_v30, %v2684_v60  ;;  %v2707_v37 = vmax.f32 %v2705_v25, %v2706_v5  ;;  %v2795_v26 = vmax.f32 %v2793_v38, %v2794_v27  ;;  %v2817_v41 = vmax.f32 %v2815_v42, %v2816_v39  ;;  %v3279_v30 = vld [vmem:[%s10490_s12 + $0x258] sm:$0xff]  ;;  %v3326_v25 = vld [vmem:[%s10490_s12 + $0x3d0] sm:$0xff]  ;;  %v12231_v38 = vld [vmem:[#allocation151_spill] sm:$0xff] }
 0x35a   :  { %v2664_v19 = vrot.slane %v2663_v1, 1  ;;  %v2730_v40 = vrot.slane %v2729_v34, 1  ;;  %v2752_v3 = vrot.slane %v2751_v28, 1  ;;  %v2774_v52 = vrot.slane %v2773_v48, 1  ;;  %v12232_v42 = vld [vmem:[#allocation195_spill] sm:$0xff]  ;;  %v3327_v16 = vld [vmem:[%s10490_s12 + $0x3d8] sm:$0xff] }
 0x35b   :  { %v2686_v29 = vrot.slane %v2685_v49, 1  ;;  %v2708_v21 = vrot.slane %v2707_v37, 1  ;;  %v2796_v12 = vrot.slane %v2795_v26, 1  ;;  %v2818_v11 = vrot.slane %v2817_v41, 1  ;;  %v12233_v5 = vld [vmem:[#allocation155_spill] sm:$0xff]  ;;  %v3310_v27 = vld [vmem:[%s10490_s12 + $0x350] sm:$0xff] }
 0x35c   :  { %v2665_v10 = vmax.f32 %v2663_v1, %v2664_v19  ;;  %v2731_v55 = vmax.f32 %v2729_v34, %v2730_v40  ;;  %v2753_v54 = vmax.f32 %v2751_v28, %v2752_v3  ;;  %v2775_v31 = vmax.f32 %v2773_v48, %v2774_v52  ;;  %v3311_v39 = vld [vmem:[%s10490_s12 + $0x358] sm:$0xff]  ;;  %v12236_v34 = vld [vmem:[#allocation215_spill] sm:$0xff]  ;;  %v3280_v3 = vld [vmem:[%s10490_s12 + $0x260] sm:$0xff] }
 0x35d   :  { %v2687_v22 = vmax.f32 %v2685_v49, %v2686_v29  ;;  %v2709_v62 = vmax.f32 %v2707_v37, %v2708_v21  ;;  %v2797_v51 = vmax.f32 %v2795_v26, %v2796_v12  ;;  %v2819_v53 = vmax.f32 %v2817_v41, %v2818_v11  ;;  %v3296_v21 = vld [vmem:[%s10490_s12 + $0x2e0] sm:$0xff]  ;;  %v3297_v40 = vld [vmem:[%s10490_s12 + $0x2e8] sm:$0xff]  ;;  %v3330_v11 = vld [vmem:[%s10490_s12 + $0x3f0] sm:$0xff] }
 0x35e   :  { %v5438_v61 = vpack.c.bf16 %v3295_v56, %v3294_v9  ;;  %v5440_v1 = vpack.c.bf16 %v3279_v30, %v3278_v4  ;;  %v5470_v41 = vpack.c.bf16 %v3327_v16, %v3326_v25  ;;  %v5472_v29 = vpack.c.bf16 %v3311_v39, %v3310_v27  ;;  %v12242_v56 = vld [vmem:[#allocation250_spill] sm:$0xff]  ;;  %v12245_v27 = vld [vmem:[#allocation156_spill] sm:$0xff]  ;;  %v12246_v39 = vld [vmem:[#allocation267_spill] sm:$0xff] }
 0x35f   :  { %v3120_v59 = vsel %vm3045_vm0, %v2687_v22, %v2665_v10  ;;  %v5442_v22 = vpack.c.bf16 %v3297_v40, %v3296_v21  ;;  %v3299_v21 = vld [vmem:[%s10490_s12 + $0x2f8] sm:$0xff]  ;;  %v3282_v40 = vld [vmem:[%s10490_s12 + $0x270] sm:$0xff]  ;;  %v12258_v14 = vld [vmem:[#allocation154_spill] sm:$0xff] }
 0x360   :  { %v3121_v43 = vsel %vm3047_vm4, %v2709_v62, %v3120_v59  ;;  %5439 = vmatprep.subr.bf16.mxu0 %v5438_v61  ;;  %v3281_v62 = vld [vmem:[%s10490_s12 + $0x268] sm:$0xff]  ;;  %v12243_v61 = vld [vmem:[#allocation153_spill] sm:$0xff]  ;;  %5471 = vmatprep.subr.bf16.mxu1 %v5470_v41  ;;  %v3314_v26 = vld [vmem:[%s10490_s12 + $0x370] sm:$0xff] }
 0x361   :  { %v3122_v0 = vsel %vm3049_vm3, %v2731_v55, %v3121_v43  ;;  %5441 = vmatpush3.bf16.msra.mxu0 %v5440_v1  ;;  %v3328_v55 = vld [vmem:[%s10490_s12 + $0x3e0] sm:$0xff]  ;;  %v5444_v30 = vpack.c.bf16 %v3281_v62, %v3280_v3  ;;  %v3313_v1 = vld [vmem:[%s10490_s12 + $0x368] sm:$0xff]  ;;  %5473 = vmatpush3.bf16.msra.mxu1 %v5472_v29  ;;  %v3283_v3 = vld [vmem:[%s10490_s12 + $0x278] sm:$0xff] }
 0x362   :  { %v3123_v49 = vsel %vm3051_vm5, %v2753_v54, %v3122_v0  ;;  %v3329_v54 = vld [vmem:[%s10490_s12 + $0x3e8] sm:$0xff]  ;;  %v12244_v43 = vld [vmem:[#allocation266_spill] sm:$0xff]  ;;  %5443 = vmatprep.subr.bf16.mxu0 %v5442_v22  ;;  %v12254_v28 = vld [vmem:[#allocation132_spill] sm:$0xff] }
 0x363   :  { %v3124_v10 = vsel %vm3053_vm6, %v2775_v31, %v3123_v49  ;;  %v12241_v31 = vld [vmem:[#allocation150_spill] sm:$0xff]  ;;  %v5474_v25 = vpack.c.bf16 %v3329_v54, %v3328_v55  ;;  %v12262_v32 = vld [vmem:[#allocation164_spill] sm:$0xff]  ;;  %v12263_v60 = vld [vmem:[#allocation273_spill] sm:$0xff] }
 0x364   :  { %v3125_v9 = vsel %vm3055_vm7, %v2797_v51, %v3124_v10  ;;  %v3312_v0 = vld [vmem:[%s10490_s12 + $0x360] sm:$0xff]  ;;  %v3298_v51 = vld [vmem:[%s10490_s12 + $0x2f0] sm:$0xff]  ;;  %v2600_v20 = vsub.f32 %v12263_v60, %v12262_v32  ;;  %v12283_v49 = vld [vmem:[#allocation285_spill] sm:$0xff] }
 0x365   :  { %v3126_v16 = vsel %vm3057_vm8, %v2819_v53, %v3125_v9  ;;  %v5476_v41 = vpack.c.bf16 %v3313_v1, %v3312_v0  ;;  %5475 = vmatprep.subr.bf16.mxu1 %v5474_v25  ;;  %v5446_v0 = vpack.c.bf16 %v3299_v21, %v3298_v51  ;;  %v5448_v1 = vpack.c.bf16 %v3283_v3, %v3282_v40  ;;  %v3315_v51 = vld [vmem:[%s10490_s12 + $0x378] sm:$0xff]  ;;  %v3348_v21 = vld [vmem:[%s10490_s12 + $0x480] sm:$0xff]  ;;  %v3349_v40 = vld [vmem:[%s10490_s12 + $0x488] sm:$0xff] }
 0x366   :  { %v3152_v53 = vsel %vm3007_vm9, %v3126_v16, 0.0  ;;  %5445 = vmatpush3.bf16.msra.mxu0 %v5444_v30  ;;  %v5478_v25 = vpack.c.bf16 %v3331_v47, %v3330_v11  ;;  %v12260_v30 = vld [vmem:[#allocation157_spill] sm:$0xff]  ;;  %v12261_v47 = vld [vmem:[#allocation272_spill] sm:$0xff]  ;;  %v5480_v59 = vpack.c.bf16 %v3315_v51, %v3314_v26  ;;  %v5482_v4 = vpack.c.bf16 %v3349_v40, %v3348_v21  ;;  %v12277_v32 = vld [vmem:[#allocation282_spill] sm:$0xff] }
 0x367   :  { %v9160_v29 = vmul.f32 %v12252_v36, %v3152_v53  ;;  %v9163_v9 = vmul.f32 %v12254_v28, %v3152_v53  ;;  %v12259_v53 = vld [vmem:[#allocation271_spill] sm:$0xff]  ;;  %v2598_v11 = vsub.f32 %v12261_v47, %v12260_v30  ;;  %5447 = vmatprep.subr.bf16.mxu0 %v5446_v0  ;;  %5477 = vmatpush3.bf16.msra.mxu1 %v5476_v41  ;;  %v12273_v0 = vld [vmem:[#allocation280_spill] sm:$0xff]  ;;  %v12275_v21 = vld [vmem:[#allocation281_spill] sm:$0xff] }
 0x368   :  { %v2596_v44 = vsub.f32 %v12259_v53, %v12258_v14  ;;  %v12266_v28 = vld [vmem:[#allocation183_spill] sm:$0xff]  ;;  %v12270_v53 = vld [vmem:[#allocation160_spill] sm:$0xff]  ;;  %5479 = vmatprep.subr.bf16.mxu1 %v5478_v25  ;;  %v12285_v3 = vld [vmem:[#allocation286_spill] sm:$0xff] }
 0x369   :  { %12253 = vst [vmem:[#allocation214_spill] sm:$0xff] %v9160_v29  ;;  %12255 = vst [vmem:[#allocation224_spill] sm:$0xff] %v9163_v9  ;;  %v12265_v9 = vld [vmem:[#allocation274_spill] sm:$0xff]  ;;  %v12267_v36 = vld [vmem:[#allocation275_spill] sm:$0xff] }
 0x36a   :  { %v2602_v29 = vsub.f32 %v12265_v9, %v12264_v57  ;;  %v2604_v45 = vsub.f32 %v12267_v36, %v12266_v28  ;;  %v12271_v14 = vld [vmem:[#allocation279_spill] sm:$0xff]  ;;  %v12274_v51 = vld [vmem:[#allocation168_spill] sm:$0xff]  ;;  %v12280_v36 = vld [vmem:[#allocation194_spill] sm:$0xff]  ;;  %5449 = vmatpush3.bf16.msra.mxu0 %v5448_v1 }
 0x36b   :  { %v2608_v52 = vsub.f32 %v12271_v14, %v12270_v53  ;;  %v12272_v47 = vld [vmem:[#allocation159_spill] sm:$0xff]  ;;  %v2612_v60 = vsub.f32 %v12275_v21, %v12274_v51  ;;  %v12276_v40 = vld [vmem:[#allocation180_spill] sm:$0xff]  ;;  %v2620_v14 = vsub.f32 %v12283_v49, %v12282_v23  ;;  %v12284_v53 = vld [vmem:[#allocation166_spill] sm:$0xff]  ;;  %5483 = vmatprep.subr.bf16.mxu0 %v5482_v4  ;;  %5481 = vmatpush3.bf16.msra.mxu1 %v5480_v59 }
 0x36c   :  { %v2610_v26 = vsub.f32 %v12273_v0, %v12272_v47  ;;  %v2614_v9 = vsub.f32 %v12277_v32, %v12276_v40  ;;  %v12278_v41 = vld [vmem:[#allocation188_spill] sm:$0xff]  ;;  %v12279_v57 = vld [vmem:[#allocation283_spill] sm:$0xff]  ;;  %v2622_v0 = vsub.f32 %v12285_v3, %v12284_v53  ;;  %v12286_v25 = vld [vmem:[#allocation174_spill] sm:$0xff] }
 0x36d   :  { %v2616_v30 = vsub.f32 %v12279_v57, %v12278_v41  ;;  %v12281_v28 = vld [vmem:[#allocation284_spill] sm:$0xff]  ;;  %v12287_v47 = vld [vmem:[#allocation287_spill] sm:$0xff]  ;;  %v12288_v21 = vld [vmem:[#allocation186_spill] sm:$0xff]  ;;  %4772 = vmatmul.mubr.msk.f32.vlgmr.msra.gmra.mrb[24].mxu0 %vm3007_vm9, %v3126_v16  ;;  %v12318_v16 = vsub.f32 %v12220_v33, %v12219_v7 }
 0x36e   :  { %v2618_v12 = vsub.f32 %v12281_v28, %v12280_v36  ;;  %v2624_v24 = vsub.f32 %v12287_v47, %v12286_v25  ;;  %v12289_v51 = vld [vmem:[#allocation288_spill] sm:$0xff]  ;;  %v12290_v32 = vld [vmem:[#allocation191_spill] sm:$0xff]  ;;  %v12291_v40 = vld [vmem:[#allocation289_spill] sm:$0xff]  ;;  %v2930_v33 = vmax.f32 %v2608_v52, %v2610_v26 }
 0x36f   :  { %v2626_v6 = vsub.f32 %v12289_v51, %v12288_v21  ;;  %v2628_v57 = vsub.f32 %v12291_v40, %v12290_v32  ;;  %v12292_v41 = vld [vmem:[#allocation198_spill] sm:$0xff]  ;;  %v12294_v1 = vld [vmem:[#allocation169_spill] sm:$0xff]  ;;  %v12295_v36 = vld [vmem:[#allocation291_spill] sm:$0xff] }
 0x370   :  { %v12293_v22 = vld [vmem:[#allocation290_spill] sm:$0xff]  ;;  %v2632_v54 = vsub.f32 %v12295_v36, %v12294_v1  ;;  %v12297_v23 = vld [vmem:[#allocation292_spill] sm:$0xff]  ;;  %v12299_v53 = vld [vmem:[#allocation293_spill] sm:$0xff] }
 0x371   :  { %v2630_v28 = vsub.f32 %v12293_v22, %v12292_v41  ;;  %v12296_v49 = vld [vmem:[#allocation170_spill] sm:$0xff]  ;;  %v12300_v25 = vld [vmem:[#allocation189_spill] sm:$0xff]  ;;  %v12302_v4 = vld [vmem:[#allocation196_spill] sm:$0xff] }
 0x372   :  { %v2634_v19 = vsub.f32 %v12297_v23, %v12296_v49  ;;  %v12298_v3 = vld [vmem:[#allocation182_spill] sm:$0xff]  ;;  %v12303_v21 = vld [vmem:[#allocation295_spill] sm:$0xff]  ;;  %v12305_v32 = vld [vmem:[#allocation296_spill] sm:$0xff] }
 0x373   :  { %v2636_v47 = vsub.f32 %v12299_v53, %v12298_v3  ;;  %v12301_v48 = vld [vmem:[#allocation294_spill] sm:$0xff]  ;;  %v2640_v8 = vsub.f32 %v12303_v21, %v12302_v4  ;;  %v12304_v40 = vld [vmem:[#allocation199_spill] sm:$0xff]  ;;  %v12306_v22 = vld [vmem:[#allocation177_spill] sm:$0xff] }
 0x374   :  { %v2638_v51 = vsub.f32 %v12301_v48, %v12300_v25  ;;  %v2642_v13 = vsub.f32 %v12305_v32, %v12304_v40  ;;  %v12307_v36 = vld [vmem:[#allocation297_spill] sm:$0xff]  ;;  %v12308_v23 = vld [vmem:[#allocation178_spill] sm:$0xff]  ;;  %v12310_v41 = vld [vmem:[#allocation187_spill] sm:$0xff] }
 0x375   :  { %v2644_v1 = vsub.f32 %v12307_v36, %v12306_v22  ;;  %v12309_v59 = vld [vmem:[#allocation298_spill] sm:$0xff]  ;;  %v12311_v53 = vld [vmem:[#allocation299_spill] sm:$0xff]  ;;  %v12312_v62 = vld [vmem:[#allocation193_spill] sm:$0xff]  ;;  %v12319_v36 = vsub.f32 %v12218_v35, %v12217_v15  ;;  %v12324_v35 = vsub.f32 %v12222_v46, %v12221_v50 }
 0x376   :  { %v2646_v49 = vsub.f32 %v12309_v59, %v12308_v23  ;;  %v2648_v3 = vsub.f32 %v12311_v53, %v12310_v41  ;;  %v12313_v48 = vld [vmem:[#allocation300_spill] sm:$0xff]  ;;  %v12314_v55 = vld [vmem:[#allocation197_spill] sm:$0xff]  ;;  %v12316_v37 = vld [vmem:[#allocation3_spill] sm:$0xff]  ;;  %v12320_v59 = vsub.f32 %v12232_v42, %v12231_v38  ;;  %v12321_v53 = vsub.f32 %v12230_v58, %v12229_v17 }
 0x377   :  { %v2650_v25 = vsub.f32 %v12313_v48, %v12312_v62  ;;  %v12315_v21 = vld [vmem:[#allocation301_spill] sm:$0xff]  ;;  %v12317_v32 = vld [vmem:[#allocation302_spill] sm:$0xff]  ;;  %v2842_v10 = vmax.f32 %v12319_v36, %v12318_v16  ;;  %v2952_v62 = vmax.f32 %v2620_v14, %v2622_v0  ;;  %v12325_v42 = vsub.f32 %v12234_v2, %v12233_v5  ;;  %v12328_v46 = vld [vmem:[#allocation163_spill] sm:$0xff] }
 0x378   :  { %v2652_v4 = vsub.f32 %v12315_v21, %v12314_v55  ;;  %v2654_v40 = vsub.f32 %v12317_v32, %v12316_v37  ;;  %v2864_v48 = vmax.f32 %v12321_v53, %v12320_v59  ;;  %v12322_v21 = vsub.f32 %v12244_v43, %v12243_v61  ;;  %v12330_v14 = vld [vmem:[#allocation268_spill] sm:$0xff] }
 0x379   :  { %v12323_v32 = vsub.f32 %v12242_v56, %v12241_v31  ;;  %v2908_v55 = vmax.f32 %v2596_v44, %v2598_v11  ;;  %v2843_v16 = vmax.f32 %v2842_v10, %v12324_v35  ;;  %v2974_v58 = vmax.f32 %v2632_v54, %v2634_v19  ;;  %v12331_v19 = vld [vmem:[#allocation167_spill] sm:$0xff] }
 0x37a   :  { %v2865_v36 = vmax.f32 %v2864_v48, %v12325_v42  ;;  %v2996_v59 = vmax.f32 %v2644_v1, %v2646_v49  ;;  %v12326_v43 = vsub.f32 %v12246_v39, %v12245_v27  ;;  %v2931_v56 = vmax.f32 %v2930_v33, %v2612_v60  ;;  %v12336_v60 = vld [vmem:[#allocation227_spill] sm:$0xff]  ;;  %v12339_v33 = vld [vmem:[#allocation269_spill] sm:$0xff] }
 0x37b   :  { %v2886_v37 = vmax.f32 %v12323_v32, %v12322_v21  ;;  %v2909_v41 = vmax.f32 %v2908_v55, %v2600_v20  ;;  %v2953_v21 = vmax.f32 %v2952_v62, %v2624_v24  ;;  %v12327_v44 = vsub.f32 %v12224_v18, %v12223_v63  ;;  %v12333_v20 = vld [vmem:[#allocation42_spill] sm:$0xff]  ;;  %v12334_v55 = vld [vmem:[#allocation176_spill] sm:$0xff]  ;;  %v12337_v18 = vld [vmem:[#allocation171_spill] sm:$0xff] }
 0x37c   :  { %v12329_v10 = vsub.f32 %v12236_v34, %v12328_v46  ;;  %v2975_v26 = vmax.f32 %v2974_v58, %v2636_v47  ;;  %v2997_v2 = vmax.f32 %v2996_v59, %v2648_v3  ;;  %v12332_v54 = vsub.f32 %v12330_v14, %v12331_v19  ;;  %v12340_v47 = vld [vmem:[#allocation179_spill] sm:$0xff]  ;;  %v12345_v58 = vld [vmem:[#allocation236_spill] sm:$0xff] }
 0x37d   :  { %v2887_v53 = vmax.f32 %v2886_v37, %v12326_v43  ;;  %v2844_v52 = vmax.f32 %v2843_v16, %v12327_v44  ;;  %v2910_v1 = vmax.f32 %v2909_v41, %v2602_v29  ;;  %v2932_v39 = vmax.f32 %v2931_v56, %v2614_v9  ;;  %v12342_v29 = vld [vmem:[#allocation45_spill] sm:$0xff]  ;;  %v12346_v59 = vld [vmem:[#allocation184_spill] sm:$0xff]  ;;  %v12348_v44 = vld [vmem:[#allocation270_spill] sm:$0xff] }
 0x37e   :  { %v2866_v11 = vmax.f32 %v2865_v36, %v12329_v10  ;;  %v2954_v37 = vmax.f32 %v2953_v21, %v2626_v6  ;;  %v12335_v24 = vsub.f32 %v12333_v20, %v12334_v55  ;;  %v12338_v49 = vsub.f32 %v12336_v60, %v12337_v18  ;;  %v12343_v9 = vld [vmem:[#allocation181_spill] sm:$0xff]  ;;  %v12351_v10 = vld [vmem:[#allocation276_spill] sm:$0xff] }
 0x37f   :  { %v2888_v0 = vmax.f32 %v2887_v53, %v12332_v54  ;;  %v2976_v32 = vmax.f32 %v2975_v26, %v2638_v51  ;;  %v2998_v34 = vmax.f32 %v2997_v2, %v2650_v25  ;;  %v12341_v3 = vsub.f32 %v12339_v33, %v12340_v47  ;;  %v12349_v51 = vld [vmem:[#allocation4_spill] sm:$0xff] }
 0x380   :  { %v2845_v62 = vmax.f32 %v2844_v52, %v12335_v24  ;;  %v2867_v48 = vmax.f32 %v2866_v11, %v12338_v49  ;;  %v2911_v16 = vmax.f32 %v2910_v1, %v2604_v45  ;;  %v2933_v42 = vmax.f32 %v2932_v39, %v2616_v30  ;;  %v12352_v11 = vld [vmem:[#allocation190_spill] sm:$0xff] }
 0x381   :  { %v2889_v35 = vmax.f32 %v2888_v0, %v12341_v3  ;;  %v2955_v36 = vmax.f32 %v2954_v37, %v2628_v57  ;;  %v12344_v6 = vsub.f32 %v12342_v29, %v12343_v9  ;;  %v12347_v43 = vsub.f32 %v12345_v58, %v12346_v59  ;;  %v4861_v3 = vpop.f32.mrb[14].mxu1  ;;  %v12444_v9 = vld [vmem:[#allocation197_spill] sm:$0xff] }
 0x382   :  { %v2977_v56 = vmax.f32 %v2976_v32, %v2640_v8  ;;  %v2999_v21 = vmax.f32 %v2998_v34, %v2652_v4  ;;  %v12350_v25 = vsub.f32 %v12348_v44, %v12349_v51  ;;  %v12353_v26 = vsub.f32 %v12351_v10, %v12352_v11  ;;  %v12429_v11 = vld [vmem:[#allocation161_spill] sm:$0xff] }
 0x383   :  { %v2846_v41 = vmax.f32 %v2845_v62, %v12344_v6  ;;  %v2868_v53 = vmax.f32 %v2867_v48, %v12347_v43  ;;  %v2934_v30 = vmax.f32 %v2933_v42, %v2618_v12  ;;  %v2956_v57 = vmax.f32 %v2955_v36, %v2630_v28  ;;  %v4862_v42 = vpop.f32.mrb[15].mxu1 }
 0x384   :  { %v2890_v52 = vmax.f32 %v2889_v35, %v12350_v25  ;;  %v2912_v45 = vmax.f32 %v2911_v16, %v12353_v26  ;;  %v2978_v54 = vmax.f32 %v2977_v56, %v2642_v13  ;;  %v3000_v0 = vmax.f32 %v2999_v21, %v2654_v40 }
 0x385   :  { %v2847_v2 = vrot.slane %v2846_v41, 4  ;;  %v2869_v14 = vrot.slane %v2868_v53, 4  ;;  %v2935_v37 = vrot.slane %v2934_v30, 4  ;;  %v2957_v20 = vrot.slane %v2956_v57, 4 }
 0x386   :  { %v2891_v1 = vrot.slane %v2890_v52, 4  ;;  %v2913_v39 = vrot.slane %v2912_v45, 4  ;;  %v2979_v24 = vrot.slane %v2978_v54, 4  ;;  %v3001_v62 = vrot.slane %v3000_v0, 4 }
 0x387   :  { %v2848_v8 = vmax.f32 %v2846_v41, %v2847_v2  ;;  %v2870_v4 = vmax.f32 %v2868_v53, %v2869_v14  ;;  %v2936_v48 = vmax.f32 %v2934_v30, %v2935_v37  ;;  %v2958_v32 = vmax.f32 %v2956_v57, %v2957_v20  ;;  %v12357_v37 = vld [vmem:[#allocation221_spill] sm:$0xff] }
 0x388   :  { %v2892_v60 = vmax.f32 %v2890_v52, %v2891_v1  ;;  %v2914_v49 = vmax.f32 %v2912_v45, %v2913_v39  ;;  %v2980_v12 = vmax.f32 %v2978_v54, %v2979_v24  ;;  %v3002_v28 = vmax.f32 %v3000_v0, %v3001_v62  ;;  %v3332_v0 = vld [vmem:[%s10490_s12 + $0x400] sm:$0xff]  ;;  %v12355_v1 = vld [vmem:[#allocation232_spill] sm:$0xff]  ;;  %v3333_v62 = vld [vmem:[%s10490_s12 + $0x408] sm:$0xff] }
 0x389   :  { %v2849_v34 = vrot.slane %v2848_v8, 2  ;;  %v2871_v33 = vrot.slane %v2870_v4, 2  ;;  %v2937_v40 = vrot.slane %v2936_v48, 2  ;;  %v2959_v16 = vrot.slane %v2958_v32, 2  ;;  %v12356_v39 = vld [vmem:[#allocation202_spill] sm:$0xff] }
 0x38a   :  { %v2893_v35 = vrot.slane %v2892_v60, 2  ;;  %v2915_v13 = vrot.slane %v2914_v49, 2  ;;  %v2981_v6 = vrot.slane %v2980_v12, 2  ;;  %v3003_v41 = vrot.slane %v3002_v28, 2 }
 0x38b   :  { %v2850_v36 = vmax.f32 %v2848_v8, %v2849_v34  ;;  %v2872_v29 = vmax.f32 %v2870_v4, %v2871_v33  ;;  %v9295_v58 = vadd.f32 %v4862_v42, %v4861_v3  ;;  %v2938_v56 = vmax.f32 %v2936_v48, %v2937_v40  ;;  %v12360_v48 = vld [vmem:[#allocation234_spill] sm:$0xff] }
 0x38c   :  { %v2894_v43 = vmax.f32 %v2892_v60, %v2893_v35  ;;  %v2916_v53 = vmax.f32 %v2914_v49, %v2915_v13  ;;  %v2960_v25 = vmax.f32 %v2958_v32, %v2959_v16  ;;  %v2982_v52 = vmax.f32 %v2980_v12, %v2981_v6  ;;  %v3380_v60 = vld [vmem:[%s10490_s12 + $0x580] sm:$0xff]  ;;  %v3381_v49 = vld [vmem:[%s10490_s12 + $0x588] sm:$0xff] }
 0x38d   :  { %12354 = vst [vmem:[#allocation235_spill] sm:$0xff] %v9295_v58  ;;  %v2851_v21 = vrot.slane %v2850_v36, 1  ;;  %v2873_v44 = vrot.slane %v2872_v29, 1  ;;  %v2939_v45 = vrot.slane %v2938_v56, 1  ;;  %v3004_v30 = vmax.f32 %v3002_v28, %v3003_v41  ;;  %v12362_v12 = vld [vmem:[#allocation222_spill] sm:$0xff]  ;;  %v9329_v16 = vld [vmem:[%s10490_s12 + $0x508] sm:$0xff] }
 0x38e   :  { %v2895_v10 = vrot.slane %v2894_v43, 1  ;;  %v2917_v26 = vrot.slane %v2916_v53, 1  ;;  %v2961_v14 = vrot.slane %v2960_v25, 1  ;;  %v2983_v54 = vrot.slane %v2982_v52, 1  ;;  %v9324_v40 = vld [vmem:[%s10490_s12 + $0x500] sm:$0xff] }
 0x38f   :  { %v2852_v57 = vmax.f32 %v2850_v36, %v2851_v21  ;;  %v2874_v2 = vmax.f32 %v2872_v29, %v2873_v44  ;;  %5794 = vlog2.f32 %v12355_v1  ;;  %v12358_v20 = vsub.f32 %v12356_v39, %v12357_v37  ;;  %v12369_v39 = vld [vmem:[#allocation192_spill] sm:$0xff] }
 0x390   :  { %v2896_v4 = vmax.f32 %v2894_v43, %v2895_v10  ;;  %v3005_v24 = vrot.slane %v3004_v30, 1  ;;  %v9316_v32 = vadd.f32 1e-05, %v12360_v48  ;;  %v2918_v34 = vmax.f32 %v2916_v53, %v2917_v26  ;;  %v12363_v53 = vld [vmem:[#allocation213_spill] sm:$0xff]  ;;  %v12394_v48 = vld [vmem:[#allocation164_spill] sm:$0xff] }
 0x391   :  { %v9304_v8 = vmax.f32 %v12358_v20, 0.0  ;;  %v3141_v33 = vsel %vm3045_vm0, %v2874_v2, %v2852_v57  ;;  %5796 = vrsqrt.f32 %v12362_v12  ;;  %v2940_v28 = vmax.f32 %v2938_v56, %v2939_v45  ;;  %v12364_v56 = vld [vmem:[#allocation204_spill] sm:$0xff]  ;;  %v12365_v45 = vld [vmem:[#allocation303_spill] sm:$0xff]  ;;  %v12415_v20 = vld [vmem:[#allocation102_spill] sm:$0xff] }
 0x392   :  { %12361 = vst [vmem:[#allocation205_spill] sm:$0xff] %v9316_v32  ;;  %v2962_v3 = vmax.f32 %v2960_v25, %v2961_v14  ;;  %v2984_v35 = vmax.f32 %v2982_v52, %v2983_v54  ;;  %v3142_v13 = vsel %vm3047_vm4, %v2896_v4, %v3141_v33  ;;  %v3006_v42 = vmax.f32 %v3004_v30, %v3005_v24  ;;  %v12366_v57 = vld [vmem:[#allocation304_spill] sm:$0xff]  ;;  %v12423_v32 = vld [vmem:[#allocation70_spill] sm:$0xff] }
 0x393   :  { %12359 = vst [vmem:[#allocation247_spill] sm:$0xff] %v9304_v8  ;;  %v3143_v36 = vsel %vm3049_vm3, %v2918_v34, %v3142_v13  ;;  %v5484_v29 = vpack.c.bf16 %v3333_v62, %v3332_v0  ;;  %v5514_v6 = vpack.c.bf16 %v3381_v49, %v3380_v60  ;;  %v1087_v43 = vand.u32 2147483648, %v12362_v12  ;;  %v12368_v0 = vld [vmem:[#allocation305_spill] sm:$0xff]  ;;  %v12371_v4 = vld [vmem:[#allocation124_spill] sm:$0xff]  ;;  %v12377_v34 = vld [vmem:[#allocation67_spill] sm:$0xff] }
 0x394   :  { %v3144_v41 = vsel %vm3051_vm5, %v2940_v28, %v3143_v36  ;;  %v1076_v21 = vmul.f32 %v12364_v56, %v12363_v53  ;;  %vm1077_vm11 = vcmp.eq.f32.partialorder %v12363_v53, inf  ;;  %vm1084_vm12 = vcmp.eq.f32.partialorder %v12362_v12, inf  ;;  %v12378_v28 = vld [vmem:[#allocation212_spill] sm:$0xff]  ;;  %v12385_v56 = vld [vmem:[#allocation246_spill] sm:$0xff]  ;;  %v12397_v60 = vld [vmem:[#allocation71_spill] sm:$0xff] }
 0x395   :  { %v3145_v44 = vsel %vm3053_vm6, %v2962_v3, %v3144_v41  ;;  %5485 = vmatpush3.bf16.msra.mxu0 %v5484_v29  ;;  %5515 = vmatprep.subr.bf16.mxu1 %v5514_v6  ;;  %vm1079_vm13 = vcmp.eq.f32.partialorder %v12363_v53, 0.0  ;;  %v1080_v25 = vand.u32 2147483648, %v12363_v53  ;;  %v5516_v52 = vpack.c.bf16 %v9329_v16, %v9324_v40  ;;  %v12380_v40 = vld [vmem:[#allocation223_spill] sm:$0xff]  ;;  %v12392_v41 = vld [vmem:[#allocation157_spill] sm:$0xff]  ;;  %v12395_v29 = vld [vmem:[#allocation48_spill] sm:$0xff] }
 0x396   :  { %v3146_v10 = vsel %vm3055_vm7, %v2984_v35, %v3145_v44  ;;  %vm1086_vm14 = vcmp.eq.f32.partialorder %v12362_v12, 0.0  ;;  %v1078_v26 = vsel %vm1077_vm11, %v12363_v53, %v1076_v21  ;;  %v2559_v30 = vsub.f32 %v12365_v45, %v12217_v15  ;;  %v12373_v15 = vld [vmem:[#allocation132_spill] sm:$0xff]  ;;  %v12379_v35 = vld [vmem:[#allocation50_spill] sm:$0xff]  ;;  %v12384_v53 = vld [vmem:[#allocation81_spill] sm:$0xff] }
 0x397   :  { %v2561_v2 = vsub.f32 %v12366_v57, %v12219_v7  ;;  %v9351_v14 = vsel %vm3057_vm8, %v3006_v42, %v3146_v10  ;;  %v1081_v54 = vsel %vm1079_vm13, %v1080_v25, %v1078_v26  ;;  %v12375_v7 = vld [vmem:[#allocation44_spill] sm:$0xff]  ;;  %v2571_v33 = vsub.f32 %v12377_v34, %v12229_v17  ;;  %v12387_v25 = vld [vmem:[#allocation69_spill] sm:$0xff]  ;;  %v12399_v16 = vld [vmem:[#allocation54_spill] sm:$0xff] }
 0x398   :  { %12367 = vst [vmem:[#allocation216_spill] sm:$0xff] %v9351_v14  ;;  %4773 = vmatprep.mubr.msk.f32.mxu0 %vm3008_vm10, %v9351_v14  ;;  %v9361_v24 = vmul.f32 %v12371_v4, %v1081_v54  ;;  %v9364_v62 = vmul.f32 %v12373_v15, %v1081_v54  ;;  %v2573_v3 = vsub.f32 %v12378_v28, %v12231_v38  ;;  %v12401_v1 = vld [vmem:[#allocation160_spill] sm:$0xff]  ;;  %v12411_v34 = vld [vmem:[#allocation62_spill] sm:$0xff]  ;;  %v12422_v4 = vld [vmem:[#allocation191_spill] sm:$0xff] }
 0x399   :  { %v2575_v13 = vsub.f32 %v12379_v35, %v12233_v5  ;;  %v9378_v42 = vpop.eup %5794  ;;  %v2583_v17 = vsub.f32 %v12384_v53, %v12241_v31  ;;  %v2585_v38 = vsub.f32 %v12385_v56, %v12243_v61  ;;  %v12386_v5 = vld [vmem:[#allocation90_spill] sm:$0xff]  ;;  %v2589_v10 = vsub.f32 %v12387_v25, %v12331_v19  ;;  %v12391_v31 = vld [vmem:[#allocation76_spill] sm:$0xff]  ;;  %v12393_v61 = vld [vmem:[#allocation93_spill] sm:$0xff] }
 0x39a   :  { %12372 = vst [vmem:[#allocation225_spill] sm:$0xff] %v9361_v24  ;;  %12374 = vst [vmem:[#allocation237_spill] sm:$0xff] %v9364_v62  ;;  %v2587_v44 = vsub.f32 %v12386_v5, %v12245_v27  ;;  %v12390_v35 = vld [vmem:[#allocation154_spill] sm:$0xff]  ;;  %v2597_v56 = vsub.f32 %v12393_v61, %v12392_v41  ;;  %v2599_v27 = vsub.f32 %v12395_v29, %v12394_v48  ;;  %v12396_v5 = vld [vmem:[#allocation173_spill] sm:$0xff] }
 0x39b   :  { %12381 = vst [vmem:[#allocation248_spill] sm:$0xff] %v9378_v42  ;;  %v5797_v21 = vpop.eup %5796  ;;  %v2595_v53 = vsub.f32 %v12391_v31, %v12390_v35  ;;  %v2601_v19 = vsub.f32 %v12397_v60, %v12396_v5  ;;  %v12398_v25 = vld [vmem:[#allocation183_spill] sm:$0xff]  ;;  %v12405_v48 = vld [vmem:[#allocation168_spill] sm:$0xff]  ;;  %v12413_v15 = vld [vmem:[#allocation78_spill] sm:$0xff]  ;;  %v2831_v47 = vmax.f32 %v2559_v30, %v2561_v2  ;;  %v12449_v30 = vsub.f32 %v12369_v39, %v12223_v63 }
 0x39c   :  { %v1083_v28 = vmul.f32 %v5797_v21, %v12362_v12  ;;  %v2603_v45 = vsub.f32 %v12399_v16, %v12398_v25  ;;  %v12402_v21 = vld [vmem:[#allocation84_spill] sm:$0xff]  ;;  %v12403_v41 = vld [vmem:[#allocation159_spill] sm:$0xff]  ;;  %v12426_v8 = vld [vmem:[#allocation169_spill] sm:$0xff] }
 0x39d   :  { %v2607_v62 = vsub.f32 %v12402_v21, %v12401_v1  ;;  %v12404_v31 = vld [vmem:[#allocation119_spill] sm:$0xff]  ;;  %v12406_v29 = vld [vmem:[#allocation52_spill] sm:$0xff]  ;;  %v12412_v21 = vld [vmem:[#allocation194_spill] sm:$0xff]  ;;  %v2897_v26 = vmax.f32 %v2595_v53, %v2597_v56 }
 0x39e   :  { %v1085_v35 = vsel %vm1084_vm12, %v12362_v12, %v1083_v28  ;;  %v2609_v61 = vsub.f32 %v12404_v31, %v12403_v41  ;;  %v2611_v58 = vsub.f32 %v12406_v29, %v12405_v48  ;;  %v12407_v60 = vld [vmem:[#allocation180_spill] sm:$0xff]  ;;  %v12408_v5 = vld [vmem:[#allocation75_spill] sm:$0xff]  ;;  %v2617_v14 = vsub.f32 %v12413_v15, %v12412_v21  ;;  %v12414_v28 = vld [vmem:[#allocation165_spill] sm:$0xff] }
 0x39f   :  { %v2613_v24 = vsub.f32 %v12408_v5, %v12407_v60  ;;  %v9422_v16 = vsel %vm1086_vm14, %v1087_v43, %v1085_v35  ;;  %v12410_v25 = vld [vmem:[#allocation188_spill] sm:$0xff]  ;;  %v2619_v42 = vsub.f32 %v12415_v20, %v12414_v28  ;;  %v12416_v41 = vld [vmem:[#allocation166_spill] sm:$0xff]  ;;  %v12419_v60 = vld [vmem:[#allocation77_spill] sm:$0xff] }
 0x3a0   :  { %12409 = vst [vmem:[#allocation206_spill] sm:$0xff] %v9422_v16  ;;  %v2615_v1 = vsub.f32 %v12411_v34, %v12410_v25  ;;  %3877 = vmatprep.mubr.f32.mxu1 %v9422_v16  ;;  %v12417_v31 = vld [vmem:[#allocation144_spill] sm:$0xff]  ;;  %v12418_v29 = vld [vmem:[#allocation174_spill] sm:$0xff]  ;;  %v2627_v34 = vsub.f32 %v12423_v32, %v12422_v4  ;;  %v12425_v15 = vld [vmem:[#allocation85_spill] sm:$0xff] }
 0x3a1   :  { %v2621_v48 = vsub.f32 %v12417_v31, %v12416_v41  ;;  %v2623_v5 = vsub.f32 %v12419_v60, %v12418_v29  ;;  %v12420_v12 = vld [vmem:[#allocation186_spill] sm:$0xff]  ;;  %v12421_v43 = vld [vmem:[#allocation56_spill] sm:$0xff]  ;;  %3878 = vmatmul.mubr.f32.vlgmr.msra.gmra.mrb[18].mxu1 %v1081_v54  ;;  %v12432_v29 = vld [vmem:[#allocation189_spill] sm:$0xff] }
 0x3a2   :  { %v2625_v35 = vsub.f32 %v12421_v43, %v12420_v12  ;;  %v12424_v25 = vld [vmem:[#allocation198_spill] sm:$0xff]  ;;  %v12431_v31 = vld [vmem:[#allocation64_spill] sm:$0xff]  ;;  %5517 = vmatpush3.bf16.msra.mxu1 %v5516_v52  ;;  %v12436_v54 = vld [vmem:[#allocation199_spill] sm:$0xff] }
 0x3a3   :  { %v2629_v21 = vsub.f32 %v12425_v15, %v12424_v25  ;;  %v12427_v20 = vld [vmem:[#allocation130_spill] sm:$0xff]  ;;  %v12434_v43 = vld [vmem:[#allocation196_spill] sm:$0xff]  ;;  %v12437_v4 = vld [vmem:[#allocation105_spill] sm:$0xff] }
 0x3a4   :  { %v2631_v28 = vsub.f32 %v12427_v20, %v12426_v8  ;;  %v12428_v16 = vld [vmem:[#allocation170_spill] sm:$0xff]  ;;  %v12435_v57 = vld [vmem:[#allocation80_spill] sm:$0xff]  ;;  %v2641_v59 = vsub.f32 %v12437_v4, %v12436_v54  ;;  %v12438_v25 = vld [vmem:[#allocation147_spill] sm:$0xff]  ;;  %v2853_v54 = vmax.f32 %v2571_v33, %v2573_v3  ;;  %v2875_v4 = vmax.f32 %v2583_v17, %v2585_v38 }
 0x3a5   :  { %v2633_v37 = vsub.f32 %v12429_v11, %v12428_v16  ;;  %v12430_v41 = vld [vmem:[#allocation182_spill] sm:$0xff]  ;;  %v2639_v32 = vsub.f32 %v12435_v57, %v12434_v43  ;;  %v2643_v15 = vsub.f32 %v12438_v25, %v12306_v22  ;;  %v12439_v8 = vld [vmem:[#allocation175_spill] sm:$0xff]  ;;  %v12441_v16 = vld [vmem:[#allocation72_spill] sm:$0xff]  ;;  %v2919_v22 = vmax.f32 %v2607_v62, %v2609_v61 }
 0x3a6   :  { %v2635_v51 = vsub.f32 %v12431_v31, %v12430_v41  ;;  %v12433_v60 = vld [vmem:[#allocation66_spill] sm:$0xff]  ;;  %v2645_v20 = vsub.f32 %v12439_v8, %v12308_v23  ;;  %v12440_v11 = vld [vmem:[#allocation187_spill] sm:$0xff]  ;;  %v12442_v41 = vld [vmem:[#allocation193_spill] sm:$0xff]  ;;  %v2941_v25 = vmax.f32 %v2619_v42, %v2621_v48  ;;  %v12448_v23 = vsub.f32 %v12368_v0, %v12221_v50 }
 0x3a7   :  { %v2637_v12 = vsub.f32 %v12433_v60, %v12432_v29  ;;  %v2647_v6 = vsub.f32 %v12441_v16, %v12440_v11  ;;  %v12443_v52 = vld [vmem:[#allocation74_spill] sm:$0xff]  ;;  %v12446_v49 = vld [vmem:[#allocation3_spill] sm:$0xff]  ;;  %v12447_v57 = vld [vmem:[#allocation133_spill] sm:$0xff]  ;;  %v2963_v18 = vmax.f32 %v2631_v28, %v2633_v37  ;;  %v2854_v11 = vmax.f32 %v2853_v54, %v2575_v13 }
 0x3a8   :  { %v2649_v31 = vsub.f32 %v12443_v52, %v12442_v41  ;;  %v12445_v29 = vld [vmem:[#allocation86_spill] sm:$0xff]  ;;  %v2653_v43 = vsub.f32 %v12447_v57, %v12446_v49  ;;  %v2832_v8 = vmax.f32 %v2831_v47, %v12448_v23  ;;  %v2876_v16 = vmax.f32 %v2875_v4, %v2587_v44  ;;  %v12455_v63 = vld [vmem:[#allocation73_spill] sm:$0xff]  ;;  %v12456_v39 = vld [vmem:[#allocation179_spill] sm:$0xff] }
 0x3a9   :  { %v2651_v60 = vsub.f32 %v12445_v29, %v12444_v9  ;;  %v2985_v41 = vmax.f32 %v2643_v15, %v2645_v20  ;;  %v2898_v52 = vmax.f32 %v2897_v26, %v2599_v27  ;;  %v2920_v36 = vmax.f32 %v2919_v22, %v2611_v58  ;;  %v12452_v42 = vld [vmem:[#allocation58_spill] sm:$0xff]  ;;  %v12461_v27 = vld [vmem:[#allocation233_spill] sm:$0xff]  ;;  %v12464_v61 = vld [vmem:[#allocation60_spill] sm:$0xff] }
 0x3aa   :  { %v2942_v9 = vmax.f32 %v2941_v25, %v2623_v5  ;;  %v2964_v29 = vmax.f32 %v2963_v18, %v2635_v51  ;;  %v2833_v2 = vmax.f32 %v2832_v8, %v12449_v30  ;;  %v12450_v62 = vsub.f32 %v12380_v40, %v12328_v46  ;;  %v12453_v18 = vld [vmem:[#allocation171_spill] sm:$0xff]  ;;  %v12465_v48 = vld [vmem:[#allocation4_spill] sm:$0xff]  ;;  %v12468_v15 = vld [vmem:[#allocation190_spill] sm:$0xff] }
 0x3ab   :  { %v2877_v37 = vmax.f32 %v2876_v16, %v2589_v10  ;;  %v2986_v33 = vmax.f32 %v2985_v41, %v2647_v6  ;;  %v2899_v3 = vmax.f32 %v2898_v52, %v2601_v19  ;;  %v2921_v50 = vmax.f32 %v2920_v36, %v2613_v24  ;;  %v12458_v24 = vld [vmem:[#allocation203_spill] sm:$0xff]  ;;  %v12459_v36 = vld [vmem:[#allocation181_spill] sm:$0xff] }
 0x3ac   :  { %v2855_v49 = vmax.f32 %v2854_v11, %v12450_v62  ;;  %v2943_v47 = vmax.f32 %v2942_v9, %v2625_v35  ;;  %v2965_v0 = vmax.f32 %v2964_v29, %v2637_v12  ;;  %v12451_v13 = vsub.f32 %v12375_v7, %v12334_v55  ;;  %v12462_v55 = vld [vmem:[#allocation184_spill] sm:$0xff] }
 0x3ad   :  { %v12454_v51 = vsub.f32 %v12452_v42, %v12453_v18  ;;  %v12457_v38 = vsub.f32 %v12455_v63, %v12456_v39  ;;  %v2987_v46 = vmax.f32 %v2986_v33, %v2649_v31  ;;  %v2900_v40 = vmax.f32 %v2899_v3, %v2603_v45  ;;  %v12467_v12 = vld [vmem:[#allocation68_spill] sm:$0xff]  ;;  %v12470_v39 = vld [vmem:[#allocation247_spill] sm:$0xff] }
 0x3ae   :  { %v2834_v58 = vmax.f32 %v2833_v2, %v12451_v13  ;;  %v2922_v10 = vmax.f32 %v2921_v50, %v2615_v1  ;;  %v2944_v6 = vmax.f32 %v2943_v47, %v2627_v34  ;;  %v2966_v26 = vmax.f32 %v2965_v0, %v2639_v32 }
 0x3af   :  { %v2856_v17 = vmax.f32 %v2855_v49, %v12454_v51  ;;  %v2878_v44 = vmax.f32 %v2877_v37, %v12457_v38  ;;  %v12460_v53 = vsub.f32 %v12458_v24, %v12459_v36  ;;  %v12463_v7 = vsub.f32 %v12461_v27, %v12462_v55  ;;  %v3335_v55 = vld [vmem:[%s10490_s12 + $0x418] sm:$0xff] }
 0x3b0   :  { %v12466_v5 = vsub.f32 %v12464_v61, %v12465_v48  ;;  %v2988_v28 = vmax.f32 %v2987_v46, %v2651_v60  ;;  %v12469_v20 = vsub.f32 %v12467_v12, %v12468_v15  ;;  %v2923_v1 = vmax.f32 %v2922_v10, %v2617_v14  ;;  %v3351_v10 = vld [vmem:[%s10490_s12 + $0x498] sm:$0xff]  ;;  %v3352_v15 = vld [vmem:[%s10490_s12 + $0x4a0] sm:$0xff] }
 0x3b1   :  { %v2835_v56 = vmax.f32 %v2834_v58, %v12460_v53  ;;  %v2857_v19 = vmax.f32 %v2856_v17, %v12463_v7  ;;  %v2945_v34 = vmax.f32 %v2944_v6, %v2629_v21  ;;  %v2967_v32 = vmax.f32 %v2966_v26, %v2641_v59  ;;  %v3334_v53 = vld [vmem:[%s10490_s12 + $0x410] sm:$0xff]  ;;  %v3367_v12 = vld [vmem:[%s10490_s12 + $0x518] sm:$0xff] }
 0x3b2   :  { %v2879_v35 = vmax.f32 %v2878_v44, %v12466_v5  ;;  %v2901_v45 = vmax.f32 %v2900_v40, %v12469_v20  ;;  %v2989_v4 = vmax.f32 %v2988_v28, %v2653_v43  ;;  %v2924_v25 = vrot.slane %v2923_v1, 4  ;;  %v3350_v40 = vld [vmem:[%s10490_s12 + $0x490] sm:$0xff]  ;;  %v12472_v20 = vld [vmem:[#allocation33_spill] sm:$0xff] }
 0x3b3   :  { %v2836_v31 = vrot.slane %v2835_v56, 4  ;;  %v2858_v57 = vrot.slane %v2857_v19, 4  ;;  %v2946_v23 = vrot.slane %v2945_v34, 4  ;;  %v2968_v8 = vrot.slane %v2967_v32, 4  ;;  %v3382_v7 = vld [vmem:[%s10490_s12 + $0x590] sm:$0xff] }
 0x3b4   :  { %v2880_v54 = vrot.slane %v2879_v35, 4  ;;  %v2902_v22 = vrot.slane %v2901_v45, 4  ;;  %v2990_v52 = vrot.slane %v2989_v4, 4  ;;  %v2925_v9 = vmax.f32 %v2923_v1, %v2924_v25  ;;  %v3366_v28 = vld [vmem:[%s10490_s12 + $0x510] sm:$0xff] }
 0x3b5   :  { %v2837_v11 = vmax.f32 %v2835_v56, %v2836_v31  ;;  %v2859_v16 = vmax.f32 %v2857_v19, %v2858_v57  ;;  %v2947_v29 = vmax.f32 %v2945_v34, %v2946_v23  ;;  %v2969_v30 = vmax.f32 %v2967_v32, %v2968_v8  ;;  %v3383_v19 = vld [vmem:[%s10490_s12 + $0x598] sm:$0xff]  ;;  %v3353_v31 = vld [vmem:[%s10490_s12 + $0x4a8] sm:$0xff]  ;;  %v3336_v57 = vld [vmem:[%s10490_s12 + $0x420] sm:$0xff] }
 0x3b6   :  { %v2881_v41 = vmax.f32 %v2879_v35, %v2880_v54  ;;  %v2903_v60 = vmax.f32 %v2901_v45, %v2902_v22  ;;  %v2991_v59 = vmax.f32 %v2989_v4, %v2990_v52  ;;  %v2926_v49 = vrot.slane %v2925_v9, 2  ;;  %v12471_v35 = vld [vmem:[#allocation205_spill] sm:$0xff]  ;;  %v3337_v54 = vld [vmem:[%s10490_s12 + $0x428] sm:$0xff]  ;;  %v3384_v8 = vld [vmem:[%s10490_s12 + $0x5a0] sm:$0xff] }
 0x3b7   :  { %v2838_v2 = vrot.slane %v2837_v11, 2  ;;  %v2860_v14 = vrot.slane %v2859_v16, 2  ;;  %v2948_v37 = vrot.slane %v2947_v29, 2  ;;  %v2970_v43 = vrot.slane %v2969_v30, 2  ;;  %v3342_v45 = vld [vmem:[%s10490_s12 + $0x450] sm:$0xff] }
 0x3b8   :  { %v2882_v21 = vrot.slane %v2881_v41, 2  ;;  %v2904_v62 = vrot.slane %v2903_v60, 2  ;;  %v2992_v47 = vrot.slane %v2991_v59, 2  ;;  %v2927_v13 = vmax.f32 %v2925_v9, %v2926_v49  ;;  %v3369_v9 = vld [vmem:[%s10490_s12 + $0x528] sm:$0xff]  ;;  %v3387_v49 = vld [vmem:[%s10490_s12 + $0x5b8] sm:$0xff] }
 0x3b9   :  { %v2839_v33 = vmax.f32 %v2837_v11, %v2838_v2  ;;  %v2861_v3 = vmax.f32 %v2859_v16, %v2860_v14  ;;  %v2949_v58 = vmax.f32 %v2947_v29, %v2948_v37  ;;  %v2971_v42 = vmax.f32 %v2969_v30, %v2970_v43  ;;  %v3385_v11 = vld [vmem:[%s10490_s12 + $0x5a8] sm:$0xff]  ;;  %v3368_v16 = vld [vmem:[%s10490_s12 + $0x520] sm:$0xff]  ;;  %v3354_v29 = vld [vmem:[%s10490_s12 + $0x4b0] sm:$0xff] }
 0x3ba   :  { %v2883_v50 = vmax.f32 %v2881_v41, %v2882_v21  ;;  %v2905_v0 = vmax.f32 %v2903_v60, %v2904_v62  ;;  %v2993_v63 = vmax.f32 %v2991_v59, %v2992_v47  ;;  %v9496_v38 = vadd.f32 1e-05, %v12470_v39  ;;  %v3355_v30 = vld [vmem:[%s10490_s12 + $0x4b8] sm:$0xff]  ;;  %v12474_v21 = vld [vmem:[#allocation124_spill] sm:$0xff] }
 0x3bb   :  { %v2840_v18 = vrot.slane %v2839_v33, 1  ;;  %v2862_v51 = vrot.slane %v2861_v3, 1  ;;  %v2928_v46 = vrot.slane %v2927_v13, 1  ;;  %v2950_v36 = vrot.slane %v2949_v58, 1  ;;  %v3386_v62 = vld [vmem:[%s10490_s12 + $0x5b0] sm:$0xff]  ;;  %v3339_v47 = vld [vmem:[%s10490_s12 + $0x438] sm:$0xff] }
 0x3bc   :  { %v2884_v17 = vrot.slane %v2883_v50, 1  ;;  %v2906_v44 = vrot.slane %v2905_v0, 1  ;;  %v2972_v56 = vrot.slane %v2971_v42, 1  ;;  %v2994_v27 = vrot.slane %v2993_v63, 1 }
 0x3bd   :  { %v2841_v6 = vmax.f32 %v2839_v33, %v2840_v18  ;;  %v2863_v26 = vmax.f32 %v2861_v3, %v2862_v51  ;;  %v5486_v5 = vpack.c.bf16 %v3351_v10, %v3350_v40  ;;  %5798 = vrsqrt.f32 %v12471_v35  ;;  %v3356_v51 = vld [vmem:[%s10490_s12 + $0x4c0] sm:$0xff]  ;;  %v3370_v40 = vld [vmem:[%s10490_s12 + $0x530] sm:$0xff]  ;;  %v3371_v10 = vld [vmem:[%s10490_s12 + $0x538] sm:$0xff] }
 0x3be   :  { %v2885_v24 = vmax.f32 %v2883_v50, %v2884_v17  ;;  %v2907_v61 = vmax.f32 %v2905_v0, %v2906_v44  ;;  %v9530_v1 = vsel %vm3007_vm9, %v12472_v20, 0.0  ;;  %v2929_v34 = vmax.f32 %v2927_v13, %v2928_v46  ;;  %v3338_v50 = vld [vmem:[%s10490_s12 + $0x430] sm:$0xff]  ;;  %v3357_v17 = vld [vmem:[%s10490_s12 + $0x4c8] sm:$0xff] }
 0x3bf   :  { %v3134_v48 = vsel %vm3045_vm0, %v2863_v26, %v2841_v6  ;;  %v2951_v4 = vmax.f32 %v2949_v58, %v2950_v36  ;;  %5487 = vmatprep.subr.bf16.mxu0 %v5486_v5  ;;  %v5488_v25 = vpack.c.bf16 %v3335_v55, %v3334_v53  ;;  %v5518_v23 = vpack.c.bf16 %v3383_v19, %v3382_v7  ;;  %v12475_v13 = vld [vmem:[#allocation220_spill] sm:$0xff]  ;;  %v3388_v26 = vld [vmem:[%s10490_s12 + $0x5c0] sm:$0xff]  ;;  %v3359_v5 = vld [vmem:[%s10490_s12 + $0x4d8] sm:$0xff] }
 0x3c0   :  { %v3135_v32 = vsel %vm3047_vm4, %v2885_v24, %v3134_v48  ;;  %v2973_v41 = vmax.f32 %v2971_v42, %v2972_v56  ;;  %v2995_v52 = vmax.f32 %v2993_v63, %v2994_v27  ;;  %5800 = vrsqrt.f32 %v9496_v38  ;;  %v12476_v63 = vld [vmem:[#allocation248_spill] sm:$0xff]  ;;  %v3389_v24 = vld [vmem:[%s10490_s12 + $0x5c8] sm:$0xff]  ;;  %v3340_v56 = vld [vmem:[%s10490_s12 + $0x440] sm:$0xff] }
 0x3c1   :  { %v3136_v22 = vsel %vm3049_vm3, %v2907_v61, %v3135_v32  ;;  %5489 = vmatpush3.bf16.msra.mxu0 %v5488_v25  ;;  %5519 = vmatprep.subr.bf16.mxu1 %v5518_v23  ;;  %v5520_v14 = vpack.c.bf16 %v3367_v12, %v3366_v28  ;;  %v9566_v59 = vmul.f32 %v12474_v21, %v9530_v1  ;;  %v9593_v39 = vmul.f32 0.6931472, %v12476_v63  ;;  %v3341_v27 = vld [vmem:[%s10490_s12 + $0x448] sm:$0xff]  ;;  %v12478_v7 = vld [vmem:[#allocation46_spill] sm:$0xff]  ;;  %v3358_v48 = vld [vmem:[%s10490_s12 + $0x4d0] sm:$0xff] }
 0x3c2   :  { %v3137_v60 = vsel %vm3051_vm5, %v2929_v34, %v3136_v22  ;;  %v5490_v43 = vpack.c.bf16 %v3353_v31, %v3352_v15  ;;  %v5492_v33 = vpack.c.bf16 %v3337_v54, %v3336_v57  ;;  %v5522_v3 = vpack.c.bf16 %v3385_v11, %v3384_v8  ;;  %v12479_v28 = vld [vmem:[#allocation306_spill] sm:$0xff]  ;;  %v12480_v34 = vld [vmem:[#allocation99_spill] sm:$0xff]  ;;  %v3343_v8 = vld [vmem:[%s10490_s12 + $0x458] sm:$0xff] }
 0x3c3   :  { %v3138_v2 = vsel %vm3053_vm6, %v2951_v4, %v3137_v60  ;;  %v3169_v58 = vmul.f32 %v12474_v21, %v12475_v13  ;;  %5521 = vmatpush3.bf16.msra.mxu1 %v5520_v14  ;;  %v5524_v42 = vpack.c.bf16 %v3369_v9, %v3368_v16  ;;  %v5494_v18 = vpack.c.bf16 %v3355_v30, %v3354_v29  ;;  %v3372_v54 = vld [vmem:[%s10490_s12 + $0x540] sm:$0xff]  ;;  %v3373_v4 = vld [vmem:[%s10490_s12 + $0x548] sm:$0xff]  ;;  %v3390_v11 = vld [vmem:[%s10490_s12 + $0x5d0] sm:$0xff] }
 0x3c4   :  { %v3139_v37 = vsel %vm3055_vm7, %v2973_v41, %v3138_v2  ;;  %5491 = vmatprep.subr.bf16.mxu0 %v5490_v43  ;;  %v5526_v46 = vpack.c.bf16 %v3387_v49, %v3386_v62  ;;  %v5496_v6 = vpack.c.bf16 %v3339_v47, %v3338_v50  ;;  %v9611_v36 = vmul.f32 0.77330506, %v9593_v39  ;;  %5523 = vmatprep.subr.bf16.mxu1 %v5522_v3  ;;  %v3391_v16 = vld [vmem:[%s10490_s12 + $0x5d8] sm:$0xff]  ;;  %v3360_v60 = vld [vmem:[%s10490_s12 + $0x4e0] sm:$0xff]  ;;  %v3361_v9 = vld [vmem:[%s10490_s12 + $0x4e8] sm:$0xff] }
 0x3c5   :  { %v9582_v0 = vsel %vm3057_vm8, %v2995_v52, %v3139_v37  ;;  %5493 = vmatpush3.bf16.msra.mxu0 %v5492_v33  ;;  %v5498_v53 = vpack.c.bf16 %v3357_v17, %v3356_v51  ;;  %v9622_v19 = vsel %vm3008_vm10, %v12478_v7, 0.0  ;;  %v5528_v61 = vpack.c.bf16 %v3371_v10, %v3370_v40  ;;  %v3374_v37 = vld [vmem:[%s10490_s12 + $0x550] sm:$0xff]  ;;  %v3375_v43 = vld [vmem:[%s10490_s12 + $0x558] sm:$0xff]  ;;  %v3344_v33 = vld [vmem:[%s10490_s12 + $0x460] sm:$0xff] }
 0x3c6   :  { %4774 = vmatmul.mubr.msk.f32.gmra.mrb[26].mxu0 %vm3008_vm10, %v9582_v0  ;;  %5495 = vmatprep.subr.bf16.mxu0 %v5494_v18  ;;  %v9633_v12 = vsel %vm3008_vm10, %v12479_v28, 0.0  ;;  %v5530_v20 = vpack.c.bf16 %v3389_v24, %v3388_v26  ;;  %v9639_v32 = vsel %vm3007_vm9, %v12480_v34, 0.0  ;;  %vm1098_vm15 = vcmp.eq.f32.partialorder %v12471_v35, inf  ;;  %v3345_v47 = vld [vmem:[%s10490_s12 + $0x468] sm:$0xff]  ;;  %v3362_v18 = vld [vmem:[%s10490_s12 + $0x4f0] sm:$0xff]  ;;  %v3363_v51 = vld [vmem:[%s10490_s12 + $0x4f8] sm:$0xff] }
 0x3c7   :  { %3952 = vmatprep.mubr.f32.mxu0 %v3169_v58  ;;  %v5799_v55 = vpop.eup %5798  ;;  %5525 = vmatpush3.bf16.msra.mxu1 %v5524_v42  ;;  %v1101_v31 = vand.u32 2147483648, %v12471_v35  ;;  %v5500_v57 = vpack.c.bf16 %v3341_v27, %v3340_v56  ;;  %vm1100_vm2 = vcmp.eq.f32.partialorder %v12471_v35, 0.0  ;;  %v5502_v23 = vpack.c.bf16 %v3359_v5, %v3358_v48  ;;  %v3392_v58 = vld [vmem:[%s10490_s12 + $0x5e0] sm:$0xff]  ;;  %v3393_v42 = vld [vmem:[%s10490_s12 + $0x5e8] sm:$0xff]  ;;  %v3347_v24 = vld [vmem:[%s10490_s12 + $0x478] sm:$0xff] }
 0x3c8   :  { %v1097_v15 = vmul.f32 %v5799_v55, %v12471_v35  ;;  %5527 = vmatprep.subr.bf16.mxu1 %v5526_v46  ;;  %v9665_v41 = vmul.f32 %v9611_v36, %v9622_v19  ;;  %vm1091_vm0 = vcmp.eq.f32.partialorder %v9496_v38, inf  ;;  %vm1093_vm4 = vcmp.eq.f32.partialorder %v9496_v38, 0.0  ;;  %v3376_v40 = vld [vmem:[%s10490_s12 + $0x560] sm:$0xff]  ;;  %v3377_v10 = vld [vmem:[%s10490_s12 + $0x568] sm:$0xff]  ;;  %v3395_v56 = vld [vmem:[%s10490_s12 + $0x5f8] sm:$0xff] }
 0x3c9   :  { %5497 = vmatpush3.bf16.msra.mxu0 %v5496_v6  ;;  %v1094_v29 = vand.u32 2147483648, %v9496_v38  ;;  %v5532_v30 = vpack.c.bf16 %v3373_v4, %v3372_v54  ;;  %v9682_v2 = vmul.f32 %v9611_v36, %v9633_v12  ;;  %v5504_v62 = vpack.c.bf16 %v3343_v8, %v3342_v45  ;;  %v12481_v6 = vld [vmem:[#allocation216_spill] sm:$0xff]  ;;  %v3412_v27 = vld [vmem:[%s10490_s12 + $0x680] sm:$0xff]  ;;  %v3413_v55 = vld [vmem:[%s10490_s12 + $0x688] sm:$0xff] }
 0x3ca   :  { %v5801_v22 = vpop.eup %5800  ;;  %v1099_v25 = vsel %vm1098_vm15, %v12471_v35, %v1097_v15  ;;  %5499 = vmatprep.subr.bf16.mxu0 %v5498_v53  ;;  %v5534_v49 = vpack.c.bf16 %v3391_v16, %v3390_v11  ;;  %v9696_v3 = vmul.f32 %v12474_v21, %v9639_v32  ;;  %v5506_v50 = vpack.c.bf16 %v3361_v9, %v3360_v60  ;;  %v3394_v53 = vld [vmem:[%s10490_s12 + $0x5f0] sm:$0xff]  ;;  %v3379_v28 = vld [vmem:[%s10490_s12 + $0x578] sm:$0xff]  ;;  %v3396_v34 = vld [vmem:[%s10490_s12 + $0x600] sm:$0xff] }
 0x3cb   :  { %v9667_v52 = vsel %vm1100_vm2, %v1101_v31, %v1099_v25  ;;  %v1090_v35 = vmul.f32 %v5801_v22, %v9496_v38  ;;  %5529 = vmatpush3.bf16.msra.mxu1 %v5528_v61  ;;  %5802 = vrcp.f32 %v9593_v39  ;;  %v5536_v17 = vpack.c.bf16 %v3375_v43, %v3374_v37  ;;  %v3346_v39 = vld [vmem:[%s10490_s12 + $0x470] sm:$0xff]  ;;  %v3397_v31 = vld [vmem:[%s10490_s12 + $0x608] sm:$0xff]  ;;  %v3415_v22 = vld [vmem:[%s10490_s12 + $0x698] sm:$0xff] }
 0x3cc   :  { %3882 = vmatprep.mubr.f32.mxu1 %v9667_v52  ;;  %5531 = vmatprep.subr.bf16.mxu1 %v5530_v20  ;;  %v5508_v63 = vpack.c.bf16 %v3345_v47, %v3344_v33  ;;  %v5538_v46 = vpack.c.bf16 %v3393_v42, %v3392_v58  ;;  %v5510_v26 = vpack.c.bf16 %v3363_v51, %v3362_v18  ;;  %v3378_v5 = vld [vmem:[%s10490_s12 + $0x570] sm:$0xff]  ;;  %v3445_v4 = vld [vmem:[%s10490_s12 + $0x788] sm:$0xff]  ;;  %v3399_v43 = vld [vmem:[%s10490_s12 + $0x618] sm:$0xff] }
 0x3cd   :  { %v1092_v14 = vsel %vm1091_vm0, %v9496_v38, %v1090_v35  ;;  %5501 = vmatpush3.bf16.msra.mxu0 %v5500_v57  ;;  %v5540_v7 = vpack.c.bf16 %v3377_v10, %v3376_v40  ;;  %v5512_v61 = vpack.c.bf16 %v3347_v24, %v3346_v39  ;;  %v5542_v48 = vpack.c.bf16 %v3395_v56, %v3394_v53  ;;  %v3444_v57 = vld [vmem:[%s10490_s12 + $0x780] sm:$0xff]  ;;  %v3414_v45 = vld [vmem:[%s10490_s12 + $0x690] sm:$0xff]  ;;  %v3429_v60 = vld [vmem:[%s10490_s12 + $0x708] sm:$0xff] }
 0x3ce   :  { %v9698_v38 = vsel %vm1093_vm4, %v1094_v29, %v1092_v14  ;;  %5503 = vmatprep.subr.bf16.mxu0 %v5502_v23  ;;  %v5546_v20 = vpack.c.bf16 %v3413_v55, %v3412_v27  ;;  %v9768_v54 = vmul.f32 %v9611_v36, %v9667_v52  ;;  %v5544_v23 = vpack.c.bf16 %v3379_v28, %v3378_v5  ;;  %v12482_v8 = vld [vmem:[#allocation132_spill] sm:$0xff]  ;;  %v3428_v35 = vld [vmem:[%s10490_s12 + $0x700] sm:$0xff]  ;;  %v3447_v14 = vld [vmem:[%s10490_s12 + $0x798] sm:$0xff] }
 0x3cf   :  { %3883 = vmatmul.mubr.f32.gmra.mrb[20].mxu1 %v9698_v38  ;;  %v9781_v25 = vmul.f32 %v9611_v36, %v9698_v38  ;;  %v9785_v11 = vmul.f32 %v12482_v8, %v9530_v1  ;;  %v5548_v16 = vpack.c.bf16 %v3397_v31, %v3396_v34  ;;  %v5578_v29 = vpack.c.bf16 %v3445_v4, %v3444_v57  ;;  %v3446_v1 = vld [vmem:[%s10490_s12 + $0x790] sm:$0xff]  ;;  %v12484_v33 = vld [vmem:[#allocation97_spill] sm:$0xff]  ;;  %v3416_v47 = vld [vmem:[%s10490_s12 + $0x6a0] sm:$0xff] }
 0x3d0   :  { %4027 = vmatprep.mubr.f32.mxu1 %v9566_v59  ;;  %5533 = vmatpush3.bf16.msra.mxu1 %v5532_v30  ;;  %v9730_v59 = vsel %vm3008_vm10, %v12481_v6, 0.0  ;;  %v5550_v30 = vpack.c.bf16 %v3415_v22, %v3414_v45  ;;  %v3398_v37 = vld [vmem:[%s10490_s12 + $0x610] sm:$0xff]  ;;  %v3417_v58 = vld [vmem:[%s10490_s12 + $0x6a8] sm:$0xff]  ;;  %v5582_v18 = vpack.c.bf16 %v3447_v14, %v3446_v1  ;;  %v12485_v10 = vld [vmem:[#allocation277_spill] sm:$0xff]  ;;  %v9876_v4 = vmul.f32 %v12482_v8, %v9639_v32 }
 0x3d1   :  { %5505 = vmatpush3.bf16.msra.mxu0 %v5504_v62  ;;  %5535 = vmatprep.subr.bf16.mxu1 %v5534_v49  ;;  %v9755_v15 = vmul.f32 %v9611_v36, %v9730_v59  ;;  %v12483_v62 = vld [vmem:[#allocation211_spill] sm:$0xff]  ;;  %v3430_v51 = vld [vmem:[%s10490_s12 + $0x710] sm:$0xff]  ;;  %v12486_v39 = vld [vmem:[#allocation201_spill] sm:$0xff]  ;;  %v9905_v1 = vsel %vm3008_vm10, %v9582_v0, 0.0 }
 0x3d2   :  { %5507 = vmatprep.subr.bf16.mxu0 %v5506_v50  ;;  %v3171_v49 = vmul.f32 %v9611_v36, %v12483_v62  ;;  %v5580_v50 = vpack.c.bf16 %v3429_v60, %v3428_v35  ;;  %v3449_v40 = vld [vmem:[%s10490_s12 + $0x7a8] sm:$0xff]  ;;  %v3170_v6 = vmul.f32 %v9611_v36, %v12486_v39  ;;  %v3400_v24 = vld [vmem:[%s10490_s12 + $0x620] sm:$0xff]  ;;  %v3418_v27 = vld [vmem:[%s10490_s12 + $0x6b0] sm:$0xff] }
 0x3d3   :  { %v3401_v53 = vld [vmem:[%s10490_s12 + $0x628] sm:$0xff]  ;;  %v3419_v55 = vld [vmem:[%s10490_s12 + $0x6b8] sm:$0xff]  ;;  %v12487_v5 = vld [vmem:[#allocation206_spill] sm:$0xff] }
 0x3d4   :  { %5537 = vmatpush3.bf16.msra.mxu1 %v5536_v17  ;;  %v3431_v17 = vld [vmem:[%s10490_s12 + $0x718] sm:$0xff]  ;;  %v3181_v28 = vmul.f32 %v12474_v21, %v12487_v5  ;;  %v3450_v34 = vld [vmem:[%s10490_s12 + $0x7b0] sm:$0xff]  ;;  %v3421_v45 = vld [vmem:[%s10490_s12 + $0x6c8] sm:$0xff] }
 0x3d5   :  { %5509 = vmatpush3.bf16.msra.mxu0 %v5508_v63  ;;  %5539 = vmatprep.subr.bf16.mxu1 %v5538_v46  ;;  %v5803_v9 = vpop.eup %5802  ;;  %v5552_v63 = vpack.c.bf16 %v3399_v43, %v3398_v37  ;;  %v3448_v46 = vld [vmem:[%s10490_s12 + $0x7a0] sm:$0xff]  ;;  %v5584_v56 = vpack.c.bf16 %v3431_v17, %v3430_v51  ;;  %v3451_v31 = vld [vmem:[%s10490_s12 + $0x7b8] sm:$0xff]  ;;  %v3402_v21 = vld [vmem:[%s10490_s12 + $0x630] sm:$0xff] }
 0x3d6   :  { %5511 = vmatprep.subr.bf16.mxu0 %v5510_v26  ;;  %v9814_v42 = vmul.f32 1.2931508, %v5803_v9  ;;  %v5554_v26 = vpack.c.bf16 %v3417_v58, %v3416_v47  ;;  %v5590_v22 = vpack.c.bf16 %v3451_v31, %v3450_v34  ;;  %v3435_v32 = vld [vmem:[%s10490_s12 + $0x738] sm:$0xff]  ;;  %v3452_v35 = vld [vmem:[%s10490_s12 + $0x7c0] sm:$0xff]  ;;  %v3453_v60 = vld [vmem:[%s10490_s12 + $0x7c8] sm:$0xff] }
 0x3d7   :  { %v3423_v37 = vld [vmem:[%s10490_s12 + $0x6d8] sm:$0xff]  ;;  %v5594_v43 = vpack.c.bf16 %v3453_v60, %v3452_v35  ;;  %v3437_v0 = vld [vmem:[%s10490_s12 + $0x748] sm:$0xff]  ;;  %v3406_v51 = vld [vmem:[%s10490_s12 + $0x650] sm:$0xff] }
 0x3d8   :  { %5541 = vmatpush3.bf16.msra.mxu1 %v5540_v7  ;;  %v5586_v7 = vpack.c.bf16 %v3449_v40, %v3448_v46  ;;  %v9865_v57 = vmul.f32 %v9814_v42, %v9633_v12  ;;  %v3455_v47 = vld [vmem:[%s10490_s12 + $0x7d8] sm:$0xff]  ;;  %v9927_v58 = vmul.f32 %v9814_v42, %v9730_v59  ;;  %v9941_v46 = vmul.f32 %v9814_v42, %v9905_v1  ;;  %v3426_v34 = vld [vmem:[%s10490_s12 + $0x6f0] sm:$0xff]  ;;  %v3476_v35 = vld [vmem:[%s10490_s12 + $0x880] sm:$0xff] }
 0x3d9   :  { %5513 = vmatpush3.bf16.msra.mxu0 %v5512_v61  ;;  %5543 = vmatprep.subr.bf16.mxu1 %v5542_v48  ;;  %v3432_v61 = vld [vmem:[%s10490_s12 + $0x720] sm:$0xff]  ;;  %v9852_v48 = vmul.f32 %v9814_v42, %v9622_v19  ;;  %v5558_v19 = vpack.c.bf16 %v3419_v55, %v3418_v27  ;;  %v3407_v17 = vld [vmem:[%s10490_s12 + $0x658] sm:$0xff]  ;;  %v9945_v59 = vmul.f32 %v9814_v42, %v9698_v38  ;;  %v3457_v55 = vld [vmem:[%s10490_s12 + $0x7e8] sm:$0xff] }
 0x3da   :  { %5547 = vmatprep.subr.bf16.mxu0 %v5546_v20  ;;  %v5556_v20 = vpack.c.bf16 %v3401_v53, %v3400_v24  ;;  %v3438_v24 = vld [vmem:[%s10490_s12 + $0x750] sm:$0xff]  ;;  %v3439_v38 = vld [vmem:[%s10490_s12 + $0x758] sm:$0xff]  ;;  %v3456_v27 = vld [vmem:[%s10490_s12 + $0x7e0] sm:$0xff] }
 0x3db   :  { %v3427_v31 = vld [vmem:[%s10490_s12 + $0x6f8] sm:$0xff]  ;;  %v3477_v60 = vld [vmem:[%s10490_s12 + $0x888] sm:$0xff] }
 0x3dc   :  { %5545 = vmatpush3.bf16.msra.mxu1 %v5544_v23  ;;  %3953 = vmatmul.mubr.f32.vlgmr.msra.gmra.mrb[28].mxu0 %v12484_v33  ;;  %v3434_v23 = vld [vmem:[%s10490_s12 + $0x730] sm:$0xff]  ;;  %v3436_v33 = vld [vmem:[%s10490_s12 + $0x740] sm:$0xff] }
 0x3dd   :  { %3957 = vmatprep.mubr.f32.mxu0 %v3171_v49  ;;  %5549 = vmatpush3.bf16.msra.mxu0 %v5548_v16  ;;  %v5592_v14 = vpack.c.bf16 %v3435_v32, %v3434_v23  ;;  %v3422_v49 = vld [vmem:[%s10490_s12 + $0x6d0] sm:$0xff]  ;;  %v5596_v40 = vpack.c.bf16 %v3437_v0, %v3436_v33  ;;  %v3411_v32 = vld [vmem:[%s10490_s12 + $0x678] sm:$0xff]  ;;  %v3460_v33 = vld [vmem:[%s10490_s12 + $0x800] sm:$0xff] }
 0x3de   :  { %5579 = vmatprep.subr.bf16.mxu1 %v5578_v29  ;;  %5551 = vmatprep.subr.bf16.mxu0 %v5550_v30  ;;  %v3404_v29 = vld [vmem:[%s10490_s12 + $0x640] sm:$0xff]  ;;  %v3405_v30 = vld [vmem:[%s10490_s12 + $0x648] sm:$0xff]  ;;  %v3410_v23 = vld [vmem:[%s10490_s12 + $0x670] sm:$0xff] }
 0x3df   :  { %4028 = vmatmul.mubr.f32.vlgmr.msra.gmra.mrb[22].mxu1 %v12485_v10  ;;  %v5564_v44 = vpack.c.bf16 %v3405_v30, %v3404_v29  ;;  %v3424_v10 = vld [vmem:[%s10490_s12 + $0x6e0] sm:$0xff]  ;;  %v3442_v29 = vld [vmem:[%s10490_s12 + $0x770] sm:$0xff]  ;;  %v3443_v30 = vld [vmem:[%s10490_s12 + $0x778] sm:$0xff] }
 0x3e0   :  { %4032 = vmatprep.mubr.f32.mxu1 %v9665_v41  ;;  %5581 = vmatpush3.bf16.msra.mxu1 %v5580_v50  ;;  %v3433_v41 = vld [vmem:[%s10490_s12 + $0x728] sm:$0xff]  ;;  %v3454_v50 = vld [vmem:[%s10490_s12 + $0x7d0] sm:$0xff] }
 0x3e1   :  { %3958 = vmatmul.mubr.f32.gmra.mrb[30].mxu0 %v3170_v6  ;;  %5583 = vmatprep.subr.bf16.mxu1 %v5582_v18  ;;  %v5588_v12 = vpack.c.bf16 %v3433_v41, %v3432_v61  ;;  %v5566_v18 = vpack.c.bf16 %v3423_v37, %v3422_v49  ;;  %v3425_v6 = vld [vmem:[%s10490_s12 + $0x6e8] sm:$0xff]  ;;  %v3408_v41 = vld [vmem:[%s10490_s12 + $0x660] sm:$0xff] }
 0x3e2   :  { %5553 = vmatpush3.bf16.msra.mxu0 %v5552_v63  ;;  %4102 = vmatprep.mubr.f32.mxu0 %v9696_v3  ;;  %v3403_v3 = vld [vmem:[%s10490_s12 + $0x638] sm:$0xff]  ;;  %v9937_v63 = vmul.f32 %v9814_v42, %v9667_v52  ;;  %v4864_v52 = vpop.f32.mrb[16].mxu1  ;;  %v5570_v61 = vpack.c.bf16 %v3425_v6, %v3424_v10  ;;  %v3508_v49 = vld [vmem:[%s10490_s12 + $0x980] sm:$0xff]  ;;  %v3509_v37 = vld [vmem:[%s10490_s12 + $0x988] sm:$0xff] }
 0x3e3   :  { %4033 = vmatmul.mubr.f32.gmra.mrb[24].mxu1 %v9682_v2  ;;  %5555 = vmatprep.subr.bf16.mxu0 %v5554_v26  ;;  %v3420_v2 = vld [vmem:[%s10490_s12 + $0x6c0] sm:$0xff]  ;;  %v5560_v16 = vpack.c.bf16 %v3403_v3, %v3402_v21  ;;  %v5598_v26 = vpack.c.bf16 %v3455_v47, %v3454_v50  ;;  %v4865_v53 = vpop.f32.mrb[17].mxu1  ;;  %v3441_v3 = vld [vmem:[%s10490_s12 + $0x768] sm:$0xff]  ;;  %v3478_v50 = vld [vmem:[%s10490_s12 + $0x890] sm:$0xff] }
 0x3e4   :  { %5585 = vmatpush3.bf16.msra.mxu1 %v5584_v56  ;;  %4177 = vmatprep.mubr.f32.mxu1 %v3181_v28  ;;  %v5562_v9 = vpack.c.bf16 %v3421_v45, %v3420_v2  ;;  %v5568_v56 = vpack.c.bf16 %v3407_v17, %v3406_v51  ;;  %v3409_v28 = vld [vmem:[%s10490_s12 + $0x668] sm:$0xff]  ;;  %v3440_v21 = vld [vmem:[%s10490_s12 + $0x760] sm:$0xff]  ;;  %v3458_v2 = vld [vmem:[%s10490_s12 + $0x7f0] sm:$0xff] }
 0x3e5   :  { %5587 = vmatprep.subr.bf16.mxu1 %v5586_v7  ;;  %v9965_v7 = vadd.f32 %v4865_v53, %v4864_v52  ;;  %v3459_v45 = vld [vmem:[%s10490_s12 + $0x7f8] sm:$0xff]  ;;  %v3461_v0 = vld [vmem:[%s10490_s12 + $0x808] sm:$0xff]  ;;  %v3492_v51 = vld [vmem:[%s10490_s12 + $0x900] sm:$0xff] }
 0x3e6   :  { %5557 = vmatpush3.bf16.msra.mxu0 %v5556_v20  ;;  %v5600_v20 = vpack.c.bf16 %v3439_v38, %v3438_v24  ;;  %v3479_v47 = vld [vmem:[%s10490_s12 + $0x898] sm:$0xff]  ;;  %v3493_v17 = vld [vmem:[%s10490_s12 + $0x908] sm:$0xff]  ;;  %v3510_v10 = vld [vmem:[%s10490_s12 + $0x990] sm:$0xff] }
 0x3e7   :  { %5559 = vmatprep.subr.bf16.mxu0 %v5558_v19  ;;  %v5602_v19 = vpack.c.bf16 %v3457_v55, %v3456_v27  ;;  %v3511_v6 = vld [vmem:[%s10490_s12 + $0x998] sm:$0xff]  ;;  %v5614_v52 = vpack.c.bf16 %v3479_v47, %v3478_v50  ;;  %v5644_v38 = vpack.c.bf16 %v3493_v17, %v3492_v51  ;;  %v3480_v53 = vld [vmem:[%s10490_s12 + $0x8a0] sm:$0xff]  ;;  %v3486_v47 = vld [vmem:[%s10490_s12 + $0x8d0] sm:$0xff] }
 0x3e8   :  { %5589 = vmatpush3.bf16.msra.mxu1 %v5588_v12  ;;  %v5572_v12 = vpack.c.bf16 %v3409_v28, %v3408_v41  ;;  %v3463_v24 = vld [vmem:[%s10490_s12 + $0x818] sm:$0xff]  ;;  %v12488_v27 = vld [vmem:[#allocation214_spill] sm:$0xff]  ;;  %v5646_v55 = vpack.c.bf16 %v3511_v6, %v3510_v10  ;;  %v3518_v6 = vld [vmem:[%s10490_s12 + $0x9d0] sm:$0xff] }
 0x3e9   :  { %5591 = vmatprep.subr.bf16.mxu1 %v5590_v22  ;;  %v5574_v22 = vpack.c.bf16 %v3427_v31, %v3426_v34  ;;  %v3495_v41 = vld [vmem:[%s10490_s12 + $0x918] sm:$0xff]  ;;  %v3513_v34 = vld [vmem:[%s10490_s12 + $0x9a8] sm:$0xff]  ;;  %v3500_v17 = vld [vmem:[%s10490_s12 + $0x940] sm:$0xff] }
 0x3ea   :  { %5561 = vmatpush3.bf16.msra.mxu0 %v5560_v16  ;;  %v5604_v16 = vpack.c.bf16 %v3441_v3, %v3440_v21  ;;  %v12489_v31 = vld [vmem:[#allocation225_spill] sm:$0xff]  ;;  %v3465_v3 = vld [vmem:[%s10490_s12 + $0x828] sm:$0xff] }
 0x3eb   :  { %5563 = vmatprep.subr.bf16.mxu0 %v5562_v9  ;;  %v5606_v9 = vpack.c.bf16 %v3459_v45, %v3458_v2 }
 0x3ec   :  { %5593 = vmatpush3.bf16.msra.mxu1 %v5592_v14  ;;  %v5576_v14 = vpack.c.bf16 %v3411_v32, %v3410_v23  ;;  %v3514_v23 = vld [vmem:[%s10490_s12 + $0x9b0] sm:$0xff]  ;;  %v3515_v32 = vld [vmem:[%s10490_s12 + $0x9b8] sm:$0xff] }
 0x3ed   :  { %5595 = vmatprep.subr.bf16.mxu1 %v5594_v43  ;;  %v5610_v43 = vpack.c.bf16 %v3477_v60, %v3476_v35  ;;  %v3466_v35 = vld [vmem:[%s10490_s12 + $0x830] sm:$0xff]  ;;  %v3467_v60 = vld [vmem:[%s10490_s12 + $0x838] sm:$0xff] }
 0x3ee   :  { %5565 = vmatpush3.bf16.msra.mxu0 %v5564_v44  ;;  %v5608_v44 = vpack.c.bf16 %v3443_v30, %v3442_v29  ;;  %v3484_v29 = vld [vmem:[%s10490_s12 + $0x8c0] sm:$0xff]  ;;  %v5654_v30 = vpack.c.bf16 %v3515_v32, %v3514_v23  ;;  %v3474_v32 = vld [vmem:[%s10490_s12 + $0x870] sm:$0xff] }
 0x3ef   :  { %5567 = vmatprep.subr.bf16.mxu0 %v5566_v18  ;;  %v5642_v18 = vpack.c.bf16 %v3509_v37, %v3508_v49  ;;  %v3499_v49 = vld [vmem:[%s10490_s12 + $0x938] sm:$0xff]  ;;  %v3516_v37 = vld [vmem:[%s10490_s12 + $0x9c0] sm:$0xff] }
 0x3f0   :  { %5597 = vmatpush3.bf16.msra.mxu1 %v5596_v40  ;;  %v5612_v40 = vpack.c.bf16 %v3461_v0, %v3460_v33  ;;  %v3468_v0 = vld [vmem:[%s10490_s12 + $0x840] sm:$0xff] }
 0x3f1   :  { %5599 = vmatprep.subr.bf16.mxu1 %v5598_v26  ;;  %v3462_v26 = vld [vmem:[%s10490_s12 + $0x810] sm:$0xff] }
 0x3f2   :  { %5569 = vmatpush3.bf16.msra.mxu0 %v5568_v56  ;;  %v3481_v56 = vld [vmem:[%s10490_s12 + $0x8a8] sm:$0xff]  ;;  %v5616_v28 = vpack.c.bf16 %v3463_v24, %v3462_v26  ;;  %v3470_v24 = vld [vmem:[%s10490_s12 + $0x850] sm:$0xff] }
 0x3f3   :  { %5571 = vmatprep.subr.bf16.mxu0 %v5570_v61  ;;  %v3494_v61 = vld [vmem:[%s10490_s12 + $0x910] sm:$0xff]  ;;  %v5618_v21 = vpack.c.bf16 %v3481_v56, %v3480_v53  ;;  %v3488_v56 = vld [vmem:[%s10490_s12 + $0x8e0] sm:$0xff] }
 0x3f4   :  { %5601 = vmatpush3.bf16.msra.mxu1 %v5600_v20  ;;  %v3512_v20 = vld [vmem:[%s10490_s12 + $0x9a0] sm:$0xff]  ;;  %v5648_v2 = vpack.c.bf16 %v3495_v41, %v3494_v61  ;;  %v3502_v61 = vld [vmem:[%s10490_s12 + $0x950] sm:$0xff]  ;;  %v3503_v41 = vld [vmem:[%s10490_s12 + $0x958] sm:$0xff] }
 0x3f5   :  { %5603 = vmatprep.subr.bf16.mxu1 %v5602_v19  ;;  %v3178_v19 = vmul.f32 %v9611_v36, %v9905_v1  ;;  %v3482_v36 = vld [vmem:[%s10490_s12 + $0x8b0] sm:$0xff]  ;;  %v3483_v1 = vld [vmem:[%s10490_s12 + $0x8b8] sm:$0xff]  ;;  %v5650_v45 = vpack.c.bf16 %v3513_v34, %v3512_v20  ;;  %v3520_v20 = vld [vmem:[%s10490_s12 + $0x9e0] sm:$0xff] }
 0x3f6   :  { %5573 = vmatpush3.bf16.msra.mxu0 %v5572_v12  ;;  %v3185_v12 = vmul.f32 %v12482_v8, %v12475_v13  ;;  %v3497_v13 = vld [vmem:[%s10490_s12 + $0x928] sm:$0xff] }
 0x3f7   :  { %5575 = vmatprep.subr.bf16.mxu0 %v5574_v22  ;;  %v3521_v34 = vld [vmem:[%s10490_s12 + $0x9e8] sm:$0xff] }
 0x3f8   :  { %5605 = vmatpush3.bf16.msra.mxu1 %v5604_v16  ;;  %v5622_v16 = vpack.c.bf16 %v3483_v1, %v3482_v36  ;;  %v3504_v36 = vld [vmem:[%s10490_s12 + $0x960] sm:$0xff]  ;;  %v3505_v1 = vld [vmem:[%s10490_s12 + $0x968] sm:$0xff] }
 0x3f9   :  { %5607 = vmatprep.subr.bf16.mxu1 %v5606_v9 }
 0x3fa   :  { %5577 = vmatpush3.bf16.msra.mxu0 %v5576_v14  ;;  %v3498_v14 = vld [vmem:[%s10490_s12 + $0x930] sm:$0xff] }
 0x3fb   :  { %5611 = vmatprep.subr.bf16.mxu0 %v5610_v43  ;;  %v3517_v43 = vld [vmem:[%s10490_s12 + $0x9c8] sm:$0xff]  ;;  %v5656_v50 = vpack.c.bf16 %v3499_v49, %v3498_v14  ;;  %v3506_v14 = vld [vmem:[%s10490_s12 + $0x970] sm:$0xff]  ;;  %v3507_v49 = vld [vmem:[%s10490_s12 + $0x978] sm:$0xff] }
 0x3fc   :  { %5609 = vmatpush3.bf16.msra.mxu1 %v5608_v44  ;;  %v3469_v44 = vld [vmem:[%s10490_s12 + $0x848] sm:$0xff]  ;;  %v5658_v51 = vpack.c.bf16 %v3517_v43, %v3516_v37  ;;  %v3572_v37 = vld [vmem:[%s10490_s12 + $0xb80] sm:$0xff] }
 0x3fd   :  { %4103 = vmatmul.mubr.f32.vlgmr.msra.gmra.mrb[32].mxu0 %v12488_v27  ;;  %5643 = vmatprep.subr.bf16.mxu1 %v5642_v18  ;;  %v3487_v18 = vld [vmem:[%s10490_s12 + $0x8d8] sm:$0xff]  ;;  %v5628_v10 = vpack.c.bf16 %v3469_v44, %v3468_v0  ;;  %v3489_v27 = vld [vmem:[%s10490_s12 + $0x8e8] sm:$0xff] }
 0x3fe   :  { %4107 = vmatprep.mubr.f32.mxu0 %v9755_v15  ;;  %5613 = vmatpush3.bf16.msra.mxu0 %v5612_v40  ;;  %v3464_v15 = vld [vmem:[%s10490_s12 + $0x820] sm:$0xff]  ;;  %v3501_v40 = vld [vmem:[%s10490_s12 + $0x948] sm:$0xff]  ;;  %v5630_v26 = vpack.c.bf16 %v3487_v18, %v3486_v47 }
 0x3ff   :  { %4178 = vmatmul.mubr.f32.vlgmr.msra.gmra.mrb[26].mxu1 %v12489_v31  ;;  %5615 = vmatprep.subr.bf16.mxu0 %v5614_v52  ;;  %v5620_v22 = vpack.c.bf16 %v3465_v3, %v3464_v15  ;;  %v3519_v52 = vld [vmem:[%s10490_s12 + $0x9d8] sm:$0xff]  ;;  %v5660_v53 = vpack.c.bf16 %v3501_v40, %v3500_v17  ;;  %v5634_v31 = vpack.c.bf16 %v3489_v27, %v3488_v56  ;;  %v3490_v3 = vld [vmem:[%s10490_s12 + $0x8f0] sm:$0xff]  ;;  %v3573_v43 = vld [vmem:[%s10490_s12 + $0xb88] sm:$0xff] }
 0x400   :  { %4182 = vmatprep.mubr.f32.mxu1 %v9768_v54  ;;  %5645 = vmatpush3.bf16.msra.mxu1 %v5644_v38  ;;  %v3496_v54 = vld [vmem:[%s10490_s12 + $0x920] sm:$0xff]  ;;  %v3471_v38 = vld [vmem:[%s10490_s12 + $0x858] sm:$0xff]  ;;  %v5664_v15 = vpack.c.bf16 %v3503_v41, %v3502_v61  ;;  %v3525_v18 = vld [vmem:[%s10490_s12 + $0xa08] sm:$0xff]  ;;  %v5672_v17 = vpack.c.bf16 %v3507_v49, %v3506_v14 }
 0x401   :  { %4108 = vmatmul.mubr.f32.gmra.mrb[34].mxu0 %v3178_v19  ;;  %5647 = vmatprep.subr.bf16.mxu1 %v5646_v55  ;;  %v5652_v9 = vpack.c.bf16 %v3497_v13, %v3496_v54  ;;  %v5662_v55 = vpack.c.bf16 %v3519_v52, %v3518_v6  ;;  %v3472_v19 = vld [vmem:[%s10490_s12 + $0x860] sm:$0xff]  ;;  %v3522_v54 = vld [vmem:[%s10490_s12 + $0x9f0] sm:$0xff]  ;;  %v3523_v13 = vld [vmem:[%s10490_s12 + $0x9f8] sm:$0xff]  ;;  %v5706_v52 = vpack.c.bf16 %v3573_v43, %v3572_v37 }
 0x402   :  { %5617 = vmatpush3.bf16.msra.mxu0 %v5616_v28  ;;  %4252 = vmatprep.mubr.f32.mxu0 %v3185_v12  ;;  %v5632_v28 = vpack.c.bf16 %v3471_v38, %v3470_v24  ;;  %v3491_v12 = vld [vmem:[%s10490_s12 + $0x8f8] sm:$0xff]  ;;  %v3524_v47 = vld [vmem:[%s10490_s12 + $0xa00] sm:$0xff]  ;;  %v3542_v40 = vld [vmem:[%s10490_s12 + $0xa90] sm:$0xff] }
 0x403   :  { %4183 = vmatmul.mubr.f32.gmra.mrb[28].mxu1 %v9781_v25  ;;  %5619 = vmatprep.subr.bf16.mxu0 %v5618_v21  ;;  %v3485_v25 = vld [vmem:[%s10490_s12 + $0x8c8] sm:$0xff]  ;;  %v5638_v23 = vpack.c.bf16 %v3491_v12, %v3490_v3  ;;  %v5676_v38 = vpack.c.bf16 %v3525_v18, %v3524_v47  ;;  %v3575_v56 = vld [vmem:[%s10490_s12 + $0xb98] sm:$0xff]  ;;  %v3526_v61 = vld [vmem:[%s10490_s12 + $0xa10] sm:$0xff] }
 0x404   :  { %5649 = vmatpush3.bf16.msra.mxu1 %v5648_v2  ;;  %4327 = vmatprep.mubr.f32.mxu1 %v9785_v11  ;;  %v5624_v11 = vpack.c.bf16 %v3467_v60, %v3466_v35  ;;  %v5626_v33 = vpack.c.bf16 %v3485_v25, %v3484_v29  ;;  %v3473_v21 = vld [vmem:[%s10490_s12 + $0x868] sm:$0xff]  ;;  %v5666_v2 = vpack.c.bf16 %v3521_v34, %v3520_v20  ;;  %v3527_v41 = vld [vmem:[%s10490_s12 + $0xa18] sm:$0xff]  ;;  %v3576_v3 = vld [vmem:[%s10490_s12 + $0xba0] sm:$0xff] }
 0x405   :  { %5651 = vmatprep.subr.bf16.mxu1 %v5650_v45  ;;  %v5636_v45 = vpack.c.bf16 %v3473_v21, %v3472_v19  ;;  %v5668_v60 = vpack.c.bf16 %v3505_v1, %v3504_v36  ;;  %v3541_v29 = vld [vmem:[%s10490_s12 + $0xa88] sm:$0xff]  ;;  %v3558_v21 = vld [vmem:[%s10490_s12 + $0xb10] sm:$0xff]  ;;  %v3186_v36 = vmul.f32 %v9814_v42, %v12486_v39  ;;  %v3563_v14 = vld [vmem:[%s10490_s12 + $0xb38] sm:$0xff] }
 0x406   :  { %5621 = vmatpush3.bf16.msra.mxu0 %v5620_v22  ;;  %v4823_v22 = vpop.f32.mrb[20].mxu0  ;;  %v3557_v24 = vld [vmem:[%s10490_s12 + $0xb08] sm:$0xff]  ;;  %v3550_v47 = vld [vmem:[%s10490_s12 + $0xad0] sm:$0xff]  ;;  %v3551_v18 = vld [vmem:[%s10490_s12 + $0xad8] sm:$0xff] }
 0x407   :  { %5623 = vmatprep.subr.bf16.mxu0 %v5622_v16  ;;  %v3475_v16 = vld [vmem:[%s10490_s12 + $0x878] sm:$0xff]  ;;  %v4824_v35 = vpop.f32.mrb[21].mxu0  ;;  %v3545_v34 = vld [vmem:[%s10490_s12 + $0xaa8] sm:$0xff] }
 0x408   :  { %5653 = vmatpush3.bf16.msra.mxu1 %v5652_v9  ;;  %v3540_v9 = vld [vmem:[%s10490_s12 + $0xa80] sm:$0xff]  ;;  %v4825_v25 = vadd.f32 %v4824_v35, %v4823_v22  ;;  %v4826_v44 = vpop.f32.mrb[22].mxu0  ;;  %v3577_v12 = vld [vmem:[%s10490_s12 + $0xba8] sm:$0xff]  ;;  %v3546_v22 = vld [vmem:[%s10490_s12 + $0xab0] sm:$0xff] }
 0x409   :  { %5655 = vmatprep.subr.bf16.mxu1 %v5654_v30  ;;  %v5670_v30 = vpack.c.bf16 %v3523_v13, %v3522_v54  ;;  %v3529_v54 = vld [vmem:[%s10490_s12 + $0xa28] sm:$0xff]  ;;  %v5714_v39 = vpack.c.bf16 %v3577_v12, %v3576_v3  ;;  %v3578_v35 = vld [vmem:[%s10490_s12 + $0xbb0] sm:$0xff]  ;;  %v3555_v3 = vld [vmem:[%s10490_s12 + $0xaf8] sm:$0xff] }
 0x40a   :  { %5625 = vmatpush3.bf16.msra.mxu0 %v5624_v11  ;;  %v5640_v11 = vpack.c.bf16 %v3475_v16, %v3474_v32  ;;  %v3197_v32 = vmul.f32 %v12482_v8, %v12487_v5  ;;  %v3531_v8 = vld [vmem:[%s10490_s12 + $0xa38] sm:$0xff]  ;;  %v3581_v37 = vld [vmem:[%s10490_s12 + $0xbc8] sm:$0xff] }
 0x40b   :  { %5627 = vmatprep.subr.bf16.mxu0 %v5626_v33  ;;  %v12490_v33 = vld [vmem:[#allocation235_spill] sm:$0xff] }
 0x40c   :  { %5657 = vmatpush3.bf16.msra.mxu1 %v5656_v50  ;;  %v10218_v0 = vadd.f32 %v12490_v33, %v4825_v25  ;;  %v5674_v50 = vpack.c.bf16 %v3541_v29, %v3540_v9  ;;  %v3548_v29 = vld [vmem:[%s10490_s12 + $0xac0] sm:$0xff] }
 0x40d   :  { %5659 = vmatprep.subr.bf16.mxu1 %v5658_v51  ;;  %v4827_v51 = vpop.f32.mrb[23].mxu0  ;;  %v3532_v33 = vld [vmem:[%s10490_s12 + $0xa40] sm:$0xff] }
 0x40e   :  { %5629 = vmatpush3.bf16.msra.mxu0 %v5628_v10  ;;  %v3543_v10 = vld [vmem:[%s10490_s12 + $0xa98] sm:$0xff]  ;;  %v4828_v6 = vadd.f32 %v4827_v51, %v4826_v44  ;;  %v3533_v44 = vld [vmem:[%s10490_s12 + $0xa48] sm:$0xff] }
 0x40f   :  { %5631 = vmatprep.subr.bf16.mxu0 %v5630_v26  ;;  %v3556_v26 = vld [vmem:[%s10490_s12 + $0xb00] sm:$0xff] }
 0x410   :  { %5661 = vmatpush3.bf16.msra.mxu1 %v5660_v53  ;;  %v3574_v53 = vld [vmem:[%s10490_s12 + $0xb90] sm:$0xff]  ;;  %v10245_v27 = vadd.f32 %v9965_v7, %v4828_v6  ;;  %v5708_v20 = vpack.c.bf16 %v3557_v24, %v3556_v26  ;;  %v3544_v7 = vld [vmem:[%s10490_s12 + $0xaa0] sm:$0xff]  ;;  %v5694_v26 = vpack.c.bf16 %v3551_v18, %v3550_v47 }
 0x411   :  { %5663 = vmatprep.subr.bf16.mxu1 %v5662_v55  ;;  %v5678_v55 = vpack.c.bf16 %v3543_v10, %v3542_v40  ;;  %v5710_v19 = vpack.c.bf16 %v3575_v56, %v3574_v53  ;;  %v5682_v1 = vpack.c.bf16 %v3545_v34, %v3544_v7  ;;  %v3565_v40 = vld [vmem:[%s10490_s12 + $0xb48] sm:$0xff]  ;;  %v5692_v10 = vpack.c.bf16 %v3533_v44, %v3532_v33  ;;  %v3582_v6 = vld [vmem:[%s10490_s12 + $0xbd0] sm:$0xff]  ;;  %v3552_v56 = vld [vmem:[%s10490_s12 + $0xae0] sm:$0xff] }
 0x412   :  { %5633 = vmatpush3.bf16.msra.mxu0 %v5632_v28  ;;  %v3187_v28 = vmul.f32 %v9814_v42, %v12483_v62  ;;  %v3559_v62 = vld [vmem:[%s10490_s12 + $0xb18] sm:$0xff]  ;;  %v3534_v24 = vld [vmem:[%s10490_s12 + $0xa50] sm:$0xff]  ;;  %v3584_v7 = vld [vmem:[%s10490_s12 + $0xbe0] sm:$0xff] }
 0x413   :  { %5635 = vmatprep.subr.bf16.mxu0 %v5634_v31  ;;  %v12491_v31 = vld [vmem:[#allocation231_spill] sm:$0xff]  ;;  %v5712_v13 = vpack.c.bf16 %v3559_v62, %v3558_v21  ;;  %v3547_v42 = vld [vmem:[%s10490_s12 + $0xab8] sm:$0xff]  ;;  %v4572_v18 = vld [vmem:[%s10493_s14] sm:$0xff] }
 0x414   :  { %5665 = vmatpush3.bf16.msra.mxu1 %v5664_v15  ;;  %v5680_v15 = vpack.c.bf16 %v3527_v41, %v3526_v61  ;;  %v5686_v9 = vpack.c.bf16 %v3547_v42, %v3546_v22  ;;  %v3566_v41 = vld [vmem:[%s10490_s12 + $0xb50] sm:$0xff]  ;;  %v3585_v34 = vld [vmem:[%s10490_s12 + $0xbe8] sm:$0xff]  ;;  %v3539_v42 = vld [vmem:[%s10490_s12 + $0xa78] sm:$0xff] }
 0x415   :  { %5667 = vmatprep.subr.bf16.mxu1 %v5666_v2  ;;  %v12492_v2 = vld [vmem:[#allocation278_spill] sm:$0xff]  ;;  %v3537_v21 = vld [vmem:[%s10490_s12 + $0xa68] sm:$0xff]  ;;  %v5730_v12 = vpack.c.bf16 %v3585_v34, %v3584_v7  ;;  %v3538_v22 = vld [vmem:[%s10490_s12 + $0xa70] sm:$0xff] }
 0x416   :  { %5637 = vmatpush3.bf16.msra.mxu0 %v5636_v45  ;;  %v3528_v45 = vld [vmem:[%s10490_s12 + $0xa20] sm:$0xff] }
 0x417   :  { %5639 = vmatprep.subr.bf16.mxu0 %v5638_v23  ;;  %v3560_v23 = vld [vmem:[%s10490_s12 + $0xb20] sm:$0xff]  ;;  %v5684_v16 = vpack.c.bf16 %v3529_v54, %v3528_v45  ;;  %v3586_v45 = vld [vmem:[%s10490_s12 + $0xbf0] sm:$0xff]  ;;  %v3587_v54 = vld [vmem:[%s10490_s12 + $0xbf8] sm:$0xff] }
 0x418   :  { %5669 = vmatpush3.bf16.msra.mxu1 %v5668_v60  ;;  %v3579_v60 = vld [vmem:[%s10490_s12 + $0xbb8] sm:$0xff] }
 0x419   :  { %5671 = vmatprep.subr.bf16.mxu1 %v5670_v30  ;;  %v5718_v25 = vpack.c.bf16 %v3579_v60, %v3578_v35  ;;  %v3562_v30 = vld [vmem:[%s10490_s12 + $0xb30] sm:$0xff]  ;;  %v3571_v35 = vld [vmem:[%s10490_s12 + $0xb78] sm:$0xff]  ;;  %v5704_v60 = vpack.c.bf16 %v3539_v42, %v3538_v22 }
 0x41a   :  { %5641 = vmatpush3.bf16.msra.mxu0 %v5640_v11  ;;  %v3580_v11 = vld [vmem:[%s10490_s12 + $0xbc0] sm:$0xff] }
 0x41b   :  { %5675 = vmatprep.subr.bf16.mxu0 %v5674_v50  ;;  %v5720_v50 = vpack.c.bf16 %v3563_v14, %v3562_v30  ;;  %v5722_v51 = vpack.c.bf16 %v3581_v37, %v3580_v11  ;;  %v5806_v30 = vld [vmem:[%s10485_s0] sm:$0xff] }
 0x41c   :  { %5673 = vmatpush3.bf16.msra.mxu1 %v5672_v17  ;;  %v3564_v17 = vld [vmem:[%s10490_s12 + $0xb40] sm:$0xff] }
 0x41d   :  { %4253 = vmatmul.mubr.f32.vlgmr.msra.gmra.mrb[36].mxu0 %v12491_v31  ;;  %5707 = vmatprep.subr.bf16.mxu1 %v5706_v52  ;;  %v3583_v52 = vld [vmem:[%s10490_s12 + $0xbd8] sm:$0xff]  ;;  %v5724_v53 = vpack.c.bf16 %v3565_v40, %v3564_v17 }
 0x41e   :  { %4257 = vmatprep.mubr.f32.mxu0 %v3187_v28  ;;  %5677 = vmatpush3.bf16.msra.mxu0 %v5676_v38  ;;  %v3535_v38 = vld [vmem:[%s10490_s12 + $0xa58] sm:$0xff]  ;;  %v5726_v61 = vpack.c.bf16 %v3583_v52, %v3582_v6 }
 0x41f   :  { %4328 = vmatmul.mubr.f32.vlgmr.msra.gmra.mrb[30].mxu1 %v12492_v2  ;;  %5679 = vmatprep.subr.bf16.mxu0 %v5678_v55  ;;  %v3553_v55 = vld [vmem:[%s10490_s12 + $0xae8] sm:$0xff]  ;;  %v3567_v28 = vld [vmem:[%s10490_s12 + $0xb58] sm:$0xff]  ;;  %v3568_v2 = vld [vmem:[%s10490_s12 + $0xb60] sm:$0xff] }
 0x420   :  { %4332 = vmatprep.mubr.f32.mxu1 %v9852_v48  ;;  %5709 = vmatpush3.bf16.msra.mxu1 %v5708_v20  ;;  %v3561_v48 = vld [vmem:[%s10490_s12 + $0xb28] sm:$0xff]  ;;  %v5696_v20 = vpack.c.bf16 %v3535_v38, %v3534_v24  ;;  %v5698_v31 = vpack.c.bf16 %v3553_v55, %v3552_v56  ;;  %v5728_v62 = vpack.c.bf16 %v3567_v28, %v3566_v41  ;;  %v4575_v40 = vld [vmem:[%s10493_s14 + $0x18] sm:$0xff] }
 0x421   :  { %4258 = vmatmul.mubr.f32.gmra.mrb[38].mxu0 %v3186_v36  ;;  %5711 = vmatprep.subr.bf16.mxu1 %v5710_v19  ;;  %v5716_v5 = vpack.c.bf16 %v3561_v48, %v3560_v23  ;;  %v3536_v19 = vld [vmem:[%s10490_s12 + $0xa60] sm:$0xff]  ;;  %v3569_v36 = vld [vmem:[%s10490_s12 + $0xb68] sm:$0xff] }
 0x422   :  { %5681 = vmatpush3.bf16.msra.mxu0 %v5680_v15  ;;  %4402 = vmatprep.mubr.f32.mxu0 %v9876_v4  ;;  %v3530_v4 = vld [vmem:[%s10490_s12 + $0xa30] sm:$0xff]  ;;  %v3200_v23 = vld [vmem:[%s10492_s11] sm:$0xff]  ;;  %v3201_v48 = vld [vmem:[%s10492_s11 + $0x8] sm:$0xff] }
 0x423   :  { %4333 = vmatmul.mubr.f32.gmra.mrb[32].mxu1 %v9865_v57  ;;  %5683 = vmatprep.subr.bf16.mxu0 %v5682_v1  ;;  %v3549_v57 = vld [vmem:[%s10490_s12 + $0xac8] sm:$0xff]  ;;  %v5688_v49 = vpack.c.bf16 %v3531_v8, %v3530_v4  ;;  %v3554_v15 = vld [vmem:[%s10490_s12 + $0xaf0] sm:$0xff]  ;;  %v5700_v1 = vpack.c.bf16 %v3537_v21, %v3536_v19 }
 0x424   :  { %5713 = vmatpush3.bf16.msra.mxu1 %v5712_v13  ;;  %4477 = vmatprep.mubr.f32.mxu1 %v3197_v32  ;;  %v5690_v43 = vpack.c.bf16 %v3549_v57, %v3548_v29  ;;  %v5702_v13 = vpack.c.bf16 %v3555_v3, %v3554_v15  ;;  %v5734_v32 = vpack.c.bf16 %v3587_v54, %v3586_v45  ;;  %v3202_v8 = vld [vmem:[%s10492_s11 + $0x10] sm:$0xff] }
 0x425   :  { %5715 = vmatprep.subr.bf16.mxu1 %v5714_v39  ;;  %v5732_v39 = vpack.c.bf16 %v3569_v36, %v3568_v2  ;;  %v12493_v57 = vld [vmem:[#allocation224_spill] sm:$0xff] }
 0x426   :  { %5685 = vmatpush3.bf16.msra.mxu0 %v5684_v16  ;;  %v3570_v16 = vld [vmem:[%s10490_s12 + $0xb70] sm:$0xff] }
 0x427   :  { %5687 = vmatprep.subr.bf16.mxu0 %v5686_v9  ;;  %v5738_v9 = vpack.c.bf16 %v3201_v48, %v3200_v23  ;;  %v5736_v4 = vpack.c.bf16 %v3571_v35, %v3570_v16 }
 0x428   :  { %5717 = vmatpush3.bf16.msra.mxu1 %v5716_v5  ;;  %v3203_v5 = vld [vmem:[%s10492_s11 + $0x18] sm:$0xff] }
 0x429   :  { %5719 = vmatprep.subr.bf16.mxu1 %v5718_v25  ;;  %v5742_v29 = vpack.c.bf16 %v3203_v5, %v3202_v8  ;;  %v12494_v25 = vld [vmem:[#allocation237_spill] sm:$0xff] }
 0x42a   :  { %5689 = vmatpush3.bf16.msra.mxu0 %v5688_v49 }
 0x42b   :  { %5691 = vmatprep.subr.bf16.mxu0 %v5690_v43 }
 0x42c   :  { %5721 = vmatpush3.bf16.msra.mxu1 %v5720_v50 }
 0x42d   :  { %5723 = vmatprep.subr.bf16.mxu1 %v5722_v51  ;;  %v4573_v51 = vld [vmem:[%s10493_s14 + $0x8] sm:$0xff] }
 0x42e   :  { %5693 = vmatpush3.bf16.msra.mxu0 %v5692_v10  ;;  %v5746_v17 = vpack.c.bf16 %v4573_v51, %v4572_v18 }
 0x42f   :  { %5695 = vmatprep.subr.bf16.mxu0 %v5694_v26 }
 0x430   :  { %5725 = vmatpush3.bf16.msra.mxu1 %v5724_v53 }
 0x431   :  { %5727 = vmatprep.subr.bf16.mxu1 %v5726_v61 }
 0x432   :  { %5697 = vmatpush3.bf16.msra.mxu0 %v5696_v20 }
 0x433   :  { %5699 = vmatprep.subr.bf16.mxu0 %v5698_v31 }
 0x434   :  { %5729 = vmatpush3.bf16.msra.mxu1 %v5728_v62 }
 0x435   :  { %5731 = vmatprep.subr.bf16.mxu1 %v5730_v12 }
 0x436   :  { %5701 = vmatpush3.bf16.msra.mxu0 %v5700_v1 }
 0x437   :  { %5703 = vmatprep.subr.bf16.mxu0 %v5702_v13 }
 0x438   :  { %5733 = vmatpush3.bf16.msra.mxu1 %v5732_v39 }
 0x439   :  { %5735 = vmatprep.subr.bf16.mxu1 %v5734_v32 }
 0x43a   :  { %5705 = vmatpush3.bf16.msra.mxu0 %v5704_v60 }
 0x43b   :  { %5739 = vmatprep.subr.bf16.mxu0 %v5738_v9 }
 0x43c   :  { %5737 = vmatpush3.bf16.msra.mxu1 %v5736_v4 }
 0x43d   :  { %4403 = vmatmul.mubr.f32.vlgmr.msra.gmra.mrb[40].mxu0 %v12493_v57 }
 0x43e   :  { %4407 = vmatprep.mubr.f32.mxu0 %v9927_v58  ;;  %5741 = vmatpush3.bf16.msra.mxu0 %v5738_v9  ;;  %v5807_v58 = vld [vmem:[%s10485_s0 + $0x8] sm:$0xff] }
 0x43f   :  { %4478 = vmatmul.mubr.f32.vlgmr.msra.gmra.mrb[34].mxu1 %v12494_v25  ;;  %5743 = vmatprep.subr.bf16.mxu0 %v5742_v29 }
 0x440   :  { %4482 = vmatprep.mubr.f32.mxu1 %v9937_v63  ;;  %v4899_v14 = vpop.f32.mrb[24].mxu0 }
 0x441   :  { %4408 = vmatmul.mubr.f32.gmra.mrb[42].mxu0 %v9941_v46  ;;  %v4900_v49 = vpop.f32.mrb[25].mxu0 }
 0x442   :  { %5745 = vmatpush3.bf16.msra.mxu0 %v5742_v29  ;;  %5280 = vmatprep.mubr.msk.f32.mxu0 %vm298_vm1, %v5806_v30  ;;  %v4901_v63 = vadd.f32 %v4900_v49, %v4899_v14 }
 0x443   :  { %4483 = vmatmul.mubr.f32.gmra.mrb[36].mxu1 %v9945_v59  ;;  %5747 = vmatprep.subr.bf16.mxu0 %v5746_v17 }
 0x444   :  { %v3805_v46 = vadd.f32 %v4901_v63, %v10218_v0  ;;  %v4574_v0 = vld [vmem:[%s10493_s14 + $0x10] sm:$0xff] }
 0x445   :  { %5281 = vmatmul.mubr.msk.f32.vlgmr.msra.gmra.mrb[44].mxu0 %vm298_vm1, %v5807_v58  ;;  %v5750_v10 = vpack.c.bf16 %v4575_v40, %v4574_v0 }
 0x446   :  { %5749 = vmatpush3.bf16.msra.mxu0 %v5746_v17 }
 0x447   :  { %5751 = vmatprep.subr.bf16.mxu0 %v5750_v10 }
 0x44a   :  { %5753 = vmatpush3.bf16.msra.mxu0 %v5750_v10 }
 0x474   :  { %v4937_v11 = vpop.f32.mrb[18].mxu1 }
 0x475   :  { %v4938_v37 = vpop.f32.mrb[19].mxu1 }
 0x476   :  { %v4939_v43 = vadd.f32 %v4938_v37, %v4937_v11 }
 0x478   :  { %v3880_v33 = vadd.f32 %v4939_v43, %v3805_v46 }
 0x499   :  { %v4902_v44 = vpop.f32.mrb[26].mxu0 }
 0x49a   :  { %v4903_v50 = vpop.f32.mrb[27].mxu0 }
 0x49b   :  { %v4904_v47 = vadd.f32 %v4903_v50, %v4902_v44 }
 0x49d   :  { %v3810_v59 = vadd.f32 %v4904_v47, %v10245_v27 }
 0x4a2   :  { %v4940_v6 = vpop.f32.mrb[20].mxu1 }
 0x4a3   :  { %v4941_v27 = vpop.f32.mrb[21].mxu1 }
 0x4a4   :  { %v4942_v52 = vadd.f32 %v4941_v27, %v4940_v6 }
 0x4a6   :  { %v3885_v26 = vadd.f32 %v4942_v52, %v3810_v59 }
 0x4af   :  { %v4975_v24 = vpop.f32.mrb[28].mxu0 }
 0x4b0   :  { %v4976_v38 = vpop.f32.mrb[29].mxu0 }
 0x4b1   :  { %v4977_v53 = vadd.f32 %v4976_v38, %v4975_v24  ;;  %v4777_v24 = vld [vmem:[%s10494_s13] ss:$0 sm:$0xff] }
 0x4b2   :  { %v5013_v56 = vpop.f32.mrb[22].mxu1 }
 0x4b3   :  { %v3955_v55 = vadd.f32 %v4977_v53, %v3880_v33  ;;  %v5014_v61 = vpop.f32.mrb[23].mxu1 }
 0x4b4   :  { %v5015_v41 = vadd.f32 %v5014_v61, %v5013_v56  ;;  %v4978_v28 = vpop.f32.mrb[30].mxu0 }
 0x4b5   :  { %v4979_v20 = vpop.f32.mrb[31].mxu0 }
 0x4b6   :  { %v4030_v7 = vadd.f32 %v5015_v41, %v3955_v55  ;;  %v4980_v34 = vadd.f32 %v4979_v20, %v4978_v28  ;;  %v5016_v31 = vpop.f32.mrb[24].mxu1  ;;  %v4778_v28 = vld [vmem:[%s10495_s15] ss:$0 sm:$0xff] }
 0x4b7   :  { %v5017_v19 = vpop.f32.mrb[25].mxu1 }
 0x4b8   :  { %v3960_v21 = vadd.f32 %v4980_v34, %v3885_v26  ;;  %v5018_v62 = vadd.f32 %v5017_v19, %v5016_v31 }
 0x4ba   :  { %v4035_v15 = vadd.f32 %v5018_v62, %v3960_v21 }
 0x4d0   :  { %v5051_v3 = vpop.f32.mrb[32].mxu0 }
 0x4d1   :  { %v5052_v12 = vpop.f32.mrb[33].mxu0 }
 0x4d2   :  { %v5053_v2 = vadd.f32 %v5052_v12, %v5051_v3  ;;  %v5089_v36 = vpop.f32.mrb[26].mxu1 }
 0x4d3   :  { %v5090_v1 = vpop.f32.mrb[27].mxu1 }
 0x4d4   :  { %v4105_v45 = vadd.f32 %v5053_v2, %v4030_v7  ;;  %v5091_v54 = vadd.f32 %v5090_v1, %v5089_v36  ;;  %v5054_v13 = vpop.f32.mrb[34].mxu0 }
 0x4d5   :  { %v5055_v22 = vpop.f32.mrb[35].mxu0 }
 0x4d6   :  { %v4180_v42 = vadd.f32 %v5091_v54, %v4105_v45  ;;  %v5056_v39 = vadd.f32 %v5055_v22, %v5054_v13  ;;  %v5092_v23 = vpop.f32.mrb[28].mxu1 }
 0x4d7   :  { %v5093_v48 = vpop.f32.mrb[29].mxu1 }
 0x4d8   :  { %v4110_v32 = vadd.f32 %v5056_v39, %v4035_v15  ;;  %v5094_v16 = vadd.f32 %v5093_v48, %v5092_v23 }
 0x4da   :  { %v4185_v35 = vadd.f32 %v5094_v16, %v4110_v32 }
 0x4f0   :  { %v5127_v60 = vpop.f32.mrb[36].mxu0 }
 0x4f1   :  { %v5128_v9 = vpop.f32.mrb[37].mxu0 }
 0x4f2   :  { %v5129_v4 = vadd.f32 %v5128_v9, %v5127_v60  ;;  %v5165_v8 = vpop.f32.mrb[30].mxu1 }
 0x4f3   :  { %v5166_v5 = vpop.f32.mrb[31].mxu1 }
 0x4f4   :  { %v4255_v29 = vadd.f32 %v5129_v4, %v4180_v42  ;;  %v5167_v57 = vadd.f32 %v5166_v5, %v5165_v8  ;;  %v5130_v25 = vpop.f32.mrb[38].mxu0 }
 0x4f5   :  { %v5131_v30 = vpop.f32.mrb[39].mxu0 }
 0x4f6   :  { %v4330_v58 = vadd.f32 %v5167_v57, %v4255_v29  ;;  %v5132_v14 = vadd.f32 %v5131_v30, %v5130_v25  ;;  %v5168_v49 = vpop.f32.mrb[32].mxu1  ;;  %v4781_v57 = vld [vmem:[%s10496_s16] ss:$0 sm:$0xff] }
 0x4f7   :  { %v5169_v63 = vpop.f32.mrb[33].mxu1 }
 0x4f8   :  { %v4260_v46 = vadd.f32 %v5132_v14, %v4185_v35  ;;  %v5170_v11 = vadd.f32 %v5169_v63, %v5168_v49 }
 0x4fa   :  { %v4335_v37 = vadd.f32 %v5170_v11, %v4260_v46 }
 0x510   :  { %v5203_v43 = vpop.f32.mrb[40].mxu0 }
 0x511   :  { %v5204_v33 = vpop.f32.mrb[41].mxu0 }
 0x512   :  { %v5205_v44 = vadd.f32 %v5204_v33, %v5203_v43  ;;  %v5241_v50 = vpop.f32.mrb[34].mxu1 }
 0x513   :  { %v5242_v47 = vpop.f32.mrb[35].mxu1 }
 0x514   :  { %v4405_v59 = vadd.f32 %v5205_v44, %v4330_v58  ;;  %v5243_v18 = vadd.f32 %v5242_v47, %v5241_v50  ;;  %v5206_v51 = vpop.f32.mrb[42].mxu0  ;;  %v4782_v58 = vld [vmem:[%s10497_s17] ss:$0 sm:$0xff] }
 0x515   :  { %v5207_v0 = vpop.f32.mrb[43].mxu0 }
 0x516   :  { %v5208_v17 = vadd.f32 %v5207_v0, %v5206_v51  ;;  %v5244_v40 = vpop.f32.mrb[36].mxu1  ;;  %v4480_v10 = vadd.f32 %v5243_v18, %v4405_v59 }
 0x517   :  { %v5245_v6 = vpop.f32.mrb[37].mxu1 }
 0x518   :  { %v4410_v27 = vadd.f32 %v5208_v17, %v4335_v37  ;;  %v5246_v52 = vadd.f32 %v5245_v6, %v5244_v40  ;;  %v5282_v26 = vpop.f32.mrb[44].mxu0 }
 0x519   :  { %v4554_v38 = vpop.f32.mrb[45].mxu0 }
 0x51a   :  { %v4485_v53 = vadd.f32 %v5246_v52, %v4410_v27  ;;  %v4555_v56 = vadd.f32 %v4554_v38, %v4480_v10 }
 0x51c   :  { %v4560_v55 = vadd.f32 %v5282_v26, %v4485_v53  ;;  %v4570_v61 = vadd.f32 %v4777_v24, %v4555_v56 }
 0x51e   :  { %v4571_v41 = vadd.f32 %v4777_v24, %v4560_v55  ;;  %5291 = vmatprep.mubr.msk.f32.mxu0 %vm298_vm1, %v4570_v61 }
 0x520   :  { %5292 = vmatmul.mubr.msk.f32.vlgmr.msra.gmra.mrb[46].mxu0 %vm298_vm1, %v4571_v41 }
 0x5f3   :  { %v5293_v20 = vpop.f32.mrb[46].mxu0 }
 0x5f4   :  { %v4661_v7 = vadd.f32 %v5293_v20, %v4778_v28  ;;  %v4655_v34 = vpop.f32.mrb[47].mxu0 }
 0x5f5   :  { %v4656_v31 = vadd.f32 %v4778_v28, %v4655_v34 }
 0x5f6   :  { %v4665_v19 = vsel %vm298_vm1, %v4661_v7, 0.0 }
 0x5f7   :  { %v4664_v21 = vsel %vm298_vm1, %v4656_v31, 0.0 }
 0x5f8   :  { %v4666_v62 = vadd.f32 %v4665_v19, %v4664_v21 }
 0x5fa   :  { %v4667_v15 = vrot.slane %v4666_v62, 4 }
 0x5fc   :  { %v4668_v3 = vadd.f32 %v4667_v15, %v4666_v62 }
 0x5fe   :  { %v4669_v12 = vrot.slane %v4668_v3, 2 }
 0x600   :  { %v4670_v2 = vadd.f32 %v4669_v12, %v4668_v3 }
 0x602   :  { %v4671_v36 = vrot.slane %v4670_v2, 1 }
 0x604   :  { %v4672_v1 = vadd.f32 %v4671_v36, %v4670_v2 }
 0x606   :  { %v4674_v45 = vmul.f32 0.0625, %v4672_v1 }
 0x608   :  { %v4675_v54 = vsub.f32 %v4656_v31, %v4674_v45  ;;  %v4676_v13 = vsub.f32 %v4661_v7, %v4674_v45 }
 0x60a   :  { %v4677_v22 = vmul.f32 %v4675_v54, %v4675_v54  ;;  %v4678_v42 = vmul.f32 %v4676_v13, %v4676_v13 }
 0x60c   :  { %v4679_v39 = vsel %vm298_vm1, %v4677_v22, 0.0  ;;  %v4680_v23 = vsel %vm298_vm1, %v4678_v42, 0.0 }
 0x60d   :  { %v4681_v48 = vadd.f32 %v4680_v23, %v4679_v39 }
 0x60f   :  { %v4682_v32 = vrot.slane %v4681_v48, 4 }
 0x611   :  { %v4683_v16 = vadd.f32 %v4682_v32, %v4681_v48 }
 0x613   :  { %v4684_v35 = vrot.slane %v4683_v16, 2 }
 0x615   :  { %v4685_v60 = vadd.f32 %v4684_v35, %v4683_v16 }
 0x617   :  { %v4686_v9 = vrot.slane %v4685_v60, 1 }
 0x619   :  { %v4687_v4 = vadd.f32 %v4686_v9, %v4685_v60 }
 0x61b   :  { %v4688_v8 = vmul.f32 0.0625, %v4687_v4 }
 0x61d   :  { %v4689_v5 = vadd.f32 1e-05, %v4688_v8 }
 0x61f   :  { %5804 = vrsqrt.f32 %v4689_v5 }
 0x629   :  { %v5805_v29 = vpop.eup %5804 }
 0x62a   :  { %v4691_v25 = vmul.f32 %v5805_v29, %v4675_v54  ;;  %v4692_v30 = vmul.f32 %v5805_v29, %v4676_v13 }
 0x62c   :  { %v4700_v14 = vmul.f32 %v4781_v57, %v4691_v25  ;;  %v4701_v49 = vmul.f32 %v4781_v57, %v4692_v30 }
 0x62e   :  { %v4709_v63 = vadd.f32 %v4782_v58, %v4700_v14  ;;  %v4710_v46 = vadd.f32 %v4782_v58, %v4701_v49 }
 0x630   :  { %v4711_v11 = vmax.f32 %v4709_v63, 0.0  ;;  %v4712_v37 = vmax.f32 %v4710_v46, 0.0 }
 0x632   :  { %4713 = vst.msk [vmem:[%s10498_s18] sm:$0xff] %vm298_vm1, %v4711_v11  ;;  %4714 = vst.msk [vmem:[%s10498_s18 + $0x8] sm:$0xff] %vm298_vm1, %v4712_v37 }

</bundles_post_ra>
